<compile_context>
chip_gen: v7x
topology: tpu7x:2x2x1
jax: 0.10.0
libtpu: 0.0.40
codegen_flags: <defaults>
</compile_context>

<pallas_src>
import jax
import jax.numpy as jnp
from jax.experimental import pallas as pl
from jax.experimental.pallas import tpu as pltpu

EMBEDDING_SIZE = 256
HIDDEN1 = 1024
HIDDEN2 = 2048
OUTPUT_SIZE = 128
BATCH = 8


def _prelu(x, alpha):
    # PyTorch nn.PReLU() with a single shared parameter (init 0.25):
    #   y = x            for x >= 0
    #   y = alpha * x    for x <  0
    return jnp.where(x >= 0, x, alpha * x)


def mlp_kernel(a1_ref, a2_ref,                       # SMEM scalars (PReLU alphas, f32)
               x_ref, w1_ref, b1_ref, w2_ref, b2_ref, w3_ref, b3_ref,
               o_ref):
    x = x_ref[...]                                                     # bf16 [tm, E]

    h1 = jnp.dot(x, w1_ref[...], preferred_element_type=jnp.float32)
    h1 = _prelu(h1 + b1_ref[...].astype(jnp.float32), a1_ref[0])       # [tm, 1024] f32

    h2 = jnp.dot(h1.astype(jnp.bfloat16), w2_ref[...],
                 preferred_element_type=jnp.float32)
    h2 = _prelu(h2 + b2_ref[...].astype(jnp.float32), a2_ref[0])       # [tm, 2048] f32

    out = jnp.dot(h2.astype(jnp.bfloat16), w3_ref[...],
                  preferred_element_type=jnp.float32)
    o_ref[...] = (out + b3_ref[...].astype(jnp.float32)).astype(o_ref.dtype)


def embedding_text_nn(x, params, *, tm=None):
    B, E = x.shape
    w1, b1, a1 = params["w1"], params["b1"], params["a1"]
    w2, b2, a2 = params["w2"], params["b2"], params["a2"]
    w3, b3 = params["w3"], params["b3"]
    H1 = w1.shape[1]
    H2 = w2.shape[1]
    O = w3.shape[1]

    # Cap the batch tile: bounds per-tile activation footprint for large B.
    if tm is None:
        tm = B if B <= 128 else 128
    assert B % tm == 0

    # Halve x DMA bytes and drop the in-kernel cast.
    x_bf16 = x.astype(jnp.bfloat16)

    smem = pl.BlockSpec(memory_space=pltpu.MemorySpace.SMEM)

    flops = 2 * B * (E * H1 + H1 * H2 + H2 * O)
    bytes_accessed = (2 * (E * H1 + H1 * H2 + H2 * O + H1 + H2 + O)  # bf16 params
                      + B * E * 2                                    # bf16 x
                      + B * O * 4)                                   # f32 out

    return pl.pallas_call(
        mlp_kernel,
        out_shape=jax.ShapeDtypeStruct((B, O), jnp.float32),
        grid=(B // tm,),
        in_specs=[
            smem,                                          # a1 (PReLU alpha)
            smem,                                          # a2
            pl.BlockSpec((tm, E), lambda i: (i, 0)),       # x tile (streamed)
            pl.BlockSpec((E, H1), lambda i: (0, 0)),       # w1 (grid-invariant)
            pl.BlockSpec((1, H1), lambda i: (0, 0)),       # b1
            pl.BlockSpec((H1, H2), lambda i: (0, 0)),      # w2 (grid-invariant)
            pl.BlockSpec((1, H2), lambda i: (0, 0)),       # b2
            pl.BlockSpec((H2, O), lambda i: (0, 0)),       # w3 (grid-invariant)
            pl.BlockSpec((1, O), lambda i: (0, 0)),        # b3
        ],
        out_specs=pl.BlockSpec((tm, O), lambda i: (i, 0)),
        compiler_params=pltpu.CompilerParams(
            dimension_semantics=("parallel",),
            # ~10 MiB resident weights (double-buffered) + small x/out tiles +
            # activation scratch; 32 MiB is within physical VMEM on v5e/v6e/v7x
            # and lifts v5e's 16 MiB scoped default.
            vmem_limit_bytes=32 * 1024 * 1024,
        ),
        cost_estimate=pl.CostEstimate(
            flops=flops, transcendentals=0, bytes_accessed=bytes_accessed),
    )(a1, a2, x_bf16, w1, b1, w2, b2, w3, b3)


def init_params(key, embedding_size, output_size, param_dtype=jnp.bfloat16):
    k1, k2, k3 = jax.random.split(key, 3)

    def linear(k, fan_in, fan_out):
        # Deterministic synthetic init (uniform, Kaiming-like bound),
        # stored in bf16 for HBM-bandwidth-bound streaming.
        bound = 1.0 / jnp.sqrt(fan_in)
        kw, kb = jax.random.split(k)
        w = jax.random.uniform(kw, (fan_in, fan_out), jnp.float32, -bound, bound)
        b = jax.random.uniform(kb, (1, fan_out), jnp.float32, -bound, bound)
        return w.astype(param_dtype), b.astype(param_dtype)

    w1, b1 = linear(k1, embedding_size, HIDDEN1)
    w2, b2 = linear(k2, HIDDEN1, HIDDEN2)
    w3, b3 = linear(k3, HIDDEN2, output_size)
    # nn.PReLU() default: single shared parameter initialized to 0.25
    a1 = jnp.full((1,), 0.25, jnp.float32)
    a2 = jnp.full((1,), 0.25, jnp.float32)
    return {"w1": w1, "b1": b1, "a1": a1,
            "w2": w2, "b2": b2, "a2": a2,
            "w3": w3, "b3": b3}


def reference(x, p):
    # Pure-JAX f32 reference using the same (bf16-stored) parameters.
    f32 = lambda a: a.astype(jnp.float32)
    h1 = x @ f32(p["w1"]) + f32(p["b1"])
    h1 = jnp.where(h1 >= 0, h1, p["a1"][0] * h1)
    h2 = h1 @ f32(p["w2"]) + f32(p["b2"])
    h2 = jnp.where(h2 >= 0, h2, p["a2"][0] * h2)
    return h2 @ f32(p["w3"]) + f32(p["b3"])


if __name__ == "__main__":
    key = jax.random.PRNGKey(0)
    kx, kp = jax.random.split(key)

    x = jax.random.normal(kx, (BATCH, EMBEDDING_SIZE), jnp.float32)
    params = init_params(kp, EMBEDDING_SIZE, OUTPUT_SIZE)

    out = embedding_text_nn(x, params)
    out = jax.block_until_ready(out)

    ref = reference(x, params)
    assert out.shape == (BATCH, OUTPUT_SIZE)
    max_err = jnp.max(jnp.abs(out - ref))
    assert jnp.allclose(out, ref, atol=2e-2, rtol=2e-2), (
        f"mismatch vs reference (max abs err = {max_err})")

    print("KERNEL_OK")
</pallas_src>

<mosaic_0001>
module attributes {stable_mosaic.version = 11 : i64} {
  func.func @mlp_kernel(%arg0: i32, %arg1: memref<1xf32, #tpu.memory_space<smem>>, %arg2: memref<1xf32, #tpu.memory_space<smem>>, %arg3: memref<8x256xbf16, #tpu.memory_space<vmem>>, %arg4: memref<256x1024xbf16, #tpu.memory_space<vmem>>, %arg5: memref<1x1024xbf16, #tpu.memory_space<vmem>>, %arg6: memref<1024x2048xbf16, #tpu.memory_space<vmem>>, %arg7: memref<1x2048xbf16, #tpu.memory_space<vmem>>, %arg8: memref<2048x128xbf16, #tpu.memory_space<vmem>>, %arg9: memref<1x128xbf16, #tpu.memory_space<vmem>>, %arg10: memref<8x128xf32, #tpu.memory_space<vmem>>) attributes {dimension_semantics = [#tpu.dimension_semantics<parallel>], iteration_bounds = array<i64: 1>, scalar_prefetch = 0 : i64, scratch_operands = 0 : i64, tpu.core_type = #tpu.core_type<tc>, window_params = [{transform_indices = @transform_0, window_bounds = array<i64: 1>}, {transform_indices = @transform_1, window_bounds = array<i64: 1>}, {transform_indices = @transform_2, window_bounds = array<i64: 8, 256>}, {pipeline_mode = #tpu.pipeline_mode<synchronous>, transform_indices = @transform_3, window_bounds = array<i64: 256, 1024>}, {pipeline_mode = #tpu.pipeline_mode<synchronous>, transform_indices = @transform_4, window_bounds = array<i64: 1, 1024>}, {pipeline_mode = #tpu.pipeline_mode<synchronous>, transform_indices = @transform_5, window_bounds = array<i64: 1024, 2048>}, {pipeline_mode = #tpu.pipeline_mode<synchronous>, transform_indices = @transform_6, window_bounds = array<i64: 1, 2048>}, {pipeline_mode = #tpu.pipeline_mode<synchronous>, transform_indices = @transform_7, window_bounds = array<i64: 2048, 128>}, {pipeline_mode = #tpu.pipeline_mode<synchronous>, transform_indices = @transform_8, window_bounds = array<i64: 1, 128>}, {transform_indices = @transform_9, window_bounds = array<i64: 8, 128>}]} {
    %c0 = arith.constant 0 : index
    %c0_0 = arith.constant 0 : index
    %0 = vector.load %arg3[%c0, %c0_0] : memref<8x256xbf16, #tpu.memory_space<vmem>>, vector<8x256xbf16>
    %c0_1 = arith.constant 0 : index
    %c0_2 = arith.constant 0 : index
    %1 = vector.load %arg4[%c0_1, %c0_2] : memref<256x1024xbf16, #tpu.memory_space<vmem>>, vector<256x1024xbf16>
    %cst = arith.constant dense<0.000000e+00> : vector<8x1024xf32>
    %2 = tpu.matmul %0, %1, %cst {dimension_numbers = #tpu.dot_dimension_numbers<[1], [0], [0], [1], [0, 0, 1, 1], [], []>} : vector<8x256xbf16>, vector<256x1024xbf16>, vector<8x1024xf32> -> vector<8x1024xf32>
    %c0_3 = arith.constant 0 : index
    %c0_4 = arith.constant 0 : index
    %3 = vector.load %arg5[%c0_3, %c0_4] : memref<1x1024xbf16, #tpu.memory_space<vmem>>, vector<1x1024xbf16>
    %4 = arith.extf %3 : vector<1x1024xbf16> to vector<1x1024xf32>
    %5 = vector.broadcast %4 : vector<1x1024xf32> to vector<8x1024xf32>
    %6 = arith.addf %2, %5 : vector<8x1024xf32>
    %c0_5 = arith.constant 0 : index
    %7 = memref.load %arg1[%c0_5] : memref<1xf32, #tpu.memory_space<smem>>
    %cst_6 = arith.constant 0.000000e+00 : f32
    %8 = vector.broadcast %cst_6 : f32 to vector<8x1024xf32>
    %9 = arith.cmpf oge, %6, %8 : vector<8x1024xf32>
    %10 = vector.broadcast %7 : f32 to vector<8x1024xf32>
    %11 = arith.mulf %10, %6 : vector<8x1024xf32>
    %12 = arith.select %9, %6, %11 : vector<8x1024xi1>, vector<8x1024xf32>
    %13 = arith.truncf %12 : vector<8x1024xf32> to vector<8x1024xbf16>
    %c0_7 = arith.constant 0 : index
    %c0_8 = arith.constant 0 : index
    %14 = vector.load %arg6[%c0_7, %c0_8] : memref<1024x2048xbf16, #tpu.memory_space<vmem>>, vector<1024x2048xbf16>
    %cst_9 = arith.constant dense<0.000000e+00> : vector<8x2048xf32>
    %15 = tpu.matmul %13, %14, %cst_9 {dimension_numbers = #tpu.dot_dimension_numbers<[1], [0], [0], [1], [0, 0, 1, 1], [], []>} : vector<8x1024xbf16>, vector<1024x2048xbf16>, vector<8x2048xf32> -> vector<8x2048xf32>
    %c0_10 = arith.constant 0 : index
    %c0_11 = arith.constant 0 : index
    %16 = vector.load %arg7[%c0_10, %c0_11] : memref<1x2048xbf16, #tpu.memory_space<vmem>>, vector<1x2048xbf16>
    %17 = arith.extf %16 : vector<1x2048xbf16> to vector<1x2048xf32>
    %18 = vector.broadcast %17 : vector<1x2048xf32> to vector<8x2048xf32>
    %19 = arith.addf %15, %18 : vector<8x2048xf32>
    %c0_12 = arith.constant 0 : index
    %20 = memref.load %arg2[%c0_12] : memref<1xf32, #tpu.memory_space<smem>>
    %cst_13 = arith.constant 0.000000e+00 : f32
    %21 = vector.broadcast %cst_13 : f32 to vector<8x2048xf32>
    %22 = arith.cmpf oge, %19, %21 : vector<8x2048xf32>
    %23 = vector.broadcast %20 : f32 to vector<8x2048xf32>
    %24 = arith.mulf %23, %19 : vector<8x2048xf32>
    %25 = arith.select %22, %19, %24 : vector<8x2048xi1>, vector<8x2048xf32>
    %26 = arith.truncf %25 : vector<8x2048xf32> to vector<8x2048xbf16>
    %c0_14 = arith.constant 0 : index
    %c0_15 = arith.constant 0 : index
    %27 = vector.load %arg8[%c0_14, %c0_15] : memref<2048x128xbf16, #tpu.memory_space<vmem>>, vector<2048x128xbf16>
    %cst_16 = arith.constant dense<0.000000e+00> : vector<8x128xf32>
    %28 = tpu.matmul %26, %27, %cst_16 {dimension_numbers = #tpu.dot_dimension_numbers<[1], [0], [0], [1], [0, 0, 1, 1], [], []>} : vector<8x2048xbf16>, vector<2048x128xbf16>, vector<8x128xf32> -> vector<8x128xf32>
    %c0_17 = arith.constant 0 : index
    %c0_18 = arith.constant 0 : index
    %29 = vector.load %arg9[%c0_17, %c0_18] : memref<1x128xbf16, #tpu.memory_space<vmem>>, vector<1x128xbf16>
    %30 = arith.extf %29 : vector<1x128xbf16> to vector<1x128xf32>
    %31 = vector.broadcast %30 : vector<1x128xf32> to vector<8x128xf32>
    %32 = arith.addf %28, %31 : vector<8x128xf32>
    %c0_19 = arith.constant 0 : index
    %c0_20 = arith.constant 0 : index
    %33 = vector.load %arg10[%c0_19, %c0_20] : memref<8x128xf32, #tpu.memory_space<vmem>>, vector<8x128xf32>
    tpu.vector_store %arg10[%c0_19, %c0_20], %32 {strides = array<i32>} : memref<8x128xf32, #tpu.memory_space<vmem>>, vector<8x128xf32>,
    return
  }
  func.func @transform_0(%arg0: i32) -> i32 {
    %c0_i32 = arith.constant 0 : i32
    %c0_i32_0 = arith.constant 0 : i32
    return %c0_i32 : i32
  }
  func.func @transform_1(%arg0: i32) -> i32 {
    %c0_i32 = arith.constant 0 : i32
    %c0_i32_0 = arith.constant 0 : i32
    return %c0_i32 : i32
  }
  func.func @transform_2(%arg0: i32) -> (i32, i32) {
    %c0_i32 = arith.constant 0 : i32
    %c0_i32_0 = arith.constant 0 : i32
    return %arg0, %c0_i32 : i32, i32
  }
  func.func @transform_3(%arg0: i32) -> (i32, i32) {
    %c0_i32 = arith.constant 0 : i32
    %c0_i32_0 = arith.constant 0 : i32
    %c0_i32_1 = arith.constant 0 : i32
    return %c0_i32, %c0_i32_0 : i32, i32
  }
  func.func @transform_4(%arg0: i32) -> (i32, i32) {
    %c0_i32 = arith.constant 0 : i32
    %c0_i32_0 = arith.constant 0 : i32
    %c0_i32_1 = arith.constant 0 : i32
    return %c0_i32, %c0_i32_0 : i32, i32
  }
  func.func @transform_5(%arg0: i32) -> (i32, i32) {
    %c0_i32 = arith.constant 0 : i32
    %c0_i32_0 = arith.constant 0 : i32
    %c0_i32_1 = arith.constant 0 : i32
    return %c0_i32, %c0_i32_0 : i32, i32
  }
  func.func @transform_6(%arg0: i32) -> (i32, i32) {
    %c0_i32 = arith.constant 0 : i32
    %c0_i32_0 = arith.constant 0 : i32
    %c0_i32_1 = arith.constant 0 : i32
    return %c0_i32, %c0_i32_0 : i32, i32
  }
  func.func @transform_7(%arg0: i32) -> (i32, i32) {
    %c0_i32 = arith.constant 0 : i32
    %c0_i32_0 = arith.constant 0 : i32
    %c0_i32_1 = arith.constant 0 : i32
    return %c0_i32, %c0_i32_0 : i32, i32
  }
  func.func @transform_8(%arg0: i32) -> (i32, i32) {
    %c0_i32 = arith.constant 0 : i32
    %c0_i32_0 = arith.constant 0 : i32
    %c0_i32_1 = arith.constant 0 : i32
    return %c0_i32, %c0_i32_0 : i32, i32
  }
  func.func @transform_9(%arg0: i32) -> (i32, i32) {
    %c0_i32 = arith.constant 0 : i32
    %c0_i32_0 = arith.constant 0 : i32
    return %arg0, %c0_i32 : i32, i32
  }
}

</mosaic_0001>

<bundles_post_ra>
// kernel: tpu_custom_call.1
= control target key start
LH: loop header
LB: loop body
LE: loop exit
PB: predicated region body
PF: predicated region fallthrough
CT: control target
= control target key end

     0   :  { %16 = vsyncpa [#allocation5], 0  ;;  %s12589_s0 = inlined_call_operand.<no memory space> [shape: f32[1], index: 0, kind: input, shape index: {}]   ;;  %s12590_s1 = inlined_call_operand.<no memory space> [shape: f32[1], index: 1, kind: input, shape index: {}]   ;;  %s12591_s2 = inlined_call_operand.hbm [shape: bf16[8,256], index: 2, kind: input, shape index: {}]   ;;  %s12592_s3 = inlined_call_operand.hbm [shape: bf16[256,1024], index: 3, kind: input, shape index: {}]   ;;  %s12593_s4 = inlined_call_operand.hbm [shape: bf16[1,1024], index: 4, kind: input, shape index: {}]   ;;  %s12594_s5 = inlined_call_operand.hbm [shape: bf16[1024,2048], index: 5, kind: input, shape index: {}]   ;;  %s12595_s6 = inlined_call_operand.hbm [shape: bf16[1,2048], index: 6, kind: input, shape index: {}]   ;;  %s12596_s7 = inlined_call_operand.hbm [shape: bf16[2048,128], index: 7, kind: input, shape index: {}]   ;;  %s12597_s8 = inlined_call_operand.hbm [shape: bf16[1,128], index: 8, kind: input, shape index: {}]   ;;  %s12598_s9 = inlined_call_operand.hbm [shape: f32[8,128], index: 9, kind: output, shape index: {}]  }
   0x1   :  { %17 = vsyncpa [#allocation8], 0 }
   0x2   :  { %18 = vsyncpa [#allocation11], 0 }
   0x3   :  { %19 = vsyncpa [#allocation14], 0 }
   0x4   :  { %20 = vsyncpa [#allocation6], 0  ;;  %s12118_s30 = smov [#allocation7]   ;;  %s11932_s13 = scalar_lea.hbm %s12592_s3, 16384 }
   0x5   :  { %s40_s10 = sshll.u32 %s12118_s30, 4  ;;  %p11933_p0 = scmp.ne.s32.totalorder %s12592_s3, %s11932_s13  ;;  %s41_s10 = int_to_ptr.vmem [resolvable:$true] %s40_s10 }
   0x6   :  { %p11936_p1 = scmp.lt.u32.totalorder %s11932_s13, %s12592_s3 }
   0x8   :  { %p11938_p2 = pnand %p11936_p1, %p11933_p0 }
   0xa   :  { %11941 = shalt.err (!%p11938_p2)
}
   0xb   :  { %s11942_s18 = scalar_lea.vmem %s41_s10, 16384  ;;  %p11947_p4 = scmp.lt.s32.totalorder %s41_s10, %s41_s10 }
   0xc   :  { %p11943_p3 = scmp.ne.s32.totalorder %s41_s10, %s11942_s18  ;;  %p11948_p5 = scmp.lt.s32.totalorder %s11942_s18, %s11942_s18 }
   0xe   :  { %p11949_p6 = por %p11948_p5, %p11947_p4 }
  0x10   :  { %p11950_p7 = pnand %p11949_p6, %p11943_p3 }
  0x12   :  { %11953 = shalt.err (!%p11950_p7)
}
  0x13   :  { %s12119_s19 = smov 512   ;;  %s12120_s20 = smov 32  }
  0x14   :  { %46 = dma.hbm_to_vmem [thread:$0]  %s12592_s3, 16384, %s41_s10, [#allocation8], %s12119_s19, %s12119_s19, %s12120_s20  }
  0x15   :  { %s12121_s23 = smov [#allocation10]   ;;  %s11954_s27 = scalar_lea.hbm %s12594_s5, 131072 }
  0x16   :  { %s62_s24 = sshll.u32 %s12121_s23, 4  ;;  %p11955_p8 = scmp.ne.s32.totalorder %s12594_s5, %s11954_s27  ;;  %s63_s24 = int_to_ptr.vmem [resolvable:$true] %s62_s24 }
  0x17   :  { %p11958_p9 = scmp.lt.u32.totalorder %s11954_s27, %s12594_s5 }
  0x19   :  { %p11960_p10 = pnand %p11958_p9, %p11955_p8 }
  0x1b   :  { %11963 = shalt.err (!%p11960_p10)
}
  0x1c   :  { %s11964_s12 = scalar_lea.vmem %s63_s24, 131072  ;;  %p11969_p12 = scmp.lt.s32.totalorder %s63_s24, %s63_s24 }
  0x1d   :  { %p11965_p11 = scmp.ne.s32.totalorder %s63_s24, %s11964_s12  ;;  %p11970_p13 = scmp.lt.s32.totalorder %s11964_s12, %s11964_s12 }
  0x1f   :  { %p11971_p0 = por %p11970_p13, %p11969_p12 }
  0x21   :  { %p11972_p1 = pnand %p11971_p0, %p11965_p11 }
  0x23   :  { %11975 = shalt.err (!%p11972_p1)
}
  0x24   :  { %s12122_s3 = smov 1024   ;;  %s12123_s10 = smov 64  }
  0x25   :  { %68 = dma.hbm_to_vmem [thread:$0]  %s12594_s5, 131072, %s63_s24, [#allocation11], %s12122_s3, %s12122_s3, %s12123_s10  }
  0x26   :  { %s12124_s15 = smov [#allocation13]   ;;  %s12125_s17 = smov [#allocation4]  }
  0x27   :  { %s84_s16 = sshll.u32 %s12124_s15, 4  ;;  %s31_s18 = sshll.u32 %s12125_s17, 4  ;;  %s85_s16 = int_to_ptr.vmem [resolvable:$true] %s84_s16  ;;  %s32_s18 = int_to_ptr.vmem [resolvable:$true] %s31_s18 }
  0x28   :  { %s11976_s21 = scalar_lea.hbm %s12596_s7, 16384 }
  0x29   :  { %p11977_p2 = scmp.ne.s32.totalorder %s12596_s7, %s11976_s21  ;;  %p11980_p3 = scmp.lt.u32.totalorder %s11976_s21, %s12596_s7 }
  0x2b   :  { %p11982_p4 = pnand %p11980_p3, %p11977_p2 }
  0x2d   :  { %11985 = shalt.err (!%p11982_p4)
}
  0x2e   :  { %s11986_s5 = scalar_lea.vmem %s85_s16, 16384  ;;  %p11991_p6 = scmp.lt.s32.totalorder %s85_s16, %s85_s16 }
  0x2f   :  { %p11987_p5 = scmp.ne.s32.totalorder %s85_s16, %s11986_s5  ;;  %p11992_p7 = scmp.lt.s32.totalorder %s11986_s5, %s11986_s5 }
  0x31   :  { %p11993_p8 = por %p11992_p7, %p11991_p6 }
  0x33   :  { %p11994_p9 = pnand %p11993_p8, %p11987_p5 }
  0x35   :  { %11997 = shalt.err (!%p11994_p9)
}
  0x36   :  { %s12126_s24 = smov 4   ;;  %s11998_s11 = scalar_lea.hbm %s12591_s2, 128 }
  0x37   :  { %90 = dma.hbm_to_vmem [thread:$0]  %s12596_s7, 16384, %s85_s16, [#allocation14], %s12123_s10, %s12123_s10, %s12126_s24  }
  0x38   :  { %p11999_p10 = scmp.ne.s32.totalorder %s12591_s2, %s11998_s11  ;;  %p12002_p11 = scmp.lt.u32.totalorder %s11998_s11, %s12591_s2 }
  0x3a   :  { %p12004_p12 = pnand %p12002_p11, %p11999_p10 }
  0x3c   :  { %12007 = shalt.err (!%p12004_p12)
}
  0x3d   :  { %s12008_s15 = scalar_lea.vmem %s32_s18, 128  ;;  %p12013_p0 = scmp.lt.s32.totalorder %s32_s18, %s32_s18 }
  0x3e   :  { %p12009_p13 = scmp.ne.s32.totalorder %s32_s18, %s12008_s15  ;;  %p12014_p1 = scmp.lt.s32.totalorder %s12008_s15, %s12008_s15 }
  0x40   :  { %p12015_p2 = por %p12014_p1, %p12013_p0 }
  0x42   :  { %p12016_p3 = pnand %p12015_p2, %p12009_p13 }
  0x44   :  { %12019 = shalt.err (!%p12016_p3)
}
  0x45   :  { %34 = dma.hbm_to_vmem [thread:$0]  %s12591_s2, 128, %s32_s18, [#allocation5]  }
  0x46   :  { %s12127_s16 = smov [#allocation9]   ;;  %s12128_s19 = smov [#allocation12]  }
  0x47   :  { %s53_s17 = sshll.u32 %s12127_s16, 4  ;;  %s75_s20 = sshll.u32 %s12128_s19, 4  ;;  %s54_s17 = int_to_ptr.vmem [resolvable:$true] %s53_s17  ;;  %s76_s20 = int_to_ptr.vmem [resolvable:$true] %s75_s20 }
  0x48   :  { %s12020_s23 = scalar_lea.hbm %s12593_s4, 128 }
  0x49   :  { %p12021_p4 = scmp.ne.s32.totalorder %s12593_s4, %s12020_s23  ;;  %p12024_p5 = scmp.lt.u32.totalorder %s12020_s23, %s12593_s4 }
  0x4b   :  { %p12026_p6 = pnand %p12024_p5, %p12021_p4 }
  0x4d   :  { %12029 = shalt.err (!%p12026_p6)
}
  0x4e   :  { %s12030_s2 = scalar_lea.vmem %s54_s17, 128  ;;  %p12035_p8 = scmp.lt.s32.totalorder %s54_s17, %s54_s17 }
  0x4f   :  { %p12031_p7 = scmp.ne.s32.totalorder %s54_s17, %s12030_s2  ;;  %p12036_p9 = scmp.lt.s32.totalorder %s12030_s2, %s12030_s2 }
  0x51   :  { %p12037_p10 = por %p12036_p9, %p12035_p8 }
  0x53   :  { %p12038_p11 = pnand %p12037_p10, %p12031_p7 }
  0x55   :  { %12041 = shalt.err (!%p12038_p11)
}
  0x56   :  { %56 = dma.hbm_to_vmem [thread:$0]  %s12593_s4, 128, %s54_s17, [#allocation8]  }
  0x57   :  { %s12042_s30 = scalar_lea.hbm %s12595_s6, 256 }
  0x58   :  { %p12043_p12 = scmp.ne.s32.totalorder %s12595_s6, %s12042_s30  ;;  %p12046_p13 = scmp.lt.u32.totalorder %s12042_s30, %s12595_s6 }
  0x5a   :  { %p12048_p0 = pnand %p12046_p13, %p12043_p12 }
  0x5c   :  { %12051 = shalt.err (!%p12048_p0)
}
  0x5d   :  { %s12052_s14 = scalar_lea.vmem %s76_s20, 256  ;;  %p12057_p2 = scmp.lt.s32.totalorder %s76_s20, %s76_s20 }
  0x5e   :  { %p12053_p1 = scmp.ne.s32.totalorder %s76_s20, %s12052_s14  ;;  %p12058_p3 = scmp.lt.s32.totalorder %s12052_s14, %s12052_s14 }
  0x60   :  { %p12059_p4 = por %p12058_p3, %p12057_p2 }
  0x62   :  { %p12060_p5 = pnand %p12059_p4, %p12053_p1 }
  0x64   :  { %12063 = shalt.err (!%p12060_p5)
}
  0x65   :  { %78 = dma.hbm_to_vmem [thread:$0]  %s12595_s6, 256, %s76_s20, [#allocation11]  }
  0x66   :  { %s12129_s7 = smov [#allocation15]   ;;  %s12064_s19 = scalar_lea.hbm %s12597_s8, 16 }
  0x67   :  { %s97_s10 = sshll.u32 %s12129_s7, 4  ;;  %p12065_p6 = scmp.ne.s32.totalorder %s12597_s8, %s12064_s19  ;;  %s98_s10 = int_to_ptr.vmem [resolvable:$true] %s97_s10 }
  0x68   :  { %p12068_p7 = scmp.lt.u32.totalorder %s12064_s19, %s12597_s8 }
  0x6a   :  { %p12070_p8 = pnand %p12068_p7, %p12065_p6 }
  0x6c   :  { %12073 = shalt.err (!%p12070_p8)
}
  0x6d   :  { %s12074_s26 = scalar_lea.vmem %s98_s10, 16  ;;  %s12078_s6 = scalar_lea.vmem %s98_s10, 32 }
  0x6e   :  { %p12075_p9 = scmp.ne.s32.totalorder %s98_s10, %s12074_s26  ;;  %p12079_p10 = scmp.lt.s32.totalorder %s98_s10, %s98_s10 }
  0x6f   :  { %p12080_p11 = scmp.lt.s32.totalorder %s12078_s6, %s12074_s26 }
  0x71   :  { %p12081_p12 = por %p12080_p11, %p12079_p10 }
  0x73   :  { %p12082_p13 = pnand %p12081_p12, %p12075_p9 }
  0x75   :  { %12085 = shalt.err (!%p12082_p13)
}
  0x76   :  { %100 = dma.hbm_to_vmem [thread:$0]  %s12597_s8, 16, %s98_s10, [#allocation14]  }
  0x77   :  { %12108 = dma.done.wait [#allocation5], 128  }
  0x78   :  { %12109 = vsyncadd [#allocation5], 4294967168 }
  0x79   :  { %12110 = dma.done.wait [#allocation8], 16512  }
  0x7a   :  { %12111 = vsyncadd [#allocation8], 4294950784 }
  0x7b   :  { %12112 = dma.done.wait [#allocation11], 131328  }
  0x7c   :  { %12113 = vsyncadd [#allocation11], 4294835968 }
  0x7d   :  { %12114 = dma.done.wait [#allocation14], 16400  }
  0x7e   :  { %12115 = vsyncadd [#allocation14], 4294950896  ;;  %v124_v0 = vld [vmem:[#allocation7] sm:$0xff]  ;;  %v125_v17 = vld [vmem:[#allocation7 + $0x8] sm:$0xff] }
  0x7f   :  { %v128_v1 = vld [vmem:[#allocation7 + $0x20] sm:$0xff]  ;;  %v129_v18 = vld [vmem:[#allocation7 + $0x28] sm:$0xff]  ;;  %v12265_v19 = vld [vmem:[#allocation4] sm:$0xff] }
  0x80   :  { %v132_v2 = vld [vmem:[#allocation7 + $0x40] sm:$0xff]  ;;  %v10222_v3 = vcombine.high %v124_v0, %v128_v1  ;;  %v10221_v4 = vcombine.low %v124_v0, %v128_v1  ;;  %v133_v20 = vld [vmem:[#allocation7 + $0x48] sm:$0xff]  ;;  %v10224_v22 = vcombine.high %v125_v17, %v129_v18  ;;  %v10223_v23 = vcombine.low %v125_v17, %v129_v18 }
  0x81   :  { %v136_v5 = vld [vmem:[#allocation7 + $0x60] sm:$0xff]  ;;  %v12269_v24 = vcombine.high %v12265_v19, %v12265_v19  ;;  %v137_v25 = vld [vmem:[#allocation7 + $0x68] sm:$0xff] }
  0x82   :  { %v10230_v6 = vcombine.high %v132_v2, %v136_v5  ;;  %v140_v7 = vld [vmem:[#allocation7 + $0x80] sm:$0xff]  ;;  %976 = vmatprep.subr.bf16.mxu0 %v10222_v3  ;;  %v10229_v9 = vcombine.low %v132_v2, %v136_v5  ;;  %v10232_v27 = vcombine.high %v133_v20, %v137_v25  ;;  %v141_v28 = vld [vmem:[#allocation7 + $0x88] sm:$0xff]  ;;  %1017 = vmatprep.subr.bf16.mxu1 %v10224_v22 }
  0x83   :  { %v144_v8 = vld [vmem:[#allocation7 + $0xa0] sm:$0xff]  ;;  %977 = vmatpush1.bf16.msra.mxu0 %v10221_v4  ;;  %v145_v29 = vld [vmem:[#allocation7 + $0xa8] sm:$0xff]  ;;  %1008 = vmatprep.mubr.bf16.mxu0 %v12269_v24  ;;  %v10231_v32 = vcombine.low %v133_v20, %v137_v25 }
  0x84   :  { %978 = vmatprep.subr.bf16.mxu0 %v10230_v6  ;;  %v10238_v10 = vcombine.high %v140_v7, %v144_v8  ;;  %v148_v11 = vld [vmem:[#allocation7 + $0xc0] sm:$0xff]  ;;  %v10237_v13 = vcombine.low %v140_v7, %v144_v8  ;;  %1018 = vmatpush1.bf16.msra.mxu1 %v10223_v23  ;;  %v10240_v34 = vcombine.high %v141_v28, %v145_v29  ;;  %v149_v36 = vld [vmem:[#allocation7 + $0xc8] sm:$0xff] }
  0x85   :  { %v152_v12 = vld [vmem:[#allocation7 + $0xe0] sm:$0xff]  ;;  %1019 = vmatprep.subr.bf16.mxu1 %v10232_v27  ;;  %v153_v37 = vld [vmem:[#allocation7 + $0xe8] sm:$0xff]  ;;  %1049 = vmatprep.mubr.bf16.mxu1 %v12269_v24  ;;  %v10239_v40 = vcombine.low %v141_v28, %v145_v29 }
  0x86   :  { %v10246_v14 = vcombine.high %v148_v11, %v152_v12  ;;  %v156_v15 = vld [vmem:[#allocation7 + $0x100] sm:$0xff]  ;;  %v10245_v21 = vcombine.low %v148_v11, %v152_v12  ;;  %v10248_v42 = vcombine.high %v149_v36, %v153_v37  ;;  %v157_v44 = vld [vmem:[#allocation7 + $0x108] sm:$0xff]  ;;  %v10247_v48 = vcombine.low %v149_v36, %v153_v37 }
  0x87   :  { %979 = vmatpush1.bf16.msra.mxu0 %v10229_v9  ;;  %v160_v16 = vld [vmem:[#allocation7 + $0x120] sm:$0xff]  ;;  %v161_v45 = vld [vmem:[#allocation7 + $0x128] sm:$0xff] }
  0x88   :  { %980 = vmatprep.subr.bf16.mxu0 %v10238_v10  ;;  %v10254_v26 = vcombine.high %v156_v15, %v160_v16  ;;  %v164_v30 = vld [vmem:[#allocation7 + $0x140] sm:$0xff]  ;;  %v10253_v33 = vcombine.low %v156_v15, %v160_v16  ;;  %1020 = vmatpush1.bf16.msra.mxu1 %v10231_v32  ;;  %v10256_v50 = vcombine.high %v157_v44, %v161_v45  ;;  %v165_v52 = vld [vmem:[#allocation7 + $0x148] sm:$0xff] }
  0x89   :  { %v168_v31 = vld [vmem:[#allocation7 + $0x160] sm:$0xff]  ;;  %1021 = vmatprep.subr.bf16.mxu1 %v10240_v34  ;;  %v169_v53 = vld [vmem:[#allocation7 + $0x168] sm:$0xff]  ;;  %v10255_v56 = vcombine.low %v157_v44, %v161_v45 }
  0x8a   :  { %v10262_v35 = vcombine.high %v164_v30, %v168_v31  ;;  %v172_v38 = vld [vmem:[#allocation7 + $0x180] sm:$0xff]  ;;  %v10261_v41 = vcombine.low %v164_v30, %v168_v31  ;;  %v10264_v58 = vcombine.high %v165_v52, %v169_v53  ;;  %v173_v60 = vld [vmem:[#allocation7 + $0x188] sm:$0xff]  ;;  %v10263_v0 = vcombine.low %v165_v52, %v169_v53 }
  0x8b   :  { %981 = vmatpush1.bf16.msra.mxu0 %v10237_v13  ;;  %v176_v39 = vld [vmem:[#allocation7 + $0x1a0] sm:$0xff]  ;;  %v177_v61 = vld [vmem:[#allocation7 + $0x1a8] sm:$0xff] }
  0x8c   :  { %982 = vmatprep.subr.bf16.mxu0 %v10246_v14  ;;  %v10270_v43 = vcombine.high %v172_v38, %v176_v39  ;;  %v180_v46 = vld [vmem:[#allocation7 + $0x1c0] sm:$0xff]  ;;  %1022 = vmatpush1.bf16.msra.mxu1 %v10239_v40  ;;  %v10269_v49 = vcombine.low %v172_v38, %v176_v39  ;;  %v10272_v2 = vcombine.high %v173_v60, %v177_v61  ;;  %v181_v4 = vld [vmem:[#allocation7 + $0x1c8] sm:$0xff] }
  0x8d   :  { %v184_v47 = vld [vmem:[#allocation7 + $0x1e0] sm:$0xff]  ;;  %1023 = vmatprep.subr.bf16.mxu1 %v10248_v42  ;;  %v185_v5 = vld [vmem:[#allocation7 + $0x1e8] sm:$0xff]  ;;  %v10271_v8 = vcombine.low %v173_v60, %v177_v61 }
  0x8e   :  { %v10278_v51 = vcombine.high %v180_v46, %v184_v47  ;;  %v188_v54 = vld [vmem:[#allocation7 + $0x200] sm:$0xff]  ;;  %v10277_v57 = vcombine.low %v180_v46, %v184_v47  ;;  %v10280_v10 = vcombine.high %v181_v4, %v185_v5  ;;  %v189_v12 = vld [vmem:[#allocation7 + $0x208] sm:$0xff]  ;;  %v10279_v16 = vcombine.low %v181_v4, %v185_v5 }
  0x8f   :  { %983 = vmatpush1.bf16.msra.mxu0 %v10245_v21  ;;  %v192_v55 = vld [vmem:[#allocation7 + $0x220] sm:$0xff]  ;;  %v193_v13 = vld [vmem:[#allocation7 + $0x228] sm:$0xff] }
  0x90   :  { %984 = vmatprep.subr.bf16.mxu0 %v10254_v26  ;;  %1024 = vmatpush1.bf16.msra.mxu1 %v10247_v48  ;;  %v10286_v59 = vcombine.high %v188_v54, %v192_v55  ;;  %v196_v62 = vld [vmem:[#allocation7 + $0x240] sm:$0xff]  ;;  %v10285_v1 = vcombine.low %v188_v54, %v192_v55  ;;  %v10288_v18 = vcombine.high %v189_v12, %v193_v13  ;;  %v197_v21 = vld [vmem:[#allocation7 + $0x248] sm:$0xff] }
  0x91   :  { %1025 = vmatprep.subr.bf16.mxu1 %v10256_v50  ;;  %v200_v63 = vld [vmem:[#allocation7 + $0x260] sm:$0xff]  ;;  %v201_v22 = vld [vmem:[#allocation7 + $0x268] sm:$0xff]  ;;  %v10287_v26 = vcombine.low %v189_v12, %v193_v13  ;;  %v127_v12 = vld [vmem:[#allocation7 + $0x18] sm:$0xff] }
  0x92   :  { %v10294_v3 = vcombine.high %v196_v62, %v200_v63  ;;  %v204_v6 = vld [vmem:[#allocation7 + $0x280] sm:$0xff]  ;;  %v10293_v9 = vcombine.low %v196_v62, %v200_v63  ;;  %v10296_v28 = vcombine.high %v197_v21, %v201_v22  ;;  %v205_v30 = vld [vmem:[#allocation7 + $0x288] sm:$0xff]  ;;  %v10295_v34 = vcombine.low %v197_v21, %v201_v22  ;;  %v134_v63 = vld [vmem:[#allocation7 + $0x50] sm:$0xff] }
  0x93   :  { %985 = vmatpush1.bf16.msra.mxu0 %v10253_v33  ;;  %v208_v7 = vld [vmem:[#allocation7 + $0x2a0] sm:$0xff]  ;;  %v209_v31 = vld [vmem:[#allocation7 + $0x2a8] sm:$0xff]  ;;  %v139_v21 = vld [vmem:[#allocation7 + $0x78] sm:$0xff] }
  0x94   :  { %986 = vmatprep.subr.bf16.mxu0 %v10262_v35  ;;  %1026 = vmatpush1.bf16.msra.mxu1 %v10255_v56  ;;  %v10302_v11 = vcombine.high %v204_v6, %v208_v7  ;;  %v212_v14 = vld [vmem:[#allocation7 + $0x2c0] sm:$0xff]  ;;  %v10301_v17 = vcombine.low %v204_v6, %v208_v7  ;;  %v10304_v36 = vcombine.high %v205_v30, %v209_v31  ;;  %v213_v38 = vld [vmem:[#allocation7 + $0x2c8] sm:$0xff]  ;;  %v126_v56 = vld [vmem:[#allocation7 + $0x10] sm:$0xff] }
  0x95   :  { %1027 = vmatprep.subr.bf16.mxu1 %v10264_v58  ;;  %v216_v15 = vld [vmem:[#allocation7 + $0x2e0] sm:$0xff]  ;;  %v217_v39 = vld [vmem:[#allocation7 + $0x2e8] sm:$0xff]  ;;  %v10303_v42 = vcombine.low %v205_v30, %v209_v31  ;;  %v147_v30 = vld [vmem:[#allocation7 + $0xb8] sm:$0xff] }
  0x96   :  { %v10310_v20 = vcombine.high %v212_v14, %v216_v15  ;;  %v220_v23 = vld [vmem:[#allocation7 + $0x300] sm:$0xff]  ;;  %v10309_v27 = vcombine.low %v212_v14, %v216_v15  ;;  %v10312_v44 = vcombine.high %v213_v38, %v217_v39  ;;  %v221_v46 = vld [vmem:[#allocation7 + $0x308] sm:$0xff]  ;;  %v10311_v50 = vcombine.low %v213_v38, %v217_v39  ;;  %v150_v14 = vld [vmem:[#allocation7 + $0xd0] sm:$0xff] }
  0x97   :  { %987 = vmatpush1.bf16.msra.mxu0 %v10261_v41  ;;  %v224_v25 = vld [vmem:[#allocation7 + $0x320] sm:$0xff]  ;;  %v225_v47 = vld [vmem:[#allocation7 + $0x328] sm:$0xff]  ;;  %v154_v15 = vld [vmem:[#allocation7 + $0xf0] sm:$0xff] }
  0x98   :  { %988 = vmatprep.subr.bf16.mxu0 %v10270_v43  ;;  %1028 = vmatpush1.bf16.msra.mxu1 %v10263_v0  ;;  %v10318_v29 = vcombine.high %v220_v23, %v224_v25  ;;  %v228_v32 = vld [vmem:[#allocation7 + $0x340] sm:$0xff]  ;;  %v10317_v35 = vcombine.low %v220_v23, %v224_v25  ;;  %v10320_v52 = vcombine.high %v221_v46, %v225_v47  ;;  %v229_v54 = vld [vmem:[#allocation7 + $0x348] sm:$0xff]  ;;  %v138_v0 = vld [vmem:[#allocation7 + $0x70] sm:$0xff] }
  0x99   :  { %1029 = vmatprep.subr.bf16.mxu1 %v10272_v2  ;;  %v232_v33 = vld [vmem:[#allocation7 + $0x360] sm:$0xff]  ;;  %v233_v55 = vld [vmem:[#allocation7 + $0x368] sm:$0xff]  ;;  %v10319_v58 = vcombine.low %v221_v46, %v225_v47  ;;  %v12275_v2 = vcombine.low %v12265_v19, %v12265_v19  ;;  %v10233_v13 = vcombine.low %v134_v63, %v138_v0  ;;  %v158_v23 = vld [vmem:[#allocation7 + $0x110] sm:$0xff]  ;;  %v10249_v31 = vcombine.low %v150_v14, %v154_v15 }
  0x9a   :  { %v10326_v37 = vcombine.high %v228_v32, %v232_v33  ;;  %v236_v40 = vld [vmem:[#allocation7 + $0x380] sm:$0xff]  ;;  %v10325_v43 = vcombine.low %v228_v32, %v232_v33  ;;  %v241_v60 = vld [vmem:[#allocation7 + $0x3a8] sm:$0xff]  ;;  %v10328_v62 = vcombine.high %v229_v54, %v233_v55  ;;  %v162_v25 = vld [vmem:[#allocation7 + $0x130] sm:$0xff] }
  0x9b   :  { %989 = vmatpush1.bf16.msra.mxu0 %v10269_v49  ;;  %v240_v41 = vld [vmem:[#allocation7 + $0x3a0] sm:$0xff]  ;;  %v245_v4 = vld [vmem:[#allocation7 + $0x3c8] sm:$0xff]  ;;  %v166_v32 = vld [vmem:[#allocation7 + $0x150] sm:$0xff]  ;;  %v10257_v39 = vcombine.low %v158_v23, %v162_v25 }
  0x9c   :  { %990 = vmatprep.subr.bf16.mxu0 %v10278_v51  ;;  %1030 = vmatpush1.bf16.msra.mxu1 %v10271_v8  ;;  %v10334_v45 = vcombine.high %v236_v40, %v240_v41  ;;  %v244_v48 = vld [vmem:[#allocation7 + $0x3c0] sm:$0xff]  ;;  %v10333_v51 = vcombine.low %v236_v40, %v240_v41  ;;  %v249_v5 = vld [vmem:[#allocation7 + $0x3e8] sm:$0xff]  ;;  %v142_v8 = vld [vmem:[#allocation7 + $0x90] sm:$0xff] }
  0x9d   :  { %1031 = vmatprep.subr.bf16.mxu1 %v10280_v10  ;;  %v248_v49 = vld [vmem:[#allocation7 + $0x3e0] sm:$0xff]  ;;  %v10234_v10 = vcombine.high %v134_v63, %v138_v0  ;;  %v10344_v19 = vcombine.high %v245_v4, %v249_v5  ;;  %v170_v33 = vld [vmem:[#allocation7 + $0x170] sm:$0xff]  ;;  %v155_v38 = vld [vmem:[#allocation7 + $0xf8] sm:$0xff] }
  0x9e   :  { %v10342_v53 = vcombine.high %v244_v48, %v248_v49  ;;  %v10341_v61 = vcombine.low %v244_v48, %v248_v49  ;;  %v174_v40 = vld [vmem:[#allocation7 + $0x190] sm:$0xff]  ;;  %v163_v46 = vld [vmem:[#allocation7 + $0x138] sm:$0xff]  ;;  %v10265_v47 = vcombine.low %v166_v32, %v170_v33 }
  0x9f   :  { %991 = vmatpush1.bf16.msra.mxu0 %v10277_v57  ;;  %v130_v57 = vld [vmem:[#allocation7 + $0x30] sm:$0xff] }
  0xa0   :  { %992 = vmatprep.subr.bf16.mxu0 %v10286_v59  ;;  %1032 = vmatpush1.bf16.msra.mxu1 %v10279_v16  ;;  %v237_v59 = vld [vmem:[#allocation7 + $0x388] sm:$0xff]  ;;  %v10225_v7 = vcombine.low %v126_v56, %v130_v57  ;;  %v178_v41 = vld [vmem:[#allocation7 + $0x1b0] sm:$0xff] }
  0xa1   :  { %1033 = vmatprep.subr.bf16.mxu1 %v10288_v18  ;;  %v10336_v6 = vcombine.high %v237_v59, %v241_v60  ;;  %v10343_v18 = vcombine.low %v245_v4, %v249_v5  ;;  %v182_v48 = vld [vmem:[#allocation7 + $0x1d0] sm:$0xff]  ;;  %v183_v5 = vld [vmem:[#allocation7 + $0x1d8] sm:$0xff] }
  0xa2   :  { %v186_v49 = vld [vmem:[#allocation7 + $0x1f0] sm:$0xff] }
  0xa3   :  { %993 = vmatpush1.bf16.msra.mxu0 %v10285_v1  ;;  %v10226_v1 = vcombine.high %v126_v56, %v130_v57  ;;  %v194_v56 = vld [vmem:[#allocation7 + $0x230] sm:$0xff] }
  0xa4   :  { %994 = vmatprep.subr.bf16.mxu0 %v10294_v3  ;;  %1034 = vmatpush1.bf16.msra.mxu1 %v10287_v26  ;;  %v10327_v3 = vcombine.low %v229_v54, %v233_v55  ;;  %v10273_v54 = vcombine.low %v174_v40, %v178_v41  ;;  %v190_v55 = vld [vmem:[#allocation7 + $0x210] sm:$0xff] }
  0xa5   :  { %1035 = vmatprep.subr.bf16.mxu1 %v10296_v28  ;;  %v198_v63 = vld [vmem:[#allocation7 + $0x250] sm:$0xff] }
  0xa6   :  { %v202_v0 = vld [vmem:[#allocation7 + $0x270] sm:$0xff] }
  0xa7   :  { %995 = vmatpush1.bf16.msra.mxu0 %v10293_v9  ;;  %v146_v9 = vld [vmem:[#allocation7 + $0xb0] sm:$0xff] }
  0xa8   :  { %996 = vmatprep.subr.bf16.mxu0 %v10302_v11  ;;  %1036 = vmatpush1.bf16.msra.mxu1 %v10295_v34  ;;  %v10335_v11 = vcombine.low %v237_v59, %v241_v60  ;;  %v10242_v16 = vcombine.high %v142_v8, %v146_v9  ;;  %v10241_v22 = vcombine.low %v142_v8, %v146_v9  ;;  %v175_v60 = vld [vmem:[#allocation7 + $0x198] sm:$0xff]  ;;  %v206_v8 = vld [vmem:[#allocation7 + $0x290] sm:$0xff] }
  0xa9   :  { %1037 = vmatprep.subr.bf16.mxu1 %v10304_v36  ;;  %v210_v9 = vld [vmem:[#allocation7 + $0x2b0] sm:$0xff] }
  0xab   :  { %997 = vmatpush1.bf16.msra.mxu0 %v10301_v17  ;;  %v131_v17 = vld [vmem:[#allocation7 + $0x38] sm:$0xff] }
  0xac   :  { %998 = vmatprep.subr.bf16.mxu0 %v10310_v20  ;;  %1038 = vmatpush1.bf16.msra.mxu1 %v10303_v42  ;;  %v135_v20 = vld [vmem:[#allocation7 + $0x58] sm:$0xff]  ;;  %v10228_v26 = vcombine.high %v127_v12, %v131_v17  ;;  %v10227_v28 = vcombine.low %v127_v12, %v131_v17 }
  0xad   :  { %1039 = vmatprep.subr.bf16.mxu1 %v10312_v44  ;;  %v10236_v34 = vcombine.high %v135_v20, %v139_v21  ;;  %v10235_v36 = vcombine.low %v135_v20, %v139_v21  ;;  %v199_v21 = vld [vmem:[#allocation7 + $0x258] sm:$0xff] }
  0xaf   :  { %999 = vmatpush1.bf16.msra.mxu0 %v10309_v27  ;;  %v10250_v27 = vcombine.high %v150_v14, %v154_v15  ;;  %v10297_v14 = vcombine.low %v198_v63, %v202_v0  ;;  %v214_v15 = vld [vmem:[#allocation7 + $0x2d0] sm:$0xff] }
  0xb0   :  { %1000 = vmatprep.subr.bf16.mxu0 %v10318_v29  ;;  %1040 = vmatpush1.bf16.msra.mxu1 %v10311_v50  ;;  %v143_v29 = vld [vmem:[#allocation7 + $0x98] sm:$0xff] }
  0xb1   :  { %1041 = vmatprep.subr.bf16.mxu1 %v10320_v52  ;;  %v10244_v42 = vcombine.high %v143_v29, %v147_v30  ;;  %v10243_v44 = vcombine.low %v143_v29, %v147_v30  ;;  %v167_v52 = vld [vmem:[#allocation7 + $0x158] sm:$0xff] }
  0xb2   :  { %v207_v30 = vld [vmem:[#allocation7 + $0x298] sm:$0xff] }
  0xb3   :  { %1001 = vmatpush1.bf16.msra.mxu0 %v10317_v35  ;;  %v10258_v35 = vcombine.high %v158_v23, %v162_v25  ;;  %v10305_v23 = vcombine.low %v206_v8, %v210_v9  ;;  %v222_v25 = vld [vmem:[#allocation7 + $0x310] sm:$0xff] }
  0xb4   :  { %1002 = vmatprep.subr.bf16.mxu0 %v10326_v37  ;;  %1042 = vmatpush1.bf16.msra.mxu1 %v10319_v58  ;;  %v151_v37 = vld [vmem:[#allocation7 + $0xd8] sm:$0xff]  ;;  %v10282_v58 = vcombine.high %v182_v48, %v186_v49 }
  0xb5   :  { %1043 = vmatprep.subr.bf16.mxu1 %v10328_v62  ;;  %v10252_v50 = vcombine.high %v151_v37, %v155_v38  ;;  %v10281_v62 = vcombine.low %v182_v48, %v186_v49  ;;  %v246_v49 = vld [vmem:[#allocation7 + $0x3d0] sm:$0xff] }
  0xb7   :  { %1003 = vmatpush1.bf16.msra.mxu0 %v10325_v43  ;;  %v10266_v43 = vcombine.high %v166_v32, %v170_v33  ;;  %v230_v33 = vld [vmem:[#allocation7 + $0x350] sm:$0xff] }
  0xb8   :  { %1004 = vmatprep.subr.bf16.mxu0 %v10334_v45  ;;  %1044 = vmatpush1.bf16.msra.mxu1 %v10327_v3  ;;  %v159_v45 = vld [vmem:[#allocation7 + $0x118] sm:$0xff]  ;;  %v10290_v3 = vcombine.high %v190_v55, %v194_v56 }
  0xb9   :  { %1045 = vmatprep.subr.bf16.mxu1 %v10336_v6  ;;  %v10260_v57 = vcombine.high %v159_v45, %v163_v46  ;;  %v10259_v59 = vcombine.low %v159_v45, %v163_v46  ;;  %v187_v6 = vld [vmem:[#allocation7 + $0x1f8] sm:$0xff] }
  0xba   :  { %v10284_v17 = vcombine.high %v183_v5, %v187_v6  ;;  %v10283_v20 = vcombine.low %v183_v5, %v187_v6  ;;  %v223_v46 = vld [vmem:[#allocation7 + $0x318] sm:$0xff] }
  0xbb   :  { %1005 = vmatpush1.bf16.msra.mxu0 %v10333_v51  ;;  %v10251_v51 = vcombine.low %v151_v37, %v155_v38  ;;  %v215_v38 = vld [vmem:[#allocation7 + $0x2d8] sm:$0xff] }
  0xbc   :  { %1006 = vmatprep.subr.bf16.mxu0 %v10342_v53  ;;  %1046 = vmatpush1.bf16.msra.mxu1 %v10335_v11  ;;  %v171_v53 = vld [vmem:[#allocation7 + $0x178] sm:$0xff]  ;;  %v10298_v11 = vcombine.high %v198_v63, %v202_v0 }
  0xbd   :  { %1047 = vmatprep.subr.bf16.mxu1 %v10344_v19  ;;  %v10267_v4 = vcombine.low %v167_v52, %v171_v53  ;;  %v191_v19 = vld [vmem:[#allocation7 + $0x218] sm:$0xff] }
  0xbe   :  { %v247_v6 = vld [vmem:[#allocation7 + $0x3d8] sm:$0xff] }
  0xbf   :  { %1007 = vmatpush1.bf16.msra.mxu0 %v10341_v61  ;;  %v179_v61 = vld [vmem:[#allocation7 + $0x1b8] sm:$0xff] }
  0xc0   :  { %1058 = vmatprep.subr.bf16.mxu0 %v10226_v1  ;;  %1048 = vmatpush1.bf16.msra.mxu1 %v10343_v18  ;;  %v10268_v1 = vcombine.high %v167_v52, %v171_v53  ;;  %v10275_v12 = vcombine.low %v175_v60, %v179_v61  ;;  %v10306_v18 = vcombine.high %v206_v8, %v210_v9  ;;  %v231_v53 = vld [vmem:[#allocation7 + $0x358] sm:$0xff] }
  0xc1   :  { %1099 = vmatprep.subr.bf16.mxu1 %v10228_v26  ;;  %v226_v26 = vld [vmem:[#allocation7 + $0x330] sm:$0xff] }
  0xc2   :  { %1009 = vmatmul.mubr.bf16.vlgmr.msra.gmra.mrb[0].mxu0 %v12275_v2 }
  0xc3   :  { %1059 = vmatpush1.bf16.msra.mxu0 %v10225_v7  ;;  %1090 = vmatprep.mubr.bf16.mxu0 %v12269_v24  ;;  %v10289_v7 = vcombine.low %v190_v55, %v194_v56 }
  0xc4   :  { %1060 = vmatprep.subr.bf16.mxu0 %v10234_v10  ;;  %1050 = vmatmul.mubr.bf16.vlgmr.msra.gmra.mrb[0].mxu1 %v12275_v2  ;;  %v10276_v10 = vcombine.high %v175_v60, %v179_v61  ;;  %v239_v61 = vld [vmem:[#allocation7 + $0x398] sm:$0xff] }
  0xc5   :  { %1100 = vmatpush1.bf16.msra.mxu1 %v10227_v28  ;;  %1131 = vmatprep.mubr.bf16.mxu1 %v12269_v24  ;;  %v10274_v24 = vcombine.high %v174_v40, %v178_v41  ;;  %v10321_v40 = vcombine.low %v222_v25, %v226_v26  ;;  %v238_v41 = vld [vmem:[#allocation7 + $0x390] sm:$0xff] }
  0xc6   :  { %1101 = vmatprep.subr.bf16.mxu1 %v10236_v34  ;;  %v234_v34 = vld [vmem:[#allocation7 + $0x370] sm:$0xff] }
  0xc7   :  { %1061 = vmatpush1.bf16.msra.mxu0 %v10233_v13  ;;  %v195_v13 = vld [vmem:[#allocation7 + $0x238] sm:$0xff]  ;;  %v10329_v48 = vcombine.low %v230_v33, %v234_v34 }
  0xc8   :  { %1062 = vmatprep.subr.bf16.mxu0 %v10242_v16  ;;  %v218_v16 = vld [vmem:[#allocation7 + $0x2f0] sm:$0xff]  ;;  %v10291_v29 = vcombine.low %v191_v19, %v195_v13 }
  0xc9   :  { %1102 = vmatpush1.bf16.msra.mxu1 %v10235_v36  ;;  %v10314_v28 = vcombine.high %v214_v15, %v218_v16  ;;  %v10313_v32 = vcombine.low %v214_v15, %v218_v16  ;;  %v10322_v36 = vcombine.high %v222_v25, %v226_v26 }
  0xca   :  { %1103 = vmatprep.subr.bf16.mxu1 %v10244_v42  ;;  %v242_v42 = vld [vmem:[#allocation7 + $0x3b0] sm:$0xff] }
  0xcb   :  { %1063 = vmatpush1.bf16.msra.mxu0 %v10241_v22  ;;  %v203_v22 = vld [vmem:[#allocation7 + $0x278] sm:$0xff]  ;;  %v10337_v55 = vcombine.low %v238_v41, %v242_v42 }
  0xcc   :  { %1064 = vmatprep.subr.bf16.mxu0 %v10250_v27  ;;  %v10292_v27 = vcombine.high %v191_v19, %v195_v13  ;;  %v10299_v37 = vcombine.low %v199_v21, %v203_v22  ;;  %v1175_v13 = vld [vmem:[#allocation10 + $0x8] sm:$0xff] }
  0xcd   :  { %1104 = vmatpush1.bf16.msra.mxu1 %v10243_v44  ;;  %v10330_v44 = vcombine.high %v230_v33, %v234_v34 }
  0xce   :  { %1105 = vmatprep.subr.bf16.mxu1 %v10252_v50  ;;  %v250_v50 = vld [vmem:[#allocation7 + $0x3f0] sm:$0xff] }
  0xcf   :  { %1065 = vmatpush1.bf16.msra.mxu0 %v10249_v31  ;;  %v211_v31 = vld [vmem:[#allocation7 + $0x2b8] sm:$0xff]  ;;  %v10345_v63 = vcombine.low %v246_v49, %v250_v50 }
  0xd0   :  { %1066 = vmatprep.subr.bf16.mxu0 %v10258_v35  ;;  %v10300_v35 = vcombine.high %v199_v21, %v203_v22  ;;  %v10307_v45 = vcombine.low %v207_v30, %v211_v31  ;;  %v1191_v22 = vld [vmem:[#allocation10 + $0x88] sm:$0xff] }
  0xd1   :  { %1106 = vmatpush1.bf16.msra.mxu1 %v10251_v51  ;;  %v10338_v51 = vcombine.high %v238_v41, %v242_v42 }
  0xd2   :  { %1107 = vmatprep.subr.bf16.mxu1 %v10260_v57  ;;  %v1174_v57 = vld [vmem:[#allocation10] sm:$0xff] }
  0xd3   :  { %1067 = vmatpush1.bf16.msra.mxu0 %v10257_v39  ;;  %v219_v39 = vld [vmem:[#allocation7 + $0x2f8] sm:$0xff] }
  0xd4   :  { %1068 = vmatprep.subr.bf16.mxu0 %v10266_v43  ;;  %v10308_v43 = vcombine.high %v207_v30, %v211_v31  ;;  %v10315_v52 = vcombine.low %v215_v38, %v219_v39  ;;  %v1207_v31 = vld [vmem:[#allocation10 + $0x108] sm:$0xff] }
  0xd5   :  { %1108 = vmatpush1.bf16.msra.mxu1 %v10259_v59  ;;  %v10346_v59 = vcombine.high %v246_v49, %v250_v50  ;;  %v1239_v49 = vld [vmem:[#allocation10 + $0x208] sm:$0xff] }
  0xd6   :  { %1109 = vmatprep.subr.bf16.mxu1 %v10268_v1  ;;  %v1190_v1 = vld [vmem:[#allocation10 + $0x80] sm:$0xff] }
  0xd7   :  { %1069 = vmatpush1.bf16.msra.mxu0 %v10265_v47  ;;  %v227_v47 = vld [vmem:[#allocation7 + $0x338] sm:$0xff] }
  0xd8   :  { %1070 = vmatprep.subr.bf16.mxu0 %v10274_v24  ;;  %v10316_v24 = vcombine.high %v215_v38, %v219_v39  ;;  %v10324_v56 = vcombine.high %v223_v46, %v227_v47  ;;  %v10323_v60 = vcombine.low %v223_v46, %v227_v47  ;;  %v1223_v39 = vld [vmem:[#allocation10 + $0x188] sm:$0xff] }
  0xd9   :  { %1110 = vmatpush1.bf16.msra.mxu1 %v10267_v4 }
  0xda   :  { %1111 = vmatprep.subr.bf16.mxu1 %v10276_v10  ;;  %v1206_v10 = vld [vmem:[#allocation10 + $0x100] sm:$0xff] }
  0xdb   :  { %1071 = vmatpush1.bf16.msra.mxu0 %v10273_v54  ;;  %v235_v54 = vld [vmem:[#allocation7 + $0x378] sm:$0xff] }
  0xdc   :  { %1072 = vmatprep.subr.bf16.mxu0 %v10282_v58  ;;  %v1182_v58 = vld [vmem:[#allocation10 + $0x40] sm:$0xff]  ;;  %v10332_v0 = vcombine.high %v231_v53, %v235_v54  ;;  %v10331_v5 = vcombine.low %v231_v53, %v235_v54 }
  0xdd   :  { %1112 = vmatpush1.bf16.msra.mxu1 %v10275_v12  ;;  %v10350_v4 = vcombine.high %v1174_v57, %v1182_v58  ;;  %v10349_v9 = vcombine.low %v1174_v57, %v1182_v58  ;;  %v1302_v58 = vld [vmem:[#allocation10 + $0x400] sm:$0xff] }
  0xde   :  { %1113 = vmatprep.subr.bf16.mxu1 %v10284_v17  ;;  %v1222_v17 = vld [vmem:[#allocation10 + $0x180] sm:$0xff] }
  0xdf   :  { %1073 = vmatpush1.bf16.msra.mxu0 %v10281_v62  ;;  %v243_v62 = vld [vmem:[#allocation7 + $0x3b8] sm:$0xff] }
  0xe0   :  { %1074 = vmatprep.subr.bf16.mxu0 %v10290_v3  ;;  %v1198_v3 = vld [vmem:[#allocation10 + $0xc0] sm:$0xff]  ;;  %v10340_v8 = vcombine.high %v239_v61, %v243_v62  ;;  %v10339_v19 = vcombine.low %v239_v61, %v243_v62 }
  0xe1   :  { %1114 = vmatpush1.bf16.msra.mxu1 %v10283_v20  ;;  %v10366_v12 = vcombine.high %v1190_v1, %v1198_v3  ;;  %v10365_v16 = vcombine.low %v1190_v1, %v1198_v3  ;;  %v12287_v1 = vld [vmem:[#allocation10 + $0x808] sm:$0xff] }
  0xe2   :  { %1115 = vmatprep.subr.bf16.mxu1 %v10292_v27  ;;  %v1238_v27 = vld [vmem:[#allocation10 + $0x200] sm:$0xff]  ;;  %v1271_v3 = vld [vmem:[#allocation10 + $0x308] sm:$0xff] }
  0xe3   :  { %1075 = vmatpush1.bf16.msra.mxu0 %v10289_v7  ;;  %v251_v7 = vld [vmem:[#allocation7 + $0x3f8] sm:$0xff] }
  0xe4   :  { %1076 = vmatprep.subr.bf16.mxu0 %v10298_v11  ;;  %v1214_v11 = vld [vmem:[#allocation10 + $0x140] sm:$0xff]  ;;  %v10348_v15 = vcombine.high %v247_v6, %v251_v7  ;;  %v10347_v21 = vcombine.low %v247_v6, %v251_v7  ;;  %v12289_v6 = vld [vmem:[#allocation10 + $0x848] sm:$0xff] }
  0xe5   :  { %1116 = vmatpush1.bf16.msra.mxu1 %v10291_v29  ;;  %v10382_v20 = vcombine.high %v1206_v10, %v1214_v11  ;;  %v10381_v26 = vcombine.low %v1206_v10, %v1214_v11  ;;  %v1318_v7 = vld [vmem:[#allocation10 + $0x480] sm:$0xff]  ;;  %v10607_v10 = vcombine.low %v12287_v1, %v12289_v6 }
  0xe6   :  { %1117 = vmatprep.subr.bf16.mxu1 %v10300_v35  ;;  %v1254_v35 = vld [vmem:[#allocation10 + $0x280] sm:$0xff] }
  0xe7   :  { %1077 = vmatpush1.bf16.msra.mxu0 %v10297_v14  ;;  %v1183_v14 = vld [vmem:[#allocation10 + $0x48] sm:$0xff] }
  0xe8   :  { %1078 = vmatprep.subr.bf16.mxu0 %v10306_v18  ;;  %v1230_v18 = vld [vmem:[#allocation10 + $0x1c0] sm:$0xff]  ;;  %v10352_v25 = vcombine.high %v1175_v13, %v1183_v14  ;;  %v10351_v30 = vcombine.low %v1175_v13, %v1183_v14  ;;  %v1287_v13 = vld [vmem:[#allocation10 + $0x388] sm:$0xff] }
  0xe9   :  { %1118 = vmatpush1.bf16.msra.mxu1 %v10299_v37  ;;  %v10398_v29 = vcombine.high %v1222_v17, %v1230_v18  ;;  %v10397_v34 = vcombine.low %v1222_v17, %v1230_v18  ;;  %v1295_v14 = vld [vmem:[#allocation10 + $0x3c8] sm:$0xff]  ;;  %v1342_v17 = vld [vmem:[#allocation10 + $0x540] sm:$0xff] }
  0xea   :  { %1119 = vmatprep.subr.bf16.mxu1 %v10308_v43  ;;  %v1270_v43 = vld [vmem:[#allocation10 + $0x300] sm:$0xff] }
  0xeb   :  { %1079 = vmatpush1.bf16.msra.mxu0 %v10305_v23  ;;  %v1199_v23 = vld [vmem:[#allocation10 + $0xc8] sm:$0xff] }
  0xec   :  { %1080 = vmatprep.subr.bf16.mxu0 %v10314_v28  ;;  %v1246_v28 = vld [vmem:[#allocation10 + $0x240] sm:$0xff]  ;;  %v10368_v33 = vcombine.high %v1191_v22, %v1199_v23  ;;  %v10367_v38 = vcombine.low %v1191_v22, %v1199_v23  ;;  %v1303_v22 = vld [vmem:[#allocation10 + $0x408] sm:$0xff] }
  0xed   :  { %1120 = vmatpush1.bf16.msra.mxu1 %v10307_v45  ;;  %v10414_v37 = vcombine.high %v1238_v27, %v1246_v28  ;;  %v10413_v42 = vcombine.low %v1238_v27, %v1246_v28  ;;  %v1278_v45 = vld [vmem:[#allocation10 + $0x340] sm:$0xff]  ;;  %v1311_v23 = vld [vmem:[#allocation10 + $0x448] sm:$0xff]  ;;  %v10463_v28 = vcombine.low %v1287_v13, %v1295_v14 }
  0xee   :  { %1121 = vmatprep.subr.bf16.mxu1 %v10316_v24  ;;  %v10446_v50 = vcombine.high %v1270_v43, %v1278_v45  ;;  %v1286_v24 = vld [vmem:[#allocation10 + $0x380] sm:$0xff]  ;;  %v10445_v54 = vcombine.low %v1270_v43, %v1278_v45 }
  0xef   :  { %1081 = vmatpush1.bf16.msra.mxu0 %v10313_v32  ;;  %v1215_v32 = vld [vmem:[#allocation10 + $0x148] sm:$0xff]  ;;  %v1358_v27 = vld [vmem:[#allocation10 + $0x5c0] sm:$0xff] }
  0xf0   :  { %1082 = vmatprep.subr.bf16.mxu0 %v10322_v36  ;;  %v1262_v36 = vld [vmem:[#allocation10 + $0x2c0] sm:$0xff]  ;;  %v10384_v41 = vcombine.high %v1207_v31, %v1215_v32  ;;  %v10383_v46 = vcombine.low %v1207_v31, %v1215_v32  ;;  %v1319_v31 = vld [vmem:[#allocation10 + $0x488] sm:$0xff] }
  0xf1   :  { %1122 = vmatpush1.bf16.msra.mxu1 %v10315_v52  ;;  %v1327_v32 = vld [vmem:[#allocation10 + $0x4c8] sm:$0xff]  ;;  %v1390_v43 = vld [vmem:[#allocation10 + $0x6c0] sm:$0xff] }
  0xf2   :  { %1123 = vmatprep.subr.bf16.mxu1 %v10324_v56  ;;  %v1263_v56 = vld [vmem:[#allocation10 + $0x2c8] sm:$0xff] }
  0xf3   :  { %1083 = vmatpush1.bf16.msra.mxu0 %v10321_v40  ;;  %v1231_v40 = vld [vmem:[#allocation10 + $0x1c8] sm:$0xff] }
  0xf4   :  { %1084 = vmatprep.subr.bf16.mxu0 %v10330_v44  ;;  %v10430_v44 = vcombine.high %v1254_v35, %v1262_v36  ;;  %v10400_v47 = vcombine.high %v1223_v39, %v1231_v40  ;;  %v10399_v52 = vcombine.low %v1223_v39, %v1231_v40  ;;  %v1335_v39 = vld [vmem:[#allocation10 + $0x508] sm:$0xff] }
  0xf5   :  { %1124 = vmatpush1.bf16.msra.mxu1 %v10323_v60  ;;  %v1343_v40 = vld [vmem:[#allocation10 + $0x548] sm:$0xff] }
  0xf6   :  { %1125 = vmatprep.subr.bf16.mxu1 %v10332_v0  ;;  %v12285_v0 = vld [vmem:[#allocation10 + $0x840] sm:$0xff]  ;;  %v10512_v45 = vcombine.high %v1335_v39, %v1343_v40 }
  0xf7   :  { %1085 = vmatpush1.bf16.msra.mxu0 %v10329_v48  ;;  %v10429_v48 = vcombine.low %v1254_v35, %v1262_v36  ;;  %v1374_v35 = vld [vmem:[#allocation10 + $0x640] sm:$0xff]  ;;  %v10479_v36 = vcombine.low %v1303_v22, %v1311_v23 }
  0xf8   :  { %1086 = vmatprep.subr.bf16.mxu0 %v10338_v51  ;;  %v1294_v51 = vld [vmem:[#allocation10 + $0x3c0] sm:$0xff] }
  0xf9   :  { %1126 = vmatpush1.bf16.msra.mxu1 %v10331_v5  ;;  %v10462_v57 = vcombine.high %v1286_v24, %v1294_v51  ;;  %v10461_v62 = vcombine.low %v1286_v24, %v1294_v51  ;;  %v10511_v24 = vcombine.low %v1335_v39, %v1343_v40 }
  0xfa   :  { %1127 = vmatprep.subr.bf16.mxu1 %v10340_v8  ;;  %v1326_v8 = vld [vmem:[#allocation10 + $0x4c0] sm:$0xff] }
  0xfb   :  { %1087 = vmatpush1.bf16.msra.mxu0 %v10337_v55  ;;  %v1255_v55 = vld [vmem:[#allocation10 + $0x288] sm:$0xff] }
  0xfc   :  { %1088 = vmatprep.subr.bf16.mxu0 %v10346_v59  ;;  %v1310_v59 = vld [vmem:[#allocation10 + $0x440] sm:$0xff]  ;;  %v10432_v61 = vcombine.high %v1255_v55, %v1263_v56  ;;  %v10431_v11 = vcombine.low %v1255_v55, %v1263_v56 }
  0xfd   :  { %1128 = vmatpush1.bf16.msra.mxu1 %v10339_v19  ;;  %v10478_v5 = vcombine.high %v1302_v58, %v1310_v59  ;;  %v10477_v19 = vcombine.low %v1302_v58, %v1310_v59  ;;  %v1414_v56 = vld [vmem:[#allocation10 + $0x780] sm:$0xff] }
  0xfe   :  { %1129 = vmatprep.subr.bf16.mxu1 %v10348_v15  ;;  %v10494_v15 = vcombine.high %v1318_v7, %v1326_v8 }
  0xff   :  { %1089 = vmatpush1.bf16.msra.mxu0 %v10345_v63  ;;  %v12283_v63 = vld [vmem:[#allocation10 + $0x800] sm:$0xff] }
 0x100   :  { %7472 = vmatprep.subr.bf16.mxu0 %v10350_v4  ;;  %v1279_v4 = vld [vmem:[#allocation10 + $0x348] sm:$0xff] }
 0x101   :  { %1130 = vmatpush1.bf16.msra.mxu1 %v10347_v21  ;;  %v10447_v18 = vcombine.low %v1271_v3, %v1279_v4  ;;  %v10493_v21 = vcombine.low %v1318_v7, %v1326_v8  ;;  %v1399_v8 = vld [vmem:[#allocation10 + $0x708] sm:$0xff] }
 0x102   :  { %1091 = vmatmul.mubr.bf16.vlgmr.msra.gmra.mrb[4].mxu0 %v12275_v2  ;;  %7636 = vmatprep.subr.bf16.mxu1 %v10352_v25 }
 0x103   :  { %7473 = vmatpush1.bf16.msra.mxu0 %v10349_v9  ;;  %v10605_v9 = vcombine.low %v12283_v63, %v12285_v0 }
 0x104   :  { %7474 = vmatprep.subr.bf16.mxu0 %v10366_v12  ;;  %1132 = vmatmul.mubr.bf16.vlgmr.msra.gmra.mrb[4].mxu1 %v12275_v2  ;;  %v1247_v2 = vld [vmem:[#allocation10 + $0x248] sm:$0xff]  ;;  %v10448_v12 = vcombine.high %v1271_v3, %v1279_v4 }
 0x105   :  { %7637 = vmatpush1.bf16.msra.mxu1 %v10351_v30  ;;  %v10416_v53 = vcombine.high %v1239_v49, %v1247_v2  ;;  %v10415_v60 = vcombine.low %v1239_v49, %v1247_v2  ;;  %v1398_v2 = vld [vmem:[#allocation10 + $0x700] sm:$0xff] }
 0x106   :  { %7638 = vmatprep.subr.bf16.mxu1 %v10368_v33 }
 0x107   :  { %7475 = vmatpush1.bf16.msra.mxu0 %v10365_v16  ;;  %v1334_v16 = vld [vmem:[#allocation10 + $0x500] sm:$0xff] }
 0x108   :  { %7476 = vmatprep.subr.bf16.mxu0 %v10382_v20  ;;  %v10464_v20 = vcombine.high %v1287_v13, %v1295_v14  ;;  %v10510_v25 = vcombine.high %v1334_v16, %v1342_v17  ;;  %v10509_v30 = vcombine.low %v1334_v16, %v1342_v17  ;;  %v1415_v14 = vld [vmem:[#allocation10 + $0x788] sm:$0xff] }
 0x109   :  { %7639 = vmatpush1.bf16.msra.mxu1 %v10367_v38 }
 0x10a   :  { %7640 = vmatprep.subr.bf16.mxu1 %v10384_v41 }
 0x10b   :  { %7477 = vmatpush1.bf16.msra.mxu0 %v10381_v26  ;;  %v1350_v26 = vld [vmem:[#allocation10 + $0x580] sm:$0xff] }
 0x10c   :  { %7478 = vmatprep.subr.bf16.mxu0 %v10398_v29  ;;  %v10480_v29 = vcombine.high %v1303_v22, %v1311_v23  ;;  %v10526_v33 = vcombine.high %v1350_v26, %v1358_v27  ;;  %v10525_v38 = vcombine.low %v1350_v26, %v1358_v27  ;;  %v12301_v23 = vld [vmem:[#allocation9] sm:$0xff] }
 0x10d   :  { %7641 = vmatpush1.bf16.msra.mxu1 %v10383_v46 }
 0x10e   :  { %7642 = vmatprep.subr.bf16.mxu1 %v10400_v47  ;;  %v1351_v47 = vld [vmem:[#allocation10 + $0x588] sm:$0xff] }
 0x10f   :  { %7479 = vmatpush1.bf16.msra.mxu0 %v10397_v34  ;;  %v1366_v34 = vld [vmem:[#allocation10 + $0x600] sm:$0xff] }
 0x110   :  { %7480 = vmatprep.subr.bf16.mxu0 %v10414_v37  ;;  %v10496_v37 = vcombine.high %v1319_v31, %v1327_v32  ;;  %v10542_v41 = vcombine.high %v1366_v34, %v1374_v35  ;;  %v10541_v46 = vcombine.low %v1366_v34, %v1374_v35 }
 0x111   :  { %7643 = vmatpush1.bf16.msra.mxu1 %v10399_v52 }
 0x112   :  { %7644 = vmatprep.subr.bf16.mxu1 %v10416_v53  ;;  %v1367_v53 = vld [vmem:[#allocation10 + $0x608] sm:$0xff] }
 0x113   :  { %7481 = vmatpush1.bf16.msra.mxu0 %v10413_v42  ;;  %v1382_v42 = vld [vmem:[#allocation10 + $0x680] sm:$0xff] }
 0x114   :  { %7482 = vmatprep.subr.bf16.mxu0 %v10430_v44  ;;  %v10495_v44 = vcombine.low %v1319_v31, %v1327_v32  ;;  %v10558_v49 = vcombine.high %v1382_v42, %v1390_v43  ;;  %v10557_v52 = vcombine.low %v1382_v42, %v1390_v43  ;;  %v1446_v42 = vld [vmem:[#allocation10 + $0x880] sm:$0xff] }
 0x115   :  { %7645 = vmatpush1.bf16.msra.mxu1 %v10415_v60 }
 0x116   :  { %7646 = vmatprep.subr.bf16.mxu1 %v10432_v61  ;;  %v1383_v61 = vld [vmem:[#allocation10 + $0x688] sm:$0xff] }
 0x117   :  { %7483 = vmatpush1.bf16.msra.mxu0 %v10429_v48  ;;  %v1359_v48 = vld [vmem:[#allocation10 + $0x5c8] sm:$0xff] }
 0x118   :  { %7484 = vmatprep.subr.bf16.mxu0 %v10446_v50  ;;  %v1406_v50 = vld [vmem:[#allocation10 + $0x740] sm:$0xff]  ;;  %v10528_v51 = vcombine.high %v1351_v47, %v1359_v48  ;;  %v10527_v58 = vcombine.low %v1351_v47, %v1359_v48 }
 0x119   :  { %7647 = vmatpush1.bf16.msra.mxu1 %v10431_v11  ;;  %v10574_v55 = vcombine.high %v1398_v2, %v1406_v50  ;;  %v10573_v60 = vcombine.low %v1398_v2, %v1406_v50  ;;  %v1407_v11 = vld [vmem:[#allocation10 + $0x748] sm:$0xff] }
 0x11a   :  { %7648 = vmatprep.subr.bf16.mxu1 %v10448_v12  ;;  %v10606_v12 = vcombine.high %v12283_v63, %v12285_v0  ;;  %v10576_v13 = vcombine.high %v1399_v8, %v1407_v11  ;;  %v10575_v16 = vcombine.low %v1399_v8, %v1407_v11  ;;  %v1494_v11 = vld [vmem:[#allocation10 + $0xa00] sm:$0xff] }
 0x11b   :  { %7485 = vmatpush1.bf16.msra.mxu0 %v10445_v54  ;;  %v1375_v54 = vld [vmem:[#allocation10 + $0x648] sm:$0xff] }
 0x11c   :  { %7486 = vmatprep.subr.bf16.mxu0 %v10462_v57  ;;  %v1422_v57 = vld [vmem:[#allocation10 + $0x7c0] sm:$0xff]  ;;  %v10544_v59 = vcombine.high %v1367_v53, %v1375_v54  ;;  %v10543_v4 = vcombine.low %v1367_v53, %v1375_v54  ;;  %v1463_v53 = vld [vmem:[#allocation10 + $0x908] sm:$0xff] }
 0x11d   :  { %7649 = vmatpush1.bf16.msra.mxu1 %v10447_v18  ;;  %v10590_v3 = vcombine.high %v1414_v56, %v1422_v57  ;;  %v10589_v7 = vcombine.low %v1414_v56, %v1422_v57  ;;  %v1471_v54 = vld [vmem:[#allocation10 + $0x948] sm:$0xff] }
 0x11e   :  { %7650 = vmatprep.subr.bf16.mxu1 %v10464_v20  ;;  %v10608_v20 = vcombine.high %v12287_v1, %v12289_v6  ;;  %v10639_v6 = vcombine.low %v1463_v53, %v1471_v54 }
 0x11f   :  { %7487 = vmatpush1.bf16.msra.mxu0 %v10461_v62  ;;  %v1391_v62 = vld [vmem:[#allocation10 + $0x6c8] sm:$0xff] }
 0x120   :  { %7488 = vmatprep.subr.bf16.mxu0 %v10478_v5  ;;  %v10560_v5 = vcombine.high %v1383_v61, %v1391_v62 }
 0x121   :  { %7651 = vmatpush1.bf16.msra.mxu1 %v10463_v28 }
 0x122   :  { %7652 = vmatprep.subr.bf16.mxu1 %v10480_v29 }
 0x123   :  { %7489 = vmatpush1.bf16.msra.mxu0 %v10477_v19  ;;  %v10559_v19 = vcombine.low %v1383_v61, %v1391_v62  ;;  %v1478_v61 = vld [vmem:[#allocation10 + $0x980] sm:$0xff] }
 0x124   :  { %7490 = vmatprep.subr.bf16.mxu0 %v10494_v15  ;;  %v1423_v15 = vld [vmem:[#allocation10 + $0x7c8] sm:$0xff] }
 0x125   :  { %7653 = vmatpush1.bf16.msra.mxu1 %v10479_v36  ;;  %v10592_v17 = vcombine.high %v1415_v14, %v1423_v15  ;;  %v10591_v18 = vcombine.low %v1415_v14, %v1423_v15 }
 0x126   :  { %7654 = vmatprep.subr.bf16.mxu1 %v10496_v37 }
 0x127   :  { %7491 = vmatpush1.bf16.msra.mxu0 %v10493_v21  ;;  %v257_v21 = vlaneseq }
 0x128   :  { %7492 = vmatprep.subr.bf16.mxu0 %v10510_v25  ;;  %v12304_v25 = vunpack.c.l.bf16 %v12301_v23 }
 0x129   :  { %7655 = vmatpush1.bf16.msra.mxu1 %v10495_v44  ;;  %v12299_v22 = vshrl.u32 %v257_v21, 7  ;;  %v1454_v44 = vld [vmem:[#allocation10 + $0x8c0] sm:$0xff] }
 0x12a   :  { %7656 = vmatprep.subr.bf16.mxu1 %v10512_v45  ;;  %v1447_v45 = vld [vmem:[#allocation10 + $0x888] sm:$0xff]  ;;  %v10622_v50 = vcombine.high %v1446_v42, %v1454_v44  ;;  %v10621_v56 = vcombine.low %v1446_v42, %v1454_v44  ;;  %v1510_v21 = vld [vmem:[#allocation10 + $0xa80] sm:$0xff] }
 0x12b   :  { %7493 = vmatpush1.bf16.msra.mxu0 %v10509_v30  ;;  %v12307_v26 = vsub.s32 0, %v12299_v22  ;;  %v12310_v27 = vsub.s32 2, %v12299_v22  ;;  %v12324_v36 = vsub.s32 6, %v12299_v22 }
 0x12c   :  { %7494 = vmatprep.subr.bf16.mxu0 %v10526_v33  ;;  %v12321_v33 = vstv %s12589_s0 }
 0x12d   :  { %7657 = vmatpush1.bf16.msra.mxu1 %v10511_v24  ;;  %v260_v28 = vrot.slane %v12304_v25, %v12307_v26  ;;  %v264_v29 = vrot.slane %v12304_v25, %v12310_v27  ;;  %v272_v47 = vrot.slane %v12304_v25, %v12324_v36 }
 0x12e   :  { %7658 = vmatprep.subr.bf16.mxu1 %v10528_v51  ;;  %v1462_v51 = vld [vmem:[#allocation10 + $0x900] sm:$0xff] }
 0x12f   :  { %7495 = vmatpush1.bf16.msra.mxu0 %v10525_v38  ;;  %v300_v30 = vrot.slane %v260_v28, %v12307_v26  ;;  %v304_v31 = vrot.slane %v264_v29, %v12307_v26  ;;  %v1518_v28 = vld [vmem:[#allocation10 + $0xac0] sm:$0xff]  ;;  %v1511_v29 = vld [vmem:[#allocation10 + $0xa88] sm:$0xff] }
 0x130   :  { %7496 = vmatprep.subr.bf16.mxu0 %v10542_v41 }
 0x131   :  { %7659 = vmatpush1.bf16.msra.mxu1 %v10527_v58 }
 0x132   :  { %7660 = vmatprep.subr.bf16.mxu1 %v10544_v59 }
 0x133   :  { %7497 = vmatpush1.bf16.msra.mxu0 %v10541_v46  ;;  %v1455_v46 = vld [vmem:[#allocation10 + $0x8c8] sm:$0xff] }
 0x134   :  { %7498 = vmatprep.subr.bf16.mxu0 %v10558_v49  ;;  %v10624_v24 = vcombine.high %v1447_v45, %v1455_v46  ;;  %v10623_v57 = vcombine.low %v1447_v45, %v1455_v46  ;;  %v1542_v45 = vld [vmem:[#allocation10 + $0xb80] sm:$0xff] }
 0x135   :  { %7661 = vmatpush1.bf16.msra.mxu1 %v10543_v4  ;;  %v1479_v4 = vld [vmem:[#allocation10 + $0x988] sm:$0xff]  ;;  %v1550_v46 = vld [vmem:[#allocation10 + $0xbc0] sm:$0xff] }
 0x136   :  { %7662 = vmatprep.subr.bf16.mxu1 %v10560_v5  ;;  %v1487_v5 = vld [vmem:[#allocation10 + $0x9c8] sm:$0xff] }
 0x137   :  { %7499 = vmatpush1.bf16.msra.mxu0 %v10557_v52  ;;  %v1470_v52 = vld [vmem:[#allocation10 + $0x940] sm:$0xff]  ;;  %v10656_v8 = vcombine.high %v1479_v4, %v1487_v5 }
 0x138   :  { %7500 = vmatprep.subr.bf16.mxu0 %v10574_v55  ;;  %v312_v55 = vrot.slane %v272_v47, %v12307_v26  ;;  %v10638_v59 = vcombine.high %v1462_v51, %v1470_v52  ;;  %v10637_v1 = vcombine.low %v1462_v51, %v1470_v52  ;;  %v1543_v47 = vld [vmem:[#allocation10 + $0xb88] sm:$0xff]  ;;  %v10718_v51 = vcombine.high %v1542_v45, %v1550_v46 }
 0x139   :  { %7663 = vmatpush1.bf16.msra.mxu1 %v10559_v19  ;;  %v1495_v19 = vld [vmem:[#allocation10 + $0xa08] sm:$0xff] }
 0x13a   :  { %7664 = vmatprep.subr.bf16.mxu1 %v10576_v13  ;;  %v1503_v13 = vld [vmem:[#allocation10 + $0xa48] sm:$0xff] }
 0x13b   :  { %7501 = vmatpush1.bf16.msra.mxu0 %v10573_v60  ;;  %v10640_v60 = vcombine.high %v1463_v53, %v1471_v54  ;;  %v1558_v53 = vld [vmem:[#allocation10 + $0xc00] sm:$0xff] }
 0x13c   :  { %7502 = vmatprep.subr.bf16.mxu0 %v10590_v3  ;;  %v1486_v3 = vld [vmem:[#allocation10 + $0x9c0] sm:$0xff] }
 0x13d   :  { %7665 = vmatpush1.bf16.msra.mxu1 %v10575_v16  ;;  %v10653_v16 = vcombine.low %v1478_v61, %v1486_v3  ;;  %v1566_v54 = vld [vmem:[#allocation10 + $0xc40] sm:$0xff] }
 0x13e   :  { %7666 = vmatprep.subr.bf16.mxu1 %v10592_v17  ;;  %v10655_v17 = vcombine.low %v1479_v4, %v1487_v5  ;;  %v1575_v4 = vld [vmem:[#allocation10 + $0xc88] sm:$0xff] }
 0x13f   :  { %7503 = vmatpush1.bf16.msra.mxu0 %v10589_v7  ;;  %v1583_v5 = vld [vmem:[#allocation10 + $0xcc8] sm:$0xff] }
 0x140   :  { %7513 = vmatprep.subr.bf16.mxu0 %v10606_v12  ;;  %v1502_v12 = vld [vmem:[#allocation10 + $0xa40] sm:$0xff] }
 0x141   :  { %7667 = vmatpush1.bf16.msra.mxu1 %v10591_v18  ;;  %v10670_v18 = vcombine.high %v1494_v11, %v1502_v12 }
 0x142   :  { %7677 = vmatprep.subr.bf16.mxu1 %v10608_v20  ;;  %v10672_v20 = vcombine.high %v1495_v19, %v1503_v13 }
 0x195   :  { %v1010_v32 = vpop.f32.mrb[0].mxu0 }
 0x196   :  { %v1011_v34 = vadd.f32 %v1010_v32, %v300_v30  ;;  %v1012_v35 = vpop.f32.mrb[1].mxu0  ;;  %v1519_v30 = vld [vmem:[#allocation10 + $0xac8] sm:$0xff]  ;;  %v10671_v32 = vcombine.low %v1495_v19, %v1503_v13 }
 0x197   :  { %v1013_v37 = vadd.f32 %v1012_v35, %v304_v31  ;;  %v1014_v38 = vpop.f32.mrb[2].mxu0  ;;  %v12345_v58 = vpop.f32.mrb[0].mxu1  ;;  %v10669_v31 = vcombine.low %v1494_v11, %v1502_v12  ;;  %v10688_v35 = vcombine.high %v1511_v29, %v1519_v30  ;;  %v10687_v42 = vcombine.low %v1511_v29, %v1519_v30  ;;  %v1622_v30 = vld [vmem:[#allocation10 + $0xe00] sm:$0xff] }
 0x198   :  { %vm1141_vm0 = vcmp.ge.f32.partialorder %v1011_v34, 0.0  ;;  %v1150_v39 = vmul.f32 %v12321_v33, %v1011_v34  ;;  %v1015_v40 = vpop.f32.mrb[3].mxu0  ;;  %v1053_v62 = vpop.f32.mrb[1].mxu1  ;;  %v1534_v38 = vld [vmem:[#allocation10 + $0xb40] sm:$0xff]  ;;  %v10751_v12 = vcombine.low %v1575_v4, %v1583_v5 }
 0x199   :  { %vm1142_vm1 = vcmp.ge.f32.partialorder %v1013_v37, 0.0  ;;  %v1151_v41 = vmul.f32 %v12321_v33, %v1013_v37  ;;  %v1054_v7 = vadd.f32 %v1053_v62, %v312_v55  ;;  %v1055_v63 = vpop.f32.mrb[2].mxu1  ;;  %v1535_v40 = vld [vmem:[#allocation10 + $0xb48] sm:$0xff]  ;;  %v1574_v62 = vld [vmem:[#allocation10 + $0xc80] sm:$0xff] }
 0x19a   :  { %v1158_v43 = vsel %vm1141_vm0, %v1011_v34, %v1150_v39  ;;  %v1056_v0 = vpop.f32.mrb[3].mxu1  ;;  %v10686_v34 = vcombine.high %v1510_v21, %v1518_v28  ;;  %v1527_v39 = vld [vmem:[#allocation10 + $0xb08] sm:$0xff] }
 0x19b   :  { %v1159_v48 = vsel %vm1142_vm1, %v1013_v37, %v1151_v41  ;;  %v12332_v2 = vpack.c.bf16 %v1158_v43, %v1158_v43  ;;  %vm1144_vm2 = vcmp.ge.f32.partialorder %v1054_v7, 0.0  ;;  %v1526_v37 = vld [vmem:[#allocation10 + $0xb00] sm:$0xff]  ;;  %v10685_v41 = vcombine.low %v1510_v21, %v1518_v28  ;;  %v1559_v55 = vld [vmem:[#allocation10 + $0xc08] sm:$0xff] }
 0x19c   :  { %v12330_v49 = vpack.c.bf16 %v1159_v48, %v1159_v48  ;;  %v10702_v43 = vcombine.high %v1526_v37, %v1534_v38  ;;  %v10704_v44 = vcombine.high %v1527_v39, %v1535_v40  ;;  %v1551_v48 = vld [vmem:[#allocation10 + $0xbc8] sm:$0xff] }
 0x19d   :  { %v10720_v52 = vcombine.high %v1543_v47, %v1551_v48 }
 0x19e   :  { %7504 = vmatprep.mubr.bf16.mxu0 %v12330_v49  ;;  %7668 = vmatprep.mubr.bf16.mxu1 %v12330_v49 }
 0x19f   :  { %7505 = vmatmul.mubr.bf16.vlgmr.msra.gmra.mrb[8].mxu0 %v12332_v2  ;;  %7669 = vmatmul.mubr.bf16.vlgmr.msra.gmra.mrb[8].mxu1 %v12332_v2 }
 0x1a0   :  { %7514 = vmatpush1.bf16.msra.mxu0 %v10605_v9  ;;  %7678 = vmatpush1.bf16.msra.mxu1 %v10607_v10  ;;  %v1153_v9 = vmul.f32 %v12321_v33, %v1054_v7  ;;  %v10654_v10 = vcombine.high %v1478_v61, %v1486_v3  ;;  %v1582_v3 = vld [vmem:[#allocation10 + $0xcc0] sm:$0xff] }
 0x1a1   :  { %7515 = vmatprep.subr.bf16.mxu0 %v10622_v50  ;;  %7679 = vmatprep.subr.bf16.mxu1 %v10624_v24  ;;  %v10701_v50 = vcombine.low %v1526_v37, %v1534_v38  ;;  %v10703_v24 = vcombine.low %v1527_v39, %v1535_v40  ;;  %v10750_v0 = vcombine.high %v1574_v62, %v1582_v3 }
 0x1a2   :  { %v1161_v14 = vsel %vm1144_vm2, %v1054_v7, %v1153_v9  ;;  %v10733_v7 = vcombine.low %v1558_v53, %v1566_v54  ;;  %v1598_v9 = vld [vmem:[#allocation10 + $0xd40] sm:$0xff]  ;;  %v10749_v11 = vcombine.low %v1574_v62, %v1582_v3  ;;  %v1671_v62 = vld [vmem:[#allocation10 + $0xf88] sm:$0xff] }
 0x1a3   :  { %v12348_v15 = vpack.c.bf16 %v1161_v14, %v1161_v14  ;;  %v1606_v14 = vld [vmem:[#allocation10 + $0xd80] sm:$0xff]  ;;  %v1679_v3 = vld [vmem:[#allocation10 + $0xfc8] sm:$0xff] }
 0x1a4   :  { %7516 = vmatpush1.bf16.msra.mxu0 %v10621_v56  ;;  %7680 = vmatpush1.bf16.msra.mxu1 %v10623_v57  ;;  %v1567_v56 = vld [vmem:[#allocation10 + $0xc48] sm:$0xff]  ;;  %v10717_v57 = vcombine.low %v1542_v45, %v1550_v46  ;;  %v12358_v46 = vunpack.c.h.bf16 %v12301_v23 }
 0x1a5   :  { %7517 = vmatprep.subr.bf16.mxu0 %v10638_v59  ;;  %7681 = vmatprep.subr.bf16.mxu1 %v10640_v60  ;;  %v10719_v59 = vcombine.low %v1543_v47, %v1551_v48  ;;  %v10734_v60 = vcombine.high %v1558_v53, %v1566_v54  ;;  %v10736_v61 = vcombine.high %v1559_v55, %v1567_v56  ;;  %v1647_v45 = vld [vmem:[#allocation10 + $0xec8] sm:$0xff] }
 0x1a6   :  { %7545 = vmatprep.mubr.bf16.mxu0 %v12348_v15  ;;  %7709 = vmatprep.mubr.bf16.mxu1 %v12348_v15  ;;  %v10735_v63 = vcombine.low %v1559_v55, %v1567_v56  ;;  %v1655_v53 = vld [vmem:[#allocation10 + $0xf08] sm:$0xff]  ;;  %v280_v54 = vrot.slane %v12358_v46, %v12310_v27 }
 0x1a8   :  { %7518 = vmatpush1.bf16.msra.mxu0 %v10637_v1  ;;  %7682 = vmatpush1.bf16.msra.mxu1 %v10639_v6  ;;  %v10752_v1 = vcombine.high %v1575_v4, %v1583_v5  ;;  %v1590_v6 = vld [vmem:[#allocation10 + $0xd00] sm:$0xff]  ;;  %v320_v4 = vrot.slane %v280_v54, %v12307_v26 }
 0x1a9   :  { %7519 = vmatprep.subr.bf16.mxu0 %v10654_v10  ;;  %7683 = vmatprep.subr.bf16.mxu1 %v10656_v8  ;;  %v1591_v10 = vld [vmem:[#allocation10 + $0xd08] sm:$0xff]  ;;  %v10766_v19 = vcombine.high %v1590_v6, %v1598_v9  ;;  %v1734_v54 = vld [vmem:[#allocation10 + $0x1180] sm:$0xff] }
 0x1aa   :  { %v1599_v8 = vld [vmem:[#allocation10 + $0xd48] sm:$0xff] }
 0x1ab   :  { %v10768_v13 = vcombine.high %v1591_v10, %v1599_v8  ;;  %v10767_v21 = vcombine.low %v1591_v10, %v1599_v8  ;;  %v1695_v8 = vld [vmem:[#allocation10 + $0x1048] sm:$0xff] }
 0x1ac   :  { %7520 = vmatpush1.bf16.msra.mxu0 %v10653_v16  ;;  %7684 = vmatpush1.bf16.msra.mxu1 %v10655_v17  ;;  %v1614_v16 = vld [vmem:[#allocation10 + $0xdc0] sm:$0xff]  ;;  %v1607_v17 = vld [vmem:[#allocation10 + $0xd88] sm:$0xff] }
 0x1ad   :  { %7521 = vmatprep.subr.bf16.mxu0 %v10670_v18  ;;  %7685 = vmatprep.subr.bf16.mxu1 %v10672_v20  ;;  %v1615_v18 = vld [vmem:[#allocation10 + $0xdc8] sm:$0xff]  ;;  %v10765_v20 = vcombine.low %v1590_v6, %v1598_v9  ;;  %v10782_v28 = vcombine.high %v1606_v14, %v1614_v16  ;;  %v10781_v37 = vcombine.low %v1606_v14, %v1614_v16  ;;  %v1694_v6 = vld [vmem:[#allocation10 + $0x1040] sm:$0xff] }
 0x1ae   :  { %v10784_v29 = vcombine.high %v1607_v17, %v1615_v18  ;;  %v10783_v38 = vcombine.low %v1607_v17, %v1615_v18  ;;  %v10847_v14 = vcombine.low %v1671_v62, %v1679_v3 }
 0x1b0   :  { %7522 = vmatpush1.bf16.msra.mxu0 %v10669_v31  ;;  %7686 = vmatpush1.bf16.msra.mxu1 %v10671_v32  ;;  %v1630_v31 = vld [vmem:[#allocation10 + $0xe40] sm:$0xff]  ;;  %v1623_v32 = vld [vmem:[#allocation10 + $0xe08] sm:$0xff] }
 0x1b1   :  { %7523 = vmatprep.subr.bf16.mxu0 %v10686_v34  ;;  %7687 = vmatprep.subr.bf16.mxu1 %v10688_v35  ;;  %v1631_v34 = vld [vmem:[#allocation10 + $0xe48] sm:$0xff]  ;;  %v12353_v35 = vsub.s32 4, %v12299_v22  ;;  %v10798_v39 = vcombine.high %v1622_v30, %v1630_v31  ;;  %v10797_v22 = vcombine.low %v1622_v30, %v1630_v31 }
 0x1b2   :  { %v10800_v40 = vcombine.high %v1623_v32, %v1631_v34  ;;  %v10799_v47 = vcombine.low %v1623_v32, %v1631_v34  ;;  %v1703_v31 = vld [vmem:[#allocation10 + $0x1088] sm:$0xff]  ;;  %v288_v34 = vrot.slane %v12358_v46, %v12324_v36 }
 0x1b3   :  { %v1711_v32 = vld [vmem:[#allocation10 + $0x10c8] sm:$0xff] }
 0x1b4   :  { %7524 = vmatpush1.bf16.msra.mxu0 %v10685_v41  ;;  %7688 = vmatpush1.bf16.msra.mxu1 %v10687_v42  ;;  %v1638_v41 = vld [vmem:[#allocation10 + $0xe80] sm:$0xff]  ;;  %v268_v42 = vrot.slane %v12304_v25, %v12353_v35  ;;  %v1663_v25 = vld [vmem:[#allocation10 + $0xf48] sm:$0xff] }
 0x1b5   :  { %7525 = vmatprep.subr.bf16.mxu0 %v10702_v43  ;;  %7689 = vmatprep.subr.bf16.mxu1 %v10704_v44  ;;  %v1646_v43 = vld [vmem:[#allocation10 + $0xec0] sm:$0xff]  ;;  %v1639_v44 = vld [vmem:[#allocation10 + $0xe88] sm:$0xff] }
 0x1b6   :  { %v10814_v48 = vcombine.high %v1638_v41, %v1646_v43  ;;  %v10813_v23 = vcombine.low %v1638_v41, %v1646_v43  ;;  %v10815_v55 = vcombine.low %v1639_v44, %v1647_v45  ;;  %v1718_v43 = vld [vmem:[#allocation10 + $0x1100] sm:$0xff] }
 0x1b8   :  { %7526 = vmatpush1.bf16.msra.mxu0 %v10701_v50  ;;  %7690 = vmatpush1.bf16.msra.mxu1 %v10703_v24  ;;  %v10816_v50 = vcombine.high %v1639_v44, %v1647_v45  ;;  %v1654_v24 = vld [vmem:[#allocation10 + $0xf00] sm:$0xff] }
 0x1b9   :  { %7527 = vmatprep.subr.bf16.mxu0 %v10718_v51  ;;  %7691 = vmatprep.subr.bf16.mxu1 %v10720_v52  ;;  %v308_v51 = vrot.slane %v268_v42, %v12307_v26  ;;  %v1662_v52 = vld [vmem:[#allocation10 + $0xf40] sm:$0xff]  ;;  %v10880_v42 = vcombine.high %v1703_v31, %v1711_v32 }
 0x1ba   :  { %v10830_v56 = vcombine.high %v1654_v24, %v1662_v52  ;;  %v10829_v5 = vcombine.low %v1654_v24, %v1662_v52  ;;  %v1726_v45 = vld [vmem:[#allocation10 + $0x1140] sm:$0xff] }
 0x1bc   :  { %7528 = vmatpush1.bf16.msra.mxu0 %v10717_v57  ;;  %7692 = vmatpush1.bf16.msra.mxu1 %v10719_v59  ;;  %v10832_v57 = vcombine.high %v1655_v53, %v1663_v25  ;;  %v1670_v59 = vld [vmem:[#allocation10 + $0xf80] sm:$0xff] }
 0x1bd   :  { %7529 = vmatprep.subr.bf16.mxu0 %v10734_v60  ;;  %7693 = vmatprep.subr.bf16.mxu1 %v10736_v61  ;;  %v1052_v60 = vadd.f32 %v12345_v58, %v308_v51  ;;  %v1678_v61 = vld [vmem:[#allocation10 + $0xfc0] sm:$0xff]  ;;  %v1687_v58 = vld [vmem:[#allocation10 + $0x1008] sm:$0xff]  ;;  %v10879_v51 = vcombine.low %v1703_v31, %v1711_v32 }
 0x1be   :  { %v10864_v18 = vcombine.high %v1687_v58, %v1695_v8 }
 0x1bf   :  { %v1152_v10 = vmul.f32 %v12321_v33, %v1052_v60  ;;  %vm1143_vm3 = vcmp.ge.f32.partialorder %v1052_v60, 0.0 }
 0x1c0   :  { %7530 = vmatpush1.bf16.msra.mxu0 %v10733_v7  ;;  %7694 = vmatpush1.bf16.msra.mxu1 %v10735_v63  ;;  %v10831_v7 = vcombine.low %v1655_v53, %v1663_v25  ;;  %v10846_v63 = vcombine.high %v1670_v59, %v1678_v61  ;;  %v10894_v53 = vcombine.high %v1718_v43, %v1726_v45 }
 0x1c1   :  { %7531 = vmatprep.subr.bf16.mxu0 %v10750_v0  ;;  %7695 = vmatprep.subr.bf16.mxu1 %v10752_v1  ;;  %v10848_v0 = vcombine.high %v1671_v62, %v1679_v3  ;;  %v1686_v1 = vld [vmem:[#allocation10 + $0x1000] sm:$0xff]  ;;  %v1160_v30 = vsel %vm1143_vm3, %v1052_v60, %v1152_v10  ;;  %v10893_v3 = vcombine.low %v1718_v43, %v1726_v45 }
 0x1c2   :  { %v10862_v16 = vcombine.high %v1686_v1, %v1694_v6  ;;  %v12374_v41 = vpack.c.bf16 %v1160_v30, %v1160_v30  ;;  %v1791_v30 = vld [vmem:[#allocation10 + $0x1348] sm:$0xff] }
 0x1c4   :  { %7532 = vmatpush1.bf16.msra.mxu0 %v10749_v11  ;;  %7696 = vmatpush1.bf16.msra.mxu1 %v10751_v12 }
 0x1c5   :  { %7533 = vmatprep.subr.bf16.mxu0 %v10766_v19  ;;  %7697 = vmatprep.subr.bf16.mxu1 %v10768_v13  ;;  %v10845_v13 = vcombine.low %v1670_v59, %v1678_v61  ;;  %v1743_v59 = vld [vmem:[#allocation10 + $0x11c8] sm:$0xff] }
 0x1c8   :  { %7534 = vmatpush1.bf16.msra.mxu0 %v10765_v20  ;;  %7698 = vmatpush1.bf16.msra.mxu1 %v10767_v21  ;;  %v1702_v20 = vld [vmem:[#allocation10 + $0x1080] sm:$0xff] }
 0x1c9   :  { %7535 = vmatprep.subr.bf16.mxu0 %v10782_v28  ;;  %7699 = vmatprep.subr.bf16.mxu1 %v10784_v29  ;;  %v1710_v21 = vld [vmem:[#allocation10 + $0x10c0] sm:$0xff]  ;;  %v284_v29 = vrot.slane %v12358_v46, %v12353_v35 }
 0x1ca   :  { %v10877_v24 = vcombine.low %v1702_v20, %v1710_v21 }
 0x1cb   :  { %v324_v44 = vrot.slane %v284_v29, %v12307_v26  ;;  %v1783_v29 = vld [vmem:[#allocation10 + $0x1308] sm:$0xff] }
 0x1cc   :  { %7536 = vmatpush1.bf16.msra.mxu0 %v10781_v37  ;;  %7700 = vmatpush1.bf16.msra.mxu1 %v10783_v38  ;;  %v10861_v38 = vcombine.low %v1686_v1, %v1694_v6  ;;  %v1751_v1 = vld [vmem:[#allocation10 + $0x1208] sm:$0xff] }
 0x1cd   :  { %7537 = vmatprep.subr.bf16.mxu0 %v10798_v39  ;;  %7701 = vmatprep.subr.bf16.mxu1 %v10800_v40  ;;  %v10863_v39 = vcombine.low %v1687_v58, %v1695_v8  ;;  %v10878_v40 = vcombine.high %v1702_v20, %v1710_v21  ;;  %v1759_v6 = vld [vmem:[#allocation10 + $0x1248] sm:$0xff]  ;;  %v1782_v21 = vld [vmem:[#allocation10 + $0x1300] sm:$0xff] }
 0x1d0   :  { %7538 = vmatpush1.bf16.msra.mxu0 %v10797_v22  ;;  %7702 = vmatpush1.bf16.msra.mxu1 %v10799_v47  ;;  %v1719_v22 = vld [vmem:[#allocation10 + $0x1108] sm:$0xff] }
 0x1d1   :  { %7539 = vmatprep.subr.bf16.mxu0 %v10814_v48  ;;  %7703 = vmatprep.subr.bf16.mxu1 %v10816_v50  ;;  %v1727_v47 = vld [vmem:[#allocation10 + $0x1148] sm:$0xff]  ;;  %v328_v50 = vrot.slane %v288_v34, %v12307_v26 }
 0x1d2   :  { %v10896_v25 = vcombine.high %v1719_v22, %v1727_v47 }
 0x1d4   :  { %7540 = vmatpush1.bf16.msra.mxu0 %v10813_v23  ;;  %7704 = vmatpush1.bf16.msra.mxu1 %v10815_v55 }
 0x1d5   :  { %7541 = vmatprep.subr.bf16.mxu0 %v10830_v56  ;;  %7705 = vmatprep.subr.bf16.mxu1 %v10832_v57  ;;  %v12365_v9 = vpop.f32.mrb[4].mxu0  ;;  %v1742_v56 = vld [vmem:[#allocation10 + $0x11c0] sm:$0xff]  ;;  %v1735_v57 = vld [vmem:[#allocation10 + $0x1188] sm:$0xff] }
 0x1d6   :  { %v1094_v11 = vpop.f32.mrb[5].mxu0  ;;  %v10909_v10 = vcombine.low %v1734_v54, %v1742_v56  ;;  %v10911_v58 = vcombine.low %v1735_v57, %v1743_v59 }
 0x1d7   :  { %v1095_v12 = vadd.f32 %v1094_v11, %v320_v4  ;;  %v1096_v19 = vpop.f32.mrb[6].mxu0  ;;  %v1133_v52 = vpop.f32.mrb[4].mxu1  ;;  %v10895_v4 = vcombine.low %v1719_v22, %v1727_v47  ;;  %v10928_v11 = vcombine.high %v1751_v1, %v1759_v6  ;;  %v1814_v47 = vld [vmem:[#allocation10 + $0x1400] sm:$0xff] }
 0x1d8   :  { %7542 = vmatpush1.bf16.msra.mxu0 %v10829_v5  ;;  %7706 = vmatpush1.bf16.msra.mxu1 %v10831_v7  ;;  %v1097_v17 = vpop.f32.mrb[7].mxu0  ;;  %v12382_v23 = vadd.f32 %v1133_v52, %v324_v44  ;;  %v1135_v55 = vpop.f32.mrb[5].mxu1  ;;  %v10910_v5 = vcombine.high %v1734_v54, %v1742_v56  ;;  %v10912_v7 = vcombine.high %v1735_v57, %v1743_v59  ;;  %v1774_v19 = vld [vmem:[#allocation10 + $0x12c0] sm:$0xff]  ;;  %v1831_v57 = vld [vmem:[#allocation10 + $0x1488] sm:$0xff] }
 0x1d9   :  { %7543 = vmatprep.subr.bf16.mxu0 %v10846_v63  ;;  %7707 = vmatprep.subr.bf16.mxu1 %v10848_v0  ;;  %vm1146_vm4 = vcmp.ge.f32.partialorder %v1095_v12, 0.0  ;;  %v1155_v28 = vmul.f32 %v12321_v33, %v1095_v12  ;;  %v12386_v60 = vadd.f32 %v1135_v55, %v328_v50  ;;  %v1137_v61 = vpop.f32.mrb[6].mxu1  ;;  %v1750_v63 = vld [vmem:[#allocation10 + $0x1200] sm:$0xff]  ;;  %v10927_v17 = vcombine.low %v1751_v1, %v1759_v6  ;;  %v1839_v59 = vld [vmem:[#allocation10 + $0x14c8] sm:$0xff] }
 0x1da   :  { %v1138_v62 = vpop.f32.mrb[7].mxu1  ;;  %v1758_v0 = vld [vmem:[#allocation10 + $0x1240] sm:$0xff]  ;;  %v10959_v44 = vcombine.low %v1783_v29, %v1791_v30  ;;  %v11007_v6 = vcombine.low %v1831_v57, %v1839_v59  ;;  %vm1147_vm7 = vcmp.ge.f32.partialorder %v12382_v23, 0.0 }
 0x1db   :  { %v1163_v37 = vsel %vm1146_vm4, %v1095_v12, %v1155_v28  ;;  %v10926_v8 = vcombine.high %v1750_v63, %v1758_v0  ;;  %v1766_v12 = vld [vmem:[#allocation10 + $0x1280] sm:$0xff]  ;;  %vm1148_vm6 = vcmp.ge.f32.partialorder %v12386_v60, 0.0 }
 0x1dc   :  { %7544 = vmatpush1.bf16.msra.mxu0 %v10845_v13  ;;  %7708 = vmatpush1.bf16.msra.mxu1 %v10847_v14  ;;  %v12377_v48 = vpack.c.bf16 %v1163_v37, %v1163_v37  ;;  %v1767_v13 = vld [vmem:[#allocation10 + $0x1288] sm:$0xff]  ;;  %v1790_v28 = vld [vmem:[#allocation10 + $0x1340] sm:$0xff]  ;;  %v10941_v31 = vcombine.low %v1766_v12, %v1774_v19  ;;  %v10960_v37 = vcombine.high %v1783_v29, %v1791_v30 }
 0x1dd   :  { %7554 = vmatprep.subr.bf16.mxu0 %v10862_v16  ;;  %7718 = vmatprep.subr.bf16.mxu1 %v10864_v18  ;;  %v1775_v14 = vld [vmem:[#allocation10 + $0x12c8] sm:$0xff]  ;;  %v10925_v16 = vcombine.low %v1750_v63, %v1758_v0  ;;  %v10942_v18 = vcombine.high %v1766_v12, %v1774_v19  ;;  %v10958_v34 = vcombine.high %v1782_v21, %v1790_v28  ;;  %v1822_v50 = vld [vmem:[#allocation10 + $0x1440] sm:$0xff] }
 0x1de   :  { %v10944_v20 = vcombine.high %v1767_v13, %v1775_v14  ;;  %v10943_v32 = vcombine.low %v1767_v13, %v1775_v14  ;;  %v10957_v43 = vcombine.low %v1782_v21, %v1790_v28  ;;  %v1830_v55 = vld [vmem:[#allocation10 + $0x1480] sm:$0xff]  ;;  %v10989_v61 = vcombine.low %v1814_v47, %v1822_v50  ;;  %v1847_v63 = vld [vmem:[#allocation10 + $0x1508] sm:$0xff] }
 0x1df   :  { %7546 = vmatmul.mubr.bf16.vlgmr.msra.gmra.mrb[8].mxu0 %v12374_v41  ;;  %7710 = vmatmul.mubr.bf16.vlgmr.msra.gmra.mrb[8].mxu1 %v12374_v41  ;;  %v1838_v56 = vld [vmem:[#allocation10 + $0x14c0] sm:$0xff]  ;;  %v1855_v0 = vld [vmem:[#allocation10 + $0x1548] sm:$0xff] }
 0x1e0   :  { %7555 = vmatpush1.bf16.msra.mxu0 %v10861_v38  ;;  %7719 = vmatpush1.bf16.msra.mxu1 %v10863_v39  ;;  %v1798_v38 = vld [vmem:[#allocation10 + $0x1380] sm:$0xff]  ;;  %v11005_v1 = vcombine.low %v1830_v55, %v1838_v56  ;;  %v1863_v12 = vld [vmem:[#allocation10 + $0x1588] sm:$0xff]  ;;  %v11023_v14 = vcombine.low %v1847_v63, %v1855_v0 }
 0x1e1   :  { %7556 = vmatprep.subr.bf16.mxu0 %v10878_v40  ;;  %7720 = vmatprep.subr.bf16.mxu1 %v10880_v42  ;;  %v1806_v39 = vld [vmem:[#allocation10 + $0x13c0] sm:$0xff]  ;;  %v1799_v40 = vld [vmem:[#allocation10 + $0x1388] sm:$0xff] }
 0x1e2   :  { %7586 = vmatprep.mubr.bf16.mxu0 %v12377_v48  ;;  %7750 = vmatprep.mubr.bf16.mxu1 %v12377_v48  ;;  %v1807_v42 = vld [vmem:[#allocation10 + $0x13c8] sm:$0xff]  ;;  %v10974_v45 = vcombine.high %v1798_v38, %v1806_v39  ;;  %v10973_v52 = vcombine.low %v1798_v38, %v1806_v39  ;;  %v1902_v38 = vld [vmem:[#allocation10 + $0x16c0] sm:$0xff] }
 0x1e3   :  { %v10976_v22 = vcombine.high %v1799_v40, %v1807_v42  ;;  %v1871_v19 = vld [vmem:[#allocation10 + $0x15c8] sm:$0xff] }
 0x1e4   :  { %7557 = vmatpush1.bf16.msra.mxu0 %v10877_v24  ;;  %7721 = vmatpush1.bf16.msra.mxu1 %v10879_v51  ;;  %v1815_v24 = vld [vmem:[#allocation10 + $0x1408] sm:$0xff]  ;;  %v11039_v30 = vcombine.low %v1863_v12, %v1871_v19 }
 0x1e5   :  { %7558 = vmatprep.subr.bf16.mxu0 %v10894_v53  ;;  %7722 = vmatprep.subr.bf16.mxu1 %v10896_v25  ;;  %v1823_v51 = vld [vmem:[#allocation10 + $0x1448] sm:$0xff]  ;;  %v10975_v53 = vcombine.low %v1799_v40, %v1807_v42  ;;  %v10990_v25 = vcombine.high %v1814_v47, %v1822_v50  ;;  %v1918_v50 = vld [vmem:[#allocation10 + $0x1740] sm:$0xff] }
 0x1e6   :  { %v10992_v54 = vcombine.high %v1815_v24, %v1823_v51  ;;  %v10991_v62 = vcombine.low %v1815_v24, %v1823_v51  ;;  %v1879_v21 = vld [vmem:[#allocation10 + $0x1608] sm:$0xff] }
 0x1e7   :  { %v1887_v28 = vld [vmem:[#allocation10 + $0x1648] sm:$0xff] }
 0x1e8   :  { %7559 = vmatpush1.bf16.msra.mxu0 %v10893_v3  ;;  %7723 = vmatpush1.bf16.msra.mxu1 %v10895_v4  ;;  %v11006_v3 = vcombine.high %v1830_v55, %v1838_v56  ;;  %v11008_v4 = vcombine.high %v1831_v57, %v1839_v59  ;;  %v1895_v39 = vld [vmem:[#allocation10 + $0x1688] sm:$0xff]  ;;  %v1934_v56 = vld [vmem:[#allocation10 + $0x17c0] sm:$0xff] }
 0x1e9   :  { %7560 = vmatprep.subr.bf16.mxu0 %v10910_v5  ;;  %7724 = vmatprep.subr.bf16.mxu1 %v10912_v7  ;;  %v1846_v5 = vld [vmem:[#allocation10 + $0x1500] sm:$0xff]  ;;  %v1903_v40 = vld [vmem:[#allocation10 + $0x16c8] sm:$0xff] }
 0x1ea   :  { %v1854_v7 = vld [vmem:[#allocation10 + $0x1540] sm:$0xff]  ;;  %v1911_v24 = vld [vmem:[#allocation10 + $0x1708] sm:$0xff] }
 0x1eb   :  { %v11021_v13 = vcombine.low %v1846_v5, %v1854_v7  ;;  %v1919_v51 = vld [vmem:[#allocation10 + $0x1748] sm:$0xff] }
 0x1ec   :  { %7561 = vmatpush1.bf16.msra.mxu0 %v10909_v10  ;;  %7725 = vmatpush1.bf16.msra.mxu1 %v10911_v58  ;;  %v11022_v10 = vcombine.high %v1846_v5, %v1854_v7  ;;  %v11024_v58 = vcombine.high %v1847_v63, %v1855_v0  ;;  %v1927_v57 = vld [vmem:[#allocation10 + $0x1788] sm:$0xff]  ;;  %v1942_v5 = vld [vmem:[#allocation10 + $0x1800] sm:$0xff] }
 0x1ed   :  { %7562 = vmatprep.subr.bf16.mxu0 %v10926_v8  ;;  %7726 = vmatprep.subr.bf16.mxu1 %v10928_v11  ;;  %v1862_v8 = vld [vmem:[#allocation10 + $0x1580] sm:$0xff]  ;;  %v1935_v59 = vld [vmem:[#allocation10 + $0x17c8] sm:$0xff] }
 0x1ee   :  { %v1870_v11 = vld [vmem:[#allocation10 + $0x15c0] sm:$0xff]  ;;  %v1943_v0 = vld [vmem:[#allocation10 + $0x1808] sm:$0xff] }
 0x1ef   :  { %v11037_v29 = vcombine.low %v1862_v8, %v1870_v11  ;;  %v1950_v63 = vld [vmem:[#allocation10 + $0x1840] sm:$0xff] }
 0x1f0   :  { %7563 = vmatpush1.bf16.msra.mxu0 %v10925_v16  ;;  %7727 = vmatpush1.bf16.msra.mxu1 %v10927_v17  ;;  %v11038_v16 = vcombine.high %v1862_v8, %v1870_v11  ;;  %v11040_v17 = vcombine.high %v1863_v12, %v1871_v19  ;;  %v1958_v11 = vld [vmem:[#allocation10 + $0x1880] sm:$0xff] }
 0x1f1   :  { %7564 = vmatprep.subr.bf16.mxu0 %v10942_v18  ;;  %7728 = vmatprep.subr.bf16.mxu1 %v10944_v20  ;;  %v1878_v18 = vld [vmem:[#allocation10 + $0x1600] sm:$0xff] }
 0x1f2   :  { %v1886_v20 = vld [vmem:[#allocation10 + $0x1640] sm:$0xff] }
 0x1f3   :  { %v11053_v42 = vcombine.low %v1878_v18, %v1886_v20  ;;  %v1966_v19 = vld [vmem:[#allocation10 + $0x18c0] sm:$0xff] }
 0x1f4   :  { %7565 = vmatpush1.bf16.msra.mxu0 %v10941_v31  ;;  %7729 = vmatpush1.bf16.msra.mxu1 %v10943_v32  ;;  %v11054_v31 = vcombine.high %v1878_v18, %v1886_v20  ;;  %v11056_v32 = vcombine.high %v1879_v21, %v1887_v28 }
 0x1f5   :  { %7566 = vmatprep.subr.bf16.mxu0 %v10958_v34  ;;  %7730 = vmatprep.subr.bf16.mxu1 %v10960_v37  ;;  %v1894_v34 = vld [vmem:[#allocation10 + $0x1680] sm:$0xff]  ;;  %v276_v37 = vrot.slane %v12358_v46, %v12307_v26 }
 0x1f6   :  { %v11069_v46 = vcombine.low %v1894_v34, %v1902_v38 }
 0x1f7   :  { %v316_v47 = vrot.slane %v276_v37, %v12307_v26 }
 0x1f8   :  { %7567 = vmatpush1.bf16.msra.mxu0 %v10957_v43  ;;  %7731 = vmatpush1.bf16.msra.mxu1 %v10959_v44  ;;  %v11055_v43 = vcombine.low %v1879_v21, %v1887_v28  ;;  %v11070_v44 = vcombine.high %v1894_v34, %v1902_v38  ;;  %v11134_v21 = vcombine.high %v1958_v11, %v1966_v19 }
 0x1f9   :  { %7568 = vmatprep.subr.bf16.mxu0 %v10974_v45  ;;  %7732 = vmatprep.subr.bf16.mxu1 %v10976_v22  ;;  %v11072_v45 = vcombine.high %v1895_v39, %v1903_v40  ;;  %v1910_v22 = vld [vmem:[#allocation10 + $0x1700] sm:$0xff]  ;;  %v1093_v55 = vadd.f32 %v12365_v9, %v316_v47  ;;  %v1157_v9 = vmul.f32 %v12321_v33, %v12386_v60 }
 0x1fb   :  { %v1154_v7 = vmul.f32 %v12321_v33, %v1093_v55  ;;  %vm1145_vm5 = vcmp.ge.f32.partialorder %v1093_v55, 0.0 }
 0x1fc   :  { %7569 = vmatpush1.bf16.msra.mxu0 %v10973_v52  ;;  %7733 = vmatpush1.bf16.msra.mxu1 %v10975_v53  ;;  %v11071_v52 = vcombine.low %v1895_v39, %v1903_v40  ;;  %v11086_v53 = vcombine.high %v1910_v22, %v1918_v50  ;;  %v1990_v40 = vld [vmem:[#allocation10 + $0x1980] sm:$0xff] }
 0x1fd   :  { %7570 = vmatprep.subr.bf16.mxu0 %v10990_v25  ;;  %7734 = vmatprep.subr.bf16.mxu1 %v10992_v54  ;;  %v11088_v25 = vcombine.high %v1911_v24, %v1919_v51  ;;  %v1926_v54 = vld [vmem:[#allocation10 + $0x1780] sm:$0xff]  ;;  %v1162_v12 = vsel %vm1145_vm5, %v1093_v55, %v1154_v7 }
 0x1fe   :  { %v12397_v20 = vpack.c.bf16 %v1162_v12, %v1162_v12  ;;  %v2038_v7 = vld [vmem:[#allocation10 + $0x1b00] sm:$0xff]  ;;  %v2055_v12 = vld [vmem:[#allocation10 + $0x1b88] sm:$0xff] }
 0x200   :  { %7571 = vmatpush1.bf16.msra.mxu0 %v10989_v61  ;;  %7735 = vmatpush1.bf16.msra.mxu1 %v10991_v62  ;;  %v11085_v61 = vcombine.low %v1910_v22, %v1918_v50  ;;  %v11087_v62 = vcombine.low %v1911_v24, %v1919_v51  ;;  %v2006_v24 = vld [vmem:[#allocation10 + $0x1a00] sm:$0xff] }
 0x201   :  { %7572 = vmatprep.subr.bf16.mxu0 %v11006_v3  ;;  %7736 = vmatprep.subr.bf16.mxu1 %v11008_v4  ;;  %v11102_v3 = vcombine.high %v1926_v54, %v1934_v56  ;;  %v11104_v4 = vcombine.high %v1927_v57, %v1935_v59  ;;  %v2014_v51 = vld [vmem:[#allocation10 + $0x1a40] sm:$0xff] }
 0x204   :  { %7573 = vmatpush1.bf16.msra.mxu0 %v11005_v1  ;;  %7737 = vmatpush1.bf16.msra.mxu1 %v11007_v6  ;;  %v1951_v1 = vld [vmem:[#allocation10 + $0x1848] sm:$0xff]  ;;  %v11101_v6 = vcombine.low %v1926_v54, %v1934_v56  ;;  %v11182_v54 = vcombine.high %v2006_v24, %v2014_v51  ;;  %v2022_v56 = vld [vmem:[#allocation10 + $0x1a80] sm:$0xff] }
 0x205   :  { %7574 = vmatprep.subr.bf16.mxu0 %v11022_v10  ;;  %7738 = vmatprep.subr.bf16.mxu1 %v11024_v58  ;;  %v11103_v10 = vcombine.low %v1927_v57, %v1935_v59  ;;  %v11118_v58 = vcombine.high %v1942_v5, %v1950_v63  ;;  %v11120_v8 = vcombine.high %v1943_v0, %v1951_v1  ;;  %v2030_v57 = vld [vmem:[#allocation10 + $0x1ac0] sm:$0xff]  ;;  %v2023_v59 = vld [vmem:[#allocation10 + $0x1a88] sm:$0xff] }
 0x206   :  { %v11119_v18 = vcombine.low %v1943_v0, %v1951_v1  ;;  %v2039_v0 = vld [vmem:[#allocation10 + $0x1b08] sm:$0xff] }
 0x207   :  { %v2047_v1 = vld [vmem:[#allocation10 + $0x1b48] sm:$0xff] }
 0x208   :  { %7575 = vmatpush1.bf16.msra.mxu0 %v11021_v13  ;;  %7739 = vmatpush1.bf16.msra.mxu1 %v11023_v14  ;;  %v1959_v13 = vld [vmem:[#allocation10 + $0x1888] sm:$0xff] }
 0x209   :  { %7576 = vmatprep.subr.bf16.mxu0 %v11038_v16  ;;  %7740 = vmatprep.subr.bf16.mxu1 %v11040_v17  ;;  %v1967_v14 = vld [vmem:[#allocation10 + $0x18c8] sm:$0xff]  ;;  %v1165_v16 = vsel %vm1148_vm6, %v12386_v60, %v1157_v9  ;;  %v11117_v17 = vcombine.low %v1942_v5, %v1950_v63  ;;  %v11133_v60 = vcombine.low %v1958_v11, %v1966_v19  ;;  %v2046_v63 = vld [vmem:[#allocation10 + $0x1b40] sm:$0xff] }
 0x20a   :  { %v11136_v28 = vcombine.high %v1959_v13, %v1967_v14  ;;  %v12399_v34 = vpack.c.bf16 %v1165_v16, %v1165_v16  ;;  %v11135_v37 = vcombine.low %v1959_v13, %v1967_v14  ;;  %v11197_v9 = vcombine.low %v2022_v56, %v2030_v57  ;;  %v2062_v11 = vld [vmem:[#allocation10 + $0x1bc0] sm:$0xff]  ;;  %v2063_v19 = vld [vmem:[#allocation10 + $0x1bc8] sm:$0xff] }
 0x20b   :  { %v11213_v13 = vcombine.low %v2038_v7, %v2046_v63  ;;  %v11215_v14 = vcombine.low %v2039_v0, %v2047_v1 }
 0x20c   :  { %7577 = vmatpush1.bf16.msra.mxu0 %v11037_v29  ;;  %7741 = vmatpush1.bf16.msra.mxu1 %v11039_v30  ;;  %v1974_v29 = vld [vmem:[#allocation10 + $0x1900] sm:$0xff] }
 0x20d   :  { %7578 = vmatprep.subr.bf16.mxu0 %v11054_v31  ;;  %7742 = vmatprep.subr.bf16.mxu1 %v11056_v32  ;;  %v1982_v30 = vld [vmem:[#allocation10 + $0x1940] sm:$0xff]  ;;  %v1975_v31 = vld [vmem:[#allocation10 + $0x1908] sm:$0xff] }
 0x20e   :  { %v1983_v32 = vld [vmem:[#allocation10 + $0x1948] sm:$0xff]  ;;  %v11150_v38 = vcombine.high %v1974_v29, %v1982_v30 }
 0x20f   :  { %v11152_v39 = vcombine.high %v1975_v31, %v1983_v32  ;;  %v11151_v22 = vcombine.low %v1975_v31, %v1983_v32  ;;  %v11231_v31 = vcombine.low %v2055_v12, %v2063_v19 }
 0x210   :  { %7579 = vmatpush1.bf16.msra.mxu0 %v11053_v42  ;;  %7743 = vmatpush1.bf16.msra.mxu1 %v11055_v43  ;;  %v1998_v42 = vld [vmem:[#allocation10 + $0x19c0] sm:$0xff]  ;;  %v1991_v43 = vld [vmem:[#allocation10 + $0x1988] sm:$0xff] }
 0x211   :  { %7580 = vmatprep.subr.bf16.mxu0 %v11070_v44  ;;  %7744 = vmatprep.subr.bf16.mxu1 %v11072_v45  ;;  %v1999_v44 = vld [vmem:[#allocation10 + $0x19c8] sm:$0xff]  ;;  %v11149_v45 = vcombine.low %v1974_v29, %v1982_v30  ;;  %v11166_v47 = vcombine.high %v1990_v40, %v1998_v42 }
 0x212   :  { %v11168_v50 = vcombine.high %v1991_v43, %v1999_v44  ;;  %v2079_v29 = vld [vmem:[#allocation10 + $0x1c48] sm:$0xff] }
 0x214   :  { %7581 = vmatpush1.bf16.msra.mxu0 %v11069_v46  ;;  %7745 = vmatpush1.bf16.msra.mxu1 %v11071_v52  ;;  %v2007_v46 = vld [vmem:[#allocation10 + $0x1a08] sm:$0xff] }
 0x215   :  { %7582 = vmatprep.subr.bf16.mxu0 %v11086_v53  ;;  %7746 = vmatprep.subr.bf16.mxu1 %v11088_v25  ;;  %v2015_v52 = vld [vmem:[#allocation10 + $0x1a48] sm:$0xff]  ;;  %v11165_v53 = vcombine.low %v1990_v40, %v1998_v42  ;;  %v11167_v25 = vcombine.low %v1991_v43, %v1999_v44 }
 0x216   :  { %v11184_v55 = vcombine.high %v2007_v46, %v2015_v52  ;;  %v2095_v40 = vld [vmem:[#allocation10 + $0x1cc8] sm:$0xff] }
 0x218   :  { %7583 = vmatpush1.bf16.msra.mxu0 %v11085_v61  ;;  %7747 = vmatpush1.bf16.msra.mxu1 %v11087_v62  ;;  %v2031_v61 = vld [vmem:[#allocation10 + $0x1ac8] sm:$0xff]  ;;  %v11181_v62 = vcombine.low %v2006_v24, %v2014_v51 }
 0x219   :  { %7584 = vmatprep.subr.bf16.mxu0 %v11102_v3  ;;  %7748 = vmatprep.subr.bf16.mxu1 %v11104_v4  ;;  %v11183_v3 = vcombine.low %v2007_v46, %v2015_v52  ;;  %v11198_v4 = vcombine.high %v2022_v56, %v2030_v57  ;;  %v11200_v5 = vcombine.high %v2023_v59, %v2031_v61  ;;  %v2111_v24 = vld [vmem:[#allocation10 + $0x1d48] sm:$0xff] }
 0x21a   :  { %v2127_v56 = vld [vmem:[#allocation10 + $0x1dc8] sm:$0xff] }
 0x21c   :  { %7585 = vmatpush1.bf16.msra.mxu0 %v11101_v6  ;;  %7749 = vmatpush1.bf16.msra.mxu1 %v11103_v10  ;;  %v11199_v6 = vcombine.low %v2023_v59, %v2031_v61  ;;  %v11214_v10 = vcombine.high %v2038_v7, %v2046_v63  ;;  %v2143_v7 = vld [vmem:[#allocation10 + $0x1e48] sm:$0xff] }
 0x21d   :  { %7595 = vmatprep.subr.bf16.mxu0 %v11118_v58  ;;  %7759 = vmatprep.subr.bf16.mxu1 %v11120_v8  ;;  %v11216_v58 = vcombine.high %v2039_v0, %v2047_v1  ;;  %v2054_v8 = vld [vmem:[#allocation10 + $0x1b80] sm:$0xff] }
 0x21e   :  { %v11230_v16 = vcombine.high %v2054_v8, %v2062_v11  ;;  %v11229_v30 = vcombine.low %v2054_v8, %v2062_v11  ;;  %v2159_v8 = vld [vmem:[#allocation10 + $0x1ec8] sm:$0xff] }
 0x21f   :  { %7587 = vmatmul.mubr.bf16.vlgmr.msra.gmra.mrb[8].mxu0 %v12397_v20  ;;  %7751 = vmatmul.mubr.bf16.vlgmr.msra.gmra.mrb[8].mxu1 %v12397_v20 }
 0x220   :  { %7596 = vmatpush1.bf16.msra.mxu0 %v11117_v17  ;;  %7760 = vmatpush1.bf16.msra.mxu1 %v11119_v18  ;;  %v11232_v17 = vcombine.high %v2055_v12, %v2063_v19  ;;  %v2070_v18 = vld [vmem:[#allocation10 + $0x1c00] sm:$0xff] }
 0x221   :  { %7597 = vmatprep.subr.bf16.mxu0 %v11134_v21  ;;  %7761 = vmatprep.subr.bf16.mxu1 %v11136_v28  ;;  %v2078_v21 = vld [vmem:[#allocation10 + $0x1c40] sm:$0xff]  ;;  %v2071_v28 = vld [vmem:[#allocation10 + $0x1c08] sm:$0xff] }
 0x222   :  { %7627 = vmatprep.mubr.bf16.mxu0 %v12399_v34  ;;  %7791 = vmatprep.mubr.bf16.mxu1 %v12399_v34  ;;  %v11246_v32 = vcombine.high %v2070_v18, %v2078_v21  ;;  %v11245_v42 = vcombine.low %v2070_v18, %v2078_v21  ;;  %v11247_v43 = vcombine.low %v2071_v28, %v2079_v29  ;;  %v2175_v18 = vld [vmem:[#allocation10 + $0x1f48] sm:$0xff] }
 0x224   :  { %7598 = vmatpush1.bf16.msra.mxu0 %v11133_v60  ;;  %7762 = vmatpush1.bf16.msra.mxu1 %v11135_v37  ;;  %v11248_v60 = vcombine.high %v2071_v28, %v2079_v29  ;;  %v2086_v37 = vld [vmem:[#allocation10 + $0x1c80] sm:$0xff] }
 0x225   :  { %7599 = vmatprep.subr.bf16.mxu0 %v11150_v38  ;;  %7763 = vmatprep.subr.bf16.mxu1 %v11152_v39  ;;  %v2094_v38 = vld [vmem:[#allocation10 + $0x1cc0] sm:$0xff]  ;;  %v2087_v39 = vld [vmem:[#allocation10 + $0x1c88] sm:$0xff] }
 0x226   :  { %v11262_v44 = vcombine.high %v2086_v37, %v2094_v38  ;;  %v11261_v51 = vcombine.low %v2086_v37, %v2094_v38  ;;  %v11263_v46 = vcombine.low %v2087_v39, %v2095_v40  ;;  %v2191_v37 = vld [vmem:[#allocation10 + $0x1fc8] sm:$0xff] }
 0x228   :  { %7600 = vmatpush1.bf16.msra.mxu0 %v11149_v45  ;;  %7764 = vmatpush1.bf16.msra.mxu1 %v11151_v22  ;;  %v11264_v45 = vcombine.high %v2087_v39, %v2095_v40  ;;  %v2102_v22 = vld [vmem:[#allocation10 + $0x1d00] sm:$0xff] }
 0x229   :  { %7601 = vmatprep.subr.bf16.mxu0 %v11166_v47  ;;  %7765 = vmatprep.subr.bf16.mxu1 %v11168_v50  ;;  %v2110_v47 = vld [vmem:[#allocation10 + $0x1d40] sm:$0xff]  ;;  %v2103_v50 = vld [vmem:[#allocation10 + $0x1d08] sm:$0xff] }
 0x22a   :  { %v11278_v52 = vcombine.high %v2102_v22, %v2110_v47  ;;  %v11277_v57 = vcombine.low %v2102_v22, %v2110_v47  ;;  %v11279_v59 = vcombine.low %v2103_v50, %v2111_v24  ;;  %v1177_v22 = vld [vmem:[#allocation10 + $0x18] sm:$0xff] }
 0x22b   :  { %v1185_v47 = vld [vmem:[#allocation10 + $0x58] sm:$0xff] }
 0x22c   :  { %7602 = vmatpush1.bf16.msra.mxu0 %v11165_v53  ;;  %7766 = vmatpush1.bf16.msra.mxu1 %v11167_v25  ;;  %v11280_v53 = vcombine.high %v2103_v50, %v2111_v24  ;;  %v2118_v25 = vld [vmem:[#allocation10 + $0x1d80] sm:$0xff] }
 0x22d   :  { %7603 = vmatprep.subr.bf16.mxu0 %v11182_v54  ;;  %7767 = vmatprep.subr.bf16.mxu1 %v11184_v55  ;;  %v2126_v54 = vld [vmem:[#allocation10 + $0x1dc0] sm:$0xff]  ;;  %v2119_v55 = vld [vmem:[#allocation10 + $0x1d88] sm:$0xff] }
 0x22e   :  { %v11294_v61 = vcombine.high %v2118_v25, %v2126_v54  ;;  %v11293_v63 = vcombine.low %v2118_v25, %v2126_v54  ;;  %v11295_v0 = vcombine.low %v2119_v55, %v2127_v56  ;;  %v1200_v25 = vld [vmem:[#allocation10 + $0xd0] sm:$0xff]  ;;  %v1193_v54 = vld [vmem:[#allocation10 + $0x98] sm:$0xff] }
 0x230   :  { %7604 = vmatpush1.bf16.msra.mxu0 %v11181_v62  ;;  %7768 = vmatpush1.bf16.msra.mxu1 %v11183_v3  ;;  %v11296_v62 = vcombine.high %v2119_v55, %v2127_v56  ;;  %v2134_v3 = vld [vmem:[#allocation10 + $0x1e00] sm:$0xff]  ;;  %v1201_v55 = vld [vmem:[#allocation10 + $0xd8] sm:$0xff] }
 0x231   :  { %7605 = vmatprep.subr.bf16.mxu0 %v11198_v4  ;;  %7769 = vmatprep.subr.bf16.mxu1 %v11200_v5  ;;  %v2142_v4 = vld [vmem:[#allocation10 + $0x1e40] sm:$0xff]  ;;  %v2135_v5 = vld [vmem:[#allocation10 + $0x1e08] sm:$0xff] }
 0x232   :  { %v11310_v1 = vcombine.high %v2134_v3, %v2142_v4  ;;  %v11309_v11 = vcombine.low %v2134_v3, %v2142_v4  ;;  %v11311_v12 = vcombine.low %v2135_v5, %v2143_v7  ;;  %v1216_v3 = vld [vmem:[#allocation10 + $0x150] sm:$0xff]  ;;  %v1217_v4 = vld [vmem:[#allocation10 + $0x158] sm:$0xff] }
 0x234   :  { %7606 = vmatpush1.bf16.msra.mxu0 %v11197_v9  ;;  %7770 = vmatpush1.bf16.msra.mxu1 %v11199_v6  ;;  %v11312_v9 = vcombine.high %v2135_v5, %v2143_v7  ;;  %v2150_v6 = vld [vmem:[#allocation10 + $0x1e80] sm:$0xff]  ;;  %v10371_v7 = vcombine.low %v1193_v54, %v1201_v55 }
 0x235   :  { %7607 = vmatprep.subr.bf16.mxu0 %v11214_v10  ;;  %7771 = vmatprep.subr.bf16.mxu1 %v11216_v58  ;;  %v2158_v10 = vld [vmem:[#allocation10 + $0x1ec0] sm:$0xff]  ;;  %v2151_v58 = vld [vmem:[#allocation10 + $0x1e88] sm:$0xff] }
 0x236   :  { %v11326_v19 = vcombine.high %v2150_v6, %v2158_v10  ;;  %v11325_v21 = vcombine.low %v2150_v6, %v2158_v10  ;;  %v11327_v28 = vcombine.low %v2151_v58, %v2159_v8  ;;  %v1225_v6 = vld [vmem:[#allocation10 + $0x198] sm:$0xff] }
 0x237   :  { %v1233_v10 = vld [vmem:[#allocation10 + $0x1d8] sm:$0xff] }
 0x238   :  { %7608 = vmatpush1.bf16.msra.mxu0 %v11213_v13  ;;  %7772 = vmatpush1.bf16.msra.mxu1 %v11215_v14  ;;  %v11328_v13 = vcombine.high %v2151_v58, %v2159_v8  ;;  %v2166_v14 = vld [vmem:[#allocation10 + $0x1f00] sm:$0xff] }
 0x239   :  { %7609 = vmatprep.subr.bf16.mxu0 %v11230_v16  ;;  %7773 = vmatprep.subr.bf16.mxu1 %v11232_v17  ;;  %v2174_v16 = vld [vmem:[#allocation10 + $0x1f40] sm:$0xff]  ;;  %v2167_v17 = vld [vmem:[#allocation10 + $0x1f08] sm:$0xff] }
 0x23a   :  { %v11342_v29 = vcombine.high %v2166_v14, %v2174_v16  ;;  %v11341_v38 = vcombine.low %v2166_v14, %v2174_v16  ;;  %v11343_v39 = vcombine.low %v2167_v17, %v2175_v18  ;;  %v1241_v14 = vld [vmem:[#allocation10 + $0x218] sm:$0xff] }
 0x23b   :  { %v1249_v16 = vld [vmem:[#allocation10 + $0x258] sm:$0xff] }
 0x23c   :  { %7610 = vmatpush1.bf16.msra.mxu0 %v11229_v30  ;;  %7774 = vmatpush1.bf16.msra.mxu1 %v11231_v31  ;;  %v11344_v30 = vcombine.high %v2167_v17, %v2175_v18  ;;  %v2182_v31 = vld [vmem:[#allocation10 + $0x1f80] sm:$0xff]  ;;  %v10403_v18 = vcombine.low %v1225_v6, %v1233_v10 }
 0x23d   :  { %7611 = vmatprep.subr.bf16.mxu0 %v11246_v32  ;;  %7775 = vmatprep.subr.bf16.mxu1 %v11248_v60  ;;  %v2190_v32 = vld [vmem:[#allocation10 + $0x1fc0] sm:$0xff]  ;;  %v2183_v60 = vld [vmem:[#allocation10 + $0x1f88] sm:$0xff] }
 0x23e   :  { %v11358_v40 = vcombine.high %v2182_v31, %v2190_v32  ;;  %v11357_v50 = vcombine.low %v2182_v31, %v2190_v32  ;;  %v11359_v24 = vcombine.low %v2183_v60, %v2191_v37  ;;  %v1257_v31 = vld [vmem:[#allocation10 + $0x298] sm:$0xff] }
 0x23f   :  { %v1265_v32 = vld [vmem:[#allocation10 + $0x2d8] sm:$0xff] }
 0x240   :  { %7612 = vmatpush1.bf16.msra.mxu0 %v11245_v42  ;;  %7776 = vmatpush1.bf16.msra.mxu1 %v11247_v43  ;;  %v11360_v42 = vcombine.high %v2183_v60, %v2191_v37  ;;  %v1176_v43 = vld [vmem:[#allocation10 + $0x10] sm:$0xff]  ;;  %v10419_v37 = vcombine.low %v1241_v14, %v1249_v16 }
 0x241   :  { %7613 = vmatprep.subr.bf16.mxu0 %v11262_v44  ;;  %7777 = vmatprep.subr.bf16.mxu1 %v11264_v45  ;;  %v1156_v44 = vmul.f32 %v12321_v33, %v12382_v23  ;;  %v1184_v45 = vld [vmem:[#allocation10 + $0x50] sm:$0xff] }
 0x242   :  { %v10353_v33 = vcombine.low %v1176_v43, %v1184_v45 }
 0x244   :  { %7614 = vmatpush1.bf16.msra.mxu0 %v11261_v51  ;;  %7778 = vmatpush1.bf16.msra.mxu1 %v11263_v46  ;;  %v10354_v51 = vcombine.high %v1176_v43, %v1184_v45  ;;  %v10356_v46 = vcombine.high %v1177_v22, %v1185_v47  ;;  %v1273_v43 = vld [vmem:[#allocation10 + $0x318] sm:$0xff] }
 0x245   :  { %7615 = vmatprep.subr.bf16.mxu0 %v11278_v52  ;;  %7779 = vmatprep.subr.bf16.mxu1 %v11280_v53  ;;  %v1164_v52 = vsel %vm1147_vm7, %v12382_v23, %v1156_v44  ;;  %v1192_v53 = vld [vmem:[#allocation10 + $0x90] sm:$0xff]  ;;  %v1209_v23 = vld [vmem:[#allocation10 + $0x118] sm:$0xff] }
 0x246   :  { %v12409_v56 = vpack.c.bf16 %v1164_v52, %v1164_v52  ;;  %v10369_v5 = vcombine.low %v1192_v53, %v1200_v25  ;;  %v10387_v8 = vcombine.low %v1209_v23, %v1217_v4  ;;  %v1281_v44 = vld [vmem:[#allocation10 + $0x358] sm:$0xff] }
 0x247   :  { %v1297_v52 = vld [vmem:[#allocation10 + $0x3d8] sm:$0xff] }
 0x248   :  { %7616 = vmatpush1.bf16.msra.mxu0 %v11277_v57  ;;  %7780 = vmatpush1.bf16.msra.mxu1 %v11279_v59  ;;  %v10355_v57 = vcombine.low %v1177_v22, %v1185_v47  ;;  %v10370_v59 = vcombine.high %v1192_v53, %v1200_v25  ;;  %v10435_v22 = vcombine.low %v1257_v31, %v1265_v32 }
 0x249   :  { %7617 = vmatprep.subr.bf16.mxu0 %v11294_v61  ;;  %7781 = vmatprep.subr.bf16.mxu1 %v11296_v62  ;;  %v10372_v61 = vcombine.high %v1193_v54, %v1201_v55  ;;  %v1208_v62 = vld [vmem:[#allocation10 + $0x110] sm:$0xff]  ;;  %v10451_v25 = vcombine.low %v1273_v43, %v1281_v44 }
 0x24a   :  { %v10385_v58 = vcombine.low %v1208_v62, %v1216_v3 }
 0x24c   :  { %7618 = vmatpush1.bf16.msra.mxu0 %v11293_v63  ;;  %7782 = vmatpush1.bf16.msra.mxu1 %v11295_v0  ;;  %v10386_v63 = vcombine.high %v1208_v62, %v1216_v3  ;;  %v10388_v0 = vcombine.high %v1209_v23, %v1217_v4 }
 0x24d   :  { %7619 = vmatprep.subr.bf16.mxu0 %v11310_v1  ;;  %7783 = vmatprep.subr.bf16.mxu1 %v11312_v9  ;;  %v1224_v1 = vld [vmem:[#allocation10 + $0x190] sm:$0xff] }
 0x24e   :  { %v1232_v9 = vld [vmem:[#allocation10 + $0x1d0] sm:$0xff] }
 0x24f   :  { %v10401_v17 = vcombine.low %v1224_v1, %v1232_v9 }
 0x250   :  { %7620 = vmatpush1.bf16.msra.mxu0 %v11309_v11  ;;  %7784 = vmatpush1.bf16.msra.mxu1 %v11311_v12  ;;  %v10402_v11 = vcombine.high %v1224_v1, %v1232_v9  ;;  %v10404_v12 = vcombine.high %v1225_v6, %v1233_v10 }
 0x251   :  { %7621 = vmatprep.subr.bf16.mxu0 %v11326_v19  ;;  %7785 = vmatprep.subr.bf16.mxu1 %v11328_v13  ;;  %v1240_v19 = vld [vmem:[#allocation10 + $0x210] sm:$0xff] }
 0x252   :  { %v1248_v13 = vld [vmem:[#allocation10 + $0x250] sm:$0xff] }
 0x253   :  { %v10417_v60 = vcombine.low %v1240_v19, %v1248_v13 }
 0x254   :  { %7622 = vmatpush1.bf16.msra.mxu0 %v11325_v21  ;;  %7786 = vmatpush1.bf16.msra.mxu1 %v11327_v28  ;;  %v10418_v21 = vcombine.high %v1240_v19, %v1248_v13  ;;  %v10420_v28 = vcombine.high %v1241_v14, %v1249_v16 }
 0x255   :  { %7623 = vmatprep.subr.bf16.mxu0 %v11342_v29  ;;  %7787 = vmatprep.subr.bf16.mxu1 %v11344_v30  ;;  %v1256_v29 = vld [vmem:[#allocation10 + $0x290] sm:$0xff] }
 0x256   :  { %v1264_v30 = vld [vmem:[#allocation10 + $0x2d0] sm:$0xff] }
 0x257   :  { %v10433_v45 = vcombine.low %v1256_v29, %v1264_v30 }
 0x258   :  { %7624 = vmatpush1.bf16.msra.mxu0 %v11341_v38  ;;  %7788 = vmatpush1.bf16.msra.mxu1 %v11343_v39  ;;  %v10434_v38 = vcombine.high %v1256_v29, %v1264_v30  ;;  %v10436_v39 = vcombine.high %v1257_v31, %v1265_v32 }
 0x259   :  { %7625 = vmatprep.subr.bf16.mxu0 %v11358_v40  ;;  %7789 = vmatprep.subr.bf16.mxu1 %v11360_v42  ;;  %v1272_v40 = vld [vmem:[#allocation10 + $0x310] sm:$0xff] }
 0x25a   :  { %v1280_v42 = vld [vmem:[#allocation10 + $0x350] sm:$0xff] }
 0x25b   :  { %v10450_v47 = vcombine.high %v1272_v40, %v1280_v42  ;;  %v10449_v53 = vcombine.low %v1272_v40, %v1280_v42 }
 0x25c   :  { %7626 = vmatpush1.bf16.msra.mxu0 %v11357_v50  ;;  %7790 = vmatpush1.bf16.msra.mxu1 %v11359_v24  ;;  %v10452_v50 = vcombine.high %v1273_v43, %v1281_v44  ;;  %v1288_v24 = vld [vmem:[#allocation10 + $0x390] sm:$0xff] }
 0x25d   :  { %7800 = vmatprep.subr.bf16.mxu0 %v10354_v51  ;;  %7964 = vmatprep.subr.bf16.mxu1 %v10356_v46  ;;  %v1296_v51 = vld [vmem:[#allocation10 + $0x3d0] sm:$0xff]  ;;  %v1289_v46 = vld [vmem:[#allocation10 + $0x398] sm:$0xff] }
 0x25e   :  { %v10466_v54 = vcombine.high %v1288_v24, %v1296_v51  ;;  %v10468_v55 = vcombine.high %v1289_v46, %v1297_v52  ;;  %v10465_v62 = vcombine.low %v1288_v24, %v1296_v51  ;;  %v10467_v3 = vcombine.low %v1289_v46, %v1297_v52 }
 0x25f   :  { %7628 = vmatmul.mubr.bf16.vlgmr.msra.gmra.mrb[8].mxu0 %v12409_v56  ;;  %7792 = vmatmul.mubr.bf16.vlgmr.msra.gmra.mrb[8].mxu1 %v12409_v56 }
 0x260   :  { %7801 = vmatpush1.bf16.msra.mxu0 %v10353_v33  ;;  %7832 = vmatprep.mubr.bf16.mxu0 %v12330_v49  ;;  %v1304_v33 = vld [vmem:[#allocation10 + $0x410] sm:$0xff] }
 0x261   :  { %7965 = vmatpush1.bf16.msra.mxu1 %v10355_v57  ;;  %7996 = vmatprep.mubr.bf16.mxu1 %v12330_v49  ;;  %v1312_v57 = vld [vmem:[#allocation10 + $0x450] sm:$0xff] }
 0x262   :  { %7802 = vmatprep.subr.bf16.mxu0 %v10370_v59  ;;  %7966 = vmatprep.subr.bf16.mxu1 %v10372_v61  ;;  %v1305_v59 = vld [vmem:[#allocation10 + $0x418] sm:$0xff]  ;;  %v10482_v23 = vcombine.high %v1304_v33, %v1312_v57  ;;  %v10481_v1 = vcombine.low %v1304_v33, %v1312_v57 }
 0x263   :  { %v1313_v61 = vld [vmem:[#allocation10 + $0x458] sm:$0xff] }
 0x264   :  { %7803 = vmatpush1.bf16.msra.mxu0 %v10369_v5  ;;  %v10484_v4 = vcombine.high %v1305_v59, %v1313_v61  ;;  %v1320_v5 = vld [vmem:[#allocation10 + $0x490] sm:$0xff]  ;;  %v10483_v9 = vcombine.low %v1305_v59, %v1313_v61 }
 0x265   :  { %7967 = vmatpush1.bf16.msra.mxu1 %v10371_v7  ;;  %7804 = vmatprep.subr.bf16.mxu0 %v10386_v63  ;;  %v1328_v7 = vld [vmem:[#allocation10 + $0x4d0] sm:$0xff]  ;;  %v1321_v63 = vld [vmem:[#allocation10 + $0x498] sm:$0xff] }
 0x266   :  { %7968 = vmatprep.subr.bf16.mxu1 %v10388_v0  ;;  %v1329_v0 = vld [vmem:[#allocation10 + $0x4d8] sm:$0xff]  ;;  %v10498_v6 = vcombine.high %v1320_v5, %v1328_v7  ;;  %v10497_v19 = vcombine.low %v1320_v5, %v1328_v7 }
 0x267   :  { %v10500_v10 = vcombine.high %v1321_v63, %v1329_v0  ;;  %v10499_v13 = vcombine.low %v1321_v63, %v1329_v0 }
 0x268   :  { %7805 = vmatpush1.bf16.msra.mxu0 %v10385_v58  ;;  %v1336_v58 = vld [vmem:[#allocation10 + $0x510] sm:$0xff] }
 0x269   :  { %7969 = vmatpush1.bf16.msra.mxu1 %v10387_v8  ;;  %7806 = vmatprep.subr.bf16.mxu0 %v10402_v11  ;;  %v1344_v8 = vld [vmem:[#allocation10 + $0x550] sm:$0xff]  ;;  %v1337_v11 = vld [vmem:[#allocation10 + $0x518] sm:$0xff] }
 0x26a   :  { %7970 = vmatprep.subr.bf16.mxu1 %v10404_v12  ;;  %v1345_v12 = vld [vmem:[#allocation10 + $0x558] sm:$0xff]  ;;  %v10514_v14 = vcombine.high %v1336_v58, %v1344_v8  ;;  %v10513_v29 = vcombine.low %v1336_v58, %v1344_v8 }
 0x26b   :  { %v10516_v16 = vcombine.high %v1337_v11, %v1345_v12  ;;  %v10515_v30 = vcombine.low %v1337_v11, %v1345_v12 }
 0x26c   :  { %7807 = vmatpush1.bf16.msra.mxu0 %v10401_v17  ;;  %v1352_v17 = vld [vmem:[#allocation10 + $0x590] sm:$0xff] }
 0x26d   :  { %7971 = vmatpush1.bf16.msra.mxu1 %v10403_v18  ;;  %7808 = vmatprep.subr.bf16.mxu0 %v10418_v21  ;;  %v1360_v18 = vld [vmem:[#allocation10 + $0x5d0] sm:$0xff]  ;;  %v1353_v21 = vld [vmem:[#allocation10 + $0x598] sm:$0xff] }
 0x26e   :  { %7972 = vmatprep.subr.bf16.mxu1 %v10420_v28  ;;  %v1361_v28 = vld [vmem:[#allocation10 + $0x5d8] sm:$0xff]  ;;  %v10530_v31 = vcombine.high %v1352_v17, %v1360_v18  ;;  %v10529_v40 = vcombine.low %v1352_v17, %v1360_v18 }
 0x26f   :  { %v10532_v32 = vcombine.high %v1353_v21, %v1361_v28  ;;  %v10531_v42 = vcombine.low %v1353_v21, %v1361_v28  ;;  %v1457_v17 = vld [vmem:[#allocation10 + $0x8d8] sm:$0xff]  ;;  %v1464_v28 = vld [vmem:[#allocation10 + $0x910] sm:$0xff] }
 0x270   :  { %7809 = vmatpush1.bf16.msra.mxu0 %v10417_v60  ;;  %v1368_v60 = vld [vmem:[#allocation10 + $0x610] sm:$0xff] }
 0x271   :  { %7973 = vmatpush1.bf16.msra.mxu1 %v10419_v37  ;;  %7810 = vmatprep.subr.bf16.mxu0 %v10434_v38  ;;  %v1376_v37 = vld [vmem:[#allocation10 + $0x650] sm:$0xff]  ;;  %v1369_v38 = vld [vmem:[#allocation10 + $0x618] sm:$0xff] }
 0x272   :  { %7974 = vmatprep.subr.bf16.mxu1 %v10436_v39  ;;  %v1377_v39 = vld [vmem:[#allocation10 + $0x658] sm:$0xff]  ;;  %v10546_v43 = vcombine.high %v1368_v60, %v1376_v37  ;;  %v10545_v24 = vcombine.low %v1368_v60, %v1376_v37 }
 0x273   :  { %v10548_v44 = vcombine.high %v1369_v38, %v1377_v39  ;;  %v10547_v51 = vcombine.low %v1369_v38, %v1377_v39 }
 0x274   :  { %7811 = vmatpush1.bf16.msra.mxu0 %v10433_v45  ;;  %v1384_v45 = vld [vmem:[#allocation10 + $0x690] sm:$0xff] }
 0x275   :  { %7975 = vmatpush1.bf16.msra.mxu1 %v10435_v22  ;;  %7812 = vmatprep.subr.bf16.mxu0 %v10450_v47  ;;  %v1392_v22 = vld [vmem:[#allocation10 + $0x6d0] sm:$0xff]  ;;  %v1385_v47 = vld [vmem:[#allocation10 + $0x698] sm:$0xff] }
 0x276   :  { %7976 = vmatprep.subr.bf16.mxu1 %v10452_v50  ;;  %v1393_v50 = vld [vmem:[#allocation10 + $0x6d8] sm:$0xff]  ;;  %v10562_v46 = vcombine.high %v1384_v45, %v1392_v22  ;;  %v10561_v33 = vcombine.low %v1384_v45, %v1392_v22 }
 0x277   :  { %v10564_v52 = vcombine.high %v1385_v47, %v1393_v50  ;;  %v10563_v57 = vcombine.low %v1385_v47, %v1393_v50 }
 0x278   :  { %7813 = vmatpush1.bf16.msra.mxu0 %v10449_v53  ;;  %v1400_v53 = vld [vmem:[#allocation10 + $0x710] sm:$0xff] }
 0x279   :  { %7977 = vmatpush1.bf16.msra.mxu1 %v10451_v25  ;;  %7814 = vmatprep.subr.bf16.mxu0 %v10466_v54  ;;  %v1408_v25 = vld [vmem:[#allocation10 + $0x750] sm:$0xff]  ;;  %v1401_v54 = vld [vmem:[#allocation10 + $0x718] sm:$0xff] }
 0x27a   :  { %7978 = vmatprep.subr.bf16.mxu1 %v10468_v55  ;;  %v1409_v55 = vld [vmem:[#allocation10 + $0x758] sm:$0xff]  ;;  %v10578_v59 = vcombine.high %v1400_v53, %v1408_v25  ;;  %v10577_v5 = vcombine.low %v1400_v53, %v1408_v25 }
 0x27b   :  { %v10580_v61 = vcombine.high %v1401_v54, %v1409_v55  ;;  %v10579_v7 = vcombine.low %v1401_v54, %v1409_v55 }
 0x27c   :  { %7815 = vmatpush1.bf16.msra.mxu0 %v10465_v62  ;;  %v1416_v62 = vld [vmem:[#allocation10 + $0x790] sm:$0xff] }
 0x27d   :  { %7979 = vmatpush1.bf16.msra.mxu1 %v10467_v3  ;;  %7816 = vmatprep.subr.bf16.mxu0 %v10482_v23  ;;  %v1424_v3 = vld [vmem:[#allocation10 + $0x7d0] sm:$0xff]  ;;  %v1417_v23 = vld [vmem:[#allocation10 + $0x798] sm:$0xff] }
 0x27e   :  { %7980 = vmatprep.subr.bf16.mxu1 %v10484_v4  ;;  %v1425_v4 = vld [vmem:[#allocation10 + $0x7d8] sm:$0xff]  ;;  %v10594_v63 = vcombine.high %v1416_v62, %v1424_v3  ;;  %v10593_v58 = vcombine.low %v1416_v62, %v1424_v3 }
 0x27f   :  { %v10596_v0 = vcombine.high %v1417_v23, %v1425_v4  ;;  %v10595_v8 = vcombine.low %v1417_v23, %v1425_v4 }
 0x280   :  { %7817 = vmatpush1.bf16.msra.mxu0 %v10481_v1  ;;  %v1432_v1 = vld [vmem:[#allocation10 + $0x810] sm:$0xff] }
 0x281   :  { %7981 = vmatpush1.bf16.msra.mxu1 %v10483_v9  ;;  %7818 = vmatprep.subr.bf16.mxu0 %v10498_v6  ;;  %v1440_v9 = vld [vmem:[#allocation10 + $0x850] sm:$0xff]  ;;  %v1433_v6 = vld [vmem:[#allocation10 + $0x818] sm:$0xff] }
 0x282   :  { %7982 = vmatprep.subr.bf16.mxu1 %v10500_v10  ;;  %v1441_v10 = vld [vmem:[#allocation10 + $0x858] sm:$0xff]  ;;  %v10610_v11 = vcombine.high %v1432_v1, %v1440_v9 }
 0x283   :  { %v10612_v12 = vcombine.high %v1433_v6, %v1441_v10  ;;  %v10611_v18 = vcombine.low %v1433_v6, %v1441_v10 }
 0x284   :  { %7819 = vmatpush1.bf16.msra.mxu0 %v10497_v19  ;;  %v1448_v19 = vld [vmem:[#allocation10 + $0x890] sm:$0xff] }
 0x285   :  { %7983 = vmatpush1.bf16.msra.mxu1 %v10499_v13  ;;  %7820 = vmatprep.subr.bf16.mxu0 %v10514_v14  ;;  %v1456_v13 = vld [vmem:[#allocation10 + $0x8d0] sm:$0xff]  ;;  %v10609_v14 = vcombine.low %v1432_v1, %v1440_v9 }
 0x286   :  { %7984 = vmatprep.subr.bf16.mxu1 %v10516_v16  ;;  %v1449_v16 = vld [vmem:[#allocation10 + $0x898] sm:$0xff]  ;;  %v10626_v21 = vcombine.high %v1448_v19, %v1456_v13  ;;  %v10625_v60 = vcombine.low %v1448_v19, %v1456_v13 }
 0x287   :  { %v10627_v37 = vcombine.low %v1449_v16, %v1457_v17 }
 0x288   :  { %7821 = vmatpush1.bf16.msra.mxu0 %v10513_v29  ;;  %v1472_v29 = vld [vmem:[#allocation10 + $0x950] sm:$0xff] }
 0x289   :  { %7985 = vmatpush1.bf16.msra.mxu1 %v10515_v30  ;;  %7822 = vmatprep.subr.bf16.mxu0 %v10530_v31  ;;  %v10628_v30 = vcombine.high %v1449_v16, %v1457_v17  ;;  %v1465_v31 = vld [vmem:[#allocation10 + $0x918] sm:$0xff]  ;;  %v10642_v38 = vcombine.high %v1464_v28, %v1472_v29  ;;  %v10641_v45 = vcombine.low %v1464_v28, %v1472_v29  ;;  %v1560_v17 = vld [vmem:[#allocation10 + $0xc10] sm:$0xff] }
 0x28a   :  { %7986 = vmatprep.subr.bf16.mxu1 %v10532_v32  ;;  %v1473_v32 = vld [vmem:[#allocation10 + $0x958] sm:$0xff] }
 0x28b   :  { %v10644_v39 = vcombine.high %v1465_v31, %v1473_v32  ;;  %v10643_v22 = vcombine.low %v1465_v31, %v1473_v32  ;;  %v1569_v28 = vld [vmem:[#allocation10 + $0xc58] sm:$0xff] }
 0x28c   :  { %7823 = vmatpush1.bf16.msra.mxu0 %v10529_v40  ;;  %v1480_v40 = vld [vmem:[#allocation10 + $0x990] sm:$0xff] }
 0x28d   :  { %7987 = vmatpush1.bf16.msra.mxu1 %v10531_v42  ;;  %7824 = vmatprep.subr.bf16.mxu0 %v10546_v43  ;;  %v1488_v42 = vld [vmem:[#allocation10 + $0x9d0] sm:$0xff]  ;;  %v1481_v43 = vld [vmem:[#allocation10 + $0x998] sm:$0xff] }
 0x28e   :  { %7988 = vmatprep.subr.bf16.mxu1 %v10548_v44  ;;  %v1489_v44 = vld [vmem:[#allocation10 + $0x9d8] sm:$0xff]  ;;  %v10658_v47 = vcombine.high %v1480_v40, %v1488_v42  ;;  %v10657_v53 = vcombine.low %v1480_v40, %v1488_v42 }
 0x28f   :  { %v10660_v50 = vcombine.high %v1481_v43, %v1489_v44  ;;  %v10659_v25 = vcombine.low %v1481_v43, %v1489_v44 }
 0x290   :  { %7825 = vmatpush1.bf16.msra.mxu0 %v10545_v24  ;;  %v1496_v24 = vld [vmem:[#allocation10 + $0xa10] sm:$0xff] }
 0x291   :  { %7989 = vmatpush1.bf16.msra.mxu1 %v10547_v51  ;;  %7826 = vmatprep.subr.bf16.mxu0 %v10562_v46  ;;  %v1504_v51 = vld [vmem:[#allocation10 + $0xa50] sm:$0xff]  ;;  %v1497_v46 = vld [vmem:[#allocation10 + $0xa18] sm:$0xff] }
 0x292   :  { %7990 = vmatprep.subr.bf16.mxu1 %v10564_v52  ;;  %v1505_v52 = vld [vmem:[#allocation10 + $0xa58] sm:$0xff]  ;;  %v10674_v54 = vcombine.high %v1496_v24, %v1504_v51  ;;  %v10673_v62 = vcombine.low %v1496_v24, %v1504_v51 }
 0x293   :  { %v10676_v55 = vcombine.high %v1497_v46, %v1505_v52  ;;  %v10675_v3 = vcombine.low %v1497_v46, %v1505_v52 }
 0x294   :  { %7827 = vmatpush1.bf16.msra.mxu0 %v10561_v33  ;;  %v1512_v33 = vld [vmem:[#allocation10 + $0xa90] sm:$0xff] }
 0x295   :  { %7991 = vmatpush1.bf16.msra.mxu1 %v10563_v57  ;;  %7828 = vmatprep.subr.bf16.mxu0 %v10578_v59  ;;  %v1520_v57 = vld [vmem:[#allocation10 + $0xad0] sm:$0xff]  ;;  %v1513_v59 = vld [vmem:[#allocation10 + $0xa98] sm:$0xff] }
 0x296   :  { %7992 = vmatprep.subr.bf16.mxu1 %v10580_v61  ;;  %v1521_v61 = vld [vmem:[#allocation10 + $0xad8] sm:$0xff]  ;;  %v10690_v23 = vcombine.high %v1512_v33, %v1520_v57  ;;  %v10689_v1 = vcombine.low %v1512_v33, %v1520_v57 }
 0x297   :  { %v10692_v4 = vcombine.high %v1513_v59, %v1521_v61  ;;  %v10691_v9 = vcombine.low %v1513_v59, %v1521_v61 }
 0x298   :  { %7829 = vmatpush1.bf16.msra.mxu0 %v10577_v5  ;;  %v1528_v5 = vld [vmem:[#allocation10 + $0xb10] sm:$0xff] }
 0x299   :  { %7993 = vmatpush1.bf16.msra.mxu1 %v10579_v7  ;;  %7830 = vmatprep.subr.bf16.mxu0 %v10594_v63  ;;  %v1536_v7 = vld [vmem:[#allocation10 + $0xb50] sm:$0xff]  ;;  %v1529_v63 = vld [vmem:[#allocation10 + $0xb18] sm:$0xff] }
 0x29a   :  { %7994 = vmatprep.subr.bf16.mxu1 %v10596_v0  ;;  %v1537_v0 = vld [vmem:[#allocation10 + $0xb58] sm:$0xff]  ;;  %v10706_v6 = vcombine.high %v1528_v5, %v1536_v7  ;;  %v10705_v19 = vcombine.low %v1528_v5, %v1536_v7 }
 0x29b   :  { %v10708_v10 = vcombine.high %v1529_v63, %v1537_v0  ;;  %v10707_v13 = vcombine.low %v1529_v63, %v1537_v0 }
 0x29c   :  { %7831 = vmatpush1.bf16.msra.mxu0 %v10593_v58  ;;  %v1544_v58 = vld [vmem:[#allocation10 + $0xb90] sm:$0xff] }
 0x29d   :  { %7995 = vmatpush1.bf16.msra.mxu1 %v10595_v8  ;;  %7841 = vmatprep.subr.bf16.mxu0 %v10610_v11  ;;  %v1552_v8 = vld [vmem:[#allocation10 + $0xbd0] sm:$0xff]  ;;  %v1545_v11 = vld [vmem:[#allocation10 + $0xb98] sm:$0xff] }
 0x29e   :  { %8005 = vmatprep.subr.bf16.mxu1 %v10612_v12  ;;  %v1553_v12 = vld [vmem:[#allocation10 + $0xbd8] sm:$0xff]  ;;  %v10721_v29 = vcombine.low %v1544_v58, %v1552_v8 }
 0x29f   :  { %7833 = vmatmul.mubr.bf16.vlgmr.msra.gmra.mrb[12].mxu0 %v12332_v2  ;;  %v10724_v16 = vcombine.high %v1545_v11, %v1553_v12 }
 0x2a0   :  { %7997 = vmatmul.mubr.bf16.vlgmr.msra.gmra.mrb[12].mxu1 %v12332_v2  ;;  %7842 = vmatpush1.bf16.msra.mxu0 %v10609_v14  ;;  %v10722_v14 = vcombine.high %v1544_v58, %v1552_v8 }
 0x2a1   :  { %7873 = vmatprep.mubr.bf16.mxu0 %v12348_v15  ;;  %8006 = vmatpush1.bf16.msra.mxu1 %v10611_v18  ;;  %v1568_v18 = vld [vmem:[#allocation10 + $0xc50] sm:$0xff] }
 0x2a2   :  { %8037 = vmatprep.mubr.bf16.mxu1 %v12348_v15  ;;  %7843 = vmatprep.subr.bf16.mxu0 %v10626_v21  ;;  %v1561_v21 = vld [vmem:[#allocation10 + $0xc18] sm:$0xff]  ;;  %v10738_v31 = vcombine.high %v1560_v17, %v1568_v18  ;;  %v10737_v40 = vcombine.low %v1560_v17, %v1568_v18 }
 0x2a3   :  { %8007 = vmatprep.subr.bf16.mxu1 %v10628_v30  ;;  %v10723_v30 = vcombine.low %v1545_v11, %v1553_v12  ;;  %v10740_v32 = vcombine.high %v1561_v21, %v1569_v28  ;;  %v10739_v42 = vcombine.low %v1561_v21, %v1569_v28 }
 0x2a4   :  { %7844 = vmatpush1.bf16.msra.mxu0 %v10625_v60  ;;  %v1576_v60 = vld [vmem:[#allocation10 + $0xc90] sm:$0xff] }
 0x2a5   :  { %8008 = vmatpush1.bf16.msra.mxu1 %v10627_v37  ;;  %7845 = vmatprep.subr.bf16.mxu0 %v10642_v38  ;;  %v1584_v37 = vld [vmem:[#allocation10 + $0xcd0] sm:$0xff]  ;;  %v1577_v38 = vld [vmem:[#allocation10 + $0xc98] sm:$0xff] }
 0x2a6   :  { %8009 = vmatprep.subr.bf16.mxu1 %v10644_v39  ;;  %v1585_v39 = vld [vmem:[#allocation10 + $0xcd8] sm:$0xff]  ;;  %v10754_v43 = vcombine.high %v1576_v60, %v1584_v37  ;;  %v10753_v24 = vcombine.low %v1576_v60, %v1584_v37 }
 0x2a7   :  { %v10756_v44 = vcombine.high %v1577_v38, %v1585_v39  ;;  %v10755_v51 = vcombine.low %v1577_v38, %v1585_v39 }
 0x2a8   :  { %7846 = vmatpush1.bf16.msra.mxu0 %v10641_v45  ;;  %v1592_v45 = vld [vmem:[#allocation10 + $0xd10] sm:$0xff] }
 0x2a9   :  { %8010 = vmatpush1.bf16.msra.mxu1 %v10643_v22  ;;  %7847 = vmatprep.subr.bf16.mxu0 %v10658_v47  ;;  %v1600_v22 = vld [vmem:[#allocation10 + $0xd50] sm:$0xff]  ;;  %v1593_v47 = vld [vmem:[#allocation10 + $0xd18] sm:$0xff] }
 0x2aa   :  { %8011 = vmatprep.subr.bf16.mxu1 %v10660_v50  ;;  %v1601_v50 = vld [vmem:[#allocation10 + $0xd58] sm:$0xff]  ;;  %v10770_v46 = vcombine.high %v1592_v45, %v1600_v22  ;;  %v10769_v33 = vcombine.low %v1592_v45, %v1600_v22 }
 0x2ab   :  { %v10772_v52 = vcombine.high %v1593_v47, %v1601_v50  ;;  %v10771_v57 = vcombine.low %v1593_v47, %v1601_v50 }
 0x2ac   :  { %7848 = vmatpush1.bf16.msra.mxu0 %v10657_v53  ;;  %v1608_v53 = vld [vmem:[#allocation10 + $0xd90] sm:$0xff] }
 0x2ad   :  { %8012 = vmatpush1.bf16.msra.mxu1 %v10659_v25  ;;  %7849 = vmatprep.subr.bf16.mxu0 %v10674_v54  ;;  %v1616_v25 = vld [vmem:[#allocation10 + $0xdd0] sm:$0xff]  ;;  %v1609_v54 = vld [vmem:[#allocation10 + $0xd98] sm:$0xff] }
 0x2ae   :  { %8013 = vmatprep.subr.bf16.mxu1 %v10676_v55  ;;  %v1617_v55 = vld [vmem:[#allocation10 + $0xdd8] sm:$0xff]  ;;  %v10786_v59 = vcombine.high %v1608_v53, %v1616_v25  ;;  %v10785_v5 = vcombine.low %v1608_v53, %v1616_v25 }
 0x2af   :  { %v10788_v61 = vcombine.high %v1609_v54, %v1617_v55  ;;  %v10787_v7 = vcombine.low %v1609_v54, %v1617_v55  ;;  %v1713_v53 = vld [vmem:[#allocation10 + $0x10d8] sm:$0xff]  ;;  %v1720_v55 = vld [vmem:[#allocation10 + $0x1110] sm:$0xff] }
 0x2b0   :  { %7850 = vmatpush1.bf16.msra.mxu0 %v10673_v62  ;;  %v1624_v62 = vld [vmem:[#allocation10 + $0xe10] sm:$0xff] }
 0x2b1   :  { %8014 = vmatpush1.bf16.msra.mxu1 %v10675_v3  ;;  %7851 = vmatprep.subr.bf16.mxu0 %v10690_v23  ;;  %v1632_v3 = vld [vmem:[#allocation10 + $0xe50] sm:$0xff]  ;;  %v1625_v23 = vld [vmem:[#allocation10 + $0xe18] sm:$0xff] }
 0x2b2   :  { %8015 = vmatprep.subr.bf16.mxu1 %v10692_v4  ;;  %v1633_v4 = vld [vmem:[#allocation10 + $0xe58] sm:$0xff]  ;;  %v10802_v63 = vcombine.high %v1624_v62, %v1632_v3  ;;  %v10801_v58 = vcombine.low %v1624_v62, %v1632_v3 }
 0x2b3   :  { %v10804_v0 = vcombine.high %v1625_v23, %v1633_v4  ;;  %v10803_v8 = vcombine.low %v1625_v23, %v1633_v4 }
 0x2b4   :  { %7852 = vmatpush1.bf16.msra.mxu0 %v10689_v1  ;;  %v1640_v1 = vld [vmem:[#allocation10 + $0xe90] sm:$0xff] }
 0x2b5   :  { %8016 = vmatpush1.bf16.msra.mxu1 %v10691_v9  ;;  %7853 = vmatprep.subr.bf16.mxu0 %v10706_v6  ;;  %v1648_v9 = vld [vmem:[#allocation10 + $0xed0] sm:$0xff]  ;;  %v1641_v6 = vld [vmem:[#allocation10 + $0xe98] sm:$0xff] }
 0x2b6   :  { %8017 = vmatprep.subr.bf16.mxu1 %v10708_v10  ;;  %v1649_v10 = vld [vmem:[#allocation10 + $0xed8] sm:$0xff]  ;;  %v10818_v11 = vcombine.high %v1640_v1, %v1648_v9  ;;  %v10817_v17 = vcombine.low %v1640_v1, %v1648_v9 }
 0x2b7   :  { %v10820_v12 = vcombine.high %v1641_v6, %v1649_v10  ;;  %v10819_v18 = vcombine.low %v1641_v6, %v1649_v10 }
 0x2b8   :  { %7854 = vmatpush1.bf16.msra.mxu0 %v10705_v19  ;;  %v1656_v19 = vld [vmem:[#allocation10 + $0xf10] sm:$0xff] }
 0x2b9   :  { %8018 = vmatpush1.bf16.msra.mxu1 %v10707_v13  ;;  %7855 = vmatprep.subr.bf16.mxu0 %v10722_v14  ;;  %v1664_v13 = vld [vmem:[#allocation10 + $0xf50] sm:$0xff]  ;;  %v1657_v14 = vld [vmem:[#allocation10 + $0xf18] sm:$0xff] }
 0x2ba   :  { %8019 = vmatprep.subr.bf16.mxu1 %v10724_v16  ;;  %v1665_v16 = vld [vmem:[#allocation10 + $0xf58] sm:$0xff]  ;;  %v10834_v21 = vcombine.high %v1656_v19, %v1664_v13  ;;  %v10833_v60 = vcombine.low %v1656_v19, %v1664_v13 }
 0x2bb   :  { %v10836_v28 = vcombine.high %v1657_v14, %v1665_v16  ;;  %v10835_v37 = vcombine.low %v1657_v14, %v1665_v16 }
 0x2bc   :  { %7856 = vmatpush1.bf16.msra.mxu0 %v10721_v29  ;;  %v1672_v29 = vld [vmem:[#allocation10 + $0xf90] sm:$0xff] }
 0x2bd   :  { %8020 = vmatpush1.bf16.msra.mxu1 %v10723_v30  ;;  %7857 = vmatprep.subr.bf16.mxu0 %v10738_v31  ;;  %v1680_v30 = vld [vmem:[#allocation10 + $0xfd0] sm:$0xff]  ;;  %v1673_v31 = vld [vmem:[#allocation10 + $0xf98] sm:$0xff] }
 0x2be   :  { %8021 = vmatprep.subr.bf16.mxu1 %v10740_v32  ;;  %v1681_v32 = vld [vmem:[#allocation10 + $0xfd8] sm:$0xff]  ;;  %v10850_v38 = vcombine.high %v1672_v29, %v1680_v30  ;;  %v10849_v45 = vcombine.low %v1672_v29, %v1680_v30 }
 0x2bf   :  { %v10852_v39 = vcombine.high %v1673_v31, %v1681_v32  ;;  %v10851_v22 = vcombine.low %v1673_v31, %v1681_v32 }
 0x2c0   :  { %7858 = vmatpush1.bf16.msra.mxu0 %v10737_v40  ;;  %v1688_v40 = vld [vmem:[#allocation10 + $0x1010] sm:$0xff] }
 0x2c1   :  { %8022 = vmatpush1.bf16.msra.mxu1 %v10739_v42  ;;  %7859 = vmatprep.subr.bf16.mxu0 %v10754_v43  ;;  %v1696_v42 = vld [vmem:[#allocation10 + $0x1050] sm:$0xff]  ;;  %v1689_v43 = vld [vmem:[#allocation10 + $0x1018] sm:$0xff] }
 0x2c2   :  { %8023 = vmatprep.subr.bf16.mxu1 %v10756_v44  ;;  %v1697_v44 = vld [vmem:[#allocation10 + $0x1058] sm:$0xff]  ;;  %v10866_v47 = vcombine.high %v1688_v40, %v1696_v42 }
 0x2c3   :  { %v10868_v50 = vcombine.high %v1689_v43, %v1697_v44  ;;  %v10867_v25 = vcombine.low %v1689_v43, %v1697_v44 }
 0x2c4   :  { %7860 = vmatpush1.bf16.msra.mxu0 %v10753_v24  ;;  %v1704_v24 = vld [vmem:[#allocation10 + $0x1090] sm:$0xff] }
 0x2c5   :  { %8024 = vmatpush1.bf16.msra.mxu1 %v10755_v51  ;;  %7861 = vmatprep.subr.bf16.mxu0 %v10770_v46  ;;  %v1712_v51 = vld [vmem:[#allocation10 + $0x10d0] sm:$0xff]  ;;  %v10865_v46 = vcombine.low %v1688_v40, %v1696_v42 }
 0x2c6   :  { %8025 = vmatprep.subr.bf16.mxu1 %v10772_v52  ;;  %v1705_v52 = vld [vmem:[#allocation10 + $0x1098] sm:$0xff]  ;;  %v10882_v54 = vcombine.high %v1704_v24, %v1712_v51  ;;  %v10881_v62 = vcombine.low %v1704_v24, %v1712_v51 }
 0x2c7   :  { %v10883_v3 = vcombine.low %v1705_v52, %v1713_v53 }
 0x2c8   :  { %7862 = vmatpush1.bf16.msra.mxu0 %v10769_v33  ;;  %v1728_v33 = vld [vmem:[#allocation10 + $0x1150] sm:$0xff] }
 0x2c9   :  { %8026 = vmatpush1.bf16.msra.mxu1 %v10771_v57  ;;  %7863 = vmatprep.subr.bf16.mxu0 %v10786_v59  ;;  %v10884_v57 = vcombine.high %v1705_v52, %v1713_v53  ;;  %v1721_v59 = vld [vmem:[#allocation10 + $0x1118] sm:$0xff]  ;;  %v10898_v23 = vcombine.high %v1720_v55, %v1728_v33  ;;  %v10897_v1 = vcombine.low %v1720_v55, %v1728_v33  ;;  %v1816_v53 = vld [vmem:[#allocation10 + $0x1410] sm:$0xff] }
 0x2ca   :  { %8027 = vmatprep.subr.bf16.mxu1 %v10788_v61  ;;  %v1729_v61 = vld [vmem:[#allocation10 + $0x1158] sm:$0xff] }
 0x2cb   :  { %v10900_v4 = vcombine.high %v1721_v59, %v1729_v61  ;;  %v10899_v9 = vcombine.low %v1721_v59, %v1729_v61  ;;  %v1825_v55 = vld [vmem:[#allocation10 + $0x1458] sm:$0xff] }
 0x2cc   :  { %7864 = vmatpush1.bf16.msra.mxu0 %v10785_v5  ;;  %v1736_v5 = vld [vmem:[#allocation10 + $0x1190] sm:$0xff] }
 0x2cd   :  { %8028 = vmatpush1.bf16.msra.mxu1 %v10787_v7  ;;  %7865 = vmatprep.subr.bf16.mxu0 %v10802_v63  ;;  %v1744_v7 = vld [vmem:[#allocation10 + $0x11d0] sm:$0xff]  ;;  %v1737_v63 = vld [vmem:[#allocation10 + $0x1198] sm:$0xff] }
 0x2ce   :  { %8029 = vmatprep.subr.bf16.mxu1 %v10804_v0  ;;  %v1745_v0 = vld [vmem:[#allocation10 + $0x11d8] sm:$0xff]  ;;  %v10914_v6 = vcombine.high %v1736_v5, %v1744_v7  ;;  %v10913_v19 = vcombine.low %v1736_v5, %v1744_v7 }
 0x2cf   :  { %v10916_v10 = vcombine.high %v1737_v63, %v1745_v0  ;;  %v10915_v13 = vcombine.low %v1737_v63, %v1745_v0 }
 0x2d0   :  { %7866 = vmatpush1.bf16.msra.mxu0 %v10801_v58  ;;  %v1752_v58 = vld [vmem:[#allocation10 + $0x1210] sm:$0xff] }
 0x2d1   :  { %8030 = vmatpush1.bf16.msra.mxu1 %v10803_v8  ;;  %7867 = vmatprep.subr.bf16.mxu0 %v10818_v11  ;;  %v1760_v8 = vld [vmem:[#allocation10 + $0x1250] sm:$0xff]  ;;  %v1753_v11 = vld [vmem:[#allocation10 + $0x1218] sm:$0xff] }
 0x2d2   :  { %8031 = vmatprep.subr.bf16.mxu1 %v10820_v12  ;;  %v1761_v12 = vld [vmem:[#allocation10 + $0x1258] sm:$0xff]  ;;  %v10930_v14 = vcombine.high %v1752_v58, %v1760_v8  ;;  %v10929_v29 = vcombine.low %v1752_v58, %v1760_v8 }
 0x2d3   :  { %v10932_v16 = vcombine.high %v1753_v11, %v1761_v12  ;;  %v10931_v30 = vcombine.low %v1753_v11, %v1761_v12 }
 0x2d4   :  { %7868 = vmatpush1.bf16.msra.mxu0 %v10817_v17  ;;  %v1768_v17 = vld [vmem:[#allocation10 + $0x1290] sm:$0xff] }
 0x2d5   :  { %8032 = vmatpush1.bf16.msra.mxu1 %v10819_v18  ;;  %7869 = vmatprep.subr.bf16.mxu0 %v10834_v21  ;;  %v1776_v18 = vld [vmem:[#allocation10 + $0x12d0] sm:$0xff]  ;;  %v1769_v21 = vld [vmem:[#allocation10 + $0x1298] sm:$0xff] }
 0x2d6   :  { %8033 = vmatprep.subr.bf16.mxu1 %v10836_v28  ;;  %v1777_v28 = vld [vmem:[#allocation10 + $0x12d8] sm:$0xff]  ;;  %v10946_v31 = vcombine.high %v1768_v17, %v1776_v18  ;;  %v10945_v40 = vcombine.low %v1768_v17, %v1776_v18 }
 0x2d7   :  { %v10948_v32 = vcombine.high %v1769_v21, %v1777_v28  ;;  %v10947_v42 = vcombine.low %v1769_v21, %v1777_v28 }
 0x2d8   :  { %7870 = vmatpush1.bf16.msra.mxu0 %v10833_v60  ;;  %v1784_v60 = vld [vmem:[#allocation10 + $0x1310] sm:$0xff] }
 0x2d9   :  { %8034 = vmatpush1.bf16.msra.mxu1 %v10835_v37  ;;  %7871 = vmatprep.subr.bf16.mxu0 %v10850_v38  ;;  %v1792_v37 = vld [vmem:[#allocation10 + $0x1350] sm:$0xff]  ;;  %v1785_v38 = vld [vmem:[#allocation10 + $0x1318] sm:$0xff] }
 0x2da   :  { %8035 = vmatprep.subr.bf16.mxu1 %v10852_v39  ;;  %v1793_v39 = vld [vmem:[#allocation10 + $0x1358] sm:$0xff]  ;;  %v10962_v43 = vcombine.high %v1784_v60, %v1792_v37  ;;  %v10961_v24 = vcombine.low %v1784_v60, %v1792_v37 }
 0x2db   :  { %v10964_v44 = vcombine.high %v1785_v38, %v1793_v39  ;;  %v10963_v51 = vcombine.low %v1785_v38, %v1793_v39 }
 0x2dc   :  { %7872 = vmatpush1.bf16.msra.mxu0 %v10849_v45  ;;  %v1800_v45 = vld [vmem:[#allocation10 + $0x1390] sm:$0xff] }
 0x2dd   :  { %8036 = vmatpush1.bf16.msra.mxu1 %v10851_v22  ;;  %7882 = vmatprep.subr.bf16.mxu0 %v10866_v47  ;;  %v1808_v22 = vld [vmem:[#allocation10 + $0x13d0] sm:$0xff]  ;;  %v1801_v47 = vld [vmem:[#allocation10 + $0x1398] sm:$0xff] }
 0x2de   :  { %8046 = vmatprep.subr.bf16.mxu1 %v10868_v50  ;;  %v1809_v50 = vld [vmem:[#allocation10 + $0x13d8] sm:$0xff]  ;;  %v10977_v33 = vcombine.low %v1800_v45, %v1808_v22 }
 0x2df   :  { %7874 = vmatmul.mubr.bf16.vlgmr.msra.gmra.mrb[12].mxu0 %v12374_v41  ;;  %v10980_v52 = vcombine.high %v1801_v47, %v1809_v50 }
 0x2e0   :  { %8038 = vmatmul.mubr.bf16.vlgmr.msra.gmra.mrb[12].mxu1 %v12374_v41  ;;  %7883 = vmatpush1.bf16.msra.mxu0 %v10865_v46  ;;  %v10978_v46 = vcombine.high %v1800_v45, %v1808_v22 }
 0x2e1   :  { %7914 = vmatprep.mubr.bf16.mxu0 %v12377_v48  ;;  %8047 = vmatpush1.bf16.msra.mxu1 %v10867_v25  ;;  %v1824_v25 = vld [vmem:[#allocation10 + $0x1450] sm:$0xff] }
 0x2e2   :  { %8078 = vmatprep.mubr.bf16.mxu1 %v12377_v48  ;;  %7884 = vmatprep.subr.bf16.mxu0 %v10882_v54  ;;  %v1817_v54 = vld [vmem:[#allocation10 + $0x1418] sm:$0xff]  ;;  %v10994_v59 = vcombine.high %v1816_v53, %v1824_v25  ;;  %v10993_v5 = vcombine.low %v1816_v53, %v1824_v25 }
 0x2e3   :  { %8048 = vmatprep.subr.bf16.mxu1 %v10884_v57  ;;  %v10979_v57 = vcombine.low %v1801_v47, %v1809_v50  ;;  %v10996_v61 = vcombine.high %v1817_v54, %v1825_v55  ;;  %v10995_v7 = vcombine.low %v1817_v54, %v1825_v55 }
 0x2e4   :  { %7885 = vmatpush1.bf16.msra.mxu0 %v10881_v62  ;;  %v1832_v62 = vld [vmem:[#allocation10 + $0x1490] sm:$0xff] }
 0x2e5   :  { %8049 = vmatpush1.bf16.msra.mxu1 %v10883_v3  ;;  %7886 = vmatprep.subr.bf16.mxu0 %v10898_v23  ;;  %v1840_v3 = vld [vmem:[#allocation10 + $0x14d0] sm:$0xff]  ;;  %v1833_v23 = vld [vmem:[#allocation10 + $0x1498] sm:$0xff] }
 0x2e6   :  { %8050 = vmatprep.subr.bf16.mxu1 %v10900_v4  ;;  %v1841_v4 = vld [vmem:[#allocation10 + $0x14d8] sm:$0xff]  ;;  %v11010_v63 = vcombine.high %v1832_v62, %v1840_v3  ;;  %v11009_v58 = vcombine.low %v1832_v62, %v1840_v3 }
 0x2e7   :  { %v11012_v0 = vcombine.high %v1833_v23, %v1841_v4  ;;  %v11011_v8 = vcombine.low %v1833_v23, %v1841_v4 }
 0x2e8   :  { %7887 = vmatpush1.bf16.msra.mxu0 %v10897_v1  ;;  %v1848_v1 = vld [vmem:[#allocation10 + $0x1510] sm:$0xff] }
 0x2e9   :  { %8051 = vmatpush1.bf16.msra.mxu1 %v10899_v9  ;;  %7888 = vmatprep.subr.bf16.mxu0 %v10914_v6  ;;  %v1856_v9 = vld [vmem:[#allocation10 + $0x1550] sm:$0xff]  ;;  %v1849_v6 = vld [vmem:[#allocation10 + $0x1518] sm:$0xff] }
 0x2ea   :  { %8052 = vmatprep.subr.bf16.mxu1 %v10916_v10  ;;  %v1857_v10 = vld [vmem:[#allocation10 + $0x1558] sm:$0xff]  ;;  %v11026_v11 = vcombine.high %v1848_v1, %v1856_v9  ;;  %v11025_v17 = vcombine.low %v1848_v1, %v1856_v9 }
 0x2eb   :  { %v11028_v12 = vcombine.high %v1849_v6, %v1857_v10  ;;  %v11027_v18 = vcombine.low %v1849_v6, %v1857_v10 }
 0x2ec   :  { %7889 = vmatpush1.bf16.msra.mxu0 %v10913_v19  ;;  %v1864_v19 = vld [vmem:[#allocation10 + $0x1590] sm:$0xff] }
 0x2ed   :  { %8053 = vmatpush1.bf16.msra.mxu1 %v10915_v13  ;;  %7890 = vmatprep.subr.bf16.mxu0 %v10930_v14  ;;  %v1872_v13 = vld [vmem:[#allocation10 + $0x15d0] sm:$0xff]  ;;  %v1865_v14 = vld [vmem:[#allocation10 + $0x1598] sm:$0xff] }
 0x2ee   :  { %8054 = vmatprep.subr.bf16.mxu1 %v10932_v16  ;;  %v1873_v16 = vld [vmem:[#allocation10 + $0x15d8] sm:$0xff]  ;;  %v11042_v21 = vcombine.high %v1864_v19, %v1872_v13  ;;  %v11041_v60 = vcombine.low %v1864_v19, %v1872_v13 }
 0x2ef   :  { %v11044_v28 = vcombine.high %v1865_v14, %v1873_v16  ;;  %v11043_v37 = vcombine.low %v1865_v14, %v1873_v16  ;;  %v1969_v19 = vld [vmem:[#allocation10 + $0x18d8] sm:$0xff]  ;;  %v1976_v16 = vld [vmem:[#allocation10 + $0x1910] sm:$0xff] }
 0x2f0   :  { %7891 = vmatpush1.bf16.msra.mxu0 %v10929_v29  ;;  %v1880_v29 = vld [vmem:[#allocation10 + $0x1610] sm:$0xff] }
 0x2f1   :  { %8055 = vmatpush1.bf16.msra.mxu1 %v10931_v30  ;;  %7892 = vmatprep.subr.bf16.mxu0 %v10946_v31  ;;  %v1888_v30 = vld [vmem:[#allocation10 + $0x1650] sm:$0xff]  ;;  %v1881_v31 = vld [vmem:[#allocation10 + $0x1618] sm:$0xff] }
 0x2f2   :  { %8056 = vmatprep.subr.bf16.mxu1 %v10948_v32  ;;  %v1889_v32 = vld [vmem:[#allocation10 + $0x1658] sm:$0xff]  ;;  %v11058_v38 = vcombine.high %v1880_v29, %v1888_v30  ;;  %v11057_v45 = vcombine.low %v1880_v29, %v1888_v30 }
 0x2f3   :  { %v11060_v39 = vcombine.high %v1881_v31, %v1889_v32  ;;  %v11059_v22 = vcombine.low %v1881_v31, %v1889_v32 }
 0x2f4   :  { %7893 = vmatpush1.bf16.msra.mxu0 %v10945_v40  ;;  %v1896_v40 = vld [vmem:[#allocation10 + $0x1690] sm:$0xff] }
 0x2f5   :  { %8057 = vmatpush1.bf16.msra.mxu1 %v10947_v42  ;;  %7894 = vmatprep.subr.bf16.mxu0 %v10962_v43  ;;  %v1904_v42 = vld [vmem:[#allocation10 + $0x16d0] sm:$0xff]  ;;  %v1897_v43 = vld [vmem:[#allocation10 + $0x1698] sm:$0xff] }
 0x2f6   :  { %8058 = vmatprep.subr.bf16.mxu1 %v10964_v44  ;;  %v1905_v44 = vld [vmem:[#allocation10 + $0x16d8] sm:$0xff]  ;;  %v11074_v47 = vcombine.high %v1896_v40, %v1904_v42  ;;  %v11073_v53 = vcombine.low %v1896_v40, %v1904_v42 }
 0x2f7   :  { %v11076_v50 = vcombine.high %v1897_v43, %v1905_v44  ;;  %v11075_v25 = vcombine.low %v1897_v43, %v1905_v44 }
 0x2f8   :  { %7895 = vmatpush1.bf16.msra.mxu0 %v10961_v24  ;;  %v1912_v24 = vld [vmem:[#allocation10 + $0x1710] sm:$0xff] }
 0x2f9   :  { %8059 = vmatpush1.bf16.msra.mxu1 %v10963_v51  ;;  %7896 = vmatprep.subr.bf16.mxu0 %v10978_v46  ;;  %v1920_v51 = vld [vmem:[#allocation10 + $0x1750] sm:$0xff]  ;;  %v1913_v46 = vld [vmem:[#allocation10 + $0x1718] sm:$0xff] }
 0x2fa   :  { %8060 = vmatprep.subr.bf16.mxu1 %v10980_v52  ;;  %v1921_v52 = vld [vmem:[#allocation10 + $0x1758] sm:$0xff]  ;;  %v11090_v54 = vcombine.high %v1912_v24, %v1920_v51  ;;  %v11089_v62 = vcombine.low %v1912_v24, %v1920_v51 }
 0x2fb   :  { %v11092_v55 = vcombine.high %v1913_v46, %v1921_v52  ;;  %v11091_v3 = vcombine.low %v1913_v46, %v1921_v52 }
 0x2fc   :  { %7897 = vmatpush1.bf16.msra.mxu0 %v10977_v33  ;;  %v1928_v33 = vld [vmem:[#allocation10 + $0x1790] sm:$0xff] }
 0x2fd   :  { %8061 = vmatpush1.bf16.msra.mxu1 %v10979_v57  ;;  %7898 = vmatprep.subr.bf16.mxu0 %v10994_v59  ;;  %v1936_v57 = vld [vmem:[#allocation10 + $0x17d0] sm:$0xff]  ;;  %v1929_v59 = vld [vmem:[#allocation10 + $0x1798] sm:$0xff] }
 0x2fe   :  { %8062 = vmatprep.subr.bf16.mxu1 %v10996_v61  ;;  %v1937_v61 = vld [vmem:[#allocation10 + $0x17d8] sm:$0xff]  ;;  %v11106_v23 = vcombine.high %v1928_v33, %v1936_v57  ;;  %v11105_v1 = vcombine.low %v1928_v33, %v1936_v57 }
 0x2ff   :  { %v11108_v4 = vcombine.high %v1929_v59, %v1937_v61  ;;  %v11107_v9 = vcombine.low %v1929_v59, %v1937_v61 }
 0x300   :  { %7899 = vmatpush1.bf16.msra.mxu0 %v10993_v5  ;;  %v1944_v5 = vld [vmem:[#allocation10 + $0x1810] sm:$0xff] }
 0x301   :  { %8063 = vmatpush1.bf16.msra.mxu1 %v10995_v7  ;;  %7900 = vmatprep.subr.bf16.mxu0 %v11010_v63  ;;  %v1952_v7 = vld [vmem:[#allocation10 + $0x1850] sm:$0xff]  ;;  %v1945_v63 = vld [vmem:[#allocation10 + $0x1818] sm:$0xff] }
 0x302   :  { %8064 = vmatprep.subr.bf16.mxu1 %v11012_v0  ;;  %v1953_v0 = vld [vmem:[#allocation10 + $0x1858] sm:$0xff]  ;;  %v11122_v6 = vcombine.high %v1944_v5, %v1952_v7 }
 0x303   :  { %v11124_v10 = vcombine.high %v1945_v63, %v1953_v0  ;;  %v11123_v13 = vcombine.low %v1945_v63, %v1953_v0 }
 0x304   :  { %7901 = vmatpush1.bf16.msra.mxu0 %v11009_v58  ;;  %v1960_v58 = vld [vmem:[#allocation10 + $0x1890] sm:$0xff] }
 0x305   :  { %8065 = vmatpush1.bf16.msra.mxu1 %v11011_v8  ;;  %7902 = vmatprep.subr.bf16.mxu0 %v11026_v11  ;;  %v1968_v8 = vld [vmem:[#allocation10 + $0x18d0] sm:$0xff]  ;;  %v11121_v11 = vcombine.low %v1944_v5, %v1952_v7 }
 0x306   :  { %8066 = vmatprep.subr.bf16.mxu1 %v11028_v12  ;;  %v1961_v12 = vld [vmem:[#allocation10 + $0x1898] sm:$0xff]  ;;  %v11138_v14 = vcombine.high %v1960_v58, %v1968_v8  ;;  %v11137_v29 = vcombine.low %v1960_v58, %v1968_v8 }
 0x307   :  { %v11139_v30 = vcombine.low %v1961_v12, %v1969_v19 }
 0x308   :  { %7903 = vmatpush1.bf16.msra.mxu0 %v11025_v17  ;;  %v1984_v17 = vld [vmem:[#allocation10 + $0x1950] sm:$0xff] }
 0x309   :  { %8067 = vmatpush1.bf16.msra.mxu1 %v11027_v18  ;;  %7904 = vmatprep.subr.bf16.mxu0 %v11042_v21  ;;  %v11140_v18 = vcombine.high %v1961_v12, %v1969_v19  ;;  %v1977_v21 = vld [vmem:[#allocation10 + $0x1918] sm:$0xff]  ;;  %v11154_v31 = vcombine.high %v1976_v16, %v1984_v17  ;;  %v11153_v40 = vcombine.low %v1976_v16, %v1984_v17 }
 0x30a   :  { %8068 = vmatprep.subr.bf16.mxu1 %v11044_v28  ;;  %v1985_v28 = vld [vmem:[#allocation10 + $0x1958] sm:$0xff] }
 0x30b   :  { %v11156_v32 = vcombine.high %v1977_v21, %v1985_v28  ;;  %v11155_v42 = vcombine.low %v1977_v21, %v1985_v28  ;;  %v2065_v12 = vld [vmem:[#allocation10 + $0x1bd8] sm:$0xff] }
 0x30c   :  { %7905 = vmatpush1.bf16.msra.mxu0 %v11041_v60  ;;  %v1992_v60 = vld [vmem:[#allocation10 + $0x1990] sm:$0xff] }
 0x30d   :  { %8069 = vmatpush1.bf16.msra.mxu1 %v11043_v37  ;;  %7906 = vmatprep.subr.bf16.mxu0 %v11058_v38  ;;  %v2000_v37 = vld [vmem:[#allocation10 + $0x19d0] sm:$0xff]  ;;  %v1993_v38 = vld [vmem:[#allocation10 + $0x1998] sm:$0xff] }
 0x30e   :  { %8070 = vmatprep.subr.bf16.mxu1 %v11060_v39  ;;  %v2001_v39 = vld [vmem:[#allocation10 + $0x19d8] sm:$0xff]  ;;  %v11170_v43 = vcombine.high %v1992_v60, %v2000_v37  ;;  %v11169_v24 = vcombine.low %v1992_v60, %v2000_v37 }
 0x30f   :  { %v11172_v44 = vcombine.high %v1993_v38, %v2001_v39  ;;  %v11171_v51 = vcombine.low %v1993_v38, %v2001_v39 }
 0x310   :  { %7907 = vmatpush1.bf16.msra.mxu0 %v11057_v45  ;;  %v2008_v45 = vld [vmem:[#allocation10 + $0x1a10] sm:$0xff] }
 0x311   :  { %8071 = vmatpush1.bf16.msra.mxu1 %v11059_v22  ;;  %7908 = vmatprep.subr.bf16.mxu0 %v11074_v47  ;;  %v2016_v22 = vld [vmem:[#allocation10 + $0x1a50] sm:$0xff]  ;;  %v2009_v47 = vld [vmem:[#allocation10 + $0x1a18] sm:$0xff] }
 0x312   :  { %8072 = vmatprep.subr.bf16.mxu1 %v11076_v50  ;;  %v2017_v50 = vld [vmem:[#allocation10 + $0x1a58] sm:$0xff]  ;;  %v11186_v46 = vcombine.high %v2008_v45, %v2016_v22  ;;  %v11185_v33 = vcombine.low %v2008_v45, %v2016_v22 }
 0x313   :  { %v11188_v52 = vcombine.high %v2009_v47, %v2017_v50  ;;  %v11187_v57 = vcombine.low %v2009_v47, %v2017_v50 }
 0x314   :  { %7909 = vmatpush1.bf16.msra.mxu0 %v11073_v53  ;;  %v2024_v53 = vld [vmem:[#allocation10 + $0x1a90] sm:$0xff] }
 0x315   :  { %8073 = vmatpush1.bf16.msra.mxu1 %v11075_v25  ;;  %7910 = vmatprep.subr.bf16.mxu0 %v11090_v54  ;;  %v2032_v25 = vld [vmem:[#allocation10 + $0x1ad0] sm:$0xff]  ;;  %v2025_v54 = vld [vmem:[#allocation10 + $0x1a98] sm:$0xff] }
 0x316   :  { %8074 = vmatprep.subr.bf16.mxu1 %v11092_v55  ;;  %v2033_v55 = vld [vmem:[#allocation10 + $0x1ad8] sm:$0xff]  ;;  %v11202_v59 = vcombine.high %v2024_v53, %v2032_v25  ;;  %v11201_v5 = vcombine.low %v2024_v53, %v2032_v25 }
 0x317   :  { %v11204_v61 = vcombine.high %v2025_v54, %v2033_v55  ;;  %v11203_v7 = vcombine.low %v2025_v54, %v2033_v55 }
 0x318   :  { %7911 = vmatpush1.bf16.msra.mxu0 %v11089_v62  ;;  %v2040_v62 = vld [vmem:[#allocation10 + $0x1b10] sm:$0xff] }
 0x319   :  { %8075 = vmatpush1.bf16.msra.mxu1 %v11091_v3  ;;  %7912 = vmatprep.subr.bf16.mxu0 %v11106_v23  ;;  %v2048_v3 = vld [vmem:[#allocation10 + $0x1b50] sm:$0xff]  ;;  %v2041_v23 = vld [vmem:[#allocation10 + $0x1b18] sm:$0xff] }
 0x31a   :  { %8076 = vmatprep.subr.bf16.mxu1 %v11108_v4  ;;  %v2049_v4 = vld [vmem:[#allocation10 + $0x1b58] sm:$0xff]  ;;  %v11218_v63 = vcombine.high %v2040_v62, %v2048_v3 }
 0x31c   :  { %7913 = vmatpush1.bf16.msra.mxu0 %v11105_v1 }
 0x31d   :  { %8077 = vmatpush1.bf16.msra.mxu1 %v11107_v9  ;;  %7923 = vmatprep.subr.bf16.mxu0 %v11122_v6  ;;  %v11220_v9 = vcombine.high %v2041_v23, %v2049_v4  ;;  %v2056_v6 = vld [vmem:[#allocation10 + $0x1b90] sm:$0xff] }
 0x31e   :  { %8087 = vmatprep.subr.bf16.mxu1 %v11124_v10  ;;  %v2064_v10 = vld [vmem:[#allocation10 + $0x1bd0] sm:$0xff] }
 0x31f   :  { %7915 = vmatmul.mubr.bf16.vlgmr.msra.gmra.mrb[12].mxu0 %v12397_v20  ;;  %v11234_v21 = vcombine.high %v2056_v6, %v2064_v10  ;;  %v11233_v60 = vcombine.low %v2056_v6, %v2064_v10 }
 0x320   :  { %8079 = vmatmul.mubr.bf16.vlgmr.msra.gmra.mrb[12].mxu1 %v12397_v20  ;;  %7924 = vmatpush1.bf16.msra.mxu0 %v11121_v11  ;;  %v2057_v11 = vld [vmem:[#allocation10 + $0x1b98] sm:$0xff] }
 0x321   :  { %7955 = vmatprep.mubr.bf16.mxu0 %v12399_v34  ;;  %8088 = vmatpush1.bf16.msra.mxu1 %v11123_v13  ;;  %v11236_v28 = vcombine.high %v2057_v11, %v2065_v12  ;;  %v11235_v37 = vcombine.low %v2057_v11, %v2065_v12 }
 0x322   :  { %8119 = vmatprep.mubr.bf16.mxu1 %v12399_v34  ;;  %7925 = vmatprep.subr.bf16.mxu0 %v11138_v14  ;;  %v11217_v14 = vcombine.low %v2040_v62, %v2048_v3 }
 0x323   :  { %8089 = vmatprep.subr.bf16.mxu1 %v11140_v18  ;;  %v11219_v18 = vcombine.low %v2041_v23, %v2049_v4 }
 0x324   :  { %7926 = vmatpush1.bf16.msra.mxu0 %v11137_v29  ;;  %v2072_v29 = vld [vmem:[#allocation10 + $0x1c10] sm:$0xff] }
 0x325   :  { %8090 = vmatpush1.bf16.msra.mxu1 %v11139_v30  ;;  %7927 = vmatprep.subr.bf16.mxu0 %v11154_v31  ;;  %v2080_v30 = vld [vmem:[#allocation10 + $0x1c50] sm:$0xff]  ;;  %v2073_v31 = vld [vmem:[#allocation10 + $0x1c18] sm:$0xff] }
 0x326   :  { %8091 = vmatprep.subr.bf16.mxu1 %v11156_v32  ;;  %v2081_v32 = vld [vmem:[#allocation10 + $0x1c58] sm:$0xff]  ;;  %v11250_v38 = vcombine.high %v2072_v29, %v2080_v30  ;;  %v11249_v45 = vcombine.low %v2072_v29, %v2080_v30  ;;  %v2168_v29 = vld [vmem:[#allocation10 + $0x1f10] sm:$0xff] }
 0x327   :  { %v11252_v39 = vcombine.high %v2073_v31, %v2081_v32  ;;  %v11251_v22 = vcombine.low %v2073_v31, %v2081_v32  ;;  %v2176_v30 = vld [vmem:[#allocation10 + $0x1f50] sm:$0xff]  ;;  %v2169_v31 = vld [vmem:[#allocation10 + $0x1f18] sm:$0xff] }
 0x328   :  { %7928 = vmatpush1.bf16.msra.mxu0 %v11153_v40  ;;  %v2088_v40 = vld [vmem:[#allocation10 + $0x1c90] sm:$0xff]  ;;  %v2177_v32 = vld [vmem:[#allocation10 + $0x1f58] sm:$0xff] }
 0x329   :  { %8092 = vmatpush1.bf16.msra.mxu1 %v11155_v42  ;;  %7929 = vmatprep.subr.bf16.mxu0 %v11170_v43  ;;  %v2096_v42 = vld [vmem:[#allocation10 + $0x1cd0] sm:$0xff]  ;;  %v2089_v43 = vld [vmem:[#allocation10 + $0x1c98] sm:$0xff] }
 0x32a   :  { %8093 = vmatprep.subr.bf16.mxu1 %v11172_v44  ;;  %v2097_v44 = vld [vmem:[#allocation10 + $0x1cd8] sm:$0xff]  ;;  %v11266_v47 = vcombine.high %v2088_v40, %v2096_v42  ;;  %v11265_v53 = vcombine.low %v2088_v40, %v2096_v42  ;;  %v2184_v40 = vld [vmem:[#allocation10 + $0x1f90] sm:$0xff] }
 0x32b   :  { %v11268_v50 = vcombine.high %v2089_v43, %v2097_v44  ;;  %v11267_v25 = vcombine.low %v2089_v43, %v2097_v44  ;;  %v2192_v42 = vld [vmem:[#allocation10 + $0x1fd0] sm:$0xff]  ;;  %v2185_v43 = vld [vmem:[#allocation10 + $0x1f98] sm:$0xff] }
 0x32c   :  { %7930 = vmatpush1.bf16.msra.mxu0 %v11169_v24  ;;  %v2104_v24 = vld [vmem:[#allocation10 + $0x1d10] sm:$0xff]  ;;  %v2193_v44 = vld [vmem:[#allocation10 + $0x1fd8] sm:$0xff] }
 0x32d   :  { %8094 = vmatpush1.bf16.msra.mxu1 %v11171_v51  ;;  %7931 = vmatprep.subr.bf16.mxu0 %v11186_v46  ;;  %v2112_v51 = vld [vmem:[#allocation10 + $0x1d50] sm:$0xff]  ;;  %v2105_v46 = vld [vmem:[#allocation10 + $0x1d18] sm:$0xff] }
 0x32e   :  { %8095 = vmatprep.subr.bf16.mxu1 %v11188_v52  ;;  %v2113_v52 = vld [vmem:[#allocation10 + $0x1d58] sm:$0xff]  ;;  %v11282_v54 = vcombine.high %v2104_v24, %v2112_v51  ;;  %v11281_v62 = vcombine.low %v2104_v24, %v2112_v51  ;;  %v1178_v24 = vld [vmem:[#allocation10 + $0x20] sm:$0xff] }
 0x32f   :  { %v11284_v55 = vcombine.high %v2105_v46, %v2113_v52  ;;  %v11283_v3 = vcombine.low %v2105_v46, %v2113_v52  ;;  %v1186_v51 = vld [vmem:[#allocation10 + $0x60] sm:$0xff]  ;;  %v1179_v46 = vld [vmem:[#allocation10 + $0x28] sm:$0xff] }
 0x330   :  { %7932 = vmatpush1.bf16.msra.mxu0 %v11185_v33  ;;  %v2120_v33 = vld [vmem:[#allocation10 + $0x1d90] sm:$0xff]  ;;  %v1187_v52 = vld [vmem:[#allocation10 + $0x68] sm:$0xff] }
 0x331   :  { %8096 = vmatpush1.bf16.msra.mxu1 %v11187_v57  ;;  %7933 = vmatprep.subr.bf16.mxu0 %v11202_v59  ;;  %v2128_v57 = vld [vmem:[#allocation10 + $0x1dd0] sm:$0xff]  ;;  %v2121_v59 = vld [vmem:[#allocation10 + $0x1d98] sm:$0xff] }
 0x332   :  { %v12427_v0 = vpop.f32.mrb[8].mxu0  ;;  %v12429_v1 = vpop.f32.mrb[8].mxu1  ;;  %8097 = vmatprep.subr.bf16.mxu1 %v11204_v61  ;;  %v2129_v61 = vld [vmem:[#allocation10 + $0x1dd8] sm:$0xff]  ;;  %v11298_v23 = vcombine.high %v2120_v33, %v2128_v57  ;;  %v11297_v6 = vcombine.low %v2120_v33, %v2128_v57  ;;  %v1194_v33 = vld [vmem:[#allocation10 + $0xa0] sm:$0xff] }
 0x333   :  { %v12431_v58 = vpop.f32.mrb[9].mxu0  ;;  %v12433_v8 = vpop.f32.mrb[9].mxu1  ;;  %v11300_v4 = vcombine.high %v2121_v59, %v2129_v61  ;;  %v11299_v10 = vcombine.low %v2121_v59, %v2129_v61  ;;  %v1202_v57 = vld [vmem:[#allocation10 + $0xe0] sm:$0xff]  ;;  %v10357_v59 = vcombine.low %v1178_v24, %v1186_v51  ;;  %v1195_v61 = vld [vmem:[#allocation10 + $0xa8] sm:$0xff] }
 0x334   :  { %v7633_v19 = vpop.f32.mrb[10].mxu0  ;;  %v7797_v13 = vpop.f32.mrb[10].mxu1  ;;  %7934 = vmatpush1.bf16.msra.mxu0 %v11201_v5  ;;  %v2136_v5 = vld [vmem:[#allocation10 + $0x1e10] sm:$0xff] }
 0x335   :  { %8098 = vmatpush1.bf16.msra.mxu1 %v11203_v7  ;;  %v7634_v16 = vpop.f32.mrb[11].mxu0  ;;  %v7798_v17 = vpop.f32.mrb[11].mxu1  ;;  %7935 = vmatprep.subr.bf16.mxu0 %v11218_v63  ;;  %v2144_v7 = vld [vmem:[#allocation10 + $0x1e50] sm:$0xff]  ;;  %v2137_v63 = vld [vmem:[#allocation10 + $0x1e18] sm:$0xff] }
 0x336   :  { %8099 = vmatprep.subr.bf16.mxu1 %v11220_v9  ;;  %v2145_v9 = vld [vmem:[#allocation10 + $0x1e58] sm:$0xff]  ;;  %v11314_v11 = vcombine.high %v2136_v5, %v2144_v7  ;;  %v2152_v19 = vld [vmem:[#allocation10 + $0x1e90] sm:$0xff]  ;;  %v11313_v17 = vcombine.low %v2136_v5, %v2144_v7  ;;  %v1218_v5 = vld [vmem:[#allocation10 + $0x160] sm:$0xff] }
 0x337   :  { %v11316_v12 = vcombine.high %v2137_v63, %v2145_v9  ;;  %v2160_v13 = vld [vmem:[#allocation10 + $0x1ed0] sm:$0xff]  ;;  %v2161_v16 = vld [vmem:[#allocation10 + $0x1ed8] sm:$0xff] }
 0x338   :  { %7936 = vmatpush1.bf16.msra.mxu0 %v11217_v14  ;;  %v2153_v14 = vld [vmem:[#allocation10 + $0x1e98] sm:$0xff] }
 0x339   :  { %8100 = vmatpush1.bf16.msra.mxu1 %v11219_v18  ;;  %7937 = vmatprep.subr.bf16.mxu0 %v11234_v21  ;;  %v11315_v18 = vcombine.low %v2137_v63, %v2145_v9  ;;  %v11330_v21 = vcombine.high %v2152_v19, %v2160_v13  ;;  %v1211_v63 = vld [vmem:[#allocation10 + $0x128] sm:$0xff] }
 0x33a   :  { %8101 = vmatprep.subr.bf16.mxu1 %v11236_v28  ;;  %v11332_v28 = vcombine.high %v2153_v14, %v2161_v16  ;;  %v1219_v9 = vld [vmem:[#allocation10 + $0x168] sm:$0xff] }
 0x33c   :  { %7938 = vmatpush1.bf16.msra.mxu0 %v11233_v60  ;;  %v11329_v60 = vcombine.low %v2152_v19, %v2160_v13  ;;  %v1226_v19 = vld [vmem:[#allocation10 + $0x1a0] sm:$0xff] }
 0x33d   :  { %8102 = vmatpush1.bf16.msra.mxu1 %v11235_v37  ;;  %7939 = vmatprep.subr.bf16.mxu0 %v11250_v38  ;;  %v11331_v37 = vcombine.low %v2153_v14, %v2161_v16  ;;  %v11346_v38 = vcombine.high %v2168_v29, %v2176_v30  ;;  %v1234_v13 = vld [vmem:[#allocation10 + $0x1e0] sm:$0xff]  ;;  %v1227_v14 = vld [vmem:[#allocation10 + $0x1a8] sm:$0xff] }
 0x33e   :  { %8103 = vmatprep.subr.bf16.mxu1 %v11252_v39  ;;  %v11348_v39 = vcombine.high %v2169_v31, %v2177_v32  ;;  %v1235_v16 = vld [vmem:[#allocation10 + $0x1e8] sm:$0xff] }
 0x340   :  { %7940 = vmatpush1.bf16.msra.mxu0 %v11249_v45  ;;  %v11345_v45 = vcombine.low %v2168_v29, %v2176_v30  ;;  %v1242_v29 = vld [vmem:[#allocation10 + $0x220] sm:$0xff] }
 0x341   :  { %8104 = vmatpush1.bf16.msra.mxu1 %v11251_v22  ;;  %7941 = vmatprep.subr.bf16.mxu0 %v11266_v47  ;;  %v11347_v22 = vcombine.low %v2169_v31, %v2177_v32  ;;  %v11362_v47 = vcombine.high %v2184_v40, %v2192_v42  ;;  %v1250_v30 = vld [vmem:[#allocation10 + $0x260] sm:$0xff]  ;;  %v1243_v31 = vld [vmem:[#allocation10 + $0x228] sm:$0xff] }
 0x342   :  { %8105 = vmatprep.subr.bf16.mxu1 %v11268_v50  ;;  %v11364_v50 = vcombine.high %v2185_v43, %v2193_v44  ;;  %v1251_v32 = vld [vmem:[#allocation10 + $0x268] sm:$0xff] }
 0x344   :  { %7942 = vmatpush1.bf16.msra.mxu0 %v11265_v53  ;;  %v11361_v53 = vcombine.low %v2184_v40, %v2192_v42  ;;  %v1258_v40 = vld [vmem:[#allocation10 + $0x2a0] sm:$0xff] }
 0x345   :  { %8106 = vmatpush1.bf16.msra.mxu1 %v11267_v25  ;;  %7943 = vmatprep.subr.bf16.mxu0 %v11282_v54  ;;  %v11363_v25 = vcombine.low %v2185_v43, %v2193_v44  ;;  %v10358_v54 = vcombine.high %v1178_v24, %v1186_v51  ;;  %v1266_v42 = vld [vmem:[#allocation10 + $0x2e0] sm:$0xff]  ;;  %v1259_v43 = vld [vmem:[#allocation10 + $0x2a8] sm:$0xff] }
 0x346   :  { %8107 = vmatprep.subr.bf16.mxu1 %v11284_v55  ;;  %v10360_v55 = vcombine.high %v1179_v46, %v1187_v52  ;;  %v1267_v44 = vld [vmem:[#allocation10 + $0x2e8] sm:$0xff]  ;;  %v1274_v24 = vld [vmem:[#allocation10 + $0x320] sm:$0xff] }
 0x347   :  { %v1282_v51 = vld [vmem:[#allocation10 + $0x360] sm:$0xff] }
 0x348   :  { %7944 = vmatpush1.bf16.msra.mxu0 %v11281_v62  ;;  %v1203_v62 = vld [vmem:[#allocation10 + $0xe8] sm:$0xff] }
 0x349   :  { %8108 = vmatpush1.bf16.msra.mxu1 %v11283_v3  ;;  %7945 = vmatprep.subr.bf16.mxu0 %v11298_v23  ;;  %v10359_v3 = vcombine.low %v1179_v46, %v1187_v52  ;;  %v10374_v23 = vcombine.high %v1194_v33, %v1202_v57  ;;  %v10376_v7 = vcombine.high %v1195_v61, %v1203_v62  ;;  %v1275_v46 = vld [vmem:[#allocation10 + $0x328] sm:$0xff] }
 0x34a   :  { %8109 = vmatprep.subr.bf16.mxu1 %v11300_v4  ;;  %v1210_v4 = vld [vmem:[#allocation10 + $0x120] sm:$0xff]  ;;  %v1283_v52 = vld [vmem:[#allocation10 + $0x368] sm:$0xff] }
 0x34c   :  { %7946 = vmatpush1.bf16.msra.mxu0 %v11297_v6  ;;  %v10373_v6 = vcombine.low %v1194_v33, %v1202_v57  ;;  %v1290_v33 = vld [vmem:[#allocation10 + $0x3a0] sm:$0xff] }
 0x34d   :  { %8110 = vmatpush1.bf16.msra.mxu1 %v11299_v10  ;;  %7947 = vmatprep.subr.bf16.mxu0 %v11314_v11  ;;  %v10375_v10 = vcombine.low %v1195_v61, %v1203_v62  ;;  %v10390_v11 = vcombine.high %v1210_v4, %v1218_v5  ;;  %v1298_v57 = vld [vmem:[#allocation10 + $0x3e0] sm:$0xff]  ;;  %v1299_v61 = vld [vmem:[#allocation10 + $0x3e8] sm:$0xff]  ;;  %v10453_v62 = vcombine.low %v1274_v24, %v1282_v51 }
 0x34e   :  { %8111 = vmatprep.subr.bf16.mxu1 %v11316_v12  ;;  %v10392_v12 = vcombine.high %v1211_v63, %v1219_v9 }
 0x350   :  { %7948 = vmatpush1.bf16.msra.mxu0 %v11313_v17  ;;  %v10389_v17 = vcombine.low %v1210_v4, %v1218_v5  ;;  %v1306_v5 = vld [vmem:[#allocation10 + $0x420] sm:$0xff] }
 0x351   :  { %8112 = vmatpush1.bf16.msra.mxu1 %v11315_v18  ;;  %7949 = vmatprep.subr.bf16.mxu0 %v11330_v21  ;;  %v10391_v18 = vcombine.low %v1211_v63, %v1219_v9  ;;  %v10406_v21 = vcombine.high %v1226_v19, %v1234_v13  ;;  %v1307_v63 = vld [vmem:[#allocation10 + $0x428] sm:$0xff] }
 0x352   :  { %8113 = vmatprep.subr.bf16.mxu1 %v11332_v28  ;;  %v10408_v28 = vcombine.high %v1227_v14, %v1235_v16  ;;  %v1315_v9 = vld [vmem:[#allocation10 + $0x468] sm:$0xff] }
 0x354   :  { %7950 = vmatpush1.bf16.msra.mxu0 %v11329_v60  ;;  %v10405_v60 = vcombine.low %v1226_v19, %v1234_v13  ;;  %v1322_v19 = vld [vmem:[#allocation10 + $0x4a0] sm:$0xff] }
 0x355   :  { %8114 = vmatpush1.bf16.msra.mxu1 %v11331_v37  ;;  %7951 = vmatprep.subr.bf16.mxu0 %v11346_v38  ;;  %v10407_v37 = vcombine.low %v1227_v14, %v1235_v16  ;;  %v10422_v38 = vcombine.high %v1242_v29, %v1250_v30  ;;  %v1330_v13 = vld [vmem:[#allocation10 + $0x4e0] sm:$0xff]  ;;  %v1323_v14 = vld [vmem:[#allocation10 + $0x4a8] sm:$0xff] }
 0x356   :  { %8115 = vmatprep.subr.bf16.mxu1 %v11348_v39  ;;  %v10424_v39 = vcombine.high %v1243_v31, %v1251_v32  ;;  %v1331_v16 = vld [vmem:[#allocation10 + $0x4e8] sm:$0xff] }
 0x358   :  { %7952 = vmatpush1.bf16.msra.mxu0 %v11345_v45  ;;  %v10421_v45 = vcombine.low %v1242_v29, %v1250_v30  ;;  %v1338_v29 = vld [vmem:[#allocation10 + $0x520] sm:$0xff] }
 0x359   :  { %8116 = vmatpush1.bf16.msra.mxu1 %v11347_v22  ;;  %7953 = vmatprep.subr.bf16.mxu0 %v11362_v47  ;;  %v10423_v22 = vcombine.low %v1243_v31, %v1251_v32  ;;  %v10438_v47 = vcombine.high %v1258_v40, %v1266_v42  ;;  %v1346_v30 = vld [vmem:[#allocation10 + $0x560] sm:$0xff]  ;;  %v1339_v31 = vld [vmem:[#allocation10 + $0x528] sm:$0xff] }
 0x35a   :  { %8117 = vmatprep.subr.bf16.mxu1 %v11364_v50  ;;  %v10440_v50 = vcombine.high %v1259_v43, %v1267_v44  ;;  %v1347_v32 = vld [vmem:[#allocation10 + $0x568] sm:$0xff] }
 0x35c   :  { %7954 = vmatpush1.bf16.msra.mxu0 %v11361_v53  ;;  %v10437_v53 = vcombine.low %v1258_v40, %v1266_v42  ;;  %v1354_v40 = vld [vmem:[#allocation10 + $0x5a0] sm:$0xff] }
 0x35d   :  { %8118 = vmatpush1.bf16.msra.mxu1 %v11363_v25  ;;  %8128 = vmatprep.subr.bf16.mxu0 %v10358_v54  ;;  %v10439_v25 = vcombine.low %v1259_v43, %v1267_v44  ;;  %v10454_v54 = vcombine.high %v1274_v24, %v1282_v51  ;;  %v1362_v42 = vld [vmem:[#allocation10 + $0x5e0] sm:$0xff]  ;;  %v1355_v43 = vld [vmem:[#allocation10 + $0x5a8] sm:$0xff] }
 0x35e   :  { %8292 = vmatprep.subr.bf16.mxu1 %v10360_v55  ;;  %v10456_v55 = vcombine.high %v1275_v46, %v1283_v52  ;;  %v1363_v44 = vld [vmem:[#allocation10 + $0x5e8] sm:$0xff]  ;;  %v1370_v24 = vld [vmem:[#allocation10 + $0x620] sm:$0xff] }
 0x35f   :  { %7956 = vmatmul.mubr.bf16.vlgmr.msra.gmra.mrb[12].mxu0 %v12409_v56  ;;  %v1378_v51 = vld [vmem:[#allocation10 + $0x660] sm:$0xff] }
 0x360   :  { %8120 = vmatmul.mubr.bf16.vlgmr.msra.gmra.mrb[12].mxu1 %v12409_v56  ;;  %8129 = vmatpush1.bf16.msra.mxu0 %v10357_v59  ;;  %v1291_v59 = vld [vmem:[#allocation10 + $0x3a8] sm:$0xff] }
 0x361   :  { %8160 = vmatprep.mubr.bf16.mxu0 %v12330_v49  ;;  %8293 = vmatpush1.bf16.msra.mxu1 %v10359_v3  ;;  %v10455_v3 = vcombine.low %v1275_v46, %v1283_v52  ;;  %v10472_v4 = vcombine.high %v1291_v59, %v1299_v61  ;;  %v1371_v46 = vld [vmem:[#allocation10 + $0x628] sm:$0xff] }
 0x362   :  { %8324 = vmatprep.mubr.bf16.mxu1 %v12330_v49  ;;  %8130 = vmatprep.subr.bf16.mxu0 %v10374_v23  ;;  %v10470_v23 = vcombine.high %v1290_v33, %v1298_v57  ;;  %v1379_v52 = vld [vmem:[#allocation10 + $0x668] sm:$0xff] }
 0x363   :  { %8294 = vmatprep.subr.bf16.mxu1 %v10376_v7  ;;  %v1314_v7 = vld [vmem:[#allocation10 + $0x460] sm:$0xff] }
 0x364   :  { %8131 = vmatpush1.bf16.msra.mxu0 %v10373_v6  ;;  %v10469_v6 = vcombine.low %v1290_v33, %v1298_v57  ;;  %v1386_v33 = vld [vmem:[#allocation10 + $0x6a0] sm:$0xff] }
 0x365   :  { %8295 = vmatpush1.bf16.msra.mxu1 %v10375_v10  ;;  %8132 = vmatprep.subr.bf16.mxu0 %v10390_v11  ;;  %v10471_v10 = vcombine.low %v1291_v59, %v1299_v61  ;;  %v10486_v11 = vcombine.high %v1306_v5, %v1314_v7  ;;  %v1394_v57 = vld [vmem:[#allocation10 + $0x6e0] sm:$0xff]  ;;  %v1387_v59 = vld [vmem:[#allocation10 + $0x6a8] sm:$0xff] }
 0x366   :  { %8296 = vmatprep.subr.bf16.mxu1 %v10392_v12  ;;  %v10488_v12 = vcombine.high %v1307_v63, %v1315_v9  ;;  %v1395_v61 = vld [vmem:[#allocation10 + $0x6e8] sm:$0xff] }
 0x368   :  { %8133 = vmatpush1.bf16.msra.mxu0 %v10389_v17  ;;  %v10485_v17 = vcombine.low %v1306_v5, %v1314_v7  ;;  %v1402_v5 = vld [vmem:[#allocation10 + $0x720] sm:$0xff] }
 0x369   :  { %8297 = vmatpush1.bf16.msra.mxu1 %v10391_v18  ;;  %8134 = vmatprep.subr.bf16.mxu0 %v10406_v21  ;;  %v10487_v18 = vcombine.low %v1307_v63, %v1315_v9  ;;  %v10502_v21 = vcombine.high %v1322_v19, %v1330_v13  ;;  %v1410_v7 = vld [vmem:[#allocation10 + $0x760] sm:$0xff]  ;;  %v1403_v63 = vld [vmem:[#allocation10 + $0x728] sm:$0xff] }
 0x36a   :  { %8298 = vmatprep.subr.bf16.mxu1 %v10408_v28  ;;  %v10504_v28 = vcombine.high %v1323_v14, %v1331_v16  ;;  %v1411_v9 = vld [vmem:[#allocation10 + $0x768] sm:$0xff] }
 0x36c   :  { %8135 = vmatpush1.bf16.msra.mxu0 %v10405_v60  ;;  %v10501_v60 = vcombine.low %v1322_v19, %v1330_v13  ;;  %v1418_v19 = vld [vmem:[#allocation10 + $0x7a0] sm:$0xff] }
 0x36d   :  { %8299 = vmatpush1.bf16.msra.mxu1 %v10407_v37  ;;  %8136 = vmatprep.subr.bf16.mxu0 %v10422_v38  ;;  %v10503_v37 = vcombine.low %v1323_v14, %v1331_v16  ;;  %v10518_v38 = vcombine.high %v1338_v29, %v1346_v30  ;;  %v1426_v13 = vld [vmem:[#allocation10 + $0x7e0] sm:$0xff]  ;;  %v1419_v14 = vld [vmem:[#allocation10 + $0x7a8] sm:$0xff] }
 0x36e   :  { %8300 = vmatprep.subr.bf16.mxu1 %v10424_v39  ;;  %v10520_v39 = vcombine.high %v1339_v31, %v1347_v32  ;;  %v1427_v16 = vld [vmem:[#allocation10 + $0x7e8] sm:$0xff] }
 0x370   :  { %8137 = vmatpush1.bf16.msra.mxu0 %v10421_v45  ;;  %v10517_v45 = vcombine.low %v1338_v29, %v1346_v30  ;;  %v1434_v29 = vld [vmem:[#allocation10 + $0x820] sm:$0xff] }
 0x371   :  { %8301 = vmatpush1.bf16.msra.mxu1 %v10423_v22  ;;  %8138 = vmatprep.subr.bf16.mxu0 %v10438_v47  ;;  %v10519_v22 = vcombine.low %v1339_v31, %v1347_v32  ;;  %v10534_v47 = vcombine.high %v1354_v40, %v1362_v42  ;;  %v1442_v30 = vld [vmem:[#allocation10 + $0x860] sm:$0xff]  ;;  %v1435_v31 = vld [vmem:[#allocation10 + $0x828] sm:$0xff] }
 0x372   :  { %8302 = vmatprep.subr.bf16.mxu1 %v10440_v50  ;;  %v10536_v50 = vcombine.high %v1355_v43, %v1363_v44  ;;  %v1443_v32 = vld [vmem:[#allocation10 + $0x868] sm:$0xff] }
 0x374   :  { %8139 = vmatpush1.bf16.msra.mxu0 %v10437_v53  ;;  %v10533_v53 = vcombine.low %v1354_v40, %v1362_v42  ;;  %v1450_v40 = vld [vmem:[#allocation10 + $0x8a0] sm:$0xff] }
 0x375   :  { %8303 = vmatpush1.bf16.msra.mxu1 %v10439_v25  ;;  %8140 = vmatprep.subr.bf16.mxu0 %v10454_v54  ;;  %v10535_v25 = vcombine.low %v1355_v43, %v1363_v44  ;;  %v10550_v54 = vcombine.high %v1370_v24, %v1378_v51  ;;  %v1458_v42 = vld [vmem:[#allocation10 + $0x8e0] sm:$0xff]  ;;  %v10613_v43 = vcombine.low %v1434_v29, %v1442_v30  ;;  %v1451_v44 = vld [vmem:[#allocation10 + $0x8a8] sm:$0xff] }
 0x376   :  { %8304 = vmatprep.subr.bf16.mxu1 %v10456_v55  ;;  %v10552_v55 = vcombine.high %v1371_v46, %v1379_v52 }
 0x378   :  { %8141 = vmatpush1.bf16.msra.mxu0 %v10453_v62  ;;  %v10549_v62 = vcombine.low %v1370_v24, %v1378_v51  ;;  %v1474_v24 = vld [vmem:[#allocation10 + $0x960] sm:$0xff] }
 0x379   :  { %8305 = vmatpush1.bf16.msra.mxu1 %v10455_v3  ;;  %8142 = vmatprep.subr.bf16.mxu0 %v10470_v23  ;;  %v10551_v3 = vcombine.low %v1371_v46, %v1379_v52  ;;  %v10566_v23 = vcombine.high %v1386_v33, %v1394_v57  ;;  %v1467_v46 = vld [vmem:[#allocation10 + $0x928] sm:$0xff] }
 0x37a   :  { %8306 = vmatprep.subr.bf16.mxu1 %v10472_v4  ;;  %v10568_v4 = vcombine.high %v1387_v59, %v1395_v61  ;;  %v1475_v52 = vld [vmem:[#allocation10 + $0x968] sm:$0xff] }
 0x37c   :  { %8143 = vmatpush1.bf16.msra.mxu0 %v10469_v6  ;;  %v10565_v6 = vcombine.low %v1386_v33, %v1394_v57  ;;  %v1482_v33 = vld [vmem:[#allocation10 + $0x9a0] sm:$0xff] }
 0x37d   :  { %8307 = vmatpush1.bf16.msra.mxu1 %v10471_v10  ;;  %8144 = vmatprep.subr.bf16.mxu0 %v10486_v11  ;;  %v10567_v10 = vcombine.low %v1387_v59, %v1395_v61  ;;  %v10582_v11 = vcombine.high %v1402_v5, %v1410_v7  ;;  %v1490_v57 = vld [vmem:[#allocation10 + $0x9e0] sm:$0xff]  ;;  %v1483_v59 = vld [vmem:[#allocation10 + $0x9a8] sm:$0xff] }
 0x37e   :  { %8308 = vmatprep.subr.bf16.mxu1 %v10488_v12  ;;  %v10584_v12 = vcombine.high %v1403_v63, %v1411_v9  ;;  %v1491_v61 = vld [vmem:[#allocation10 + $0x9e8] sm:$0xff] }
 0x380   :  { %8145 = vmatpush1.bf16.msra.mxu0 %v10485_v17  ;;  %v10581_v17 = vcombine.low %v1402_v5, %v1410_v7  ;;  %v1498_v5 = vld [vmem:[#allocation10 + $0xa20] sm:$0xff] }
 0x381   :  { %8309 = vmatpush1.bf16.msra.mxu1 %v10487_v18  ;;  %8146 = vmatprep.subr.bf16.mxu0 %v10502_v21  ;;  %v10583_v18 = vcombine.low %v1403_v63, %v1411_v9  ;;  %v10598_v21 = vcombine.high %v1418_v19, %v1426_v13  ;;  %v1506_v7 = vld [vmem:[#allocation10 + $0xa60] sm:$0xff]  ;;  %v1499_v63 = vld [vmem:[#allocation10 + $0xa28] sm:$0xff] }
 0x382   :  { %8310 = vmatprep.subr.bf16.mxu1 %v10504_v28  ;;  %v10600_v28 = vcombine.high %v1419_v14, %v1427_v16  ;;  %v1507_v9 = vld [vmem:[#allocation10 + $0xa68] sm:$0xff] }
 0x384   :  { %8147 = vmatpush1.bf16.msra.mxu0 %v10501_v60  ;;  %v10597_v60 = vcombine.low %v1418_v19, %v1426_v13  ;;  %v1514_v19 = vld [vmem:[#allocation10 + $0xaa0] sm:$0xff] }
 0x385   :  { %8311 = vmatpush1.bf16.msra.mxu1 %v10503_v37  ;;  %8148 = vmatprep.subr.bf16.mxu0 %v10518_v38  ;;  %v10599_v37 = vcombine.low %v1419_v14, %v1427_v16  ;;  %v10614_v38 = vcombine.high %v1434_v29, %v1442_v30  ;;  %v1522_v13 = vld [vmem:[#allocation10 + $0xae0] sm:$0xff]  ;;  %v1515_v14 = vld [vmem:[#allocation10 + $0xaa8] sm:$0xff] }
 0x386   :  { %8312 = vmatprep.subr.bf16.mxu1 %v10520_v39  ;;  %v10616_v39 = vcombine.high %v1435_v31, %v1443_v32  ;;  %v1523_v16 = vld [vmem:[#allocation10 + $0xae8] sm:$0xff]  ;;  %v1530_v29 = vld [vmem:[#allocation10 + $0xb20] sm:$0xff] }
 0x387   :  { %v1538_v30 = vld [vmem:[#allocation10 + $0xb60] sm:$0xff] }
 0x388   :  { %8149 = vmatpush1.bf16.msra.mxu0 %v10517_v45  ;;  %v1459_v45 = vld [vmem:[#allocation10 + $0x8e8] sm:$0xff] }
 0x389   :  { %8313 = vmatpush1.bf16.msra.mxu1 %v10519_v22  ;;  %8150 = vmatprep.subr.bf16.mxu0 %v10534_v47  ;;  %v10615_v22 = vcombine.low %v1435_v31, %v1443_v32  ;;  %v10630_v47 = vcombine.high %v1450_v40, %v1458_v42  ;;  %v10632_v51 = vcombine.high %v1451_v44, %v1459_v45  ;;  %v1531_v31 = vld [vmem:[#allocation10 + $0xb28] sm:$0xff] }
 0x38a   :  { %8314 = vmatprep.subr.bf16.mxu1 %v10536_v50  ;;  %v1466_v50 = vld [vmem:[#allocation10 + $0x920] sm:$0xff]  ;;  %v1539_v32 = vld [vmem:[#allocation10 + $0xb68] sm:$0xff] }
 0x38c   :  { %8151 = vmatpush1.bf16.msra.mxu0 %v10533_v53  ;;  %v10629_v53 = vcombine.low %v1450_v40, %v1458_v42  ;;  %v1546_v40 = vld [vmem:[#allocation10 + $0xba0] sm:$0xff] }
 0x38d   :  { %8315 = vmatpush1.bf16.msra.mxu1 %v10535_v25  ;;  %8152 = vmatprep.subr.bf16.mxu0 %v10550_v54  ;;  %v10631_v25 = vcombine.low %v1451_v44, %v1459_v45  ;;  %v10646_v54 = vcombine.high %v1466_v50, %v1474_v24  ;;  %v1554_v42 = vld [vmem:[#allocation10 + $0xbe0] sm:$0xff]  ;;  %v1555_v44 = vld [vmem:[#allocation10 + $0xbe8] sm:$0xff]  ;;  %v10709_v45 = vcombine.low %v1530_v29, %v1538_v30 }
 0x38e   :  { %8316 = vmatprep.subr.bf16.mxu1 %v10552_v55  ;;  %v10648_v55 = vcombine.high %v1467_v46, %v1475_v52 }
 0x390   :  { %8153 = vmatpush1.bf16.msra.mxu0 %v10549_v62  ;;  %v10645_v62 = vcombine.low %v1466_v50, %v1474_v24  ;;  %v1562_v24 = vld [vmem:[#allocation10 + $0xc20] sm:$0xff] }
 0x391   :  { %8317 = vmatpush1.bf16.msra.mxu1 %v10551_v3  ;;  %8154 = vmatprep.subr.bf16.mxu0 %v10566_v23  ;;  %v10647_v3 = vcombine.low %v1467_v46, %v1475_v52  ;;  %v10662_v23 = vcombine.high %v1482_v33, %v1490_v57  ;;  %v1563_v46 = vld [vmem:[#allocation10 + $0xc28] sm:$0xff] }
 0x392   :  { %8318 = vmatprep.subr.bf16.mxu1 %v10568_v4  ;;  %v10664_v4 = vcombine.high %v1483_v59, %v1491_v61  ;;  %v1571_v52 = vld [vmem:[#allocation10 + $0xc68] sm:$0xff] }
 0x394   :  { %8155 = vmatpush1.bf16.msra.mxu0 %v10565_v6  ;;  %v10661_v6 = vcombine.low %v1482_v33, %v1490_v57  ;;  %v1578_v33 = vld [vmem:[#allocation10 + $0xca0] sm:$0xff] }
 0x395   :  { %8319 = vmatpush1.bf16.msra.mxu1 %v10567_v10  ;;  %8156 = vmatprep.subr.bf16.mxu0 %v10582_v11  ;;  %v10663_v10 = vcombine.low %v1483_v59, %v1491_v61  ;;  %v10678_v11 = vcombine.high %v1498_v5, %v1506_v7  ;;  %v1586_v57 = vld [vmem:[#allocation10 + $0xce0] sm:$0xff]  ;;  %v1579_v59 = vld [vmem:[#allocation10 + $0xca8] sm:$0xff] }
 0x396   :  { %8320 = vmatprep.subr.bf16.mxu1 %v10584_v12  ;;  %v10680_v12 = vcombine.high %v1499_v63, %v1507_v9  ;;  %v1587_v61 = vld [vmem:[#allocation10 + $0xce8] sm:$0xff] }
 0x398   :  { %8157 = vmatpush1.bf16.msra.mxu0 %v10581_v17  ;;  %v10677_v17 = vcombine.low %v1498_v5, %v1506_v7  ;;  %v1594_v5 = vld [vmem:[#allocation10 + $0xd20] sm:$0xff] }
 0x399   :  { %8321 = vmatpush1.bf16.msra.mxu1 %v10583_v18  ;;  %8158 = vmatprep.subr.bf16.mxu0 %v10598_v21  ;;  %v10679_v18 = vcombine.low %v1499_v63, %v1507_v9  ;;  %v10694_v21 = vcombine.high %v1514_v19, %v1522_v13  ;;  %v1602_v7 = vld [vmem:[#allocation10 + $0xd60] sm:$0xff]  ;;  %v1595_v63 = vld [vmem:[#allocation10 + $0xd28] sm:$0xff] }
 0x39a   :  { %8322 = vmatprep.subr.bf16.mxu1 %v10600_v28  ;;  %v10696_v28 = vcombine.high %v1515_v14, %v1523_v16  ;;  %v1603_v9 = vld [vmem:[#allocation10 + $0xd68] sm:$0xff] }
 0x39c   :  { %8159 = vmatpush1.bf16.msra.mxu0 %v10597_v60  ;;  %v10693_v60 = vcombine.low %v1514_v19, %v1522_v13  ;;  %v1610_v19 = vld [vmem:[#allocation10 + $0xda0] sm:$0xff] }
 0x39d   :  { %8323 = vmatpush1.bf16.msra.mxu1 %v10599_v37  ;;  %8169 = vmatprep.subr.bf16.mxu0 %v10614_v38  ;;  %v10695_v37 = vcombine.low %v1515_v14, %v1523_v16  ;;  %v10710_v38 = vcombine.high %v1530_v29, %v1538_v30  ;;  %v1618_v13 = vld [vmem:[#allocation10 + $0xde0] sm:$0xff]  ;;  %v1611_v14 = vld [vmem:[#allocation10 + $0xda8] sm:$0xff] }
 0x39e   :  { %8333 = vmatprep.subr.bf16.mxu1 %v10616_v39  ;;  %v10712_v39 = vcombine.high %v1531_v31, %v1539_v32  ;;  %v1619_v16 = vld [vmem:[#allocation10 + $0xde8] sm:$0xff]  ;;  %v1626_v29 = vld [vmem:[#allocation10 + $0xe20] sm:$0xff] }
 0x39f   :  { %8161 = vmatmul.mubr.bf16.vlgmr.msra.gmra.mrb[16].mxu0 %v12332_v2  ;;  %v1634_v30 = vld [vmem:[#allocation10 + $0xe60] sm:$0xff] }
 0x3a0   :  { %8325 = vmatmul.mubr.bf16.vlgmr.msra.gmra.mrb[16].mxu1 %v12332_v2  ;;  %8170 = vmatpush1.bf16.msra.mxu0 %v10613_v43  ;;  %v1547_v43 = vld [vmem:[#allocation10 + $0xba8] sm:$0xff] }
 0x3a1   :  { %8201 = vmatprep.mubr.bf16.mxu0 %v12348_v15  ;;  %8334 = vmatpush1.bf16.msra.mxu1 %v10615_v22  ;;  %v10711_v22 = vcombine.low %v1531_v31, %v1539_v32  ;;  %v10728_v50 = vcombine.high %v1547_v43, %v1555_v44  ;;  %v1627_v31 = vld [vmem:[#allocation10 + $0xe28] sm:$0xff] }
 0x3a2   :  { %8365 = vmatprep.mubr.bf16.mxu1 %v12348_v15  ;;  %8171 = vmatprep.subr.bf16.mxu0 %v10630_v47  ;;  %v10726_v47 = vcombine.high %v1546_v40, %v1554_v42  ;;  %v1635_v32 = vld [vmem:[#allocation10 + $0xe68] sm:$0xff] }
 0x3a3   :  { %8335 = vmatprep.subr.bf16.mxu1 %v10632_v51  ;;  %v1570_v51 = vld [vmem:[#allocation10 + $0xc60] sm:$0xff] }
 0x3a4   :  { %8172 = vmatpush1.bf16.msra.mxu0 %v10629_v53  ;;  %v10725_v53 = vcombine.low %v1546_v40, %v1554_v42  ;;  %v1642_v40 = vld [vmem:[#allocation10 + $0xea0] sm:$0xff] }
 0x3a5   :  { %8336 = vmatpush1.bf16.msra.mxu1 %v10631_v25  ;;  %8173 = vmatprep.subr.bf16.mxu0 %v10646_v54  ;;  %v10727_v25 = vcombine.low %v1547_v43, %v1555_v44  ;;  %v10742_v54 = vcombine.high %v1562_v24, %v1570_v51  ;;  %v1650_v42 = vld [vmem:[#allocation10 + $0xee0] sm:$0xff]  ;;  %v1643_v43 = vld [vmem:[#allocation10 + $0xea8] sm:$0xff] }
 0x3a6   :  { %8337 = vmatprep.subr.bf16.mxu1 %v10648_v55  ;;  %v10744_v55 = vcombine.high %v1563_v46, %v1571_v52  ;;  %v1651_v44 = vld [vmem:[#allocation10 + $0xee8] sm:$0xff] }
 0x3a8   :  { %8174 = vmatpush1.bf16.msra.mxu0 %v10645_v62  ;;  %v10741_v62 = vcombine.low %v1562_v24, %v1570_v51  ;;  %v1658_v24 = vld [vmem:[#allocation10 + $0xf20] sm:$0xff] }
 0x3a9   :  { %8338 = vmatpush1.bf16.msra.mxu1 %v10647_v3  ;;  %8175 = vmatprep.subr.bf16.mxu0 %v10662_v23  ;;  %v10743_v3 = vcombine.low %v1563_v46, %v1571_v52  ;;  %v10758_v23 = vcombine.high %v1578_v33, %v1586_v57  ;;  %v1666_v51 = vld [vmem:[#allocation10 + $0xf60] sm:$0xff]  ;;  %v1659_v46 = vld [vmem:[#allocation10 + $0xf28] sm:$0xff] }
 0x3aa   :  { %8339 = vmatprep.subr.bf16.mxu1 %v10664_v4  ;;  %v10760_v4 = vcombine.high %v1579_v59, %v1587_v61  ;;  %v1667_v52 = vld [vmem:[#allocation10 + $0xf68] sm:$0xff] }
 0x3ac   :  { %8176 = vmatpush1.bf16.msra.mxu0 %v10661_v6  ;;  %v10757_v6 = vcombine.low %v1578_v33, %v1586_v57  ;;  %v1674_v33 = vld [vmem:[#allocation10 + $0xfa0] sm:$0xff] }
 0x3ad   :  { %8340 = vmatpush1.bf16.msra.mxu1 %v10663_v10  ;;  %8177 = vmatprep.subr.bf16.mxu0 %v10678_v11  ;;  %v10759_v10 = vcombine.low %v1579_v59, %v1587_v61  ;;  %v10774_v11 = vcombine.high %v1594_v5, %v1602_v7  ;;  %v1682_v57 = vld [vmem:[#allocation10 + $0xfe0] sm:$0xff]  ;;  %v1675_v59 = vld [vmem:[#allocation10 + $0xfa8] sm:$0xff] }
 0x3ae   :  { %8341 = vmatprep.subr.bf16.mxu1 %v10680_v12  ;;  %v10776_v12 = vcombine.high %v1595_v63, %v1603_v9  ;;  %v1683_v61 = vld [vmem:[#allocation10 + $0xfe8] sm:$0xff] }
 0x3b0   :  { %8178 = vmatpush1.bf16.msra.mxu0 %v10677_v17  ;;  %v10773_v17 = vcombine.low %v1594_v5, %v1602_v7  ;;  %v1690_v5 = vld [vmem:[#allocation10 + $0x1020] sm:$0xff] }
 0x3b1   :  { %8342 = vmatpush1.bf16.msra.mxu1 %v10679_v18  ;;  %8179 = vmatprep.subr.bf16.mxu0 %v10694_v21  ;;  %v10775_v18 = vcombine.low %v1595_v63, %v1603_v9  ;;  %v10790_v21 = vcombine.high %v1610_v19, %v1618_v13  ;;  %v1698_v7 = vld [vmem:[#allocation10 + $0x1060] sm:$0xff]  ;;  %v1691_v63 = vld [vmem:[#allocation10 + $0x1028] sm:$0xff] }
 0x3b2   :  { %8343 = vmatprep.subr.bf16.mxu1 %v10696_v28  ;;  %v10792_v28 = vcombine.high %v1611_v14, %v1619_v16  ;;  %v1699_v9 = vld [vmem:[#allocation10 + $0x1068] sm:$0xff] }
 0x3b4   :  { %8180 = vmatpush1.bf16.msra.mxu0 %v10693_v60  ;;  %v10789_v60 = vcombine.low %v1610_v19, %v1618_v13  ;;  %v1706_v19 = vld [vmem:[#allocation10 + $0x10a0] sm:$0xff] }
 0x3b5   :  { %8344 = vmatpush1.bf16.msra.mxu1 %v10695_v37  ;;  %8181 = vmatprep.subr.bf16.mxu0 %v10710_v38  ;;  %v10791_v37 = vcombine.low %v1611_v14, %v1619_v16  ;;  %v10806_v38 = vcombine.high %v1626_v29, %v1634_v30  ;;  %v1714_v13 = vld [vmem:[#allocation10 + $0x10e0] sm:$0xff]  ;;  %v10869_v14 = vcombine.low %v1690_v5, %v1698_v7  ;;  %v1707_v16 = vld [vmem:[#allocation10 + $0x10a8] sm:$0xff] }
 0x3b6   :  { %8345 = vmatprep.subr.bf16.mxu1 %v10712_v39  ;;  %v10808_v39 = vcombine.high %v1627_v31, %v1635_v32 }
 0x3b8   :  { %8182 = vmatpush1.bf16.msra.mxu0 %v10709_v45  ;;  %v10805_v45 = vcombine.low %v1626_v29, %v1634_v30  ;;  %v1730_v29 = vld [vmem:[#allocation10 + $0x1160] sm:$0xff] }
 0x3b9   :  { %8346 = vmatpush1.bf16.msra.mxu1 %v10711_v22  ;;  %8183 = vmatprep.subr.bf16.mxu0 %v10726_v47  ;;  %v10807_v22 = vcombine.low %v1627_v31, %v1635_v32  ;;  %v10822_v47 = vcombine.high %v1642_v40, %v1650_v42  ;;  %v1723_v31 = vld [vmem:[#allocation10 + $0x1128] sm:$0xff] }
 0x3ba   :  { %8347 = vmatprep.subr.bf16.mxu1 %v10728_v50  ;;  %v10824_v50 = vcombine.high %v1643_v43, %v1651_v44  ;;  %v1731_v32 = vld [vmem:[#allocation10 + $0x1168] sm:$0xff] }
 0x3bc   :  { %8184 = vmatpush1.bf16.msra.mxu0 %v10725_v53  ;;  %v10821_v53 = vcombine.low %v1642_v40, %v1650_v42  ;;  %v1738_v40 = vld [vmem:[#allocation10 + $0x11a0] sm:$0xff] }
 0x3bd   :  { %8348 = vmatpush1.bf16.msra.mxu1 %v10727_v25  ;;  %8185 = vmatprep.subr.bf16.mxu0 %v10742_v54  ;;  %v10823_v25 = vcombine.low %v1643_v43, %v1651_v44  ;;  %v10838_v54 = vcombine.high %v1658_v24, %v1666_v51  ;;  %v1746_v42 = vld [vmem:[#allocation10 + $0x11e0] sm:$0xff]  ;;  %v1739_v43 = vld [vmem:[#allocation10 + $0x11a8] sm:$0xff] }
 0x3be   :  { %8349 = vmatprep.subr.bf16.mxu1 %v10744_v55  ;;  %v10840_v55 = vcombine.high %v1659_v46, %v1667_v52  ;;  %v1747_v44 = vld [vmem:[#allocation10 + $0x11e8] sm:$0xff] }
 0x3c0   :  { %8186 = vmatpush1.bf16.msra.mxu0 %v10741_v62  ;;  %v10837_v62 = vcombine.low %v1658_v24, %v1666_v51  ;;  %v1754_v24 = vld [vmem:[#allocation10 + $0x1220] sm:$0xff] }
 0x3c1   :  { %8350 = vmatpush1.bf16.msra.mxu1 %v10743_v3  ;;  %8187 = vmatprep.subr.bf16.mxu0 %v10758_v23  ;;  %v10839_v3 = vcombine.low %v1659_v46, %v1667_v52  ;;  %v10854_v23 = vcombine.high %v1674_v33, %v1682_v57  ;;  %v1762_v51 = vld [vmem:[#allocation10 + $0x1260] sm:$0xff]  ;;  %v1755_v46 = vld [vmem:[#allocation10 + $0x1228] sm:$0xff] }
 0x3c2   :  { %8351 = vmatprep.subr.bf16.mxu1 %v10760_v4  ;;  %v10856_v4 = vcombine.high %v1675_v59, %v1683_v61  ;;  %v1763_v52 = vld [vmem:[#allocation10 + $0x1268] sm:$0xff] }
 0x3c4   :  { %8188 = vmatpush1.bf16.msra.mxu0 %v10757_v6  ;;  %v10853_v6 = vcombine.low %v1674_v33, %v1682_v57  ;;  %v1770_v33 = vld [vmem:[#allocation10 + $0x12a0] sm:$0xff] }
 0x3c5   :  { %8352 = vmatpush1.bf16.msra.mxu1 %v10759_v10  ;;  %8189 = vmatprep.subr.bf16.mxu0 %v10774_v11  ;;  %v10855_v10 = vcombine.low %v1675_v59, %v1683_v61  ;;  %v10870_v11 = vcombine.high %v1690_v5, %v1698_v7  ;;  %v1778_v57 = vld [vmem:[#allocation10 + $0x12e0] sm:$0xff]  ;;  %v1771_v59 = vld [vmem:[#allocation10 + $0x12a8] sm:$0xff] }
 0x3c6   :  { %8353 = vmatprep.subr.bf16.mxu1 %v10776_v12  ;;  %v10872_v12 = vcombine.high %v1691_v63, %v1699_v9  ;;  %v1779_v61 = vld [vmem:[#allocation10 + $0x12e8] sm:$0xff]  ;;  %v1786_v5 = vld [vmem:[#allocation10 + $0x1320] sm:$0xff] }
 0x3c7   :  { %v1794_v7 = vld [vmem:[#allocation10 + $0x1360] sm:$0xff] }
 0x3c8   :  { %8190 = vmatpush1.bf16.msra.mxu0 %v10773_v17  ;;  %v1715_v17 = vld [vmem:[#allocation10 + $0x10e8] sm:$0xff] }
 0x3c9   :  { %8354 = vmatpush1.bf16.msra.mxu1 %v10775_v18  ;;  %8191 = vmatprep.subr.bf16.mxu0 %v10790_v21  ;;  %v10871_v18 = vcombine.low %v1691_v63, %v1699_v9  ;;  %v10886_v21 = vcombine.high %v1706_v19, %v1714_v13  ;;  %v10888_v30 = vcombine.high %v1707_v16, %v1715_v17  ;;  %v1787_v63 = vld [vmem:[#allocation10 + $0x1328] sm:$0xff] }
 0x3ca   :  { %8355 = vmatprep.subr.bf16.mxu1 %v10792_v28  ;;  %v1722_v28 = vld [vmem:[#allocation10 + $0x1120] sm:$0xff]  ;;  %v1795_v9 = vld [vmem:[#allocation10 + $0x1368] sm:$0xff] }
 0x3cc   :  { %8192 = vmatpush1.bf16.msra.mxu0 %v10789_v60  ;;  %v10885_v60 = vcombine.low %v1706_v19, %v1714_v13  ;;  %v1802_v19 = vld [vmem:[#allocation10 + $0x13a0] sm:$0xff] }
 0x3cd   :  { %8356 = vmatpush1.bf16.msra.mxu1 %v10791_v37  ;;  %8193 = vmatprep.subr.bf16.mxu0 %v10806_v38  ;;  %v10887_v37 = vcombine.low %v1707_v16, %v1715_v17  ;;  %v10902_v38 = vcombine.high %v1722_v28, %v1730_v29  ;;  %v1810_v13 = vld [vmem:[#allocation10 + $0x13e0] sm:$0xff]  ;;  %v1811_v16 = vld [vmem:[#allocation10 + $0x13e8] sm:$0xff]  ;;  %v10965_v17 = vcombine.low %v1786_v5, %v1794_v7 }
 0x3ce   :  { %8357 = vmatprep.subr.bf16.mxu1 %v10808_v39  ;;  %v10904_v39 = vcombine.high %v1723_v31, %v1731_v32 }
 0x3d0   :  { %8194 = vmatpush1.bf16.msra.mxu0 %v10805_v45  ;;  %v10901_v45 = vcombine.low %v1722_v28, %v1730_v29  ;;  %v1818_v29 = vld [vmem:[#allocation10 + $0x1420] sm:$0xff] }
 0x3d1   :  { %8358 = vmatpush1.bf16.msra.mxu1 %v10807_v22  ;;  %8195 = vmatprep.subr.bf16.mxu0 %v10822_v47  ;;  %v10903_v22 = vcombine.low %v1723_v31, %v1731_v32  ;;  %v10918_v47 = vcombine.high %v1738_v40, %v1746_v42  ;;  %v1819_v31 = vld [vmem:[#allocation10 + $0x1428] sm:$0xff] }
 0x3d2   :  { %8359 = vmatprep.subr.bf16.mxu1 %v10824_v50  ;;  %v10920_v50 = vcombine.high %v1739_v43, %v1747_v44  ;;  %v1827_v32 = vld [vmem:[#allocation10 + $0x1468] sm:$0xff] }
 0x3d4   :  { %8196 = vmatpush1.bf16.msra.mxu0 %v10821_v53  ;;  %v10917_v53 = vcombine.low %v1738_v40, %v1746_v42  ;;  %v1834_v40 = vld [vmem:[#allocation10 + $0x14a0] sm:$0xff] }
 0x3d5   :  { %8360 = vmatpush1.bf16.msra.mxu1 %v10823_v25  ;;  %8197 = vmatprep.subr.bf16.mxu0 %v10838_v54  ;;  %v10919_v25 = vcombine.low %v1739_v43, %v1747_v44  ;;  %v10934_v54 = vcombine.high %v1754_v24, %v1762_v51  ;;  %v1842_v42 = vld [vmem:[#allocation10 + $0x14e0] sm:$0xff]  ;;  %v1835_v43 = vld [vmem:[#allocation10 + $0x14a8] sm:$0xff] }
 0x3d6   :  { %8361 = vmatprep.subr.bf16.mxu1 %v10840_v55  ;;  %v10936_v55 = vcombine.high %v1755_v46, %v1763_v52  ;;  %v1843_v44 = vld [vmem:[#allocation10 + $0x14e8] sm:$0xff] }
 0x3d8   :  { %8198 = vmatpush1.bf16.msra.mxu0 %v10837_v62  ;;  %v10933_v62 = vcombine.low %v1754_v24, %v1762_v51  ;;  %v1850_v24 = vld [vmem:[#allocation10 + $0x1520] sm:$0xff] }
 0x3d9   :  { %8362 = vmatpush1.bf16.msra.mxu1 %v10839_v3  ;;  %8199 = vmatprep.subr.bf16.mxu0 %v10854_v23  ;;  %v10935_v3 = vcombine.low %v1755_v46, %v1763_v52  ;;  %v10950_v23 = vcombine.high %v1770_v33, %v1778_v57  ;;  %v1858_v51 = vld [vmem:[#allocation10 + $0x1560] sm:$0xff]  ;;  %v1851_v46 = vld [vmem:[#allocation10 + $0x1528] sm:$0xff] }
 0x3da   :  { %8363 = vmatprep.subr.bf16.mxu1 %v10856_v4  ;;  %v10952_v4 = vcombine.high %v1771_v59, %v1779_v61  ;;  %v1859_v52 = vld [vmem:[#allocation10 + $0x1568] sm:$0xff] }
 0x3dc   :  { %8200 = vmatpush1.bf16.msra.mxu0 %v10853_v6  ;;  %v10949_v6 = vcombine.low %v1770_v33, %v1778_v57  ;;  %v1866_v33 = vld [vmem:[#allocation10 + $0x15a0] sm:$0xff] }
 0x3dd   :  { %8364 = vmatpush1.bf16.msra.mxu1 %v10855_v10  ;;  %8210 = vmatprep.subr.bf16.mxu0 %v10870_v11  ;;  %v10951_v10 = vcombine.low %v1771_v59, %v1779_v61  ;;  %v10966_v11 = vcombine.high %v1786_v5, %v1794_v7  ;;  %v1874_v57 = vld [vmem:[#allocation10 + $0x15e0] sm:$0xff]  ;;  %v1867_v59 = vld [vmem:[#allocation10 + $0x15a8] sm:$0xff] }
 0x3de   :  { %8374 = vmatprep.subr.bf16.mxu1 %v10872_v12  ;;  %v10968_v12 = vcombine.high %v1787_v63, %v1795_v9  ;;  %v1875_v61 = vld [vmem:[#allocation10 + $0x15e8] sm:$0xff]  ;;  %v1882_v5 = vld [vmem:[#allocation10 + $0x1620] sm:$0xff] }
 0x3df   :  { %8202 = vmatmul.mubr.bf16.vlgmr.msra.gmra.mrb[16].mxu0 %v12374_v41  ;;  %v1890_v7 = vld [vmem:[#allocation10 + $0x1660] sm:$0xff] }
 0x3e0   :  { %8366 = vmatmul.mubr.bf16.vlgmr.msra.gmra.mrb[16].mxu1 %v12374_v41  ;;  %8211 = vmatpush1.bf16.msra.mxu0 %v10869_v14  ;;  %v1803_v14 = vld [vmem:[#allocation10 + $0x13a8] sm:$0xff] }
 0x3e1   :  { %8242 = vmatprep.mubr.bf16.mxu0 %v12377_v48  ;;  %8375 = vmatpush1.bf16.msra.mxu1 %v10871_v18  ;;  %v10967_v18 = vcombine.low %v1787_v63, %v1795_v9  ;;  %v10984_v28 = vcombine.high %v1803_v14, %v1811_v16  ;;  %v1883_v63 = vld [vmem:[#allocation10 + $0x1628] sm:$0xff] }
 0x3e2   :  { %8406 = vmatprep.mubr.bf16.mxu1 %v12377_v48  ;;  %8212 = vmatprep.subr.bf16.mxu0 %v10886_v21  ;;  %v10982_v21 = vcombine.high %v1802_v19, %v1810_v13  ;;  %v1891_v9 = vld [vmem:[#allocation10 + $0x1668] sm:$0xff] }
 0x3e3   :  { %8376 = vmatprep.subr.bf16.mxu1 %v10888_v30  ;;  %v1826_v30 = vld [vmem:[#allocation10 + $0x1460] sm:$0xff] }
 0x3e4   :  { %8213 = vmatpush1.bf16.msra.mxu0 %v10885_v60  ;;  %v10981_v60 = vcombine.low %v1802_v19, %v1810_v13  ;;  %v1898_v19 = vld [vmem:[#allocation10 + $0x16a0] sm:$0xff] }
 0x3e5   :  { %8377 = vmatpush1.bf16.msra.mxu1 %v10887_v37  ;;  %8214 = vmatprep.subr.bf16.mxu0 %v10902_v38  ;;  %v10983_v37 = vcombine.low %v1803_v14, %v1811_v16  ;;  %v10998_v38 = vcombine.high %v1818_v29, %v1826_v30  ;;  %v1906_v13 = vld [vmem:[#allocation10 + $0x16e0] sm:$0xff]  ;;  %v1899_v14 = vld [vmem:[#allocation10 + $0x16a8] sm:$0xff] }
 0x3e6   :  { %8378 = vmatprep.subr.bf16.mxu1 %v10904_v39  ;;  %v11000_v39 = vcombine.high %v1819_v31, %v1827_v32  ;;  %v1907_v16 = vld [vmem:[#allocation10 + $0x16e8] sm:$0xff] }
 0x3e8   :  { %8215 = vmatpush1.bf16.msra.mxu0 %v10901_v45  ;;  %v10997_v45 = vcombine.low %v1818_v29, %v1826_v30  ;;  %v1914_v29 = vld [vmem:[#allocation10 + $0x1720] sm:$0xff] }
 0x3e9   :  { %8379 = vmatpush1.bf16.msra.mxu1 %v10903_v22  ;;  %8216 = vmatprep.subr.bf16.mxu0 %v10918_v47  ;;  %v10999_v22 = vcombine.low %v1819_v31, %v1827_v32  ;;  %v11014_v47 = vcombine.high %v1834_v40, %v1842_v42  ;;  %v1922_v30 = vld [vmem:[#allocation10 + $0x1760] sm:$0xff]  ;;  %v1915_v31 = vld [vmem:[#allocation10 + $0x1728] sm:$0xff] }
 0x3ea   :  { %8380 = vmatprep.subr.bf16.mxu1 %v10920_v50  ;;  %v11016_v50 = vcombine.high %v1835_v43, %v1843_v44  ;;  %v1923_v32 = vld [vmem:[#allocation10 + $0x1768] sm:$0xff] }
 0x3ec   :  { %8217 = vmatpush1.bf16.msra.mxu0 %v10917_v53  ;;  %v11013_v53 = vcombine.low %v1834_v40, %v1842_v42  ;;  %v1930_v40 = vld [vmem:[#allocation10 + $0x17a0] sm:$0xff] }
 0x3ed   :  { %8381 = vmatpush1.bf16.msra.mxu1 %v10919_v25  ;;  %8218 = vmatprep.subr.bf16.mxu0 %v10934_v54  ;;  %v11015_v25 = vcombine.low %v1835_v43, %v1843_v44  ;;  %v11030_v54 = vcombine.high %v1850_v24, %v1858_v51  ;;  %v1938_v42 = vld [vmem:[#allocation10 + $0x17e0] sm:$0xff]  ;;  %v1931_v43 = vld [vmem:[#allocation10 + $0x17a8] sm:$0xff] }
 0x3ee   :  { %8382 = vmatprep.subr.bf16.mxu1 %v10936_v55  ;;  %v11032_v55 = vcombine.high %v1851_v46, %v1859_v52  ;;  %v1939_v44 = vld [vmem:[#allocation10 + $0x17e8] sm:$0xff] }
 0x3f0   :  { %8219 = vmatpush1.bf16.msra.mxu0 %v10933_v62  ;;  %v11029_v62 = vcombine.low %v1850_v24, %v1858_v51  ;;  %v1946_v24 = vld [vmem:[#allocation10 + $0x1820] sm:$0xff] }
 0x3f1   :  { %8383 = vmatpush1.bf16.msra.mxu1 %v10935_v3  ;;  %8220 = vmatprep.subr.bf16.mxu0 %v10950_v23  ;;  %v11031_v3 = vcombine.low %v1851_v46, %v1859_v52  ;;  %v11046_v23 = vcombine.high %v1866_v33, %v1874_v57  ;;  %v1954_v51 = vld [vmem:[#allocation10 + $0x1860] sm:$0xff]  ;;  %v1947_v46 = vld [vmem:[#allocation10 + $0x1828] sm:$0xff] }
 0x3f2   :  { %8384 = vmatprep.subr.bf16.mxu1 %v10952_v4  ;;  %v11048_v4 = vcombine.high %v1867_v59, %v1875_v61  ;;  %v1955_v52 = vld [vmem:[#allocation10 + $0x1868] sm:$0xff] }
 0x3f4   :  { %8221 = vmatpush1.bf16.msra.mxu0 %v10949_v6  ;;  %v11045_v6 = vcombine.low %v1866_v33, %v1874_v57  ;;  %v1962_v33 = vld [vmem:[#allocation10 + $0x18a0] sm:$0xff] }
 0x3f5   :  { %8385 = vmatpush1.bf16.msra.mxu1 %v10951_v10  ;;  %8222 = vmatprep.subr.bf16.mxu0 %v10966_v11  ;;  %v11047_v10 = vcombine.low %v1867_v59, %v1875_v61  ;;  %v11062_v11 = vcombine.high %v1882_v5, %v1890_v7  ;;  %v1970_v57 = vld [vmem:[#allocation10 + $0x18e0] sm:$0xff]  ;;  %v11125_v59 = vcombine.low %v1946_v24, %v1954_v51  ;;  %v1963_v61 = vld [vmem:[#allocation10 + $0x18a8] sm:$0xff] }
 0x3f6   :  { %8386 = vmatprep.subr.bf16.mxu1 %v10968_v12  ;;  %v11064_v12 = vcombine.high %v1883_v63, %v1891_v9 }
 0x3f8   :  { %8223 = vmatpush1.bf16.msra.mxu0 %v10965_v17  ;;  %v11061_v17 = vcombine.low %v1882_v5, %v1890_v7  ;;  %v1986_v5 = vld [vmem:[#allocation10 + $0x1960] sm:$0xff] }
 0x3f9   :  { %8387 = vmatpush1.bf16.msra.mxu1 %v10967_v18  ;;  %8224 = vmatprep.subr.bf16.mxu0 %v10982_v21  ;;  %v11063_v18 = vcombine.low %v1883_v63, %v1891_v9  ;;  %v11078_v21 = vcombine.high %v1898_v19, %v1906_v13  ;;  %v1979_v63 = vld [vmem:[#allocation10 + $0x1928] sm:$0xff] }
 0x3fa   :  { %8388 = vmatprep.subr.bf16.mxu1 %v10984_v28  ;;  %v11080_v28 = vcombine.high %v1899_v14, %v1907_v16  ;;  %v1987_v9 = vld [vmem:[#allocation10 + $0x1968] sm:$0xff] }
 0x3fc   :  { %8225 = vmatpush1.bf16.msra.mxu0 %v10981_v60  ;;  %v11077_v60 = vcombine.low %v1898_v19, %v1906_v13  ;;  %v1994_v19 = vld [vmem:[#allocation10 + $0x19a0] sm:$0xff] }
 0x3fd   :  { %8389 = vmatpush1.bf16.msra.mxu1 %v10983_v37  ;;  %8226 = vmatprep.subr.bf16.mxu0 %v10998_v38  ;;  %v11079_v37 = vcombine.low %v1899_v14, %v1907_v16  ;;  %v11094_v38 = vcombine.high %v1914_v29, %v1922_v30  ;;  %v2002_v13 = vld [vmem:[#allocation10 + $0x19e0] sm:$0xff]  ;;  %v1995_v14 = vld [vmem:[#allocation10 + $0x19a8] sm:$0xff] }
 0x3fe   :  { %8390 = vmatprep.subr.bf16.mxu1 %v11000_v39  ;;  %v11096_v39 = vcombine.high %v1915_v31, %v1923_v32  ;;  %v2003_v16 = vld [vmem:[#allocation10 + $0x19e8] sm:$0xff] }
 0x400   :  { %8227 = vmatpush1.bf16.msra.mxu0 %v10997_v45  ;;  %v11093_v45 = vcombine.low %v1914_v29, %v1922_v30  ;;  %v2010_v29 = vld [vmem:[#allocation10 + $0x1a20] sm:$0xff] }
 0x401   :  { %8391 = vmatpush1.bf16.msra.mxu1 %v10999_v22  ;;  %8228 = vmatprep.subr.bf16.mxu0 %v11014_v47  ;;  %v11095_v22 = vcombine.low %v1915_v31, %v1923_v32  ;;  %v11110_v47 = vcombine.high %v1930_v40, %v1938_v42  ;;  %v2018_v30 = vld [vmem:[#allocation10 + $0x1a60] sm:$0xff]  ;;  %v2011_v31 = vld [vmem:[#allocation10 + $0x1a28] sm:$0xff] }
 0x402   :  { %8392 = vmatprep.subr.bf16.mxu1 %v11016_v50  ;;  %v11112_v50 = vcombine.high %v1931_v43, %v1939_v44  ;;  %v2019_v32 = vld [vmem:[#allocation10 + $0x1a68] sm:$0xff] }
 0x404   :  { %8229 = vmatpush1.bf16.msra.mxu0 %v11013_v53  ;;  %v11109_v53 = vcombine.low %v1930_v40, %v1938_v42  ;;  %v2026_v40 = vld [vmem:[#allocation10 + $0x1aa0] sm:$0xff] }
 0x405   :  { %8393 = vmatpush1.bf16.msra.mxu1 %v11015_v25  ;;  %8230 = vmatprep.subr.bf16.mxu0 %v11030_v54  ;;  %v11111_v25 = vcombine.low %v1931_v43, %v1939_v44  ;;  %v11126_v54 = vcombine.high %v1946_v24, %v1954_v51  ;;  %v2034_v42 = vld [vmem:[#allocation10 + $0x1ae0] sm:$0xff]  ;;  %v2027_v43 = vld [vmem:[#allocation10 + $0x1aa8] sm:$0xff] }
 0x406   :  { %8394 = vmatprep.subr.bf16.mxu1 %v11032_v55  ;;  %v11128_v55 = vcombine.high %v1947_v46, %v1955_v52  ;;  %v2035_v44 = vld [vmem:[#allocation10 + $0x1ae8] sm:$0xff]  ;;  %v2042_v24 = vld [vmem:[#allocation10 + $0x1b20] sm:$0xff] }
 0x407   :  { %v2050_v51 = vld [vmem:[#allocation10 + $0x1b60] sm:$0xff] }
 0x408   :  { %8231 = vmatpush1.bf16.msra.mxu0 %v11029_v62  ;;  %v1971_v62 = vld [vmem:[#allocation10 + $0x18e8] sm:$0xff] }
 0x409   :  { %8395 = vmatpush1.bf16.msra.mxu1 %v11031_v3  ;;  %8232 = vmatprep.subr.bf16.mxu0 %v11046_v23  ;;  %v11127_v3 = vcombine.low %v1947_v46, %v1955_v52  ;;  %v11142_v23 = vcombine.high %v1962_v33, %v1970_v57  ;;  %v11144_v7 = vcombine.high %v1963_v61, %v1971_v62  ;;  %v2043_v46 = vld [vmem:[#allocation10 + $0x1b28] sm:$0xff] }
 0x40a   :  { %8396 = vmatprep.subr.bf16.mxu1 %v11048_v4  ;;  %v1978_v4 = vld [vmem:[#allocation10 + $0x1920] sm:$0xff]  ;;  %v2051_v52 = vld [vmem:[#allocation10 + $0x1b68] sm:$0xff] }
 0x40c   :  { %8233 = vmatpush1.bf16.msra.mxu0 %v11045_v6  ;;  %v11141_v6 = vcombine.low %v1962_v33, %v1970_v57  ;;  %v11224_v33 = vcombine.high %v2043_v46, %v2051_v52  ;;  %v2058_v57 = vld [vmem:[#allocation10 + $0x1ba0] sm:$0xff] }
 0x40d   :  { %8397 = vmatpush1.bf16.msra.mxu1 %v11047_v10  ;;  %8234 = vmatprep.subr.bf16.mxu0 %v11062_v11  ;;  %v11143_v10 = vcombine.low %v1963_v61, %v1971_v62  ;;  %v11158_v11 = vcombine.high %v1978_v4, %v1986_v5 }
 0x40e   :  { %8398 = vmatprep.subr.bf16.mxu1 %v11064_v12  ;;  %v11160_v12 = vcombine.high %v1979_v63, %v1987_v9 }
 0x410   :  { %8235 = vmatpush1.bf16.msra.mxu0 %v11061_v17  ;;  %v11157_v17 = vcombine.low %v1978_v4, %v1986_v5 }
 0x411   :  { %8399 = vmatpush1.bf16.msra.mxu1 %v11063_v18  ;;  %8236 = vmatprep.subr.bf16.mxu0 %v11078_v21  ;;  %v11159_v18 = vcombine.low %v1979_v63, %v1987_v9  ;;  %v11174_v21 = vcombine.high %v1994_v19, %v2002_v13 }
 0x412   :  { %8400 = vmatprep.subr.bf16.mxu1 %v11080_v28  ;;  %v11176_v28 = vcombine.high %v1995_v14, %v2003_v16 }
 0x414   :  { %8237 = vmatpush1.bf16.msra.mxu0 %v11077_v60  ;;  %v11173_v60 = vcombine.low %v1994_v19, %v2002_v13  ;;  %v2074_v19 = vld [vmem:[#allocation10 + $0x1c20] sm:$0xff] }
 0x415   :  { %8401 = vmatpush1.bf16.msra.mxu1 %v11079_v37  ;;  %8238 = vmatprep.subr.bf16.mxu0 %v11094_v38  ;;  %v11175_v37 = vcombine.low %v1995_v14, %v2003_v16  ;;  %v11190_v38 = vcombine.high %v2010_v29, %v2018_v30  ;;  %v2082_v13 = vld [vmem:[#allocation10 + $0x1c60] sm:$0xff]  ;;  %v2075_v14 = vld [vmem:[#allocation10 + $0x1c28] sm:$0xff] }
 0x416   :  { %8402 = vmatprep.subr.bf16.mxu1 %v11096_v39  ;;  %v11192_v39 = vcombine.high %v2011_v31, %v2019_v32  ;;  %v2083_v16 = vld [vmem:[#allocation10 + $0x1c68] sm:$0xff] }
 0x418   :  { %8239 = vmatpush1.bf16.msra.mxu0 %v11093_v45  ;;  %v11189_v45 = vcombine.low %v2010_v29, %v2018_v30  ;;  %v2090_v29 = vld [vmem:[#allocation10 + $0x1ca0] sm:$0xff] }
 0x419   :  { %8403 = vmatpush1.bf16.msra.mxu1 %v11095_v22  ;;  %8240 = vmatprep.subr.bf16.mxu0 %v11110_v47  ;;  %v11191_v22 = vcombine.low %v2011_v31, %v2019_v32  ;;  %v11206_v47 = vcombine.high %v2026_v40, %v2034_v42  ;;  %v2098_v30 = vld [vmem:[#allocation10 + $0x1ce0] sm:$0xff]  ;;  %v2091_v31 = vld [vmem:[#allocation10 + $0x1ca8] sm:$0xff] }
 0x41a   :  { %8404 = vmatprep.subr.bf16.mxu1 %v11112_v50  ;;  %v11208_v50 = vcombine.high %v2027_v43, %v2035_v44  ;;  %v2099_v32 = vld [vmem:[#allocation10 + $0x1ce8] sm:$0xff] }
 0x41c   :  { %8241 = vmatpush1.bf16.msra.mxu0 %v11109_v53  ;;  %v11205_v53 = vcombine.low %v2026_v40, %v2034_v42  ;;  %v2106_v40 = vld [vmem:[#allocation10 + $0x1d20] sm:$0xff] }
 0x41d   :  { %8405 = vmatpush1.bf16.msra.mxu1 %v11111_v25  ;;  %8251 = vmatprep.subr.bf16.mxu0 %v11126_v54  ;;  %v11207_v25 = vcombine.low %v2027_v43, %v2035_v44  ;;  %v11222_v54 = vcombine.high %v2042_v24, %v2050_v51  ;;  %v2114_v42 = vld [vmem:[#allocation10 + $0x1d60] sm:$0xff]  ;;  %v2107_v43 = vld [vmem:[#allocation10 + $0x1d28] sm:$0xff] }
 0x41e   :  { %8415 = vmatprep.subr.bf16.mxu1 %v11128_v55  ;;  %v2115_v44 = vld [vmem:[#allocation10 + $0x1d68] sm:$0xff] }
 0x41f   :  { %8243 = vmatmul.mubr.bf16.vlgmr.msra.gmra.mrb[16].mxu0 %v12397_v20 }
 0x420   :  { %8407 = vmatmul.mubr.bf16.vlgmr.msra.gmra.mrb[16].mxu1 %v12397_v20  ;;  %8252 = vmatpush1.bf16.msra.mxu0 %v11125_v59  ;;  %v2066_v59 = vld [vmem:[#allocation10 + $0x1be0] sm:$0xff] }
 0x421   :  { %8283 = vmatprep.mubr.bf16.mxu0 %v12399_v34  ;;  %8416 = vmatpush1.bf16.msra.mxu1 %v11127_v3  ;;  %v2059_v3 = vld [vmem:[#allocation10 + $0x1ba8] sm:$0xff] }
 0x422   :  { %8447 = vmatprep.mubr.bf16.mxu1 %v12399_v34  ;;  %8253 = vmatprep.subr.bf16.mxu0 %v11142_v23  ;;  %v2067_v23 = vld [vmem:[#allocation10 + $0x1be8] sm:$0xff] }
 0x423   :  { %8417 = vmatprep.subr.bf16.mxu1 %v11144_v7  ;;  %v11221_v7 = vcombine.low %v2042_v24, %v2050_v51  ;;  %v2122_v24 = vld [vmem:[#allocation10 + $0x1da0] sm:$0xff] }
 0x424   :  { %8254 = vmatpush1.bf16.msra.mxu0 %v11141_v6  ;;  %v11223_v6 = vcombine.low %v2043_v46, %v2051_v52  ;;  %v2130_v51 = vld [vmem:[#allocation10 + $0x1de0] sm:$0xff]  ;;  %v2123_v46 = vld [vmem:[#allocation10 + $0x1da8] sm:$0xff] }
 0x425   :  { %8418 = vmatpush1.bf16.msra.mxu1 %v11143_v10  ;;  %8255 = vmatprep.subr.bf16.mxu0 %v11158_v11  ;;  %v11238_v10 = vcombine.high %v2058_v57, %v2066_v59  ;;  %v2131_v52 = vld [vmem:[#allocation10 + $0x1de8] sm:$0xff] }
 0x426   :  { %8419 = vmatprep.subr.bf16.mxu1 %v11160_v12  ;;  %v11240_v12 = vcombine.high %v2059_v3, %v2067_v23 }
 0x428   :  { %8256 = vmatpush1.bf16.msra.mxu0 %v11157_v17  ;;  %v11237_v17 = vcombine.low %v2058_v57, %v2066_v59  ;;  %v2138_v57 = vld [vmem:[#allocation10 + $0x1e20] sm:$0xff] }
 0x429   :  { %8420 = vmatpush1.bf16.msra.mxu1 %v11159_v18  ;;  %8257 = vmatprep.subr.bf16.mxu0 %v11174_v21  ;;  %v11239_v18 = vcombine.low %v2059_v3, %v2067_v23  ;;  %v11254_v21 = vcombine.high %v2074_v19, %v2082_v13  ;;  %v2146_v59 = vld [vmem:[#allocation10 + $0x1e60] sm:$0xff]  ;;  %v2139_v3 = vld [vmem:[#allocation10 + $0x1e28] sm:$0xff] }
 0x42a   :  { %8421 = vmatprep.subr.bf16.mxu1 %v11176_v28  ;;  %v11256_v28 = vcombine.high %v2075_v14, %v2083_v16  ;;  %v2147_v23 = vld [vmem:[#allocation10 + $0x1e68] sm:$0xff] }
 0x42c   :  { %8258 = vmatpush1.bf16.msra.mxu0 %v11173_v60  ;;  %v11253_v60 = vcombine.low %v2074_v19, %v2082_v13  ;;  %v11317_v19 = vcombine.low %v2138_v57, %v2146_v59  ;;  %v11319_v13 = vcombine.low %v2139_v3, %v2147_v23 }
 0x42d   :  { %8422 = vmatpush1.bf16.msra.mxu1 %v11175_v37  ;;  %8259 = vmatprep.subr.bf16.mxu0 %v11190_v38  ;;  %v11255_v37 = vcombine.low %v2075_v14, %v2083_v16  ;;  %v11270_v38 = vcombine.high %v2090_v29, %v2098_v30 }
 0x42e   :  { %8423 = vmatprep.subr.bf16.mxu1 %v11192_v39  ;;  %v11272_v39 = vcombine.high %v2091_v31, %v2099_v32 }
 0x430   :  { %8260 = vmatpush1.bf16.msra.mxu0 %v11189_v45  ;;  %v11269_v45 = vcombine.low %v2090_v29, %v2098_v30 }
 0x431   :  { %8424 = vmatpush1.bf16.msra.mxu1 %v11191_v22  ;;  %8261 = vmatprep.subr.bf16.mxu0 %v11206_v47  ;;  %v11271_v22 = vcombine.low %v2091_v31, %v2099_v32  ;;  %v11286_v47 = vcombine.high %v2106_v40, %v2114_v42 }
 0x432   :  { %v12451_v55 = vpop.f32.mrb[12].mxu0  ;;  %8425 = vmatprep.subr.bf16.mxu1 %v11208_v50  ;;  %v11288_v50 = vcombine.high %v2107_v43, %v2115_v44 }
 0x433   :  { %v12453_v61 = vpop.f32.mrb[12].mxu1  ;;  %v12455_v62 = vpop.f32.mrb[13].mxu0 }
 0x434   :  { %v12457_v4 = vpop.f32.mrb[13].mxu1  ;;  %v7961_v5 = vpop.f32.mrb[14].mxu0  ;;  %8262 = vmatpush1.bf16.msra.mxu0 %v11205_v53  ;;  %v11285_v53 = vcombine.low %v2106_v40, %v2114_v42 }
 0x435   :  { %v8125_v63 = vpop.f32.mrb[14].mxu1  ;;  %8426 = vmatpush1.bf16.msra.mxu1 %v11207_v25  ;;  %v7962_v9 = vpop.f32.mrb[15].mxu0  ;;  %8263 = vmatprep.subr.bf16.mxu0 %v11222_v54  ;;  %v11287_v25 = vcombine.low %v2107_v43, %v2115_v44  ;;  %v11302_v54 = vcombine.high %v2122_v24, %v2130_v51  ;;  %v11301_v5 = vcombine.low %v2122_v24, %v2130_v51 }
 0x436   :  { %v8126_v11 = vpop.f32.mrb[15].mxu1  ;;  %8427 = vmatprep.subr.bf16.mxu1 %v11224_v33  ;;  %v11304_v33 = vcombine.high %v2123_v46, %v2131_v52  ;;  %v11318_v63 = vcombine.high %v2138_v57, %v2146_v59  ;;  %v11320_v9 = vcombine.high %v2139_v3, %v2147_v23  ;;  %v1205_v57 = vld [vmem:[#allocation10 + $0xf8] sm:$0xff]  ;;  %v1212_v23 = vld [vmem:[#allocation10 + $0x130] sm:$0xff] }
 0x437   :  { %v2155_v11 = vld [vmem:[#allocation10 + $0x1ea8] sm:$0xff] }
 0x438   :  { %8264 = vmatpush1.bf16.msra.mxu0 %v11221_v7  ;;  %v11303_v7 = vcombine.low %v2123_v46, %v2131_v52 }
 0x439   :  { %8428 = vmatpush1.bf16.msra.mxu1 %v11223_v6  ;;  %8265 = vmatprep.subr.bf16.mxu0 %v11238_v10  ;;  %v2154_v6 = vld [vmem:[#allocation10 + $0x1ea0] sm:$0xff] }
 0x43a   :  { %8429 = vmatprep.subr.bf16.mxu1 %v11240_v12  ;;  %v2162_v10 = vld [vmem:[#allocation10 + $0x1ee0] sm:$0xff]  ;;  %v2163_v12 = vld [vmem:[#allocation10 + $0x1ee8] sm:$0xff] }
 0x43b   :  { %v11334_v14 = vcombine.high %v2154_v6, %v2162_v10  ;;  %v11336_v16 = vcombine.high %v2155_v11, %v2163_v12  ;;  %v11333_v29 = vcombine.low %v2154_v6, %v2162_v10  ;;  %v11335_v30 = vcombine.low %v2155_v11, %v2163_v12 }
 0x43c   :  { %8266 = vmatpush1.bf16.msra.mxu0 %v11237_v17  ;;  %v2170_v17 = vld [vmem:[#allocation10 + $0x1f20] sm:$0xff] }
 0x43d   :  { %8430 = vmatpush1.bf16.msra.mxu1 %v11239_v18  ;;  %8267 = vmatprep.subr.bf16.mxu0 %v11254_v21  ;;  %v2178_v18 = vld [vmem:[#allocation10 + $0x1f60] sm:$0xff]  ;;  %v2171_v21 = vld [vmem:[#allocation10 + $0x1f28] sm:$0xff] }
 0x43e   :  { %8431 = vmatprep.subr.bf16.mxu1 %v11256_v28  ;;  %v2179_v28 = vld [vmem:[#allocation10 + $0x1f68] sm:$0xff]  ;;  %v11350_v31 = vcombine.high %v2170_v17, %v2178_v18  ;;  %v11349_v40 = vcombine.low %v2170_v17, %v2178_v18 }
 0x43f   :  { %v11352_v32 = vcombine.high %v2171_v21, %v2179_v28  ;;  %v11351_v42 = vcombine.low %v2171_v21, %v2179_v28 }
 0x440   :  { %8268 = vmatpush1.bf16.msra.mxu0 %v11253_v60  ;;  %v2186_v60 = vld [vmem:[#allocation10 + $0x1fa0] sm:$0xff] }
 0x441   :  { %8432 = vmatpush1.bf16.msra.mxu1 %v11255_v37  ;;  %8269 = vmatprep.subr.bf16.mxu0 %v11270_v38  ;;  %v2194_v37 = vld [vmem:[#allocation10 + $0x1fe0] sm:$0xff]  ;;  %v2187_v38 = vld [vmem:[#allocation10 + $0x1fa8] sm:$0xff] }
 0x442   :  { %8433 = vmatprep.subr.bf16.mxu1 %v11272_v39  ;;  %v2195_v39 = vld [vmem:[#allocation10 + $0x1fe8] sm:$0xff]  ;;  %v11366_v43 = vcombine.high %v2186_v60, %v2194_v37  ;;  %v11365_v24 = vcombine.low %v2186_v60, %v2194_v37 }
 0x443   :  { %v11368_v44 = vcombine.high %v2187_v38, %v2195_v39  ;;  %v11367_v51 = vcombine.low %v2187_v38, %v2195_v39  ;;  %v1260_v39 = vld [vmem:[#allocation10 + $0x2b0] sm:$0xff] }
 0x444   :  { %8270 = vmatpush1.bf16.msra.mxu0 %v11269_v45  ;;  %v1180_v45 = vld [vmem:[#allocation10 + $0x30] sm:$0xff] }
 0x445   :  { %8434 = vmatpush1.bf16.msra.mxu1 %v11271_v22  ;;  %8271 = vmatprep.subr.bf16.mxu0 %v11286_v47  ;;  %v1188_v22 = vld [vmem:[#allocation10 + $0x70] sm:$0xff]  ;;  %v1181_v47 = vld [vmem:[#allocation10 + $0x38] sm:$0xff] }
 0x446   :  { %8435 = vmatprep.subr.bf16.mxu1 %v11288_v50  ;;  %v1189_v50 = vld [vmem:[#allocation10 + $0x78] sm:$0xff]  ;;  %v10362_v46 = vcombine.high %v1180_v45, %v1188_v22 }
 0x447   :  { %v10364_v52 = vcombine.high %v1181_v47, %v1189_v50  ;;  %v10363_v59 = vcombine.low %v1181_v47, %v1189_v50  ;;  %v1276_v50 = vld [vmem:[#allocation10 + $0x330] sm:$0xff] }
 0x448   :  { %8272 = vmatpush1.bf16.msra.mxu0 %v11285_v53  ;;  %v1196_v53 = vld [vmem:[#allocation10 + $0xb0] sm:$0xff] }
 0x449   :  { %8436 = vmatpush1.bf16.msra.mxu1 %v11287_v25  ;;  %8273 = vmatprep.subr.bf16.mxu0 %v11302_v54  ;;  %v1204_v25 = vld [vmem:[#allocation10 + $0xf0] sm:$0xff]  ;;  %v10361_v54 = vcombine.low %v1180_v45, %v1188_v22 }
 0x44a   :  { %8437 = vmatprep.subr.bf16.mxu1 %v11304_v33  ;;  %v1197_v33 = vld [vmem:[#allocation10 + $0xb8] sm:$0xff]  ;;  %v10378_v3 = vcombine.high %v1196_v53, %v1204_v25  ;;  %v10377_v6 = vcombine.low %v1196_v53, %v1204_v25 }
 0x44b   :  { %v10379_v10 = vcombine.low %v1197_v33, %v1205_v57 }
 0x44c   :  { %8274 = vmatpush1.bf16.msra.mxu0 %v11301_v5  ;;  %v1220_v5 = vld [vmem:[#allocation10 + $0x170] sm:$0xff] }
 0x44d   :  { %8438 = vmatpush1.bf16.msra.mxu1 %v11303_v7  ;;  %8275 = vmatprep.subr.bf16.mxu0 %v11318_v63  ;;  %v10380_v7 = vcombine.high %v1197_v33, %v1205_v57  ;;  %v1213_v63 = vld [vmem:[#allocation10 + $0x138] sm:$0xff]  ;;  %v10394_v11 = vcombine.high %v1212_v23, %v1220_v5  ;;  %v10393_v17 = vcombine.low %v1212_v23, %v1220_v5  ;;  %v1292_v33 = vld [vmem:[#allocation10 + $0x3b0] sm:$0xff] }
 0x44e   :  { %8439 = vmatprep.subr.bf16.mxu1 %v11320_v9  ;;  %v1221_v9 = vld [vmem:[#allocation10 + $0x178] sm:$0xff]  ;;  %v1300_v57 = vld [vmem:[#allocation10 + $0x3f0] sm:$0xff] }
 0x44f   :  { %v10396_v12 = vcombine.high %v1213_v63, %v1221_v9  ;;  %v10395_v18 = vcombine.low %v1213_v63, %v1221_v9  ;;  %v1308_v9 = vld [vmem:[#allocation10 + $0x430] sm:$0xff] }
 0x450   :  { %8276 = vmatpush1.bf16.msra.mxu0 %v11317_v19  ;;  %v1228_v19 = vld [vmem:[#allocation10 + $0x1b0] sm:$0xff] }
 0x451   :  { %8440 = vmatpush1.bf16.msra.mxu1 %v11319_v13  ;;  %8277 = vmatprep.subr.bf16.mxu0 %v11334_v14  ;;  %v1236_v13 = vld [vmem:[#allocation10 + $0x1f0] sm:$0xff]  ;;  %v1229_v14 = vld [vmem:[#allocation10 + $0x1b8] sm:$0xff] }
 0x452   :  { %8441 = vmatprep.subr.bf16.mxu1 %v11336_v16  ;;  %v1237_v16 = vld [vmem:[#allocation10 + $0x1f8] sm:$0xff]  ;;  %v10410_v21 = vcombine.high %v1228_v19, %v1236_v13 }
 0x453   :  { %v10412_v28 = vcombine.high %v1229_v14, %v1237_v16  ;;  %v10411_v60 = vcombine.low %v1229_v14, %v1237_v16  ;;  %v1324_v16 = vld [vmem:[#allocation10 + $0x4b0] sm:$0xff] }
 0x454   :  { %8278 = vmatpush1.bf16.msra.mxu0 %v11333_v29  ;;  %v1244_v29 = vld [vmem:[#allocation10 + $0x230] sm:$0xff] }
 0x455   :  { %8442 = vmatpush1.bf16.msra.mxu1 %v11335_v30  ;;  %8279 = vmatprep.subr.bf16.mxu0 %v11350_v31  ;;  %v1252_v30 = vld [vmem:[#allocation10 + $0x270] sm:$0xff]  ;;  %v1245_v31 = vld [vmem:[#allocation10 + $0x238] sm:$0xff] }
 0x456   :  { %8443 = vmatprep.subr.bf16.mxu1 %v11352_v32  ;;  %v1253_v32 = vld [vmem:[#allocation10 + $0x278] sm:$0xff]  ;;  %v10426_v37 = vcombine.high %v1244_v29, %v1252_v30 }
 0x457   :  { %v10428_v38 = vcombine.high %v1245_v31, %v1253_v32  ;;  %v10427_v45 = vcombine.low %v1245_v31, %v1253_v32  ;;  %v1340_v32 = vld [vmem:[#allocation10 + $0x530] sm:$0xff] }
 0x458   :  { %8280 = vmatpush1.bf16.msra.mxu0 %v11349_v40  ;;  %v1268_v40 = vld [vmem:[#allocation10 + $0x2f0] sm:$0xff] }
 0x459   :  { %8444 = vmatpush1.bf16.msra.mxu1 %v11351_v42  ;;  %8281 = vmatprep.subr.bf16.mxu0 %v11366_v43  ;;  %v1261_v42 = vld [vmem:[#allocation10 + $0x2b8] sm:$0xff]  ;;  %v10442_v22 = vcombine.high %v1260_v39, %v1268_v40 }
 0x45a   :  { %8445 = vmatprep.subr.bf16.mxu1 %v11368_v44  ;;  %v1269_v43 = vld [vmem:[#allocation10 + $0x2f8] sm:$0xff]  ;;  %v10425_v44 = vcombine.low %v1244_v29, %v1252_v30 }
 0x45b   :  { %v10444_v47 = vcombine.high %v1261_v42, %v1269_v43  ;;  %v10443_v53 = vcombine.low %v1261_v42, %v1269_v43  ;;  %v1356_v43 = vld [vmem:[#allocation10 + $0x5b0] sm:$0xff] }
 0x45c   :  { %8282 = vmatpush1.bf16.msra.mxu0 %v11365_v24  ;;  %v1284_v24 = vld [vmem:[#allocation10 + $0x370] sm:$0xff] }
 0x45d   :  { %8446 = vmatpush1.bf16.msra.mxu1 %v11367_v51  ;;  %8456 = vmatprep.subr.bf16.mxu0 %v10362_v46  ;;  %v1277_v51 = vld [vmem:[#allocation10 + $0x338] sm:$0xff]  ;;  %v10458_v25 = vcombine.high %v1276_v50, %v1284_v24  ;;  %v10457_v23 = vcombine.low %v1276_v50, %v1284_v24 }
 0x45e   :  { %8620 = vmatprep.subr.bf16.mxu1 %v10364_v52  ;;  %v1285_v46 = vld [vmem:[#allocation10 + $0x378] sm:$0xff]  ;;  %v10441_v52 = vcombine.low %v1260_v39, %v1268_v40 }
 0x45f   :  { %8284 = vmatmul.mubr.bf16.vlgmr.msra.gmra.mrb[16].mxu0 %v12409_v56  ;;  %v10459_v5 = vcombine.low %v1277_v51, %v1285_v46 }
 0x460   :  { %8448 = vmatmul.mubr.bf16.vlgmr.msra.gmra.mrb[16].mxu1 %v12409_v56  ;;  %8457 = vmatpush1.bf16.msra.mxu0 %v10361_v54  ;;  %v10460_v54 = vcombine.high %v1277_v51, %v1285_v46  ;;  %v1372_v46 = vld [vmem:[#allocation10 + $0x630] sm:$0xff] }
 0x461   :  { %8488 = vmatprep.mubr.bf16.mxu0 %v12330_v49  ;;  %8621 = vmatpush1.bf16.msra.mxu1 %v10363_v59  ;;  %v1293_v59 = vld [vmem:[#allocation10 + $0x3b8] sm:$0xff] }
 0x462   :  { %8652 = vmatprep.mubr.bf16.mxu1 %v12330_v49  ;;  %8458 = vmatprep.subr.bf16.mxu0 %v10378_v3  ;;  %v10409_v49 = vcombine.low %v1228_v19, %v1236_v13  ;;  %v1301_v3 = vld [vmem:[#allocation10 + $0x3f8] sm:$0xff] }
 0x463   :  { %8622 = vmatprep.subr.bf16.mxu1 %v10380_v7  ;;  %v10474_v7 = vcombine.high %v1292_v33, %v1300_v57  ;;  %v10476_v63 = vcombine.high %v1293_v59, %v1301_v3  ;;  %v10475_v19 = vcombine.low %v1293_v59, %v1301_v3  ;;  %v1388_v3 = vld [vmem:[#allocation10 + $0x6b0] sm:$0xff] }
 0x464   :  { %8459 = vmatpush1.bf16.msra.mxu0 %v10377_v6  ;;  %v1316_v6 = vld [vmem:[#allocation10 + $0x470] sm:$0xff] }
 0x465   :  { %8623 = vmatpush1.bf16.msra.mxu1 %v10379_v10  ;;  %8460 = vmatprep.subr.bf16.mxu0 %v10394_v11  ;;  %v1309_v10 = vld [vmem:[#allocation10 + $0x438] sm:$0xff]  ;;  %v10490_v13 = vcombine.high %v1308_v9, %v1316_v6 }
 0x466   :  { %8624 = vmatprep.subr.bf16.mxu1 %v10396_v12  ;;  %v1317_v11 = vld [vmem:[#allocation10 + $0x478] sm:$0xff]  ;;  %v10473_v12 = vcombine.low %v1292_v33, %v1300_v57 }
 0x467   :  { %v10492_v14 = vcombine.high %v1309_v10, %v1317_v11  ;;  %v10491_v29 = vcombine.low %v1309_v10, %v1317_v11  ;;  %v1404_v11 = vld [vmem:[#allocation10 + $0x730] sm:$0xff] }
 0x468   :  { %8461 = vmatpush1.bf16.msra.mxu0 %v10393_v17  ;;  %v1332_v17 = vld [vmem:[#allocation10 + $0x4f0] sm:$0xff] }
 0x469   :  { %8625 = vmatpush1.bf16.msra.mxu1 %v10395_v18  ;;  %8462 = vmatprep.subr.bf16.mxu0 %v10410_v21  ;;  %v1325_v18 = vld [vmem:[#allocation10 + $0x4b8] sm:$0xff]  ;;  %v10506_v30 = vcombine.high %v1324_v16, %v1332_v17 }
 0x46a   :  { %8626 = vmatprep.subr.bf16.mxu1 %v10412_v28  ;;  %v1333_v21 = vld [vmem:[#allocation10 + $0x4f8] sm:$0xff]  ;;  %v10489_v28 = vcombine.low %v1308_v9, %v1316_v6 }
 0x46b   :  { %v10508_v31 = vcombine.high %v1325_v18, %v1333_v21  ;;  %v10507_v39 = vcombine.low %v1325_v18, %v1333_v21  ;;  %v1420_v21 = vld [vmem:[#allocation10 + $0x7b0] sm:$0xff] }
 0x46c   :  { %8463 = vmatpush1.bf16.msra.mxu0 %v10409_v49  ;;  %v1348_v49 = vld [vmem:[#allocation10 + $0x570] sm:$0xff] }
 0x46d   :  { %8627 = vmatpush1.bf16.msra.mxu1 %v10411_v60  ;;  %8464 = vmatprep.subr.bf16.mxu0 %v10426_v37  ;;  %v1341_v60 = vld [vmem:[#allocation10 + $0x538] sm:$0xff]  ;;  %v10522_v40 = vcombine.high %v1340_v32, %v1348_v49 }
 0x46e   :  { %8628 = vmatprep.subr.bf16.mxu1 %v10428_v38  ;;  %v1349_v37 = vld [vmem:[#allocation10 + $0x578] sm:$0xff]  ;;  %v10505_v38 = vcombine.low %v1324_v16, %v1332_v17 }
 0x46f   :  { %v10524_v42 = vcombine.high %v1341_v60, %v1349_v37  ;;  %v10523_v50 = vcombine.low %v1341_v60, %v1349_v37  ;;  %v1436_v37 = vld [vmem:[#allocation10 + $0x830] sm:$0xff] }
 0x470   :  { %8465 = vmatpush1.bf16.msra.mxu0 %v10425_v44  ;;  %v1364_v44 = vld [vmem:[#allocation10 + $0x5f0] sm:$0xff] }
 0x471   :  { %8629 = vmatpush1.bf16.msra.mxu1 %v10427_v45  ;;  %8466 = vmatprep.subr.bf16.mxu0 %v10442_v22  ;;  %v1357_v45 = vld [vmem:[#allocation10 + $0x5b8] sm:$0xff]  ;;  %v10538_v24 = vcombine.high %v1356_v43, %v1364_v44 }
 0x472   :  { %8630 = vmatprep.subr.bf16.mxu1 %v10444_v47  ;;  %v1365_v22 = vld [vmem:[#allocation10 + $0x5f8] sm:$0xff]  ;;  %v10521_v47 = vcombine.low %v1340_v32, %v1348_v49 }
 0x473   :  { %v10540_v51 = vcombine.high %v1357_v45, %v1365_v22  ;;  %v10539_v33 = vcombine.low %v1357_v45, %v1365_v22  ;;  %v1452_v22 = vld [vmem:[#allocation10 + $0x8b0] sm:$0xff] }
 0x474   :  { %8467 = vmatpush1.bf16.msra.mxu0 %v10441_v52  ;;  %v1380_v52 = vld [vmem:[#allocation10 + $0x670] sm:$0xff] }
 0x475   :  { %8631 = vmatpush1.bf16.msra.mxu1 %v10443_v53  ;;  %8468 = vmatprep.subr.bf16.mxu0 %v10458_v25  ;;  %v1373_v53 = vld [vmem:[#allocation10 + $0x638] sm:$0xff]  ;;  %v10554_v57 = vcombine.high %v1372_v46, %v1380_v52 }
 0x476   :  { %8632 = vmatprep.subr.bf16.mxu1 %v10460_v54  ;;  %v1381_v25 = vld [vmem:[#allocation10 + $0x678] sm:$0xff]  ;;  %v10537_v54 = vcombine.low %v1356_v43, %v1364_v44 }
 0x477   :  { %v10556_v59 = vcombine.high %v1373_v53, %v1381_v25  ;;  %v10555_v9 = vcombine.low %v1373_v53, %v1381_v25  ;;  %v1468_v53 = vld [vmem:[#allocation10 + $0x930] sm:$0xff] }
 0x478   :  { %8469 = vmatpush1.bf16.msra.mxu0 %v10457_v23  ;;  %v1396_v23 = vld [vmem:[#allocation10 + $0x6f0] sm:$0xff] }
 0x479   :  { %8633 = vmatpush1.bf16.msra.mxu1 %v10459_v5  ;;  %8470 = vmatprep.subr.bf16.mxu0 %v10474_v7  ;;  %v1389_v5 = vld [vmem:[#allocation10 + $0x6b8] sm:$0xff]  ;;  %v10570_v6 = vcombine.high %v1388_v3, %v1396_v23  ;;  %v1476_v25 = vld [vmem:[#allocation10 + $0x970] sm:$0xff] }
 0x47a   :  { %8634 = vmatprep.subr.bf16.mxu1 %v10476_v63  ;;  %v1397_v7 = vld [vmem:[#allocation10 + $0x6f8] sm:$0xff]  ;;  %v10553_v63 = vcombine.low %v1372_v46, %v1380_v52 }
 0x47b   :  { %v10572_v10 = vcombine.high %v1389_v5, %v1397_v7  ;;  %v10571_v16 = vcombine.low %v1389_v5, %v1397_v7  ;;  %v1484_v7 = vld [vmem:[#allocation10 + $0x9b0] sm:$0xff] }
 0x47c   :  { %8471 = vmatpush1.bf16.msra.mxu0 %v10473_v12  ;;  %v1412_v12 = vld [vmem:[#allocation10 + $0x770] sm:$0xff] }
 0x47d   :  { %8635 = vmatpush1.bf16.msra.mxu1 %v10475_v19  ;;  %8472 = vmatprep.subr.bf16.mxu0 %v10490_v13  ;;  %v1405_v19 = vld [vmem:[#allocation10 + $0x738] sm:$0xff]  ;;  %v10586_v17 = vcombine.high %v1404_v11, %v1412_v12 }
 0x47e   :  { %8636 = vmatprep.subr.bf16.mxu1 %v10492_v14  ;;  %v1413_v13 = vld [vmem:[#allocation10 + $0x778] sm:$0xff]  ;;  %v10569_v14 = vcombine.low %v1388_v3, %v1396_v23  ;;  %v10650_v23 = vcombine.high %v1468_v53, %v1476_v25 }
 0x47f   :  { %v10588_v18 = vcombine.high %v1405_v19, %v1413_v13  ;;  %v10587_v32 = vcombine.low %v1405_v19, %v1413_v13  ;;  %v1500_v19 = vld [vmem:[#allocation10 + $0xa30] sm:$0xff] }
 0x480   :  { %8473 = vmatpush1.bf16.msra.mxu0 %v10489_v28  ;;  %v1428_v28 = vld [vmem:[#allocation10 + $0x7f0] sm:$0xff] }
 0x481   :  { %8637 = vmatpush1.bf16.msra.mxu1 %v10491_v29  ;;  %8474 = vmatprep.subr.bf16.mxu0 %v10506_v30  ;;  %v1421_v29 = vld [vmem:[#allocation10 + $0x7b8] sm:$0xff]  ;;  %v10602_v49 = vcombine.high %v1420_v21, %v1428_v28  ;;  %v1508_v13 = vld [vmem:[#allocation10 + $0xa70] sm:$0xff] }
 0x482   :  { %8638 = vmatprep.subr.bf16.mxu1 %v10508_v31  ;;  %v1429_v30 = vld [vmem:[#allocation10 + $0x7f8] sm:$0xff]  ;;  %v10585_v31 = vcombine.low %v1404_v11, %v1412_v12 }
 0x483   :  { %v10604_v60 = vcombine.high %v1421_v29, %v1429_v30  ;;  %v10603_v43 = vcombine.low %v1421_v29, %v1429_v30  ;;  %v1524_v29 = vld [vmem:[#allocation10 + $0xaf0] sm:$0xff]  ;;  %v1517_v30 = vld [vmem:[#allocation10 + $0xab8] sm:$0xff] }
 0x484   :  { %8475 = vmatpush1.bf16.msra.mxu0 %v10505_v38  ;;  %v1444_v38 = vld [vmem:[#allocation10 + $0x870] sm:$0xff] }
 0x485   :  { %8639 = vmatpush1.bf16.msra.mxu1 %v10507_v39  ;;  %8476 = vmatprep.subr.bf16.mxu0 %v10522_v40  ;;  %v1437_v39 = vld [vmem:[#allocation10 + $0x838] sm:$0xff]  ;;  %v10618_v44 = vcombine.high %v1436_v37, %v1444_v38 }
 0x486   :  { %8640 = vmatprep.subr.bf16.mxu1 %v10524_v42  ;;  %v1445_v40 = vld [vmem:[#allocation10 + $0x878] sm:$0xff]  ;;  %v10601_v42 = vcombine.low %v1420_v21, %v1428_v28  ;;  %v1516_v28 = vld [vmem:[#allocation10 + $0xab0] sm:$0xff] }
 0x487   :  { %v10620_v45 = vcombine.high %v1437_v39, %v1445_v40  ;;  %v10619_v46 = vcombine.low %v1437_v39, %v1445_v40  ;;  %v1540_v39 = vld [vmem:[#allocation10 + $0xb70] sm:$0xff]  ;;  %v1533_v40 = vld [vmem:[#allocation10 + $0xb38] sm:$0xff] }
 0x488   :  { %8477 = vmatpush1.bf16.msra.mxu0 %v10521_v47  ;;  %v1460_v47 = vld [vmem:[#allocation10 + $0x8f0] sm:$0xff] }
 0x489   :  { %8641 = vmatpush1.bf16.msra.mxu1 %v10523_v50  ;;  %8478 = vmatprep.subr.bf16.mxu0 %v10538_v24  ;;  %v10617_v50 = vcombine.low %v1436_v37, %v1444_v38  ;;  %v1453_v24 = vld [vmem:[#allocation10 + $0x8b8] sm:$0xff]  ;;  %v10634_v52 = vcombine.high %v1452_v22, %v1460_v47  ;;  %v1532_v38 = vld [vmem:[#allocation10 + $0xb30] sm:$0xff] }
 0x48a   :  { %8642 = vmatprep.subr.bf16.mxu1 %v10540_v51  ;;  %v1461_v51 = vld [vmem:[#allocation10 + $0x8f8] sm:$0xff] }
 0x48b   :  { %v10635_v3 = vcombine.low %v1453_v24, %v1461_v51 }
 0x48c   :  { %8479 = vmatpush1.bf16.msra.mxu0 %v10537_v54  ;;  %v10636_v54 = vcombine.high %v1453_v24, %v1461_v51  ;;  %v1549_v24 = vld [vmem:[#allocation10 + $0xbb8] sm:$0xff] }
 0x48d   :  { %8643 = vmatpush1.bf16.msra.mxu1 %v10539_v33  ;;  %8480 = vmatprep.subr.bf16.mxu0 %v10554_v57  ;;  %v1469_v33 = vld [vmem:[#allocation10 + $0x938] sm:$0xff] }
 0x48e   :  { %8644 = vmatprep.subr.bf16.mxu1 %v10556_v59  ;;  %v1477_v57 = vld [vmem:[#allocation10 + $0x978] sm:$0xff]  ;;  %v10633_v59 = vcombine.low %v1452_v22, %v1460_v47  ;;  %v1548_v47 = vld [vmem:[#allocation10 + $0xbb0] sm:$0xff] }
 0x48f   :  { %v10652_v5 = vcombine.high %v1469_v33, %v1477_v57  ;;  %v1557_v51 = vld [vmem:[#allocation10 + $0xbf8] sm:$0xff] }
 0x490   :  { %8481 = vmatpush1.bf16.msra.mxu0 %v10553_v63  ;;  %v1492_v63 = vld [vmem:[#allocation10 + $0x9f0] sm:$0xff] }
 0x491   :  { %8645 = vmatpush1.bf16.msra.mxu1 %v10555_v9  ;;  %8482 = vmatprep.subr.bf16.mxu0 %v10570_v6  ;;  %v1485_v9 = vld [vmem:[#allocation10 + $0x9b8] sm:$0xff]  ;;  %v10666_v11 = vcombine.high %v1484_v7, %v1492_v63 }
 0x492   :  { %8646 = vmatprep.subr.bf16.mxu1 %v10572_v10  ;;  %v1493_v6 = vld [vmem:[#allocation10 + $0x9f8] sm:$0xff]  ;;  %v10649_v10 = vcombine.low %v1468_v53, %v1476_v25  ;;  %v10732_v25 = vcombine.high %v1549_v24, %v1557_v51 }
 0x493   :  { %v10668_v12 = vcombine.high %v1485_v9, %v1493_v6 }
 0x494   :  { %8483 = vmatpush1.bf16.msra.mxu0 %v10569_v14  ;;  %v1501_v14 = vld [vmem:[#allocation10 + $0xa38] sm:$0xff] }
 0x495   :  { %8647 = vmatpush1.bf16.msra.mxu1 %v10571_v16  ;;  %8484 = vmatprep.subr.bf16.mxu0 %v10586_v17  ;;  %v1509_v16 = vld [vmem:[#allocation10 + $0xa78] sm:$0xff]  ;;  %v10667_v17 = vcombine.low %v1485_v9, %v1493_v6  ;;  %v1588_v9 = vld [vmem:[#allocation10 + $0xcf0] sm:$0xff] }
 0x496   :  { %8648 = vmatprep.subr.bf16.mxu1 %v10588_v18  ;;  %v10682_v18 = vcombine.high %v1500_v19, %v1508_v13  ;;  %v10684_v21 = vcombine.high %v1501_v14, %v1509_v16  ;;  %v1581_v6 = vld [vmem:[#allocation10 + $0xcb8] sm:$0xff] }
 0x498   :  { %8485 = vmatpush1.bf16.msra.mxu0 %v10585_v31  ;;  %v1525_v31 = vld [vmem:[#allocation10 + $0xaf8] sm:$0xff] }
 0x499   :  { %8649 = vmatpush1.bf16.msra.mxu1 %v10587_v32  ;;  %8486 = vmatprep.subr.bf16.mxu0 %v10602_v49  ;;  %v10681_v32 = vcombine.low %v1500_v19, %v1508_v13  ;;  %v10683_v49 = vcombine.low %v1501_v14, %v1509_v16  ;;  %v10700_v37 = vcombine.high %v1517_v30, %v1525_v31  ;;  %v1596_v13 = vld [vmem:[#allocation10 + $0xd30] sm:$0xff]  ;;  %v1597_v16 = vld [vmem:[#allocation10 + $0xd38] sm:$0xff] }
 0x49a   :  { %8650 = vmatprep.subr.bf16.mxu1 %v10604_v60  ;;  %v10698_v60 = vcombine.high %v1516_v28, %v1524_v29  ;;  %v1604_v14 = vld [vmem:[#allocation10 + $0xd70] sm:$0xff] }
 0x49c   :  { %8487 = vmatpush1.bf16.msra.mxu0 %v10601_v42  ;;  %v1541_v42 = vld [vmem:[#allocation10 + $0xb78] sm:$0xff] }
 0x49d   :  { %8651 = vmatpush1.bf16.msra.mxu1 %v10603_v43  ;;  %8497 = vmatprep.subr.bf16.mxu0 %v10618_v44  ;;  %v10697_v43 = vcombine.low %v1516_v28, %v1524_v29  ;;  %v10699_v44 = vcombine.low %v1517_v30, %v1525_v31  ;;  %v10716_v22 = vcombine.high %v1533_v40, %v1541_v42  ;;  %v1612_v29 = vld [vmem:[#allocation10 + $0xdb0] sm:$0xff]  ;;  %v1613_v31 = vld [vmem:[#allocation10 + $0xdb8] sm:$0xff] }
 0x49e   :  { %8661 = vmatprep.subr.bf16.mxu1 %v10620_v45  ;;  %v10714_v45 = vcombine.high %v1532_v38, %v1540_v39  ;;  %v1620_v30 = vld [vmem:[#allocation10 + $0xdf0] sm:$0xff] }
 0x49f   :  { %8489 = vmatmul.mubr.bf16.vlgmr.msra.gmra.mrb[20].mxu0 %v12332_v2 }
 0x4a0   :  { %8653 = vmatmul.mubr.bf16.vlgmr.msra.gmra.mrb[20].mxu1 %v12332_v2  ;;  %8498 = vmatpush1.bf16.msra.mxu0 %v10617_v50  ;;  %v10651_v2 = vcombine.low %v1469_v33, %v1477_v57  ;;  %v1556_v50 = vld [vmem:[#allocation10 + $0xbf0] sm:$0xff]  ;;  %v1565_v57 = vld [vmem:[#allocation10 + $0xc38] sm:$0xff] }
 0x4a1   :  { %8529 = vmatprep.mubr.bf16.mxu0 %v12348_v15  ;;  %8662 = vmatpush1.bf16.msra.mxu1 %v10619_v46  ;;  %v10713_v46 = vcombine.low %v1532_v38, %v1540_v39  ;;  %v10730_v53 = vcombine.high %v1548_v47, %v1556_v50  ;;  %v1572_v33 = vld [vmem:[#allocation10 + $0xc70] sm:$0xff] }
 0x4a2   :  { %8693 = vmatprep.mubr.bf16.mxu1 %v12348_v15  ;;  %8499 = vmatprep.subr.bf16.mxu0 %v10634_v52  ;;  %v10665_v15 = vcombine.low %v1484_v7, %v1492_v63  ;;  %v10715_v52 = vcombine.low %v1533_v40, %v1541_v42  ;;  %v1580_v63 = vld [vmem:[#allocation10 + $0xcb0] sm:$0xff]  ;;  %v1629_v42 = vld [vmem:[#allocation10 + $0xe38] sm:$0xff] }
 0x4a3   :  { %8663 = vmatprep.subr.bf16.mxu1 %v10636_v54  ;;  %v1564_v54 = vld [vmem:[#allocation10 + $0xc30] sm:$0xff] }
 0x4a4   :  { %8500 = vmatpush1.bf16.msra.mxu0 %v10633_v59  ;;  %v1573_v59 = vld [vmem:[#allocation10 + $0xc78] sm:$0xff]  ;;  %v1628_v39 = vld [vmem:[#allocation10 + $0xe30] sm:$0xff] }
 0x4a5   :  { %8664 = vmatpush1.bf16.msra.mxu1 %v10635_v3  ;;  %8501 = vmatprep.subr.bf16.mxu0 %v10650_v23  ;;  %v10729_v3 = vcombine.low %v1548_v47, %v1556_v50  ;;  %v10731_v23 = vcombine.low %v1549_v24, %v1557_v51  ;;  %v10748_v7 = vcombine.high %v1565_v57, %v1573_v59  ;;  %v1636_v40 = vld [vmem:[#allocation10 + $0xe70] sm:$0xff]  ;;  %v1645_v51 = vld [vmem:[#allocation10 + $0xeb8] sm:$0xff] }
 0x4a6   :  { %8665 = vmatprep.subr.bf16.mxu1 %v10652_v5  ;;  %v10746_v5 = vcombine.high %v1564_v54, %v1572_v33  ;;  %v1644_v50 = vld [vmem:[#allocation10 + $0xeb0] sm:$0xff] }
 0x4a7   :  { %v1652_v24 = vld [vmem:[#allocation10 + $0xef0] sm:$0xff] }
 0x4a8   :  { %8502 = vmatpush1.bf16.msra.mxu0 %v10649_v10  ;;  %v1589_v10 = vld [vmem:[#allocation10 + $0xcf8] sm:$0xff] }
 0x4a9   :  { %8666 = vmatpush1.bf16.msra.mxu1 %v10651_v2  ;;  %8503 = vmatprep.subr.bf16.mxu0 %v10666_v11  ;;  %v10745_v2 = vcombine.low %v1564_v54, %v1572_v33  ;;  %v10747_v11 = vcombine.low %v1565_v57, %v1573_v59  ;;  %v10764_v19 = vcombine.high %v1581_v6, %v1589_v10  ;;  %v1660_v33 = vld [vmem:[#allocation10 + $0xf30] sm:$0xff]  ;;  %v1661_v59 = vld [vmem:[#allocation10 + $0xf38] sm:$0xff] }
 0x4aa   :  { %8667 = vmatprep.subr.bf16.mxu1 %v10668_v12  ;;  %v10762_v12 = vcombine.high %v1580_v63, %v1588_v9  ;;  %v1668_v57 = vld [vmem:[#allocation10 + $0xf70] sm:$0xff] }
 0x4ac   :  { %8504 = vmatpush1.bf16.msra.mxu0 %v10665_v15  ;;  %v1605_v15 = vld [vmem:[#allocation10 + $0xd78] sm:$0xff] }
 0x4ad   :  { %8668 = vmatpush1.bf16.msra.mxu1 %v10667_v17  ;;  %8505 = vmatprep.subr.bf16.mxu0 %v10682_v18  ;;  %v10761_v17 = vcombine.low %v1580_v63, %v1588_v9  ;;  %v10763_v18 = vcombine.low %v1581_v6, %v1589_v10  ;;  %v10780_v28 = vcombine.high %v1597_v16, %v1605_v15  ;;  %v1676_v9 = vld [vmem:[#allocation10 + $0xfb0] sm:$0xff]  ;;  %v1677_v10 = vld [vmem:[#allocation10 + $0xfb8] sm:$0xff] }
 0x4ae   :  { %8669 = vmatprep.subr.bf16.mxu1 %v10684_v21  ;;  %v10778_v21 = vcombine.high %v1596_v13, %v1604_v14  ;;  %v1684_v6 = vld [vmem:[#allocation10 + $0xff0] sm:$0xff] }
 0x4b0   :  { %8506 = vmatpush1.bf16.msra.mxu0 %v10681_v32  ;;  %v1621_v32 = vld [vmem:[#allocation10 + $0xdf8] sm:$0xff] }
 0x4b1   :  { %8670 = vmatpush1.bf16.msra.mxu1 %v10683_v49  ;;  %8507 = vmatprep.subr.bf16.mxu0 %v10698_v60  ;;  %v10777_v49 = vcombine.low %v1596_v13, %v1604_v14  ;;  %v10779_v60 = vcombine.low %v1597_v16, %v1605_v15  ;;  %v10796_v38 = vcombine.high %v1613_v31, %v1621_v32  ;;  %v1692_v14 = vld [vmem:[#allocation10 + $0x1030] sm:$0xff]  ;;  %v1693_v15 = vld [vmem:[#allocation10 + $0x1038] sm:$0xff] }
 0x4b2   :  { %8671 = vmatprep.subr.bf16.mxu1 %v10700_v37  ;;  %v10794_v37 = vcombine.high %v1612_v29, %v1620_v30  ;;  %v1700_v16 = vld [vmem:[#allocation10 + $0x1070] sm:$0xff] }
 0x4b4   :  { %8508 = vmatpush1.bf16.msra.mxu0 %v10697_v43  ;;  %v1637_v43 = vld [vmem:[#allocation10 + $0xe78] sm:$0xff] }
 0x4b5   :  { %8672 = vmatpush1.bf16.msra.mxu1 %v10699_v44  ;;  %8509 = vmatprep.subr.bf16.mxu0 %v10714_v45  ;;  %v10793_v44 = vcombine.low %v1612_v29, %v1620_v30  ;;  %v10795_v45 = vcombine.low %v1613_v31, %v1621_v32  ;;  %v10812_v47 = vcombine.high %v1629_v42, %v1637_v43  ;;  %v1708_v30 = vld [vmem:[#allocation10 + $0x10b0] sm:$0xff] }
 0x4b6   :  { %8673 = vmatprep.subr.bf16.mxu1 %v10716_v22  ;;  %v10810_v22 = vcombine.high %v1628_v39, %v1636_v40  ;;  %v1716_v31 = vld [vmem:[#allocation10 + $0x10f0] sm:$0xff]  ;;  %v10873_v32 = vcombine.low %v1692_v14, %v1700_v16 }
 0x4b8   :  { %8510 = vmatpush1.bf16.msra.mxu0 %v10713_v46  ;;  %v1653_v46 = vld [vmem:[#allocation10 + $0xef8] sm:$0xff] }
 0x4b9   :  { %8674 = vmatpush1.bf16.msra.mxu1 %v10715_v52  ;;  %8511 = vmatprep.subr.bf16.mxu0 %v10730_v53  ;;  %v10809_v52 = vcombine.low %v1628_v39, %v1636_v40  ;;  %v10811_v53 = vcombine.low %v1629_v42, %v1637_v43  ;;  %v10828_v54 = vcombine.high %v1645_v51, %v1653_v46  ;;  %v1724_v39 = vld [vmem:[#allocation10 + $0x1130] sm:$0xff]  ;;  %v1725_v43 = vld [vmem:[#allocation10 + $0x1138] sm:$0xff] }
 0x4ba   :  { %8675 = vmatprep.subr.bf16.mxu1 %v10732_v25  ;;  %v10826_v25 = vcombine.high %v1644_v50, %v1652_v24  ;;  %v1732_v40 = vld [vmem:[#allocation10 + $0x1170] sm:$0xff] }
 0x4bc   :  { %8512 = vmatpush1.bf16.msra.mxu0 %v10729_v3  ;;  %v1669_v3 = vld [vmem:[#allocation10 + $0xf78] sm:$0xff] }
 0x4bd   :  { %8676 = vmatpush1.bf16.msra.mxu1 %v10731_v23  ;;  %8513 = vmatprep.subr.bf16.mxu0 %v10746_v5  ;;  %v10825_v23 = vcombine.low %v1644_v50, %v1652_v24  ;;  %v10827_v5 = vcombine.low %v1645_v51, %v1653_v46  ;;  %v10844_v63 = vcombine.high %v1661_v59, %v1669_v3  ;;  %v1740_v24 = vld [vmem:[#allocation10 + $0x11b0] sm:$0xff]  ;;  %v1741_v46 = vld [vmem:[#allocation10 + $0x11b8] sm:$0xff] }
 0x4be   :  { %8677 = vmatprep.subr.bf16.mxu1 %v10748_v7  ;;  %v10842_v7 = vcombine.high %v1660_v33, %v1668_v57  ;;  %v1748_v51 = vld [vmem:[#allocation10 + $0x11f0] sm:$0xff] }
 0x4c0   :  { %8514 = vmatpush1.bf16.msra.mxu0 %v10745_v2  ;;  %v1685_v2 = vld [vmem:[#allocation10 + $0xff8] sm:$0xff] }
 0x4c1   :  { %8678 = vmatpush1.bf16.msra.mxu1 %v10747_v11  ;;  %8515 = vmatprep.subr.bf16.mxu0 %v10762_v12  ;;  %v10841_v11 = vcombine.low %v1660_v33, %v1668_v57  ;;  %v10843_v12 = vcombine.low %v1661_v59, %v1669_v3  ;;  %v10860_v13 = vcombine.high %v1677_v10, %v1685_v2  ;;  %v1756_v33 = vld [vmem:[#allocation10 + $0x1230] sm:$0xff]  ;;  %v1757_v59 = vld [vmem:[#allocation10 + $0x1238] sm:$0xff] }
 0x4c2   :  { %8679 = vmatprep.subr.bf16.mxu1 %v10764_v19  ;;  %v10858_v19 = vcombine.high %v1676_v9, %v1684_v6  ;;  %v1764_v57 = vld [vmem:[#allocation10 + $0x1270] sm:$0xff]  ;;  %v1765_v3 = vld [vmem:[#allocation10 + $0x1278] sm:$0xff] }
 0x4c4   :  { %8516 = vmatpush1.bf16.msra.mxu0 %v10761_v17  ;;  %v1701_v17 = vld [vmem:[#allocation10 + $0x1078] sm:$0xff] }
 0x4c5   :  { %8680 = vmatpush1.bf16.msra.mxu1 %v10763_v18  ;;  %8517 = vmatprep.subr.bf16.mxu0 %v10778_v21  ;;  %v10857_v18 = vcombine.low %v1676_v9, %v1684_v6  ;;  %v10859_v21 = vcombine.low %v1677_v10, %v1685_v2  ;;  %v10876_v29 = vcombine.high %v1693_v15, %v1701_v17  ;;  %v1780_v9 = vld [vmem:[#allocation10 + $0x12f0] sm:$0xff]  ;;  %v1773_v6 = vld [vmem:[#allocation10 + $0x12b8] sm:$0xff] }
 0x4c6   :  { %8681 = vmatprep.subr.bf16.mxu1 %v10780_v28  ;;  %v10874_v28 = vcombine.high %v1692_v14, %v1700_v16  ;;  %v1781_v10 = vld [vmem:[#allocation10 + $0x12f8] sm:$0xff]  ;;  %v10937_v2 = vcombine.low %v1756_v33, %v1764_v57  ;;  %v1796_v14 = vld [vmem:[#allocation10 + $0x1370] sm:$0xff] }
 0x4c7   :  { %v1789_v16 = vld [vmem:[#allocation10 + $0x1338] sm:$0xff] }
 0x4c8   :  { %8518 = vmatpush1.bf16.msra.mxu0 %v10777_v49  ;;  %v1709_v49 = vld [vmem:[#allocation10 + $0x10b8] sm:$0xff] }
 0x4c9   :  { %8682 = vmatpush1.bf16.msra.mxu1 %v10779_v60  ;;  %8519 = vmatprep.subr.bf16.mxu0 %v10794_v37  ;;  %v1717_v60 = vld [vmem:[#allocation10 + $0x10f8] sm:$0xff]  ;;  %v10875_v37 = vcombine.low %v1693_v15, %v1701_v17 }
 0x4ca   :  { %8683 = vmatprep.subr.bf16.mxu1 %v10796_v38  ;;  %v10890_v38 = vcombine.high %v1708_v30, %v1716_v31  ;;  %v10892_v42 = vcombine.high %v1709_v49, %v1717_v60  ;;  %v1797_v15 = vld [vmem:[#allocation10 + $0x1378] sm:$0xff] }
 0x4cc   :  { %8520 = vmatpush1.bf16.msra.mxu0 %v10793_v44  ;;  %v1733_v44 = vld [vmem:[#allocation10 + $0x1178] sm:$0xff] }
 0x4cd   :  { %8684 = vmatpush1.bf16.msra.mxu1 %v10795_v45  ;;  %8521 = vmatprep.subr.bf16.mxu0 %v10810_v22  ;;  %v10889_v45 = vcombine.low %v1708_v30, %v1716_v31  ;;  %v10891_v22 = vcombine.low %v1709_v49, %v1717_v60  ;;  %v10908_v50 = vcombine.high %v1725_v43, %v1733_v44  ;;  %v1812_v30 = vld [vmem:[#allocation10 + $0x13f0] sm:$0xff]  ;;  %v1805_v31 = vld [vmem:[#allocation10 + $0x13b8] sm:$0xff] }
 0x4ce   :  { %8685 = vmatprep.subr.bf16.mxu1 %v10812_v47  ;;  %v10906_v47 = vcombine.high %v1724_v39, %v1732_v40  ;;  %v10971_v60 = vcombine.low %v1789_v16, %v1797_v15 }
 0x4d0   :  { %8522 = vmatpush1.bf16.msra.mxu0 %v10809_v52  ;;  %v1749_v52 = vld [vmem:[#allocation10 + $0x11f8] sm:$0xff] }
 0x4d1   :  { %8686 = vmatpush1.bf16.msra.mxu1 %v10811_v53  ;;  %8523 = vmatprep.subr.bf16.mxu0 %v10826_v25  ;;  %v10905_v53 = vcombine.low %v1724_v39, %v1732_v40  ;;  %v10922_v25 = vcombine.high %v1740_v24, %v1748_v51  ;;  %v1820_v39 = vld [vmem:[#allocation10 + $0x1430] sm:$0xff] }
 0x4d2   :  { %8687 = vmatprep.subr.bf16.mxu1 %v10828_v54  ;;  %v10924_v54 = vcombine.high %v1741_v46, %v1749_v52  ;;  %v1828_v40 = vld [vmem:[#allocation10 + $0x1470] sm:$0xff] }
 0x4d4   :  { %8524 = vmatpush1.bf16.msra.mxu0 %v10825_v23  ;;  %v10923_v23 = vcombine.low %v1741_v46, %v1749_v52  ;;  %v1845_v46 = vld [vmem:[#allocation10 + $0x14f8] sm:$0xff]  ;;  %v11001_v52 = vcombine.low %v1820_v39, %v1828_v40 }
 0x4d5   :  { %8688 = vmatpush1.bf16.msra.mxu1 %v10827_v5  ;;  %8525 = vmatprep.subr.bf16.mxu0 %v10842_v7  ;;  %v10938_v5 = vcombine.high %v1756_v33, %v1764_v57  ;;  %v10940_v7 = vcombine.high %v1757_v59, %v1765_v3  ;;  %v1860_v33 = vld [vmem:[#allocation10 + $0x1570] sm:$0xff]  ;;  %v1853_v57 = vld [vmem:[#allocation10 + $0x1538] sm:$0xff] }
 0x4d6   :  { %8689 = vmatprep.subr.bf16.mxu1 %v10844_v63  ;;  %v1772_v63 = vld [vmem:[#allocation10 + $0x12b0] sm:$0xff] }
 0x4d7   :  { %v10953_v17 = vcombine.low %v1772_v63, %v1780_v9 }
 0x4d8   :  { %8526 = vmatpush1.bf16.msra.mxu0 %v10841_v11  ;;  %v10939_v11 = vcombine.low %v1757_v59, %v1765_v3  ;;  %v1861_v59 = vld [vmem:[#allocation10 + $0x1578] sm:$0xff] }
 0x4d9   :  { %8690 = vmatpush1.bf16.msra.mxu1 %v10843_v12  ;;  %8527 = vmatprep.subr.bf16.mxu0 %v10858_v19  ;;  %v10954_v12 = vcombine.high %v1772_v63, %v1780_v9  ;;  %v10956_v19 = vcombine.high %v1773_v6, %v1781_v10  ;;  %v1876_v63 = vld [vmem:[#allocation10 + $0x15f0] sm:$0xff]  ;;  %v1869_v9 = vld [vmem:[#allocation10 + $0x15b8] sm:$0xff] }
 0x4da   :  { %8691 = vmatprep.subr.bf16.mxu1 %v10860_v13  ;;  %v1788_v13 = vld [vmem:[#allocation10 + $0x1330] sm:$0xff] }
 0x4db   :  { %v10969_v49 = vcombine.low %v1788_v13, %v1796_v14 }
 0x4dc   :  { %8528 = vmatpush1.bf16.msra.mxu0 %v10857_v18  ;;  %v10955_v18 = vcombine.low %v1773_v6, %v1781_v10  ;;  %v1877_v6 = vld [vmem:[#allocation10 + $0x15f8] sm:$0xff] }
 0x4dd   :  { %8692 = vmatpush1.bf16.msra.mxu1 %v10859_v21  ;;  %8538 = vmatprep.subr.bf16.mxu0 %v10874_v28  ;;  %v10970_v21 = vcombine.high %v1788_v13, %v1796_v14  ;;  %v10972_v28 = vcombine.high %v1789_v16, %v1797_v15  ;;  %v1892_v13 = vld [vmem:[#allocation10 + $0x1670] sm:$0xff]  ;;  %v1885_v14 = vld [vmem:[#allocation10 + $0x1638] sm:$0xff] }
 0x4de   :  { %8702 = vmatprep.subr.bf16.mxu1 %v10876_v29  ;;  %v1804_v29 = vld [vmem:[#allocation10 + $0x13b0] sm:$0xff]  ;;  %v1893_v16 = vld [vmem:[#allocation10 + $0x1678] sm:$0xff] }
 0x4df   :  { %8530 = vmatmul.mubr.bf16.vlgmr.msra.gmra.mrb[20].mxu0 %v12374_v41 }
 0x4e0   :  { %8694 = vmatmul.mubr.bf16.vlgmr.msra.gmra.mrb[20].mxu1 %v12374_v41  ;;  %8539 = vmatpush1.bf16.msra.mxu0 %v10873_v32  ;;  %v10907_v41 = vcombine.low %v1725_v43, %v1733_v44  ;;  %v1813_v32 = vld [vmem:[#allocation10 + $0x13f8] sm:$0xff]  ;;  %v10985_v44 = vcombine.low %v1804_v29, %v1812_v30 }
 0x4e1   :  { %8570 = vmatprep.mubr.bf16.mxu0 %v12377_v48  ;;  %8703 = vmatpush1.bf16.msra.mxu1 %v10875_v37  ;;  %v10986_v37 = vcombine.high %v1804_v29, %v1812_v30  ;;  %v1829_v43 = vld [vmem:[#allocation10 + $0x1478] sm:$0xff]  ;;  %v1908_v29 = vld [vmem:[#allocation10 + $0x16f0] sm:$0xff] }
 0x4e2   :  { %8734 = vmatprep.mubr.bf16.mxu1 %v12377_v48  ;;  %8540 = vmatprep.subr.bf16.mxu0 %v10890_v38  ;;  %v10921_v48 = vcombine.low %v1740_v24, %v1748_v51  ;;  %v10988_v38 = vcombine.high %v1805_v31, %v1813_v32  ;;  %v1844_v24 = vld [vmem:[#allocation10 + $0x14f0] sm:$0xff]  ;;  %v1837_v51 = vld [vmem:[#allocation10 + $0x14b8] sm:$0xff] }
 0x4e3   :  { %8704 = vmatprep.subr.bf16.mxu1 %v10892_v42  ;;  %v1821_v42 = vld [vmem:[#allocation10 + $0x1438] sm:$0xff] }
 0x4e4   :  { %8541 = vmatpush1.bf16.msra.mxu0 %v10889_v45  ;;  %v10987_v45 = vcombine.low %v1805_v31, %v1813_v32  ;;  %v1901_v30 = vld [vmem:[#allocation10 + $0x16b8] sm:$0xff] }
 0x4e5   :  { %8705 = vmatpush1.bf16.msra.mxu1 %v10891_v22  ;;  %8542 = vmatprep.subr.bf16.mxu0 %v10906_v47  ;;  %v11002_v22 = vcombine.high %v1820_v39, %v1828_v40  ;;  %v11004_v47 = vcombine.high %v1821_v42, %v1829_v43  ;;  %v1909_v31 = vld [vmem:[#allocation10 + $0x16f8] sm:$0xff]  ;;  %v1924_v39 = vld [vmem:[#allocation10 + $0x1770] sm:$0xff] }
 0x4e6   :  { %8706 = vmatprep.subr.bf16.mxu1 %v10908_v50  ;;  %v1836_v50 = vld [vmem:[#allocation10 + $0x14b0] sm:$0xff]  ;;  %v1917_v40 = vld [vmem:[#allocation10 + $0x1738] sm:$0xff] }
 0x4e7   :  { %v11017_v3 = vcombine.low %v1836_v50, %v1844_v24 }
 0x4e8   :  { %8543 = vmatpush1.bf16.msra.mxu0 %v10905_v53  ;;  %v11003_v53 = vcombine.low %v1821_v42, %v1829_v43  ;;  %v1925_v42 = vld [vmem:[#allocation10 + $0x1778] sm:$0xff] }
 0x4e9   :  { %8707 = vmatpush1.bf16.msra.mxu1 %v10907_v41  ;;  %8544 = vmatprep.subr.bf16.mxu0 %v10922_v25  ;;  %v11018_v41 = vcombine.high %v1836_v50, %v1844_v24  ;;  %v11020_v25 = vcombine.high %v1837_v51, %v1845_v46  ;;  %v1940_v50 = vld [vmem:[#allocation10 + $0x17f0] sm:$0xff]  ;;  %v1933_v24 = vld [vmem:[#allocation10 + $0x17b8] sm:$0xff] }
 0x4ea   :  { %8708 = vmatprep.subr.bf16.mxu1 %v10924_v54  ;;  %v1852_v54 = vld [vmem:[#allocation10 + $0x1530] sm:$0xff] }
 0x4eb   :  { %v11033_v10 = vcombine.low %v1852_v54, %v1860_v33 }
 0x4ec   :  { %8545 = vmatpush1.bf16.msra.mxu0 %v10921_v48  ;;  %v11019_v48 = vcombine.low %v1837_v51, %v1845_v46  ;;  %v1941_v51 = vld [vmem:[#allocation10 + $0x17f8] sm:$0xff] }
 0x4ed   :  { %8709 = vmatpush1.bf16.msra.mxu1 %v10923_v23  ;;  %8546 = vmatprep.subr.bf16.mxu0 %v10938_v5  ;;  %v11034_v23 = vcombine.high %v1852_v54, %v1860_v33  ;;  %v11036_v5 = vcombine.high %v1853_v57, %v1861_v59  ;;  %v1956_v54 = vld [vmem:[#allocation10 + $0x1870] sm:$0xff]  ;;  %v1949_v33 = vld [vmem:[#allocation10 + $0x1838] sm:$0xff] }
 0x4ee   :  { %8710 = vmatprep.subr.bf16.mxu1 %v10940_v7  ;;  %v1868_v7 = vld [vmem:[#allocation10 + $0x15b0] sm:$0xff] }
 0x4ef   :  { %v11049_v15 = vcombine.low %v1868_v7, %v1876_v63 }
 0x4f0   :  { %8547 = vmatpush1.bf16.msra.mxu0 %v10937_v2  ;;  %v11035_v2 = vcombine.low %v1853_v57, %v1861_v59  ;;  %v1957_v57 = vld [vmem:[#allocation10 + $0x1878] sm:$0xff] }
 0x4f1   :  { %8711 = vmatpush1.bf16.msra.mxu1 %v10939_v11  ;;  %8548 = vmatprep.subr.bf16.mxu0 %v10954_v12  ;;  %v11050_v11 = vcombine.high %v1868_v7, %v1876_v63  ;;  %v11052_v12 = vcombine.high %v1869_v9, %v1877_v6  ;;  %v1972_v7 = vld [vmem:[#allocation10 + $0x18f0] sm:$0xff] }
 0x4f2   :  { %8712 = vmatprep.subr.bf16.mxu1 %v10956_v19  ;;  %v1884_v19 = vld [vmem:[#allocation10 + $0x1630] sm:$0xff] }
 0x4f3   :  { %v11065_v32 = vcombine.low %v1884_v19, %v1892_v13 }
 0x4f4   :  { %8549 = vmatpush1.bf16.msra.mxu0 %v10953_v17  ;;  %v11051_v17 = vcombine.low %v1869_v9, %v1877_v6  ;;  %v1965_v9 = vld [vmem:[#allocation10 + $0x18b8] sm:$0xff] }
 0x4f5   :  { %8713 = vmatpush1.bf16.msra.mxu1 %v10955_v18  ;;  %8550 = vmatprep.subr.bf16.mxu0 %v10970_v21  ;;  %v11066_v18 = vcombine.high %v1884_v19, %v1892_v13  ;;  %v11068_v21 = vcombine.high %v1885_v14, %v1893_v16  ;;  %v1973_v6 = vld [vmem:[#allocation10 + $0x18f8] sm:$0xff] }
 0x4f6   :  { %8714 = vmatprep.subr.bf16.mxu1 %v10972_v28  ;;  %v1900_v28 = vld [vmem:[#allocation10 + $0x16b0] sm:$0xff]  ;;  %v11148_v19 = vcombine.high %v1965_v9, %v1973_v6  ;;  %v1981_v13 = vld [vmem:[#allocation10 + $0x1938] sm:$0xff] }
 0x4f7   :  { %v11081_v43 = vcombine.low %v1900_v28, %v1908_v29 }
 0x4f8   :  { %8551 = vmatpush1.bf16.msra.mxu0 %v10969_v49  ;;  %v11067_v49 = vcombine.low %v1885_v14, %v1893_v16  ;;  %v1989_v14 = vld [vmem:[#allocation10 + $0x1978] sm:$0xff] }
 0x4f9   :  { %8715 = vmatpush1.bf16.msra.mxu1 %v10971_v60  ;;  %8552 = vmatprep.subr.bf16.mxu0 %v10986_v37  ;;  %v11082_v60 = vcombine.high %v1900_v28, %v1908_v29  ;;  %v11084_v37 = vcombine.high %v1901_v30, %v1909_v31  ;;  %v2004_v28 = vld [vmem:[#allocation10 + $0x19f0] sm:$0xff]  ;;  %v1997_v29 = vld [vmem:[#allocation10 + $0x19b8] sm:$0xff] }
 0x4fa   :  { %8716 = vmatprep.subr.bf16.mxu1 %v10988_v38  ;;  %v1916_v38 = vld [vmem:[#allocation10 + $0x1730] sm:$0xff] }
 0x4fb   :  { %v11097_v46 = vcombine.low %v1916_v38, %v1924_v39 }
 0x4fc   :  { %8553 = vmatpush1.bf16.msra.mxu0 %v10985_v44  ;;  %v11083_v44 = vcombine.low %v1901_v30, %v1909_v31  ;;  %v2005_v30 = vld [vmem:[#allocation10 + $0x19f8] sm:$0xff] }
 0x4fd   :  { %8717 = vmatpush1.bf16.msra.mxu1 %v10987_v45  ;;  %8554 = vmatprep.subr.bf16.mxu0 %v11002_v22  ;;  %v11098_v45 = vcombine.high %v1916_v38, %v1924_v39  ;;  %v11100_v22 = vcombine.high %v1917_v40, %v1925_v42  ;;  %v2013_v38 = vld [vmem:[#allocation10 + $0x1a38] sm:$0xff] }
 0x4fe   :  { %8718 = vmatprep.subr.bf16.mxu1 %v11004_v47  ;;  %v1932_v47 = vld [vmem:[#allocation10 + $0x17b0] sm:$0xff]  ;;  %v2021_v39 = vld [vmem:[#allocation10 + $0x1a78] sm:$0xff] }
 0x4ff   :  { %v11113_v59 = vcombine.low %v1932_v47, %v1940_v50 }
 0x500   :  { %8555 = vmatpush1.bf16.msra.mxu0 %v11001_v52  ;;  %v11099_v52 = vcombine.low %v1917_v40, %v1925_v42  ;;  %v11179_v40 = vcombine.low %v1997_v29, %v2005_v30 }
 0x501   :  { %8719 = vmatpush1.bf16.msra.mxu1 %v11003_v53  ;;  %8556 = vmatprep.subr.bf16.mxu0 %v11018_v41  ;;  %v11114_v53 = vcombine.high %v1932_v47, %v1940_v50  ;;  %v11116_v41 = vcombine.high %v1933_v24, %v1941_v51  ;;  %v2037_v47 = vld [vmem:[#allocation10 + $0x1af8] sm:$0xff] }
 0x502   :  { %8720 = vmatprep.subr.bf16.mxu1 %v11020_v25  ;;  %v1948_v25 = vld [vmem:[#allocation10 + $0x1830] sm:$0xff] }
 0x503   :  { %v11129_v63 = vcombine.low %v1948_v25, %v1956_v54 }
 0x504   :  { %8557 = vmatpush1.bf16.msra.mxu0 %v11017_v3  ;;  %v11115_v3 = vcombine.low %v1933_v24, %v1941_v51  ;;  %v11195_v24 = vcombine.low %v2013_v38, %v2021_v39 }
 0x505   :  { %8721 = vmatpush1.bf16.msra.mxu1 %v11019_v48  ;;  %8558 = vmatprep.subr.bf16.mxu0 %v11034_v23  ;;  %v11130_v48 = vcombine.high %v1948_v25, %v1956_v54  ;;  %v11132_v23 = vcombine.high %v1949_v33, %v1957_v57  ;;  %v2053_v25 = vld [vmem:[#allocation10 + $0x1b78] sm:$0xff] }
 0x506   :  { %8722 = vmatprep.subr.bf16.mxu1 %v11036_v5  ;;  %v1964_v5 = vld [vmem:[#allocation10 + $0x18b0] sm:$0xff] }
 0x507   :  { %v11145_v16 = vcombine.low %v1964_v5, %v1972_v7 }
 0x508   :  { %8559 = vmatpush1.bf16.msra.mxu0 %v11033_v10  ;;  %v11131_v10 = vcombine.low %v1949_v33, %v1957_v57 }
 0x509   :  { %8723 = vmatpush1.bf16.msra.mxu1 %v11035_v2  ;;  %8560 = vmatprep.subr.bf16.mxu0 %v11050_v11  ;;  %v11146_v2 = vcombine.high %v1964_v5, %v1972_v7  ;;  %v1980_v11 = vld [vmem:[#allocation10 + $0x1930] sm:$0xff] }
 0x50a   :  { %8724 = vmatprep.subr.bf16.mxu1 %v11052_v12  ;;  %v1988_v12 = vld [vmem:[#allocation10 + $0x1970] sm:$0xff] }
 0x50b   :  { %v11161_v31 = vcombine.low %v1980_v11, %v1988_v12 }
 0x50c   :  { %8561 = vmatpush1.bf16.msra.mxu0 %v11049_v15  ;;  %v11147_v15 = vcombine.low %v1965_v9, %v1973_v6  ;;  %v2069_v9 = vld [vmem:[#allocation10 + $0x1bf8] sm:$0xff] }
 0x50d   :  { %8725 = vmatpush1.bf16.msra.mxu1 %v11051_v17  ;;  %8562 = vmatprep.subr.bf16.mxu0 %v11066_v18  ;;  %v11162_v17 = vcombine.high %v1980_v11, %v1988_v12  ;;  %v11164_v18 = vcombine.high %v1981_v13, %v1989_v14 }
 0x50e   :  { %8726 = vmatprep.subr.bf16.mxu1 %v11068_v21  ;;  %v1996_v21 = vld [vmem:[#allocation10 + $0x19b0] sm:$0xff] }
 0x510   :  { %8563 = vmatpush1.bf16.msra.mxu0 %v11065_v32  ;;  %v11178_v32 = vcombine.high %v1996_v21, %v2004_v28 }
 0x511   :  { %8727 = vmatpush1.bf16.msra.mxu1 %v11067_v49  ;;  %8564 = vmatprep.subr.bf16.mxu0 %v11082_v60  ;;  %v11180_v49 = vcombine.high %v1997_v29, %v2005_v30  ;;  %v2012_v60 = vld [vmem:[#allocation10 + $0x1a30] sm:$0xff] }
 0x512   :  { %8728 = vmatprep.subr.bf16.mxu1 %v11084_v37  ;;  %v2020_v37 = vld [vmem:[#allocation10 + $0x1a70] sm:$0xff] }
 0x513   :  { %v11194_v42 = vcombine.high %v2012_v60, %v2020_v37  ;;  %v11193_v50 = vcombine.low %v2012_v60, %v2020_v37  ;;  %v2101_v60 = vld [vmem:[#allocation10 + $0x1cf8] sm:$0xff] }
 0x514   :  { %8565 = vmatpush1.bf16.msra.mxu0 %v11081_v43  ;;  %v11196_v43 = vcombine.high %v2013_v38, %v2021_v39 }
 0x515   :  { %8729 = vmatpush1.bf16.msra.mxu1 %v11083_v44  ;;  %8566 = vmatprep.subr.bf16.mxu0 %v11098_v45  ;;  %v2028_v44 = vld [vmem:[#allocation10 + $0x1ab0] sm:$0xff] }
 0x516   :  { %8730 = vmatprep.subr.bf16.mxu1 %v11100_v22  ;;  %v2036_v45 = vld [vmem:[#allocation10 + $0x1af0] sm:$0xff]  ;;  %v2029_v22 = vld [vmem:[#allocation10 + $0x1ab8] sm:$0xff] }
 0x517   :  { %v11210_v51 = vcombine.high %v2028_v44, %v2036_v45  ;;  %v11209_v54 = vcombine.low %v2028_v44, %v2036_v45  ;;  %v11211_v33 = vcombine.low %v2029_v22, %v2037_v47  ;;  %v2117_v44 = vld [vmem:[#allocation10 + $0x1d78] sm:$0xff] }
 0x518   :  { %8567 = vmatpush1.bf16.msra.mxu0 %v11097_v46  ;;  %v11212_v46 = vcombine.high %v2029_v22, %v2037_v47 }
 0x519   :  { %8731 = vmatpush1.bf16.msra.mxu1 %v11099_v52  ;;  %8568 = vmatprep.subr.bf16.mxu0 %v11114_v53  ;;  %v2044_v52 = vld [vmem:[#allocation10 + $0x1b30] sm:$0xff] }
 0x51a   :  { %8732 = vmatprep.subr.bf16.mxu1 %v11116_v41  ;;  %v2052_v53 = vld [vmem:[#allocation10 + $0x1b70] sm:$0xff]  ;;  %v2045_v41 = vld [vmem:[#allocation10 + $0x1b38] sm:$0xff] }
 0x51b   :  { %v11226_v57 = vcombine.high %v2044_v52, %v2052_v53 }
 0x51c   :  { %8569 = vmatpush1.bf16.msra.mxu0 %v11113_v59 }
 0x51d   :  { %8733 = vmatpush1.bf16.msra.mxu1 %v11115_v3  ;;  %8579 = vmatprep.subr.bf16.mxu0 %v11130_v48  ;;  %v11228_v3 = vcombine.high %v2045_v41, %v2053_v25  ;;  %v2060_v48 = vld [vmem:[#allocation10 + $0x1bb0] sm:$0xff] }
 0x51e   :  { %8743 = vmatprep.subr.bf16.mxu1 %v11132_v23  ;;  %v2068_v23 = vld [vmem:[#allocation10 + $0x1bf0] sm:$0xff] }
 0x51f   :  { %8571 = vmatmul.mubr.bf16.vlgmr.msra.gmra.mrb[20].mxu0 %v12397_v20 }
 0x520   :  { %8735 = vmatmul.mubr.bf16.vlgmr.msra.gmra.mrb[20].mxu1 %v12397_v20  ;;  %8580 = vmatpush1.bf16.msra.mxu0 %v11129_v63  ;;  %v11163_v20 = vcombine.low %v1981_v13, %v1989_v14  ;;  %v2061_v63 = vld [vmem:[#allocation10 + $0x1bb8] sm:$0xff]  ;;  %v11242_v13 = vcombine.high %v2060_v48, %v2068_v23 }
 0x521   :  { %8611 = vmatprep.mubr.bf16.mxu0 %v12399_v34  ;;  %8744 = vmatpush1.bf16.msra.mxu1 %v11131_v10  ;;  %v11243_v29 = vcombine.low %v2061_v63, %v2069_v9 }
 0x522   :  { %8775 = vmatprep.mubr.bf16.mxu1 %v12399_v34  ;;  %8581 = vmatprep.subr.bf16.mxu0 %v11146_v2  ;;  %v11177_v34 = vcombine.low %v1996_v21, %v2004_v28  ;;  %v11225_v2 = vcombine.low %v2044_v52, %v2052_v53  ;;  %v2085_v21 = vld [vmem:[#allocation10 + $0x1c78] sm:$0xff]  ;;  %v11241_v28 = vcombine.low %v2060_v48, %v2068_v23 }
 0x523   :  { %8745 = vmatprep.subr.bf16.mxu1 %v11148_v19  ;;  %v11227_v19 = vcombine.low %v2045_v41, %v2053_v25  ;;  %v2133_v52 = vld [vmem:[#allocation10 + $0x1df8] sm:$0xff]  ;;  %v12483_v41 = vld [vmem:[#allocation12] sm:$0xff] }
 0x524   :  { %8582 = vmatpush1.bf16.msra.mxu0 %v11145_v16  ;;  %v11244_v16 = vcombine.high %v2061_v63, %v2069_v9  ;;  %v2141_v48 = vld [vmem:[#allocation10 + $0x1e38] sm:$0xff]  ;;  %v12486_v63 = vunpack.c.l.bf16 %v12483_v41 }
 0x525   :  { %8746 = vmatpush1.bf16.msra.mxu1 %v11147_v15  ;;  %8583 = vmatprep.subr.bf16.mxu0 %v11162_v17  ;;  %v2076_v15 = vld [vmem:[#allocation10 + $0x1c30] sm:$0xff]  ;;  %v2149_v23 = vld [vmem:[#allocation10 + $0x1e78] sm:$0xff] }
 0x526   :  { %8747 = vmatprep.subr.bf16.mxu1 %v11164_v18  ;;  %v2084_v17 = vld [vmem:[#allocation10 + $0x1c70] sm:$0xff]  ;;  %v2077_v18 = vld [vmem:[#allocation10 + $0x1c38] sm:$0xff] }
 0x527   :  { %v11258_v30 = vcombine.high %v2076_v15, %v2084_v17  ;;  %v11257_v37 = vcombine.low %v2076_v15, %v2084_v17  ;;  %v11259_v38 = vcombine.low %v2077_v18, %v2085_v21  ;;  %v2223_v17 = vrot.slane %v12486_v63, %v12324_v36 }
 0x528   :  { %8584 = vmatpush1.bf16.msra.mxu0 %v11161_v31  ;;  %v11260_v31 = vcombine.high %v2077_v18, %v2085_v21  ;;  %v11323_v18 = vcombine.low %v2141_v48, %v2149_v23 }
 0x529   :  { %8748 = vmatpush1.bf16.msra.mxu1 %v11163_v20  ;;  %8585 = vmatprep.subr.bf16.mxu0 %v11178_v32  ;;  %v2092_v20 = vld [vmem:[#allocation10 + $0x1cb0] sm:$0xff] }
 0x52a   :  { %8749 = vmatprep.subr.bf16.mxu1 %v11180_v49  ;;  %v2100_v32 = vld [vmem:[#allocation10 + $0x1cf0] sm:$0xff]  ;;  %v2093_v49 = vld [vmem:[#allocation10 + $0x1cb8] sm:$0xff] }
 0x52b   :  { %v11274_v39 = vcombine.high %v2092_v20, %v2100_v32  ;;  %v11273_v45 = vcombine.low %v2092_v20, %v2100_v32  ;;  %v11275_v22 = vcombine.low %v2093_v49, %v2101_v60  ;;  %v2181_v20 = vld [vmem:[#allocation10 + $0x1f78] sm:$0xff] }
 0x52c   :  { %8586 = vmatpush1.bf16.msra.mxu0 %v11177_v34  ;;  %v11276_v34 = vcombine.high %v2093_v49, %v2101_v60  ;;  %v2303_v60 = vrot.slane %v2223_v17, %v12307_v26  ;;  %v11818_v17 = vld [vmem:[#allocation13 + $0x18] sm:$0xff]  }
 0x52d   :  { %8750 = vmatpush1.bf16.msra.mxu1 %v11179_v40  ;;  %8587 = vmatprep.subr.bf16.mxu0 %v11194_v42  ;;  %v2108_v40 = vld [vmem:[#allocation10 + $0x1d30] sm:$0xff] }
 0x52e   :  { %8751 = vmatprep.subr.bf16.mxu1 %v11196_v43  ;;  %v2116_v42 = vld [vmem:[#allocation10 + $0x1d70] sm:$0xff]  ;;  %v2109_v43 = vld [vmem:[#allocation10 + $0x1d38] sm:$0xff] }
 0x52f   :  { %v11290_v47 = vcombine.high %v2108_v40, %v2116_v42  ;;  %v11289_v53 = vcombine.low %v2108_v40, %v2116_v42  ;;  %v11291_v25 = vcombine.low %v2109_v43, %v2117_v44  ;;  %v2196_v40 = vld [vmem:[#allocation10 + $0x1ff0] sm:$0xff]  ;;  %v2189_v42 = vld [vmem:[#allocation10 + $0x1fb8] sm:$0xff] }
 0x530   :  { %8588 = vmatpush1.bf16.msra.mxu0 %v11193_v50  ;;  %v11292_v50 = vcombine.high %v2109_v43, %v2117_v44  ;;  %v2197_v43 = vld [vmem:[#allocation10 + $0x1ff8] sm:$0xff] }
 0x531   :  { %8752 = vmatpush1.bf16.msra.mxu1 %v11195_v24  ;;  %8589 = vmatprep.subr.bf16.mxu0 %v11210_v51  ;;  %v2124_v24 = vld [vmem:[#allocation10 + $0x1db0] sm:$0xff] }
 0x532   :  { %v12475_v59 = vpop.f32.mrb[16].mxu0  ;;  %8753 = vmatprep.subr.bf16.mxu1 %v11212_v46  ;;  %v2132_v51 = vld [vmem:[#allocation10 + $0x1df0] sm:$0xff]  ;;  %v2125_v46 = vld [vmem:[#allocation10 + $0x1db8] sm:$0xff] }
 0x533   :  { %v12477_v5 = vpop.f32.mrb[16].mxu1  ;;  %v12479_v7 = vpop.f32.mrb[17].mxu0  ;;  %v11305_v9 = vcombine.low %v2124_v24, %v2132_v51 }
 0x534   :  { %v12481_v6 = vpop.f32.mrb[17].mxu1  ;;  %v8289_v10 = vpop.f32.mrb[18].mxu0  ;;  %8590 = vmatpush1.bf16.msra.mxu0 %v11209_v54  ;;  %v11306_v54 = vcombine.high %v2124_v24, %v2132_v51  ;;  %v11372_v51 = vcombine.high %v2189_v42, %v2197_v43 }
 0x535   :  { %v8453_v11 = vpop.f32.mrb[18].mxu1  ;;  %8754 = vmatpush1.bf16.msra.mxu1 %v11211_v33  ;;  %v8290_v12 = vpop.f32.mrb[19].mxu0  ;;  %8591 = vmatprep.subr.bf16.mxu0 %v11226_v57  ;;  %v11308_v33 = vcombine.high %v2125_v46, %v2133_v52  ;;  %v2140_v57 = vld [vmem:[#allocation10 + $0x1e30] sm:$0xff]  ;;  %v11307_v10 = vcombine.low %v2125_v46, %v2133_v52 }
 0x536   :  { %v8454_v14 = vpop.f32.mrb[19].mxu1  ;;  %8755 = vmatprep.subr.bf16.mxu1 %v11228_v3  ;;  %v2148_v3 = vld [vmem:[#allocation10 + $0x1e70] sm:$0xff]  ;;  %v11324_v11 = vcombine.high %v2141_v48, %v2149_v23  ;;  %v11808_v48 = vld [vmem:[#allocation13 + $0x48] sm:$0xff]  }
 0x537   :  { %v2156_v12 = vld [vmem:[#allocation10 + $0x1eb0] sm:$0xff]  ;;  %v2165_v14 = vld [vmem:[#allocation10 + $0x1ef8] sm:$0xff]  ;;  %v11321_v15 = vcombine.low %v2140_v57, %v2148_v3 }
 0x538   :  { %8592 = vmatpush1.bf16.msra.mxu0 %v11225_v2  ;;  %v11322_v2 = vcombine.high %v2140_v57, %v2148_v3  ;;  %v11807_v57 = vld [vmem:[#allocation13 + $0x80] sm:$0xff]  }
 0x539   :  { %8756 = vmatpush1.bf16.msra.mxu1 %v11227_v19  ;;  %8593 = vmatprep.subr.bf16.mxu0 %v11242_v13  ;;  %v2164_v19 = vld [vmem:[#allocation10 + $0x1ef0] sm:$0xff]  ;;  %v2157_v13 = vld [vmem:[#allocation10 + $0x1eb8] sm:$0xff] }
 0x53a   :  { %8757 = vmatprep.subr.bf16.mxu1 %v11244_v16  ;;  %v2215_v16 = vrot.slane %v12486_v63, %v12310_v27  ;;  %v11338_v21 = vcombine.high %v2156_v12, %v2164_v19  ;;  %v11337_v49 = vcombine.low %v2156_v12, %v2164_v19  ;;  %v11812_v12 = vld [vmem:[#allocation13 + $0x50] sm:$0xff]  }
 0x53b   :  { %v11813_v19 = vld [vmem:[#allocation13 + $0xd0] sm:$0xff]  }
 0x53c   :  { %8594 = vmatpush1.bf16.msra.mxu0 %v11241_v28  ;;  %v11340_v28 = vcombine.high %v2157_v13, %v2165_v14  ;;  %v2295_v32 = vrot.slane %v2215_v16, %v12307_v26  ;;  %v11816_v16 = vld [vmem:[#allocation13 + $0x58] sm:$0xff]  }
 0x53d   :  { %8758 = vmatpush1.bf16.msra.mxu1 %v11243_v29  ;;  %8595 = vmatprep.subr.bf16.mxu0 %v11258_v30  ;;  %v2172_v29 = vld [vmem:[#allocation10 + $0x1f30] sm:$0xff] }
 0x53e   :  { %8759 = vmatprep.subr.bf16.mxu1 %v11260_v31  ;;  %v2180_v30 = vld [vmem:[#allocation10 + $0x1f70] sm:$0xff]  ;;  %v2173_v31 = vld [vmem:[#allocation10 + $0x1f38] sm:$0xff]  ;;  %v11678_v44 = vadd.f32 %v12431_v58, %v2295_v32 }
 0x53f   :  { %v11823_v32 = vld [vmem:[#allocation13 + $0xa0] sm:$0xff]  }
 0x540   :  { %8596 = vmatpush1.bf16.msra.mxu0 %v11257_v37  ;;  %v11339_v37 = vcombine.low %v2157_v13, %v2165_v14  ;;  %vm8786_vm8 = vcmp.ge.f32.partialorder %v11678_v44, 0.0  ;;  %v11814_v13 = vld [vmem:[#allocation13 + $0x10] sm:$0xff]  }
 0x541   :  { %8760 = vmatpush1.bf16.msra.mxu1 %v11259_v38  ;;  %8597 = vmatprep.subr.bf16.mxu0 %v11274_v39  ;;  %v11354_v38 = vcombine.high %v2172_v29, %v2180_v30  ;;  %v11356_v39 = vcombine.high %v2173_v31, %v2181_v20  ;;  %v11815_v14 = vld [vmem:[#allocation13 + $0x90] sm:$0xff]  }
 0x542   :  { %8761 = vmatprep.subr.bf16.mxu1 %v11276_v34  ;;  %v2188_v34 = vld [vmem:[#allocation10 + $0x1fb0] sm:$0xff] }
 0x543   :  { %v11370_v24 = vcombine.high %v2188_v34, %v2196_v40  ;;  %v11369_v52 = vcombine.low %v2188_v34, %v2196_v40  ;;  %v11827_v40 = vld [vmem:[#allocation13 + $0xa8] sm:$0xff]  }
 0x544   :  { %8598 = vmatpush1.bf16.msra.mxu0 %v11273_v45  ;;  %v11353_v45 = vcombine.low %v2172_v29, %v2180_v30  ;;  %v11821_v29 = vld [vmem:[#allocation13 + $0xe0] sm:$0xff]   ;;  %v2219_v30 = vrot.slane %v12486_v63, %v12353_v35 }
 0x545   :  { %8762 = vmatpush1.bf16.msra.mxu1 %v11275_v22  ;;  %8599 = vmatprep.subr.bf16.mxu0 %v11290_v47  ;;  %v12498_v22 = vstv %s12590_s1  ;;  %v11680_v47 = vadd.f32 %v12433_v8, %v2303_v60  ;;  %v11805_v8 = vld [vmem:[#allocation13 + $0xc0] sm:$0xff]   ;;  %s12130_s1 = smov [#allocation16]  }
 0x546   :  { %8763 = vmatprep.subr.bf16.mxu1 %v11292_v50  ;;  %v11355_v50 = vcombine.low %v2173_v31, %v2181_v20  ;;  %v8803_v46 = vmul.f32 %v11678_v44, %v12498_v22  ;;  %s10207_s18 = sshll.u32 %s12130_s1, 4  ;;  %s10208_s18 = int_to_ptr.vmem [resolvable:$true] %s10207_s18 }
 0x547   :  { %v8805_v58 = vmul.f32 %v11680_v47, %v12498_v22  ;;  %vm8788_vm9 = vcmp.ge.f32.partialorder %v11680_v47, 0.0  ;;  %s12086_s27 = scalar_lea.vmem %s10208_s18, 128  ;;  %p12091_p1 = scmp.lt.s32.totalorder %s10208_s18, %s10208_s18 }
 0x548   :  { %8600 = vmatpush1.bf16.msra.mxu0 %v11289_v53  ;;  %v11371_v53 = vcombine.low %v2189_v42, %v2197_v43  ;;  %v11828_v42 = vld [vmem:[#allocation13 + $0x70] sm:$0xff]   ;;  %p12087_p0 = scmp.ne.s32.totalorder %s10208_s18, %s12086_s27  ;;  %p12092_p2 = scmp.lt.s32.totalorder %s12086_s27, %s12086_s27 }
 0x549   :  { %8764 = vmatpush1.bf16.msra.mxu1 %v11291_v25  ;;  %8601 = vmatprep.subr.bf16.mxu0 %v11306_v54  ;;  %v11804_v25 = vld [vmem:[#allocation13 + $0x40] sm:$0xff]   ;;  %v8821_v3 = vsel %vm8788_vm9, %v11680_v47, %v8805_v58  ;;  %v11833_v58 = vld [vmem:[#allocation13 + $0xf8] sm:$0xff]  }
 0x54a   :  { %8765 = vmatprep.subr.bf16.mxu1 %v11308_v33  ;;  %v11806_v54 = vld [vmem:[#allocation13] sm:$0xff]   ;;  %v8819_v33 = vsel %vm8786_vm8, %v11678_v44, %v8803_v46  ;;  %v11829_v44 = vld [vmem:[#allocation13 + $0xf0] sm:$0xff]   ;;  %v11832_v46 = vld [vmem:[#allocation13 + $0x78] sm:$0xff]   ;;  %p12093_p3 = por %p12092_p2, %p12091_p1 }
 0x54b   :  { %v8835_v23 = vpack.c.bf16 %v8819_v33, %v8819_v33 }
 0x54c   :  { %8602 = vmatpush1.bf16.msra.mxu0 %v11305_v9  ;;  %v11809_v9 = vld [vmem:[#allocation13 + $0xc8] sm:$0xff]   ;;  %p12094_p4 = pnand %p12093_p3, %p12087_p0 }
 0x54d   :  { %8766 = vmatpush1.bf16.msra.mxu1 %v11307_v10  ;;  %8603 = vmatprep.subr.bf16.mxu0 %v11322_v2  ;;  %v8837_v10 = vpack.c.bf16 %v8821_v3, %v8821_v3  ;;  %v11810_v2 = vld [vmem:[#allocation13 + $0x8] sm:$0xff]  }
 0x54e   :  { %8767 = vmatprep.subr.bf16.mxu1 %v11324_v11  ;;  %v11811_v11 = vld [vmem:[#allocation13 + $0x88] sm:$0xff]  }
 0x550   :  { %8604 = vmatpush1.bf16.msra.mxu0 %v11321_v15  ;;  %v11817_v15 = vld [vmem:[#allocation13 + $0xd8] sm:$0xff]  }
 0x551   :  { %8768 = vmatpush1.bf16.msra.mxu1 %v11323_v18  ;;  %8605 = vmatprep.subr.bf16.mxu0 %v11338_v21  ;;  %v11819_v18 = vld [vmem:[#allocation13 + $0x98] sm:$0xff]   ;;  %v11820_v21 = vld [vmem:[#allocation13 + $0x60] sm:$0xff]  }
 0x552   :  { %8769 = vmatprep.subr.bf16.mxu1 %v11340_v28  ;;  %v2211_v28 = vrot.slane %v12486_v63, %v12307_v26 }
 0x554   :  { %8606 = vmatpush1.bf16.msra.mxu0 %v11337_v49  ;;  %v11824_v49 = vld [vmem:[#allocation13 + $0x68] sm:$0xff]   ;;  %v2291_v60 = vrot.slane %v2211_v28, %v12307_v26  ;;  %v11848_v28 = vld [vmem:[#allocation13 + $0x158] sm:$0xff]  }
 0x555   :  { %8770 = vmatpush1.bf16.msra.mxu1 %v11339_v37  ;;  %8607 = vmatprep.subr.bf16.mxu0 %v11354_v38  ;;  %v11825_v37 = vld [vmem:[#allocation13 + $0xe8] sm:$0xff]   ;;  %v2299_v38 = vrot.slane %v2219_v30, %v12307_v26 }
 0x556   :  { %8771 = vmatprep.subr.bf16.mxu1 %v11356_v39  ;;  %v11826_v39 = vld [vmem:[#allocation13 + $0x28] sm:$0xff]   ;;  %v11677_v43 = vadd.f32 %v12427_v0, %v2291_v60 }
 0x558   :  { %8608 = vmatpush1.bf16.msra.mxu0 %v11353_v45  ;;  %v11679_v45 = vadd.f32 %v12429_v1, %v2299_v38  ;;  %vm8785_vm10 = vcmp.ge.f32.partialorder %v11677_v43, 0.0  ;;  %v11854_v38 = vld [vmem:[#allocation13 + $0x120] sm:$0xff]  }
 0x559   :  { %8772 = vmatpush1.bf16.msra.mxu1 %v11355_v50  ;;  %8609 = vmatprep.subr.bf16.mxu0 %v11370_v24  ;;  %v11830_v50 = vld [vmem:[#allocation13 + $0x30] sm:$0xff]  }
 0x55a   :  { %8773 = vmatprep.subr.bf16.mxu1 %v11372_v51  ;;  %v11831_v51 = vld [vmem:[#allocation13 + $0xb0] sm:$0xff]   ;;  %v8804_v0 = vmul.f32 %v11679_v45, %v12498_v22  ;;  %vm8787_vm11 = vcmp.ge.f32.partialorder %v11679_v45, 0.0 }
 0x55c   :  { %8610 = vmatpush1.bf16.msra.mxu0 %v11369_v52  ;;  %v8802_v52 = vmul.f32 %v11677_v43, %v12498_v22  ;;  %v8820_v33 = vsel %vm8787_vm11, %v11679_v45, %v8804_v0 }
 0x55d   :  { %8774 = vmatpush1.bf16.msra.mxu1 %v11371_v53  ;;  %11501 = vmatprep.subr.bf16.mxu0 %v11804_v25  ;;  %v11836_v25 = vld [vmem:[#allocation13 + $0x140] sm:$0xff]  }
 0x55e   :  { %11523 = vmatprep.subr.bf16.mxu1 %v11805_v8  ;;  %v8818_v8 = vsel %vm8785_vm10, %v11677_v43, %v8802_v52 }
 0x55f   :  { %8612 = vmatmul.mubr.bf16.vlgmr.msra.gmra.mrb[20].mxu0 %v12409_v56 }
 0x560   :  { %8776 = vmatmul.mubr.bf16.vlgmr.msra.gmra.mrb[20].mxu1 %v12409_v56  ;;  %11502 = vmatpush3.bf16.msra.mxu0 %v11806_v54  ;;  %v12506_v56 = vunpack.c.h.bf16 %v12483_v41  ;;  %v11822_v41 = vld [vmem:[#allocation13 + $0x20] sm:$0xff]  }
 0x561   :  { %9912 = vmatprep.mubr.bf16.mxu0 %v8835_v23  ;;  %11524 = vmatpush3.bf16.msra.mxu1 %v11807_v57  ;;  %v11837_v54 = vld [vmem:[#allocation13 + $0x1c0] sm:$0xff]  }
 0x562   :  { %9952 = vmatprep.mubr.bf16.mxu1 %v8837_v10  ;;  %11503 = vmatprep.subr.bf16.mxu0 %v11808_v48  ;;  %v2231_v31 = vrot.slane %v12506_v56, %v12310_v27  ;;  %v2239_v20 = vrot.slane %v12506_v56, %v12324_v36  ;;  %v11838_v57 = vld [vmem:[#allocation13 + $0x100] sm:$0xff]   ;;  %v8834_v48 = vpack.c.bf16 %v8818_v8, %v8818_v8 }
 0x563   :  { %11525 = vmatprep.subr.bf16.mxu1 %v11809_v9  ;;  %v11839_v23 = vld [vmem:[#allocation13 + $0x180] sm:$0xff]   ;;  %v8836_v10 = vpack.c.bf16 %v8820_v33, %v8820_v33  ;;  %v2235_v60 = vrot.slane %v12506_v56, %v12353_v35 }
 0x564   :  { %11504 = vmatpush3.bf16.msra.mxu0 %v11810_v2  ;;  %v2311_v63 = vrot.slane %v2231_v31, %v12307_v26  ;;  %v2319_v34 = vrot.slane %v2239_v20, %v12307_v26  ;;  %v11840_v2 = vld [vmem:[#allocation13 + $0x148] sm:$0xff]   ;;  %v11850_v31 = vld [vmem:[#allocation13 + $0x118] sm:$0xff]   ;;  %v11852_v20 = vld [vmem:[#allocation13 + $0x160] sm:$0xff]  }
 0x565   :  { %11526 = vmatpush3.bf16.msra.mxu1 %v11811_v11  ;;  %11505 = vmatprep.subr.bf16.mxu0 %v11812_v12  ;;  %v11841_v12 = vld [vmem:[#allocation13 + $0x1c8] sm:$0xff]   ;;  %v2315_v43 = vrot.slane %v2235_v60, %v12307_v26  ;;  %v11868_v8 = vld [vmem:[#allocation13 + $0x240] sm:$0xff]  }
 0x566   :  { %11527 = vmatprep.subr.bf16.mxu1 %v11813_v19  ;;  %v11682_v47 = vadd.f32 %v12455_v62, %v2311_v63  ;;  %v11684_v24 = vadd.f32 %v12457_v4, %v2319_v34  ;;  %v11834_v62 = vld [vmem:[#allocation13 + $0x38] sm:$0xff]   ;;  %v11856_v34 = vld [vmem:[#allocation13 + $0x168] sm:$0xff]   ;;  %v11869_v33 = vld [vmem:[#allocation13 + $0x2c0] sm:$0xff]  }
 0x567   :  { %v11835_v4 = vld [vmem:[#allocation13 + $0xb8] sm:$0xff]   ;;  %v11885_v60 = vld [vmem:[#allocation13 + $0x2e0] sm:$0xff]  }
 0x568   :  { %11506 = vmatpush3.bf16.msra.mxu0 %v11814_v13  ;;  %v8807_v1 = vmul.f32 %v11682_v47, %v12498_v22  ;;  %vm8790_vm12 = vcmp.ge.f32.partialorder %v11682_v47, 0.0  ;;  %v8809_v53 = vmul.f32 %v11684_v24, %v12498_v22  ;;  %vm8792_vm13 = vcmp.ge.f32.partialorder %v11684_v24, 0.0  ;;  %v11842_v13 = vld [vmem:[#allocation13 + $0x108] sm:$0xff]  }
 0x569   :  { %11528 = vmatpush3.bf16.msra.mxu1 %v11815_v14  ;;  %11507 = vmatprep.subr.bf16.mxu0 %v11816_v16  ;;  %v11843_v14 = vld [vmem:[#allocation13 + $0x188] sm:$0xff]   ;;  %v11844_v16 = vld [vmem:[#allocation13 + $0x150] sm:$0xff]  }
 0x56a   :  { %11529 = vmatprep.subr.bf16.mxu1 %v11817_v15  ;;  %v8823_v3 = vsel %vm8790_vm12, %v11682_v47, %v8807_v1  ;;  %v8825_v9 = vsel %vm8792_vm13, %v11684_v24, %v8809_v53  ;;  %v11845_v15 = vld [vmem:[#allocation13 + $0x1d0] sm:$0xff]   ;;  %v11859_v47 = vld [vmem:[#allocation13 + $0x1a8] sm:$0xff]  }
 0x56b   :  { %v8839_v11 = vpack.c.bf16 %v8823_v3, %v8823_v3  ;;  %v8841_v19 = vpack.c.bf16 %v8825_v9, %v8825_v9  ;;  %v11863_v1 = vld [vmem:[#allocation13 + $0x1b0] sm:$0xff]   ;;  %v11870_v3 = vld [vmem:[#allocation13 + $0x200] sm:$0xff]  }
 0x56c   :  { %11508 = vmatpush3.bf16.msra.mxu0 %v11818_v17  ;;  %v11846_v17 = vld [vmem:[#allocation13 + $0x110] sm:$0xff]   ;;  %v11871_v9 = vld [vmem:[#allocation13 + $0x280] sm:$0xff]  }
 0x56d   :  { %11530 = vmatpush3.bf16.msra.mxu1 %v11819_v18  ;;  %11509 = vmatprep.subr.bf16.mxu0 %v11820_v21  ;;  %v12528_v18 = vld [vmem:[#allocation12 + $0x8] sm:$0xff]  ;;  %v11847_v21 = vld [vmem:[#allocation13 + $0x190] sm:$0xff]  }
 0x56e   :  { %11531 = vmatprep.subr.bf16.mxu1 %v11821_v29  ;;  %v11849_v29 = vld [vmem:[#allocation13 + $0x1d8] sm:$0xff]   ;;  %v12531_v30 = vunpack.c.l.bf16 %v12528_v18 }
 0x570   :  { %11510 = vmatpush3.bf16.msra.mxu0 %v11822_v41  ;;  %v11851_v41 = vld [vmem:[#allocation13 + $0x198] sm:$0xff]   ;;  %v2255_v63 = vrot.slane %v12531_v30, %v12324_v36 }
 0x571   :  { %11532 = vmatpush3.bf16.msra.mxu1 %v11823_v32  ;;  %11511 = vmatprep.subr.bf16.mxu0 %v11824_v49  ;;  %v2227_v32 = vrot.slane %v12506_v56, %v12307_v26  ;;  %v11853_v49 = vld [vmem:[#allocation13 + $0x1e0] sm:$0xff]  }
 0x572   :  { %11533 = vmatprep.subr.bf16.mxu1 %v11825_v37  ;;  %v2247_v37 = vrot.slane %v12531_v30, %v12310_v27  ;;  %v2335_v45 = vrot.slane %v2255_v63, %v12307_v26  ;;  %v11887_v63 = vld [vmem:[#allocation13 + $0x2a0] sm:$0xff]  }
 0x574   :  { %11512 = vmatpush3.bf16.msra.mxu0 %v11826_v39  ;;  %v11855_v39 = vld [vmem:[#allocation13 + $0x1a0] sm:$0xff]   ;;  %v2327_v56 = vrot.slane %v2247_v37, %v12307_v26  ;;  %v11688_v0 = vadd.f32 %v12481_v6, %v2335_v45  ;;  %v11867_v6 = vld [vmem:[#allocation13 + $0x1b8] sm:$0xff]   ;;  %v2251_v37 = vrot.slane %v12531_v30, %v12353_v35  ;;  %v11893_v45 = vld [vmem:[#allocation13 + $0x2f0] sm:$0xff]  }
 0x575   :  { %11534 = vmatpush3.bf16.msra.mxu1 %v11827_v40  ;;  %11513 = vmatprep.subr.bf16.mxu0 %v11828_v42  ;;  %v2307_v40 = vrot.slane %v2227_v32, %v12307_v26  ;;  %v11857_v42 = vld [vmem:[#allocation13 + $0x1e8] sm:$0xff]   ;;  %v11884_v32 = vld [vmem:[#allocation13 + $0x260] sm:$0xff]  }
 0x576   :  { %11535 = vmatprep.subr.bf16.mxu1 %v11829_v44  ;;  %v11858_v44 = vld [vmem:[#allocation13 + $0x128] sm:$0xff]   ;;  %v11686_v52 = vadd.f32 %v12479_v7, %v2327_v56  ;;  %v11866_v7 = vld [vmem:[#allocation13 + $0x138] sm:$0xff]   ;;  %vm8796_vm1 = vcmp.ge.f32.partialorder %v11688_v0, 0.0 }
 0x577   :  { %v11681_v24 = vadd.f32 %v12451_v55, %v2307_v40  ;;  %v11889_v40 = vld [vmem:[#allocation13 + $0x2e8] sm:$0xff]  }
 0x578   :  { %11514 = vmatpush3.bf16.msra.mxu0 %v11830_v50  ;;  %v11860_v50 = vld [vmem:[#allocation13 + $0x170] sm:$0xff]   ;;  %vm8794_vm0 = vcmp.ge.f32.partialorder %v11686_v52, 0.0  ;;  %v11891_v56 = vld [vmem:[#allocation13 + $0x2a8] sm:$0xff]  }
 0x579   :  { %11536 = vmatpush3.bf16.msra.mxu1 %v11831_v51  ;;  %11515 = vmatprep.subr.bf16.mxu0 %v11832_v46  ;;  %v11861_v51 = vld [vmem:[#allocation13 + $0x1f0] sm:$0xff]   ;;  %v11683_v46 = vadd.f32 %v12453_v61, %v2315_v43  ;;  %v8806_v53 = vmul.f32 %v11681_v24, %v12498_v22  ;;  %vm8789_vm14 = vcmp.ge.f32.partialorder %v11681_v24, 0.0  ;;  %v8811_v61 = vmul.f32 %v11686_v52, %v12498_v22  ;;  %v11890_v43 = vld [vmem:[#allocation13 + $0x228] sm:$0xff]  }
 0x57a   :  { %11537 = vmatprep.subr.bf16.mxu1 %v11833_v58  ;;  %v11862_v58 = vld [vmem:[#allocation13 + $0x130] sm:$0xff]  }
 0x57b   :  { %v8808_v55 = vmul.f32 %v11683_v46, %v12498_v22  ;;  %vm8791_vm15 = vcmp.ge.f32.partialorder %v11683_v46, 0.0 }
 0x57c   :  { %11516 = vmatpush3.bf16.msra.mxu0 %v11834_v62  ;;  %v11864_v62 = vld [vmem:[#allocation13 + $0x178] sm:$0xff]  }
 0x57d   :  { %11538 = vmatpush3.bf16.msra.mxu1 %v11835_v4  ;;  %11545 = vmatprep.subr.bf16.mxu0 %v11836_v25  ;;  %v11865_v4 = vld [vmem:[#allocation13 + $0x1f8] sm:$0xff]   ;;  %v8813_v25 = vmul.f32 %v11688_v0, %v12498_v22 }
 0x57e   :  { %11567 = vmatprep.subr.bf16.mxu1 %v11837_v54  ;;  %v8822_v54 = vsel %vm8789_vm14, %v11681_v24, %v8806_v53  ;;  %v11895_v24 = vld [vmem:[#allocation13 + $0x2b0] sm:$0xff]  }
 0x57f   :  { %9913 = vmatmul.mubr.bf16.vlgmr.msra.gmra.mrb[24].mxu0 %v8834_v48  ;;  %v8827_v48 = vsel %vm8794_vm0, %v11686_v52, %v8811_v61  ;;  %v11897_v52 = vld [vmem:[#allocation13 + $0x2f8] sm:$0xff]   ;;  %v11903_v61 = vld [vmem:[#allocation13 + $0x380] sm:$0xff]  }
 0x580   :  { %9953 = vmatmul.mubr.bf16.vlgmr.msra.gmra.mrb[24].mxu1 %v8836_v10  ;;  %11546 = vmatpush3.bf16.msra.mxu0 %v11838_v57  ;;  %v8824_v57 = vsel %vm8791_vm15, %v11683_v46, %v8808_v55  ;;  %v8829_v10 = vsel %vm8796_vm1, %v11688_v0, %v8813_v25  ;;  %v11899_v0 = vld [vmem:[#allocation13 + $0x2b8] sm:$0xff]  }
 0x581   :  { %9992 = vmatprep.mubr.bf16.mxu0 %v8839_v11  ;;  %11568 = vmatpush3.bf16.msra.mxu1 %v11839_v23  ;;  %v8838_v23 = vpack.c.bf16 %v8822_v54, %v8822_v54  ;;  %v11872_v11 = vld [vmem:[#allocation13 + $0x248] sm:$0xff]  }
 0x582   :  { %10032 = vmatprep.mubr.bf16.mxu1 %v8841_v19  ;;  %11547 = vmatprep.subr.bf16.mxu0 %v11840_v2  ;;  %v8840_v2 = vpack.c.bf16 %v8824_v57, %v8824_v57  ;;  %v11873_v19 = vld [vmem:[#allocation13 + $0x2c8] sm:$0xff]   ;;  %v11909_v57 = vld [vmem:[#allocation13 + $0x3d0] sm:$0xff]  }
 0x583   :  { %11569 = vmatprep.subr.bf16.mxu1 %v11841_v12  ;;  %v8843_v12 = vpack.c.bf16 %v8827_v48, %v8827_v48  ;;  %v11907_v54 = vld [vmem:[#allocation13 + $0x388] sm:$0xff]   ;;  %v11911_v48 = vld [vmem:[#allocation13 + $0x390] sm:$0xff]  }
 0x584   :  { %11548 = vmatpush3.bf16.msra.mxu0 %v11842_v13  ;;  %v8845_v13 = vpack.c.bf16 %v8829_v10, %v8829_v10  ;;  %v11914_v10 = vld [vmem:[#allocation13 + $0x318] sm:$0xff]  }
 0x585   :  { %11570 = vmatpush3.bf16.msra.mxu1 %v11843_v14  ;;  %11549 = vmatprep.subr.bf16.mxu0 %v11844_v16  ;;  %v11874_v14 = vld [vmem:[#allocation13 + $0x208] sm:$0xff]  }
 0x586   :  { %11571 = vmatprep.subr.bf16.mxu1 %v11845_v15  ;;  %v11875_v16 = vld [vmem:[#allocation13 + $0x288] sm:$0xff]   ;;  %v11876_v15 = vld [vmem:[#allocation13 + $0x250] sm:$0xff]  }
 0x588   :  { %11550 = vmatpush3.bf16.msra.mxu0 %v11846_v17  ;;  %v11877_v17 = vld [vmem:[#allocation13 + $0x2d0] sm:$0xff]  }
 0x589   :  { %11572 = vmatpush3.bf16.msra.mxu1 %v11847_v21  ;;  %11551 = vmatprep.subr.bf16.mxu0 %v11848_v28  ;;  %v11878_v21 = vld [vmem:[#allocation13 + $0x210] sm:$0xff]  }
 0x58a   :  { %11573 = vmatprep.subr.bf16.mxu1 %v11849_v29  ;;  %v11879_v28 = vld [vmem:[#allocation13 + $0x290] sm:$0xff]   ;;  %v11880_v29 = vld [vmem:[#allocation13 + $0x258] sm:$0xff]  }
 0x58c   :  { %11552 = vmatpush3.bf16.msra.mxu0 %v11850_v31  ;;  %v11881_v31 = vld [vmem:[#allocation13 + $0x2d8] sm:$0xff]  }
 0x58d   :  { %11574 = vmatpush3.bf16.msra.mxu1 %v11851_v41  ;;  %11553 = vmatprep.subr.bf16.mxu0 %v11852_v20  ;;  %v11882_v41 = vld [vmem:[#allocation13 + $0x218] sm:$0xff]  }
 0x58e   :  { %11575 = vmatprep.subr.bf16.mxu1 %v11853_v49  ;;  %v11883_v20 = vld [vmem:[#allocation13 + $0x298] sm:$0xff]   ;;  %v2243_v49 = vrot.slane %v12531_v30, %v12307_v26 }
 0x590   :  { %11554 = vmatpush3.bf16.msra.mxu0 %v11854_v38  ;;  %v11886_v38 = vld [vmem:[#allocation13 + $0x220] sm:$0xff]  }
 0x591   :  { %11576 = vmatpush3.bf16.msra.mxu1 %v11855_v39  ;;  %11555 = vmatprep.subr.bf16.mxu0 %v11856_v34  ;;  %v11888_v39 = vld [vmem:[#allocation13 + $0x268] sm:$0xff]   ;;  %v2323_v34 = vrot.slane %v2243_v49, %v12307_v26  ;;  %v11931_v49 = vld [vmem:[#allocation13 + $0x3b8] sm:$0xff]  }
 0x592   :  { %11577 = vmatprep.subr.bf16.mxu1 %v11857_v42  ;;  %v2331_v42 = vrot.slane %v2251_v37, %v12307_v26 }
 0x593   :  { %v11685_v30 = vadd.f32 %v12475_v59, %v2323_v34  ;;  %v11898_v59 = vld [vmem:[#allocation13 + $0x238] sm:$0xff]  }
 0x594   :  { %11556 = vmatpush3.bf16.msra.mxu0 %v11858_v44  ;;  %v11892_v44 = vld [vmem:[#allocation13 + $0x270] sm:$0xff]  }
 0x595   :  { %11578 = vmatpush3.bf16.msra.mxu1 %v11859_v47  ;;  %11557 = vmatprep.subr.bf16.mxu0 %v11860_v50  ;;  %v11687_v47 = vadd.f32 %v12477_v5, %v2331_v42  ;;  %v11894_v50 = vld [vmem:[#allocation13 + $0x230] sm:$0xff]   ;;  %v8810_v46 = vmul.f32 %v11685_v30, %v12498_v22  ;;  %vm8793_vm2 = vcmp.ge.f32.partialorder %v11685_v30, 0.0  ;;  %v11900_v5 = vld [vmem:[#allocation13 + $0x340] sm:$0xff]  }
 0x596   :  { %11579 = vmatprep.subr.bf16.mxu1 %v11861_v51  ;;  %v11896_v51 = vld [vmem:[#allocation13 + $0x278] sm:$0xff]  }
 0x597   :  { %vm8795_vm3 = vcmp.ge.f32.partialorder %v11687_v47, 0.0 }
 0x598   :  { %11558 = vmatpush3.bf16.msra.mxu0 %v11862_v58  ;;  %v8812_v58 = vmul.f32 %v11687_v47, %v12498_v22 }
 0x599   :  { %11580 = vmatpush3.bf16.msra.mxu1 %v11863_v1  ;;  %11559 = vmatprep.subr.bf16.mxu0 %v11864_v62  ;;  %v8826_v1 = vsel %vm8793_vm2, %v11685_v30, %v8810_v46  ;;  %v11901_v62 = vld [vmem:[#allocation13 + $0x3c0] sm:$0xff]  }
 0x59a   :  { %11581 = vmatprep.subr.bf16.mxu1 %v11865_v4  ;;  %v8828_v53 = vsel %vm8795_vm3, %v11687_v47, %v8812_v58  ;;  %v11902_v4 = vld [vmem:[#allocation13 + $0x300] sm:$0xff]   ;;  %v8842_v55 = vpack.c.bf16 %v8826_v1, %v8826_v1 }
 0x59b   :  { %v8844_v25 = vpack.c.bf16 %v8828_v53, %v8828_v53 }
 0x59c   :  { %11560 = vmatpush3.bf16.msra.mxu0 %v11866_v7  ;;  %v11904_v7 = vld [vmem:[#allocation13 + $0x348] sm:$0xff]  }
 0x59d   :  { %11582 = vmatpush3.bf16.msra.mxu1 %v11867_v6  ;;  %11589 = vmatprep.subr.bf16.mxu0 %v11868_v8  ;;  %v11905_v6 = vld [vmem:[#allocation13 + $0x3c8] sm:$0xff]  }
 0x59e   :  { %11611 = vmatprep.subr.bf16.mxu1 %v11869_v33  ;;  %v11906_v8 = vld [vmem:[#allocation13 + $0x308] sm:$0xff]   ;;  %v11908_v33 = vld [vmem:[#allocation13 + $0x350] sm:$0xff]  }
 0x59f   :  { %9993 = vmatmul.mubr.bf16.vlgmr.msra.gmra.mrb[28].mxu0 %v8838_v23  ;;  %v11912_v23 = vld [vmem:[#allocation13 + $0x358] sm:$0xff]  }
 0x5a0   :  { %10033 = vmatmul.mubr.bf16.vlgmr.msra.gmra.mrb[28].mxu1 %v8840_v2  ;;  %11590 = vmatpush3.bf16.msra.mxu0 %v11870_v3  ;;  %v11910_v3 = vld [vmem:[#allocation13 + $0x310] sm:$0xff]   ;;  %v11915_v2 = vld [vmem:[#allocation13 + $0x398] sm:$0xff]  }
 0x5a1   :  { %10072 = vmatprep.mubr.bf16.mxu0 %v8843_v12  ;;  %11612 = vmatpush3.bf16.msra.mxu1 %v11871_v9  ;;  %v11913_v9 = vld [vmem:[#allocation13 + $0x3d8] sm:$0xff]   ;;  %v11917_v12 = vld [vmem:[#allocation13 + $0x3e0] sm:$0xff]  }
 0x5a2   :  { %10112 = vmatprep.mubr.bf16.mxu1 %v8845_v13  ;;  %11591 = vmatprep.subr.bf16.mxu0 %v11872_v11  ;;  %v11916_v11 = vld [vmem:[#allocation13 + $0x360] sm:$0xff]  }
 0x5a3   :  { %11613 = vmatprep.subr.bf16.mxu1 %v11873_v19  ;;  %v11918_v19 = vld [vmem:[#allocation13 + $0x320] sm:$0xff]  }
 0x5a4   :  { %11592 = vmatpush3.bf16.msra.mxu0 %v11874_v14  ;;  %v11919_v13 = vld [vmem:[#allocation13 + $0x3a0] sm:$0xff]   ;;  %v11920_v14 = vld [vmem:[#allocation13 + $0x368] sm:$0xff]  }
 0x5a5   :  { %11614 = vmatpush3.bf16.msra.mxu1 %v11875_v16  ;;  %11593 = vmatprep.subr.bf16.mxu0 %v11876_v15  ;;  %v11921_v16 = vld [vmem:[#allocation13 + $0x3e8] sm:$0xff]  }
 0x5a6   :  { %11615 = vmatprep.subr.bf16.mxu1 %v11877_v17  ;;  %v11922_v15 = vld [vmem:[#allocation13 + $0x328] sm:$0xff]  }
 0x5a7   :  { %v11923_v17 = vld [vmem:[#allocation13 + $0x3a8] sm:$0xff]  }
 0x5a8   :  { %11594 = vmatpush3.bf16.msra.mxu0 %v11878_v21  ;;  %v11924_v21 = vld [vmem:[#allocation13 + $0x370] sm:$0xff]  }
 0x5a9   :  { %11616 = vmatpush3.bf16.msra.mxu1 %v11879_v28  ;;  %11595 = vmatprep.subr.bf16.mxu0 %v11880_v29  ;;  %v11925_v28 = vld [vmem:[#allocation13 + $0x3f0] sm:$0xff]  }
 0x5aa   :  { %11617 = vmatprep.subr.bf16.mxu1 %v11881_v31  ;;  %v11926_v29 = vld [vmem:[#allocation13 + $0x330] sm:$0xff]  }
 0x5ab   :  { %v11927_v31 = vld [vmem:[#allocation13 + $0x3b0] sm:$0xff]  }
 0x5ac   :  { %11596 = vmatpush3.bf16.msra.mxu0 %v11882_v41  ;;  %v11928_v41 = vld [vmem:[#allocation13 + $0x378] sm:$0xff]  }
 0x5ad   :  { %11618 = vmatpush3.bf16.msra.mxu1 %v11883_v20  ;;  %11597 = vmatprep.subr.bf16.mxu0 %v11884_v32  ;;  %v11929_v20 = vld [vmem:[#allocation13 + $0x3f8] sm:$0xff]  }
 0x5ae   :  { %11619 = vmatprep.subr.bf16.mxu1 %v11885_v60  ;;  %v11930_v32 = vld [vmem:[#allocation13 + $0x338] sm:$0xff]   ;;  %v2203_v60 = vunpack.c.h.bf16 %v12528_v18 }
 0x5b0   :  { %11598 = vmatpush3.bf16.msra.mxu0 %v11886_v38  ;;  %v2259_v37 = vrot.slane %v2203_v60, %v12307_v26  ;;  %v2267_v38 = vrot.slane %v2203_v60, %v12353_v35 }
 0x5b1   :  { %11620 = vmatpush3.bf16.msra.mxu1 %v11887_v63  ;;  %11599 = vmatprep.subr.bf16.mxu0 %v11888_v39  ;;  %v2263_v63 = vrot.slane %v2203_v60, %v12310_v27  ;;  %v2271_v39 = vrot.slane %v2203_v60, %v12324_v36 }
 0x5b2   :  { %11621 = vmatprep.subr.bf16.mxu1 %v11889_v40  ;;  %v2339_v34 = vrot.slane %v2259_v37, %v12307_v26  ;;  %v2347_v40 = vrot.slane %v2267_v38, %v12307_v26 }
 0x5b3   :  { %v2343_v42 = vrot.slane %v2263_v63, %v12307_v26 }
 0x5b4   :  { %11600 = vmatpush3.bf16.msra.mxu0 %v11890_v43  ;;  %v2351_v43 = vrot.slane %v2271_v39, %v12307_v26 }
 0x5b5   :  { %11622 = vmatpush3.bf16.msra.mxu1 %v11891_v56  ;;  %11601 = vmatprep.subr.bf16.mxu0 %v11892_v44 }
 0x5b6   :  { %11623 = vmatprep.subr.bf16.mxu1 %v11893_v45 }
 0x5b8   :  { %11602 = vmatpush3.bf16.msra.mxu0 %v11894_v50 }
 0x5b9   :  { %11624 = vmatpush3.bf16.msra.mxu1 %v11895_v24  ;;  %11603 = vmatprep.subr.bf16.mxu0 %v11896_v51 }
 0x5ba   :  { %11625 = vmatprep.subr.bf16.mxu1 %v11897_v52 }
 0x5bc   :  { %11604 = vmatpush3.bf16.msra.mxu0 %v11898_v59 }
 0x5bd   :  { %11626 = vmatpush3.bf16.msra.mxu1 %v11899_v0  ;;  %11633 = vmatprep.subr.bf16.mxu0 %v11900_v5 }
 0x5be   :  { %11655 = vmatprep.subr.bf16.mxu1 %v11901_v62 }
 0x5bf   :  { %10073 = vmatmul.mubr.bf16.vlgmr.msra.gmra.mrb[32].mxu0 %v8842_v55 }
 0x5c0   :  { %10113 = vmatmul.mubr.bf16.vlgmr.msra.gmra.mrb[32].mxu1 %v8844_v25  ;;  %11634 = vmatpush3.bf16.msra.mxu0 %v11902_v4 }
 0x5c1   :  { %11656 = vmatpush3.bf16.msra.mxu1 %v11903_v61  ;;  %11635 = vmatprep.subr.bf16.mxu0 %v11904_v7  ;;  %v9106_v7 = vld [vmem:[#allocation15] sm:$0x1] }
 0x5c2   :  { %11657 = vmatprep.subr.bf16.mxu1 %v11905_v6  ;;  %v9107_v25 = vunpack.c.l.bf16 %v9106_v7 }
 0x5c4   :  { %11636 = vmatpush3.bf16.msra.mxu0 %v11906_v8  ;;  %v9111_v8 = vrot.slane %v9107_v25, %v12307_v26 }
 0x5c5   :  { %11658 = vmatpush3.bf16.msra.mxu1 %v11907_v54  ;;  %11637 = vmatprep.subr.bf16.mxu0 %v11908_v33 }
 0x5c6   :  { %11659 = vmatprep.subr.bf16.mxu1 %v11909_v57 }
 0x5c8   :  { %11638 = vmatpush3.bf16.msra.mxu0 %v11910_v3 }
 0x5c9   :  { %11660 = vmatpush3.bf16.msra.mxu1 %v11911_v48  ;;  %11639 = vmatprep.subr.bf16.mxu0 %v11912_v23 }
 0x5ca   :  { %11661 = vmatprep.subr.bf16.mxu1 %v11913_v9 }
 0x5cc   :  { %11640 = vmatpush3.bf16.msra.mxu0 %v11914_v10 }
 0x5cd   :  { %11662 = vmatpush3.bf16.msra.mxu1 %v11915_v2  ;;  %11641 = vmatprep.subr.bf16.mxu0 %v11916_v11 }
 0x5ce   :  { %11663 = vmatprep.subr.bf16.mxu1 %v11917_v12 }
 0x5d0   :  { %11642 = vmatpush3.bf16.msra.mxu0 %v11918_v19 }
 0x5d1   :  { %11664 = vmatpush3.bf16.msra.mxu1 %v11919_v13  ;;  %11643 = vmatprep.subr.bf16.mxu0 %v11920_v14 }
 0x5d2   :  { %11665 = vmatprep.subr.bf16.mxu1 %v11921_v16 }
 0x5d4   :  { %11644 = vmatpush3.bf16.msra.mxu0 %v11922_v15 }
 0x5d5   :  { %11666 = vmatpush3.bf16.msra.mxu1 %v11923_v17  ;;  %11645 = vmatprep.subr.bf16.mxu0 %v11924_v21 }
 0x5d6   :  { %11667 = vmatprep.subr.bf16.mxu1 %v11925_v28 }
 0x5d8   :  { %11646 = vmatpush3.bf16.msra.mxu0 %v11926_v29 }
 0x5d9   :  { %11668 = vmatpush3.bf16.msra.mxu1 %v11927_v31  ;;  %11647 = vmatprep.subr.bf16.mxu0 %v11928_v41 }
 0x5da   :  { %11669 = vmatprep.subr.bf16.mxu1 %v11929_v20 }
 0x5dc   :  { %11648 = vmatpush3.bf16.msra.mxu0 %v11930_v32 }
 0x5dd   :  { %11670 = vmatpush3.bf16.msra.mxu1 %v11931_v49 }
 0x632   :  { %v8613_v56 = vpop.f32.mrb[20].mxu0 }
 0x633   :  { %v11689_v44 = vadd.f32 %v8613_v56, %v2339_v34  ;;  %v8777_v30 = vpop.f32.mrb[20].mxu1  ;;  %v8615_v18 = vpop.f32.mrb[21].mxu0 }
 0x634   :  { %v11691_v45 = vadd.f32 %v8777_v30, %v2347_v40  ;;  %v11690_v47 = vadd.f32 %v8615_v18, %v2343_v42  ;;  %v8779_v50 = vpop.f32.mrb[21].mxu1  ;;  %v8617_v35 = vpop.f32.mrb[22].mxu0 }
 0x635   :  { %vm8797_vm4 = vcmp.ge.f32.partialorder %v11689_v44, 0.0  ;;  %v8814_v27 = vmul.f32 %v11689_v44, %v12498_v22  ;;  %v11692_v36 = vadd.f32 %v8779_v50, %v2351_v43  ;;  %v8781_v24 = vpop.f32.mrb[22].mxu1  ;;  %v8618_v51 = vpop.f32.mrb[23].mxu0 }
 0x636   :  { %vm8799_vm5 = vcmp.ge.f32.partialorder %v11691_v45, 0.0  ;;  %v8816_v46 = vmul.f32 %v11691_v45, %v12498_v22  ;;  %vm8798_vm6 = vcmp.ge.f32.partialorder %v11690_v47, 0.0  ;;  %v8815_v52 = vmul.f32 %v11690_v47, %v12498_v22  ;;  %v8782_v58 = vpop.f32.mrb[23].mxu1 }
 0x637   :  { %v8830_v59 = vsel %vm8797_vm4, %v11689_v44, %v8814_v27  ;;  %vm8800_vm7 = vcmp.ge.f32.partialorder %v11692_v36, 0.0  ;;  %v8817_v0 = vmul.f32 %v11692_v36, %v12498_v22 }
 0x638   :  { %v8832_v5 = vsel %vm8799_vm5, %v11691_v45, %v8816_v46  ;;  %v8831_v1 = vsel %vm8798_vm6, %v11690_v47, %v8815_v52  ;;  %v8846_v4 = vpack.c.bf16 %v8830_v59, %v8830_v59 }
 0x639   :  { %v8847_v62 = vpack.c.bf16 %v8831_v1, %v8831_v1  ;;  %v8833_v53 = vsel %vm8800_vm7, %v11692_v36, %v8817_v0  ;;  %v8848_v61 = vpack.c.bf16 %v8832_v5, %v8832_v5 }
 0x63a   :  { %v8849_v55 = vpack.c.bf16 %v8833_v53, %v8833_v53 }
 0x63b   :  { %10152 = vmatprep.mubr.bf16.mxu0 %v8847_v62 }
 0x63c   :  { %10192 = vmatprep.mubr.bf16.mxu1 %v8849_v55  ;;  %10153 = vmatmul.mubr.bf16.vlgmr.msra.gmra.mrb[36].mxu0 %v8846_v4 }
 0x63d   :  { %10193 = vmatmul.mubr.bf16.vlgmr.msra.gmra.mrb[36].mxu1 %v8848_v61 }
 0x652   :  { %v11517_v6 = vpop.f32.mrb[24].mxu0 }
 0x653   :  { %v11539_v54 = vpop.f32.mrb[24].mxu1  ;;  %v11518_v33 = vpop.f32.mrb[25].mxu0 }
 0x654   :  { %v11519_v57 = vadd.f32 %v11518_v33, %v11517_v6  ;;  %v11540_v22 = vpop.f32.mrb[25].mxu1  ;;  %v11520_v3 = vpop.f32.mrb[26].mxu0 }
 0x655   :  { %v11541_v48 = vadd.f32 %v11540_v22, %v11539_v54  ;;  %v11542_v23 = vpop.f32.mrb[26].mxu1  ;;  %v11521_v9 = vpop.f32.mrb[27].mxu0 }
 0x656   :  { %v9915_v10 = vadd.f32 %v11519_v57, %v9111_v8  ;;  %v11543_v2 = vpop.f32.mrb[27].mxu1 }
 0x658   :  { %v9955_v11 = vadd.f32 %v11541_v48, %v9915_v10 }
 0x672   :  { %v11561_v12 = vpop.f32.mrb[28].mxu0 }
 0x673   :  { %v11583_v19 = vpop.f32.mrb[28].mxu1  ;;  %v11562_v13 = vpop.f32.mrb[29].mxu0 }
 0x674   :  { %v11563_v14 = vadd.f32 %v11562_v13, %v11561_v12  ;;  %v11584_v16 = vpop.f32.mrb[29].mxu1  ;;  %v11564_v15 = vpop.f32.mrb[30].mxu0 }
 0x675   :  { %v11585_v17 = vadd.f32 %v11584_v16, %v11583_v19  ;;  %v11586_v21 = vpop.f32.mrb[30].mxu1  ;;  %v11565_v26 = vpop.f32.mrb[31].mxu0 }
 0x676   :  { %v9995_v28 = vadd.f32 %v11563_v14, %v9955_v11  ;;  %v11587_v29 = vpop.f32.mrb[31].mxu1 }
 0x678   :  { %v10035_v31 = vadd.f32 %v11585_v17, %v9995_v28 }
 0x692   :  { %v11605_v41 = vpop.f32.mrb[32].mxu0 }
 0x693   :  { %v11627_v20 = vpop.f32.mrb[32].mxu1  ;;  %v11606_v32 = vpop.f32.mrb[33].mxu0 }
 0x694   :  { %v11607_v49 = vadd.f32 %v11606_v32, %v11605_v41  ;;  %v11628_v60 = vpop.f32.mrb[33].mxu1  ;;  %v11608_v37 = vpop.f32.mrb[34].mxu0 }
 0x695   :  { %v11629_v38 = vadd.f32 %v11628_v60, %v11627_v20  ;;  %v11630_v63 = vpop.f32.mrb[34].mxu1  ;;  %v11609_v39 = vpop.f32.mrb[35].mxu0 }
 0x696   :  { %v10075_v34 = vadd.f32 %v11607_v49, %v10035_v31  ;;  %v11631_v40 = vpop.f32.mrb[35].mxu1 }
 0x698   :  { %v10115_v42 = vadd.f32 %v11629_v38, %v10075_v34 }
 0x70f   :  { %v11649_v43 = vpop.f32.mrb[36].mxu0 }
 0x710   :  { %v11671_v56 = vpop.f32.mrb[36].mxu1  ;;  %v11650_v44 = vpop.f32.mrb[37].mxu0 }
 0x711   :  { %v11651_v30 = vadd.f32 %v11650_v44, %v11649_v43  ;;  %v11672_v18 = vpop.f32.mrb[37].mxu1  ;;  %v11652_v45 = vpop.f32.mrb[38].mxu0 }
 0x712   :  { %v11673_v47 = vadd.f32 %v11672_v18, %v11671_v56  ;;  %v11674_v50 = vpop.f32.mrb[38].mxu1  ;;  %v11653_v35 = vpop.f32.mrb[39].mxu0 }
 0x713   :  { %v10155_v27 = vadd.f32 %v11651_v30, %v10115_v42  ;;  %v11675_v36 = vpop.f32.mrb[39].mxu1 }
 0x715   :  { %v10195_v24 = vadd.f32 %v11673_v47, %v10155_v27 }
 0x717   :  { %10200 = vst [vmem:[#allocation16] sm:$0xff] %v10195_v24 }
 0x718   :  { %12097 = shalt.err (!%p12094_p4)
}
 0x719   :  { %s12098_s30 = scalar_lea.hbm %s12598_s9, 128 }
 0x71a   :  { %p12099_p5 = scmp.ne.s32.totalorder %s12598_s9, %s12098_s30  ;;  %p12102_p6 = scmp.lt.u32.totalorder %s12098_s30, %s12598_s9 }
 0x71c   :  { %p12104_p7 = pnand %p12102_p6, %p12099_p5 }
 0x71e   :  { %12107 = shalt.err (!%p12104_p7)
}
 0x71f   :  { %10210 = dma.vmem_to_hbm [thread:$0]  %s10208_s18, 128, %s12598_s9, [#allocation6]  }
 0x720   :  { %12116 = dma.done.wait [#allocation6], 128  }
 0x721   :  { %12117 = vsyncadd [#allocation6], 4294967168 }
 0x722   :  { %10214 = vsyncpa [#allocation5], 1 }
 0x723   :  { %10215 = vsyncpa [#allocation8], 1 }
 0x724   :  { %10216 = vsyncpa [#allocation11], 1 }
 0x725   :  { %10217 = vsyncpa [#allocation14], 1 }
 0x726   :  { %10218 = vsyncpa [#allocation6], 1 }

</bundles_post_ra>
